<compile_context>
chip_gen: v5e
topology: v5e:2x2
jax: 0.10.0
libtpu: 0.0.40
codegen_flags: <defaults>
</compile_context>

<pallas_src>
import jax
import jax.numpy as jnp
from jax.experimental import pallas as pl
from jax.experimental.pallas import tpu as pltpu

_VMEM_LIMIT = 48 * 1024 * 1024  # safely under v7x's 64 MiB physical VMEM


def _round_up(x, m):
    return (x + m - 1) // m * m


def _pick_tile(m, target, *, min_steps=4, align=16):
    """Row tile: multiple of `align` (bf16 sublane pack), <= target, and sized
    so the grid has >= min_steps steps whenever m allows (megacore sharding +
    pipeline overlap even at small batch)."""
    tm = _round_up((m + min_steps - 1) // min_steps, align)
    tm = min(tm, target)
    return max(tm, align)


# ----------------------------------------------------------------------------
# Pallas kernels
# ----------------------------------------------------------------------------
def _conv_relu_pool_kernel(x_ref, w_ref, b_ref, o_ref):
    """Fused im2col-matmul conv + bias + ReLU + 2x2 max-pool.

    x_ref: (4, tm, Kp) bf16 -- 4 pool-window positions for tm pooled pixels
    w_ref: (Kp, 128)  bf16  -- resident across the grid (index_map -> (0, 0))
    b_ref: (1, 128)   f32
    o_ref: (tm, 128)  bf16  -- pooled output, lane-dense
    """
    w = w_ref[...]
    # Running max over the 4 pool positions keeps <= 2 live f32 tiles (instead
    # of 4), halving accumulator/spill pressure in the epilogue.
    y = jnp.dot(x_ref[0], w, preferred_element_type=jnp.float32)
    y = jnp.maximum(y, jnp.dot(x_ref[1], w, preferred_element_type=jnp.float32))
    y = jnp.maximum(y, jnp.dot(x_ref[2], w, preferred_element_type=jnp.float32))
    y = jnp.maximum(y, jnp.dot(x_ref[3], w, preferred_element_type=jnp.float32))
    # max-pool commutes with the (monotonic) bias-add + ReLU epilogue.
    o_ref[...] = jnp.maximum(y + b_ref[...], 0.0).astype(o_ref.dtype)


def _mlp_softmax_kernel(x_ref, w1_ref, b1_ref, w2_ref, b2_ref, w3_ref, b3_ref,
                        o_ref):
    """fc1+ReLU -> fc2+ReLU -> out -> softmax, entirely in VMEM.

    Logits are padded to 128 lanes with a -1e30 bias (weights zero) so the
    output store is lane-dense and the softmax over 128 lanes is exact for the
    10 real classes (padded columns exp to 0).
    """
    h = jnp.dot(x_ref[...], w1_ref[...], preferred_element_type=jnp.float32)
    h = jnp.maximum(h + b1_ref[...], 0.0).astype(jnp.bfloat16)
    h = jnp.dot(h, w2_ref[...], preferred_element_type=jnp.float32)
    h = jnp.maximum(h + b2_ref[...], 0.0).astype(jnp.bfloat16)
    y = jnp.dot(h, w3_ref[...], preferred_element_type=jnp.float32) + b3_ref[...]
    y = y - jnp.max(y, axis=-1, keepdims=True)
    e = jnp.exp(y)
    inv = pl.reciprocal(jnp.sum(e, axis=-1, keepdims=True), approx=True)
    o_ref[...] = (e * inv).astype(o_ref.dtype)


# ----------------------------------------------------------------------------
# Wrappers calling pallas_call
# ----------------------------------------------------------------------------
def _im2col_pool_order(x_nhwc, k, cin):
    """k x k VALID patches (feature order (c, kh, kw), matching OIHW weights),
    with the 4 positions of each 2x2 pool window gathered on a leading axis.
    Returns cols: (4, N*Ho*Wo, cin*k*k)."""
    # TODO(synk): this XLA-side patch extraction materializes an ~11-25x blown
    # up tensor in HBM; at large batch it should move inside the conv kernel.
    n, h, w, _ = x_nhwc.shape
    x = x_nhwc[..., :cin]                     # drop channel padding, if any
    oh, ow = h - k + 1, w - k + 1
    ho, wo = oh // 2, ow // 2
    cols = jnp.stack(
        [x[:, i:i + oh, j:j + ow, :] for i in range(k) for j in range(k)],
        axis=-1,
    )                                         # (N, OH, OW, C, k*k)
    cols = cols.reshape(n, oh, ow, cin * k * k)
    cols = cols.reshape(n, ho, 2, wo, 2, cin * k * k)
    cols = jnp.transpose(cols, (2, 4, 0, 1, 3, 5))        # (2, 2, N, Ho, Wo, F)
    return cols.reshape(4, n * ho * wo, cin * k * k), (n, ho, wo)


def conv_relu_pool(x_nhwc, w_kf, b_row, *, k, cin):
    """VALID kxk conv + ReLU + 2x2/2 max-pool; returns bf16 NHWC with output
    channels padded to 128 lanes."""
    cols, (n, ho, wo) = _im2col_pool_order(x_nhwc, k, cin)
    _, mp, kk = cols.shape
    kpad = w_kf.shape[0]                      # 32 (conv1) / 512 (conv2)
    if kpad != kk:
        cols = jnp.pad(cols, ((0, 0), (0, 0), (0, kpad - kk)))
    tm = _pick_tile(mp, target=512)
    mpad = _round_up(mp, tm)
    if mpad != mp:
        cols = jnp.pad(cols, ((0, 0), (0, mpad - mp), (0, 0)))
    ocp = w_kf.shape[1]                       # 128
    out = pl.pallas_call(
        _conv_relu_pool_kernel,
        out_shape=jax.ShapeDtypeStruct((mpad, ocp), jnp.bfloat16),
        grid=(mpad // tm,),
        in_specs=[
            pl.BlockSpec((4, tm, kpad), lambda i: (0, i, 0)),
            pl.BlockSpec((kpad, ocp), lambda i: (0, 0)),   # weights stay resident
            pl.BlockSpec((1, ocp), lambda i: (0, 0)),
        ],
        out_specs=pl.BlockSpec((tm, ocp), lambda i: (i, 0)),
        compiler_params=pltpu.CompilerParams(
            dimension_semantics=("parallel",),
            vmem_limit_bytes=_VMEM_LIMIT,
        ),
    )(cols, w_kf, b_row)
    return out[:mp].reshape(n, ho, wo, ocp)


def mlp_head(x, p):
    """Fused fc1/fc2/out/softmax over row tiles; x: (N, 640) -> (N, 10)."""
    n = x.shape[0]
    x = x.astype(jnp.bfloat16)
    tm = _pick_tile(n, target=256)
    mpad = _round_up(n, tm)
    if mpad != n:
        x = jnp.pad(x, ((0, mpad - n), (0, 0)))
    kin = x.shape[1]            # 640
    hdim = p["w1"].shape[1]     # 1024 (1000 padded)
    nop = p["w3"].shape[1]      # 128  (10 padded, lane-dense output)
    out = pl.pallas_call(
        _mlp_softmax_kernel,
        out_shape=jax.ShapeDtypeStruct((mpad, nop), jnp.float32),
        grid=(mpad // tm,),
        in_specs=[
            pl.BlockSpec((tm, kin), lambda i: (i, 0)),
            pl.BlockSpec((kin, hdim), lambda i: (0, 0)),   # weight-resident
            pl.BlockSpec((1, hdim), lambda i: (0, 0)),
            pl.BlockSpec((hdim, hdim), lambda i: (0, 0)),  # weight-resident
            pl.BlockSpec((1, hdim), lambda i: (0, 0)),
            pl.BlockSpec((hdim, nop), lambda i: (0, 0)),   # weight-resident
            pl.BlockSpec((1, nop), lambda i: (0, 0)),
        ],
        out_specs=pl.BlockSpec((tm, nop), lambda i: (i, 0)),
        compiler_params=pltpu.CompilerParams(
            dimension_semantics=("parallel",),
            vmem_limit_bytes=_VMEM_LIMIT,
        ),
    )(x, p["w1"], p["b1"], p["w2"], p["b2"], p["w3"], p["b3"])
    return out[:n, :10]


# ----------------------------------------------------------------------------
# Full network forward
# ----------------------------------------------------------------------------
def net_forward(p, x_nchw):
    x = jnp.transpose(x_nchw, (0, 2, 3, 1)).astype(jnp.bfloat16)     # NCHW->NHWC
    x = conv_relu_pool(x, p["conv1_w"], p["conv1_b"], k=5, cin=1)    # (N,12,12,128)
    x = conv_relu_pool(x, p["conv2_w"], p["conv2_b"], k=5, cin=20)   # (N,4,4,128)
    # torch.flatten on NCHW => feature order (C, H, W); drop the channel padding.
    n = x.shape[0]
    x = jnp.transpose(x[..., :40], (0, 3, 1, 2)).reshape(n, 640)
    # TODO(synk): nn.Dropout(p=0.5) treated as eval-mode identity (train-mode RNG not modeled).
    return mlp_head(x, p)


# ----------------------------------------------------------------------------
# One-time parameter preparation (transpose / pad / cast into kernel layouts)
# ----------------------------------------------------------------------------
def prepare_params(params):
    def conv_prep(w, b, *, ocp=128):
        oc, cin, kh, kw = w.shape
        kk = cin * kh * kw
        kpad = _round_up(kk, 128 if kk >= 128 else 16)   # 25->32, 500->512
        w2 = w.reshape(oc, kk).T                         # (kk, oc), (c,kh,kw) order
        w2 = jnp.pad(w2, ((0, kpad - kk), (0, ocp - oc)))
        b2 = jnp.pad(b, (0, ocp - oc)).reshape(1, ocp)
        return w2.astype(jnp.bfloat16), b2.astype(jnp.float32)

    c1w, c1b = conv_prep(params["conv1_w"], params["conv1_b"])
    c2w, c2b = conv_prep(params["conv2_w"], params["conv2_b"])
    h = 1024                                             # 1000 padded to 8x128
    nop = 128                                            # 10 logits padded to 128 lanes
    w1 = jnp.pad(params["fc1_w"].T, ((0, 0), (0, h - 1000))).astype(jnp.bfloat16)
    b1 = jnp.pad(params["fc1_b"], (0, h - 1000)).reshape(1, h).astype(jnp.float32)
    w2 = jnp.pad(params["fc2_w"].T, ((0, h - 1000), (0, h - 1000))).astype(jnp.bfloat16)
    b2 = jnp.pad(params["fc2_b"], (0, h - 1000)).reshape(1, h).astype(jnp.float32)
    w3 = jnp.pad(params["out_w"].T, ((0, h - 1000), (0, nop - 10))).astype(jnp.bfloat16)
    # Padded logit columns get a large negative bias (zero weights) so the
    # 128-lane softmax puts no mass there.
    b3 = jnp.pad(params["out_b"], (0, nop - 10),
                 constant_values=-1e30).reshape(1, nop).astype(jnp.float32)
    return {"conv1_w": c1w, "conv1_b": c1b, "conv2_w": c2w, "conv2_b": c2b,
            "w1": w1, "b1": b1, "w2": w2, "b2": b2, "w3": w3, "b3": b3}


# ----------------------------------------------------------------------------
# Deterministic parameter init (PyTorch-default-style uniform(-1/sqrt(fan_in)))
# ----------------------------------------------------------------------------
def init_params(key):
    ks = jax.random.split(key, 10)

    def u(k, shape, fan_in):
        bound = 1.0 / (fan_in ** 0.5)
        return jax.random.uniform(k, shape, jnp.float32, -bound, bound)

    return {
        "conv1_w": u(ks[0], (20, 1, 5, 5), 1 * 5 * 5),
        "conv1_b": u(ks[1], (20,), 1 * 5 * 5),
        "conv2_w": u(ks[2], (40, 20, 5, 5), 20 * 5 * 5),
        "conv2_b": u(ks[3], (40,), 20 * 5 * 5),
        "fc1_w": u(ks[4], (1000, 640), 640),
        "fc1_b": u(ks[5], (1000,), 640),
        "fc2_w": u(ks[6], (1000, 1000), 1000),
        "fc2_b": u(ks[7], (1000,), 1000),
        "out_w": u(ks[8], (10, 1000), 1000),
        "out_b": u(ks[9], (10,), 1000),
    }


# ----------------------------------------------------------------------------
# Pure-JAX f32 reference (for correctness check), using ORIGINAL torch layouts
# ----------------------------------------------------------------------------
def ref_forward(params, x):
    dn = ("NCHW", "OIHW", "NCHW")
    y = jax.lax.conv_general_dilated(x, params["conv1_w"], (1, 1), "VALID",
                                     dimension_numbers=dn)
    y = jax.nn.relu(y + params["conv1_b"][None, :, None, None])
    y = jax.lax.reduce_window(y, -jnp.inf, jax.lax.max,
                              (1, 1, 2, 2), (1, 1, 2, 2), "VALID")
    y = jax.lax.conv_general_dilated(y, params["conv2_w"], (1, 1), "VALID",
                                     dimension_numbers=dn)
    y = jax.nn.relu(y + params["conv2_b"][None, :, None, None])
    y = jax.lax.reduce_window(y, -jnp.inf, jax.lax.max,
                              (1, 1, 2, 2), (1, 1, 2, 2), "VALID")
    y = y.reshape(y.shape[0], -1)
    y = jax.nn.relu(y @ params["fc1_w"].T + params["fc1_b"])
    y = jax.nn.relu(y @ params["fc2_w"].T + params["fc2_b"])
    y = y @ params["out_w"].T + params["out_b"]
    return jax.nn.softmax(y, axis=1)


if __name__ == "__main__":
    key = jax.random.PRNGKey(0)
    pkey, xkey = jax.random.split(key)
    params = init_params(pkey)
    kparams = prepare_params(params)     # one-time layout/padding/bf16 prep
    x = jax.random.normal(xkey, (2, 1, 28, 28), dtype=jnp.float32)

    fwd = jax.jit(net_forward)
    out = jax.block_until_ready(fwd(kparams, x))

    ref = ref_forward(params, x)
    assert out.shape == (2, 10), out.shape
    assert bool(jnp.allclose(jnp.sum(out, axis=1), 1.0, atol=5e-3))
    # bf16 matmul path vs f32 reference: probabilities agree to ~1e-3..1e-2.
    assert bool(jnp.allclose(out, ref, atol=2e-2, rtol=2e-2))
    print("KERNEL_OK")
</pallas_src>

<mosaic_0001>
module attributes {stable_mosaic.version = 11 : i64} {
  func.func @_conv_relu_pool_kernel(%arg0: i32, %arg1: memref<4x80x32xbf16, #tpu.memory_space<vmem>>, %arg2: memref<32x128xbf16, #tpu.memory_space<vmem>>, %arg3: memref<1x128xf32, #tpu.memory_space<vmem>>, %arg4: memref<80x128xbf16, #tpu.memory_space<vmem>>) attributes {dimension_semantics = [#tpu.dimension_semantics<parallel>], iteration_bounds = array<i64: 4>, scalar_prefetch = 0 : i64, scratch_operands = 0 : i64, tpu.core_type = #tpu.core_type<tc>, window_params = [{transform_indices = @transform_0, window_bounds = array<i64: 4, 80, 32>}, {pipeline_mode = #tpu.pipeline_mode<synchronous>, transform_indices = @transform_1, window_bounds = array<i64: 32, 128>}, {pipeline_mode = #tpu.pipeline_mode<synchronous>, transform_indices = @transform_2, window_bounds = array<i64: 1, 128>}, {transform_indices = @transform_3, window_bounds = array<i64: 80, 128>}]} {
    %c0 = arith.constant 0 : index
    %c0_0 = arith.constant 0 : index
    %0 = vector.load %arg2[%c0, %c0_0] : memref<32x128xbf16, #tpu.memory_space<vmem>>, vector<32x128xbf16>
    %c0_1 = arith.constant 0 : index
    %c0_2 = arith.constant 0 : index
    %c0_3 = arith.constant 0 : index
    %1 = vector.load %arg1[%c0_1, %c0_2, %c0_3] : memref<4x80x32xbf16, #tpu.memory_space<vmem>>, vector<1x80x32xbf16>
    %2 = vector.shape_cast %1 : vector<1x80x32xbf16> to vector<80x32xbf16>
    %cst = arith.constant dense<0.000000e+00> : vector<80x128xf32>
    %3 = tpu.matmul %2, %0, %cst {dimension_numbers = #tpu.dot_dimension_numbers<[1], [0], [0], [1], [0, 0, 1, 1], [], []>} : vector<80x32xbf16>, vector<32x128xbf16>, vector<80x128xf32> -> vector<80x128xf32>
    %c1 = arith.constant 1 : index
    %c0_4 = arith.constant 0 : index
    %c0_5 = arith.constant 0 : index
    %4 = vector.load %arg1[%c1, %c0_4, %c0_5] : memref<4x80x32xbf16, #tpu.memory_space<vmem>>, vector<1x80x32xbf16>
    %5 = vector.shape_cast %4 : vector<1x80x32xbf16> to vector<80x32xbf16>
    %cst_6 = arith.constant dense<0.000000e+00> : vector<80x128xf32>
    %6 = tpu.matmul %5, %0, %cst_6 {dimension_numbers = #tpu.dot_dimension_numbers<[1], [0], [0], [1], [0, 0, 1, 1], [], []>} : vector<80x32xbf16>, vector<32x128xbf16>, vector<80x128xf32> -> vector<80x128xf32>
    %7 = arith.maximumf %3, %6 : vector<80x128xf32>
    %c2 = arith.constant 2 : index
    %c0_7 = arith.constant 0 : index
    %c0_8 = arith.constant 0 : index
    %8 = vector.load %arg1[%c2, %c0_7, %c0_8] : memref<4x80x32xbf16, #tpu.memory_space<vmem>>, vector<1x80x32xbf16>
    %9 = vector.shape_cast %8 : vector<1x80x32xbf16> to vector<80x32xbf16>
    %cst_9 = arith.constant dense<0.000000e+00> : vector<80x128xf32>
    %10 = tpu.matmul %9, %0, %cst_9 {dimension_numbers = #tpu.dot_dimension_numbers<[1], [0], [0], [1], [0, 0, 1, 1], [], []>} : vector<80x32xbf16>, vector<32x128xbf16>, vector<80x128xf32> -> vector<80x128xf32>
    %11 = arith.maximumf %7, %10 : vector<80x128xf32>
    %c3 = arith.constant 3 : index
    %c0_10 = arith.constant 0 : index
    %c0_11 = arith.constant 0 : index
    %12 = vector.load %arg1[%c3, %c0_10, %c0_11] : memref<4x80x32xbf16, #tpu.memory_space<vmem>>, vector<1x80x32xbf16>
    %13 = vector.shape_cast %12 : vector<1x80x32xbf16> to vector<80x32xbf16>
    %cst_12 = arith.constant dense<0.000000e+00> : vector<80x128xf32>
    %14 = tpu.matmul %13, %0, %cst_12 {dimension_numbers = #tpu.dot_dimension_numbers<[1], [0], [0], [1], [0, 0, 1, 1], [], []>} : vector<80x32xbf16>, vector<32x128xbf16>, vector<80x128xf32> -> vector<80x128xf32>
    %15 = arith.maximumf %11, %14 : vector<80x128xf32>
    %c0_13 = arith.constant 0 : index
    %c0_14 = arith.constant 0 : index
    %16 = vector.load %arg3[%c0_13, %c0_14] : memref<1x128xf32, #tpu.memory_space<vmem>>, vector<1x128xf32>
    %17 = vector.broadcast %16 : vector<1x128xf32> to vector<80x128xf32>
    %18 = arith.addf %15, %17 : vector<80x128xf32>
    %cst_15 = arith.constant 0.000000e+00 : f32
    %19 = vector.broadcast %cst_15 : f32 to vector<80x128xf32>
    %20 = arith.maximumf %18, %19 : vector<80x128xf32>
    %21 = arith.truncf %20 : vector<80x128xf32> to vector<80x128xbf16>
    %c0_16 = arith.constant 0 : index
    %c0_17 = arith.constant 0 : index
    %22 = vector.load %arg4[%c0_16, %c0_17] : memref<80x128xbf16, #tpu.memory_space<vmem>>, vector<80x128xbf16>
    tpu.vector_store %arg4[%c0_16, %c0_17], %21 {strides = array<i32>} : memref<80x128xbf16, #tpu.memory_space<vmem>>, vector<80x128xbf16>,
    return
  }
  func.func @transform_0(%arg0: i32) -> (i32, i32, i32) {
    %c0_i32 = arith.constant 0 : i32
    %c0_i32_0 = arith.constant 0 : i32
    %c0_i32_1 = arith.constant 0 : i32
    return %c0_i32, %arg0, %c0_i32_0 : i32, i32, i32
  }
  func.func @transform_1(%arg0: i32) -> (i32, i32) {
    %c0_i32 = arith.constant 0 : i32
    %c0_i32_0 = arith.constant 0 : i32
    %c0_i32_1 = arith.constant 0 : i32
    return %c0_i32, %c0_i32_0 : i32, i32
  }
  func.func @transform_2(%arg0: i32) -> (i32, i32) {
    %c0_i32 = arith.constant 0 : i32
    %c0_i32_0 = arith.constant 0 : i32
    %c0_i32_1 = arith.constant 0 : i32
    return %c0_i32, %c0_i32_0 : i32, i32
  }
  func.func @transform_3(%arg0: i32) -> (i32, i32) {
    %c0_i32 = arith.constant 0 : i32
    %c0_i32_0 = arith.constant 0 : i32
    return %arg0, %c0_i32 : i32, i32
  }
}

module attributes {stable_mosaic.version = 11 : i64} {
  func.func @_conv_relu_pool_kernel(%arg0: i32, %arg1: memref<4x16x512xbf16, #tpu.memory_space<vmem>>, %arg2: memref<512x128xbf16, #tpu.memory_space<vmem>>, %arg3: memref<1x128xf32, #tpu.memory_space<vmem>>, %arg4: memref<16x128xbf16, #tpu.memory_space<vmem>>) attributes {dimension_semantics = [#tpu.dimension_semantics<parallel>], iteration_bounds = array<i64: 2>, scalar_prefetch = 0 : i64, scratch_operands = 0 : i64, tpu.core_type = #tpu.core_type<tc>, window_params = [{transform_indices = @transform_0, window_bounds = array<i64: 4, 16, 512>}, {pipeline_mode = #tpu.pipeline_mode<synchronous>, transform_indices = @transform_1, window_bounds = array<i64: 512, 128>}, {pipeline_mode = #tpu.pipeline_mode<synchronous>, transform_indices = @transform_2, window_bounds = array<i64: 1, 128>}, {transform_indices = @transform_3, window_bounds = array<i64: 16, 128>}]} {
    %c0 = arith.constant 0 : index
    %c0_0 = arith.constant 0 : index
    %0 = vector.load %arg2[%c0, %c0_0] : memref<512x128xbf16, #tpu.memory_space<vmem>>, vector<512x128xbf16>
    %c0_1 = arith.constant 0 : index
    %c0_2 = arith.constant 0 : index
    %c0_3 = arith.constant 0 : index
    %1 = vector.load %arg1[%c0_1, %c0_2, %c0_3] : memref<4x16x512xbf16, #tpu.memory_space<vmem>>, vector<1x16x512xbf16>
    %2 = vector.shape_cast %1 : vector<1x16x512xbf16> to vector<16x512xbf16>
    %cst = arith.constant dense<0.000000e+00> : vector<16x128xf32>
    %3 = tpu.matmul %2, %0, %cst {dimension_numbers = #tpu.dot_dimension_numbers<[1], [0], [0], [1], [0, 0, 1, 1], [], []>} : vector<16x512xbf16>, vector<512x128xbf16>, vector<16x128xf32> -> vector<16x128xf32>
    %c1 = arith.constant 1 : index
    %c0_4 = arith.constant 0 : index
    %c0_5 = arith.constant 0 : index
    %4 = vector.load %arg1[%c1, %c0_4, %c0_5] : memref<4x16x512xbf16, #tpu.memory_space<vmem>>, vector<1x16x512xbf16>
    %5 = vector.shape_cast %4 : vector<1x16x512xbf16> to vector<16x512xbf16>
    %cst_6 = arith.constant dense<0.000000e+00> : vector<16x128xf32>
    %6 = tpu.matmul %5, %0, %cst_6 {dimension_numbers = #tpu.dot_dimension_numbers<[1], [0], [0], [1], [0, 0, 1, 1], [], []>} : vector<16x512xbf16>, vector<512x128xbf16>, vector<16x128xf32> -> vector<16x128xf32>
    %7 = arith.maximumf %3, %6 : vector<16x128xf32>
    %c2 = arith.constant 2 : index
    %c0_7 = arith.constant 0 : index
    %c0_8 = arith.constant 0 : index
    %8 = vector.load %arg1[%c2, %c0_7, %c0_8] : memref<4x16x512xbf16, #tpu.memory_space<vmem>>, vector<1x16x512xbf16>
    %9 = vector.shape_cast %8 : vector<1x16x512xbf16> to vector<16x512xbf16>
    %cst_9 = arith.constant dense<0.000000e+00> : vector<16x128xf32>
    %10 = tpu.matmul %9, %0, %cst_9 {dimension_numbers = #tpu.dot_dimension_numbers<[1], [0], [0], [1], [0, 0, 1, 1], [], []>} : vector<16x512xbf16>, vector<512x128xbf16>, vector<16x128xf32> -> vector<16x128xf32>
    %11 = arith.maximumf %7, %10 : vector<16x128xf32>
    %c3 = arith.constant 3 : index
    %c0_10 = arith.constant 0 : index
    %c0_11 = arith.constant 0 : index
    %12 = vector.load %arg1[%c3, %c0_10, %c0_11] : memref<4x16x512xbf16, #tpu.memory_space<vmem>>, vector<1x16x512xbf16>
    %13 = vector.shape_cast %12 : vector<1x16x512xbf16> to vector<16x512xbf16>
    %cst_12 = arith.constant dense<0.000000e+00> : vector<16x128xf32>
    %14 = tpu.matmul %13, %0, %cst_12 {dimension_numbers = #tpu.dot_dimension_numbers<[1], [0], [0], [1], [0, 0, 1, 1], [], []>} : vector<16x512xbf16>, vector<512x128xbf16>, vector<16x128xf32> -> vector<16x128xf32>
    %15 = arith.maximumf %11, %14 : vector<16x128xf32>
    %c0_13 = arith.constant 0 : index
    %c0_14 = arith.constant 0 : index
    %16 = vector.load %arg3[%c0_13, %c0_14] : memref<1x128xf32, #tpu.memory_space<vmem>>, vector<1x128xf32>
    %17 = vector.broadcast %16 : vector<1x128xf32> to vector<16x128xf32>
    %18 = arith.addf %15, %17 : vector<16x128xf32>
    %cst_15 = arith.constant 0.000000e+00 : f32
    %19 = vector.broadcast %cst_15 : f32 to vector<16x128xf32>
    %20 = arith.maximumf %18, %19 : vector<16x128xf32>
    %21 = arith.truncf %20 : vector<16x128xf32> to vector<16x128xbf16>
    %c0_16 = arith.constant 0 : index
    %c0_17 = arith.constant 0 : index
    %22 = vector.load %arg4[%c0_16, %c0_17] : memref<16x128xbf16, #tpu.memory_space<vmem>>, vector<16x128xbf16>
    tpu.vector_store %arg4[%c0_16, %c0_17], %21 {strides = array<i32>} : memref<16x128xbf16, #tpu.memory_space<vmem>>, vector<16x128xbf16>,
    return
  }
  func.func @transform_0(%arg0: i32) -> (i32, i32, i32) {
    %c0_i32 = arith.constant 0 : i32
    %c0_i32_0 = arith.constant 0 : i32
    %c0_i32_1 = arith.constant 0 : i32
    return %c0_i32, %arg0, %c0_i32_0 : i32, i32, i32
  }
  func.func @transform_1(%arg0: i32) -> (i32, i32) {
    %c0_i32 = arith.constant 0 : i32
    %c0_i32_0 = arith.constant 0 : i32
    %c0_i32_1 = arith.constant 0 : i32
    return %c0_i32, %c0_i32_0 : i32, i32
  }
  func.func @transform_2(%arg0: i32) -> (i32, i32) {
    %c0_i32 = arith.constant 0 : i32
    %c0_i32_0 = arith.constant 0 : i32
    %c0_i32_1 = arith.constant 0 : i32
    return %c0_i32, %c0_i32_0 : i32, i32
  }
  func.func @transform_3(%arg0: i32) -> (i32, i32) {
    %c0_i32 = arith.constant 0 : i32
    %c0_i32_0 = arith.constant 0 : i32
    return %arg0, %c0_i32 : i32, i32
  }
}

module attributes {stable_mosaic.version = 11 : i64} {
  func.func @_mlp_softmax_kernel(%arg0: i32, %arg1: memref<16x640xbf16, #tpu.memory_space<vmem>>, %arg2: memref<640x1024xbf16, #tpu.memory_space<vmem>>, %arg3: memref<1x1024xf32, #tpu.memory_space<vmem>>, %arg4: memref<1024x1024xbf16, #tpu.memory_space<vmem>>, %arg5: memref<1x1024xf32, #tpu.memory_space<vmem>>, %arg6: memref<1024x128xbf16, #tpu.memory_space<vmem>>, %arg7: memref<1x128xf32, #tpu.memory_space<vmem>>, %arg8: memref<16x128xf32, #tpu.memory_space<vmem>>) attributes {dimension_semantics = [#tpu.dimension_semantics<parallel>], iteration_bounds = array<i64: 1>, scalar_prefetch = 0 : i64, scratch_operands = 0 : i64, tpu.core_type = #tpu.core_type<tc>, window_params = [{transform_indices = @transform_0, window_bounds = array<i64: 16, 640>}, {pipeline_mode = #tpu.pipeline_mode<synchronous>, transform_indices = @transform_1, window_bounds = array<i64: 640, 1024>}, {pipeline_mode = #tpu.pipeline_mode<synchronous>, transform_indices = @transform_2, window_bounds = array<i64: 1, 1024>}, {pipeline_mode = #tpu.pipeline_mode<synchronous>, transform_indices = @transform_3, window_bounds = array<i64: 1024, 1024>}, {pipeline_mode = #tpu.pipeline_mode<synchronous>, transform_indices = @transform_4, window_bounds = array<i64: 1, 1024>}, {pipeline_mode = #tpu.pipeline_mode<synchronous>, transform_indices = @transform_5, window_bounds = array<i64: 1024, 128>}, {pipeline_mode = #tpu.pipeline_mode<synchronous>, transform_indices = @transform_6, window_bounds = array<i64: 1, 128>}, {transform_indices = @transform_7, window_bounds = array<i64: 16, 128>}]} {
    %c0 = arith.constant 0 : index
    %c0_0 = arith.constant 0 : index
    %0 = vector.load %arg1[%c0, %c0_0] : memref<16x640xbf16, #tpu.memory_space<vmem>>, vector<16x640xbf16>
    %c0_1 = arith.constant 0 : index
    %c0_2 = arith.constant 0 : index
    %1 = vector.load %arg2[%c0_1, %c0_2] : memref<640x1024xbf16, #tpu.memory_space<vmem>>, vector<640x1024xbf16>
    %cst = arith.constant dense<0.000000e+00> : vector<16x1024xf32>
    %2 = tpu.matmul %0, %1, %cst {dimension_numbers = #tpu.dot_dimension_numbers<[1], [0], [0], [1], [0, 0, 1, 1], [], []>} : vector<16x640xbf16>, vector<640x1024xbf16>, vector<16x1024xf32> -> vector<16x1024xf32>
    %c0_3 = arith.constant 0 : index
    %c0_4 = arith.constant 0 : index
    %3 = vector.load %arg3[%c0_3, %c0_4] : memref<1x1024xf32, #tpu.memory_space<vmem>>, vector<1x1024xf32>
    %4 = vector.broadcast %3 : vector<1x1024xf32> to vector<16x1024xf32>
    %5 = arith.addf %2, %4 : vector<16x1024xf32>
    %cst_5 = arith.constant 0.000000e+00 : f32
    %6 = vector.broadcast %cst_5 : f32 to vector<16x1024xf32>
    %7 = arith.maximumf %5, %6 : vector<16x1024xf32>
    %8 = arith.truncf %7 : vector<16x1024xf32> to vector<16x1024xbf16>
    %c0_6 = arith.constant 0 : index
    %c0_7 = arith.constant 0 : index
    %9 = vector.load %arg4[%c0_6, %c0_7] : memref<1024x1024xbf16, #tpu.memory_space<vmem>>, vector<1024x1024xbf16>
    %cst_8 = arith.constant dense<0.000000e+00> : vector<16x1024xf32>
    %10 = tpu.matmul %8, %9, %cst_8 {dimension_numbers = #tpu.dot_dimension_numbers<[1], [0], [0], [1], [0, 0, 1, 1], [], []>} : vector<16x1024xbf16>, vector<1024x1024xbf16>, vector<16x1024xf32> -> vector<16x1024xf32>
    %c0_9 = arith.constant 0 : index
    %c0_10 = arith.constant 0 : index
    %11 = vector.load %arg5[%c0_9, %c0_10] : memref<1x1024xf32, #tpu.memory_space<vmem>>, vector<1x1024xf32>
    %12 = vector.broadcast %11 : vector<1x1024xf32> to vector<16x1024xf32>
    %13 = arith.addf %10, %12 : vector<16x1024xf32>
    %cst_11 = arith.constant 0.000000e+00 : f32
    %14 = vector.broadcast %cst_11 : f32 to vector<16x1024xf32>
    %15 = arith.maximumf %13, %14 : vector<16x1024xf32>
    %16 = arith.truncf %15 : vector<16x1024xf32> to vector<16x1024xbf16>
    %c0_12 = arith.constant 0 : index
    %c0_13 = arith.constant 0 : index
    %17 = vector.load %arg6[%c0_12, %c0_13] : memref<1024x128xbf16, #tpu.memory_space<vmem>>, vector<1024x128xbf16>
    %cst_14 = arith.constant dense<0.000000e+00> : vector<16x128xf32>
    %18 = tpu.matmul %16, %17, %cst_14 {dimension_numbers = #tpu.dot_dimension_numbers<[1], [0], [0], [1], [0, 0, 1, 1], [], []>} : vector<16x1024xbf16>, vector<1024x128xbf16>, vector<16x128xf32> -> vector<16x128xf32>
    %c0_15 = arith.constant 0 : index
    %c0_16 = arith.constant 0 : index
    %19 = vector.load %arg7[%c0_15, %c0_16] : memref<1x128xf32, #tpu.memory_space<vmem>>, vector<1x128xf32>
    %20 = vector.broadcast %19 : vector<1x128xf32> to vector<16x128xf32>
    %21 = arith.addf %18, %20 : vector<16x128xf32>
    %cst_17 = arith.constant dense<0xFF800000> : vector<16xf32>
    %22 = vector.multi_reduction <maximumf>, %21, %cst_17 [1] : vector<16x128xf32> to vector<16xf32>
    %23 = vector.shape_cast %22 : vector<16xf32> to vector<16x1xf32>
    %24 = vector.broadcast %23 : vector<16x1xf32> to vector<16x128xf32>
    %25 = arith.subf %21, %24 : vector<16x128xf32>
    %26 = math.exp %25 : vector<16x128xf32>
    %cst_18 = arith.constant dense<0.000000e+00> : vector<16xf32>
    %27 = vector.multi_reduction <add>, %26, %cst_18 [1] : vector<16x128xf32> to vector<16xf32>
    %28 = vector.shape_cast %27 : vector<16xf32> to vector<16x1xf32>
    %29 = tpu.reciprocal %28 {approx = true} : vector<16x1xf32> -> vector<16x1xf32>
    %30 = vector.broadcast %29 : vector<16x1xf32> to vector<16x128xf32>
    %31 = arith.mulf %26, %30 : vector<16x128xf32>
    %c0_19 = arith.constant 0 : index
    %c0_20 = arith.constant 0 : index
    %32 = vector.load %arg8[%c0_19, %c0_20] : memref<16x128xf32, #tpu.memory_space<vmem>>, vector<16x128xf32>
    tpu.vector_store %arg8[%c0_19, %c0_20], %31 {strides = array<i32>} : memref<16x128xf32, #tpu.memory_space<vmem>>, vector<16x128xf32>,
    return
  }
  func.func @transform_0(%arg0: i32) -> (i32, i32) {
    %c0_i32 = arith.constant 0 : i32
    %c0_i32_0 = arith.constant 0 : i32
    return %arg0, %c0_i32 : i32, i32
  }
  func.func @transform_1(%arg0: i32) -> (i32, i32) {
    %c0_i32 = arith.constant 0 : i32
    %c0_i32_0 = arith.constant 0 : i32
    %c0_i32_1 = arith.constant 0 : i32
    return %c0_i32, %c0_i32_0 : i32, i32
  }
  func.func @transform_2(%arg0: i32) -> (i32, i32) {
    %c0_i32 = arith.constant 0 : i32
    %c0_i32_0 = arith.constant 0 : i32
    %c0_i32_1 = arith.constant 0 : i32
    return %c0_i32, %c0_i32_0 : i32, i32
  }
  func.func @transform_3(%arg0: i32) -> (i32, i32) {
    %c0_i32 = arith.constant 0 : i32
    %c0_i32_0 = arith.constant 0 : i32
    %c0_i32_1 = arith.constant 0 : i32
    return %c0_i32, %c0_i32_0 : i32, i32
  }
  func.func @transform_4(%arg0: i32) -> (i32, i32) {
    %c0_i32 = arith.constant 0 : i32
    %c0_i32_0 = arith.constant 0 : i32
    %c0_i32_1 = arith.constant 0 : i32
    return %c0_i32, %c0_i32_0 : i32, i32
  }
  func.func @transform_5(%arg0: i32) -> (i32, i32) {
    %c0_i32 = arith.constant 0 : i32
    %c0_i32_0 = arith.constant 0 : i32
    %c0_i32_1 = arith.constant 0 : i32
    return %c0_i32, %c0_i32_0 : i32, i32
  }
  func.func @transform_6(%arg0: i32) -> (i32, i32) {
    %c0_i32 = arith.constant 0 : i32
    %c0_i32_0 = arith.constant 0 : i32
    %c0_i32_1 = arith.constant 0 : i32
    return %c0_i32, %c0_i32_0 : i32, i32
  }
  func.func @transform_7(%arg0: i32) -> (i32, i32) {
    %c0_i32 = arith.constant 0 : i32
    %c0_i32_0 = arith.constant 0 : i32
    return %arg0, %c0_i32 : i32, i32
  }
}

</mosaic_0001>

<bundles_post_ra>
// kernel: net_forward.3
= control target key start
LH: loop header
LB: loop body
LE: loop exit
PB: predicated region body
PF: predicated region fallthrough
CT: control target
= control target key end

     0   :  { %s1136_s12 = smov 0   ;;  %s1138_s13 = smov 0   ;;  %s1302_s0 = inlined_call_operand.vmem [shape: bf16[4,320,32], index: 0, kind: input, shape index: {}]   ;;  %s1303_s1 = inlined_call_operand.vmem [shape: bf16[32,128], index: 1, kind: input, shape index: {}]   ;;  %s1304_s2 = inlined_call_operand.vmem [shape: f32[1,128], index: 2, kind: input, shape index: {}]   ;;  %s1305_s3 = inlined_call_operand.vmem [shape: bf16[320,128], index: 3, kind: output, shape index: {}]  }
   0x1   :  { %s1140_s14 = smov 0  }
   0x2 LB: > { %s866_s15 = sadd.s32 4294967295, %s1114_s14   ;;  %s1153_s16 = sadd.s32 1, %s1114_s14   ;;  %s1114_s14 = sphi %s1140_s14, %s1308_s14   ;;  %s1110_s13 = sphi %s1138_s13, %s1307_s13   ;;  %s1106_s12 = sphi %s1136_s12, %s1306_s12  }
   0x3   : > { %s17_s17 = ssub.s32 %s1114_s14, %s1153_s16  ;;  %s20_s18 = sadd.s32 1, %s1110_s13 }
   0x4   : > { %p18_p0 = scmp.eq.s32.totalorder %s17_s17, 0  ;;  %p27_p1 = scmp.ne.s32.totalorder %s1110_s13, %s1106_s12 }
   0x5   : > { %p28_p2 = scmp.eq.s32.totalorder %s1114_s14, 0  ;;  %p869_p4 = scmp.ge.s32.totalorder %s1114_s14, 4 }
   0x6   : > { %s1162_s19 = scalar_select %p18_p0, %s1110_s13, %s20_s18  }
   0x7   : > { %p29_p3 = por %p28_p2, %p27_p1  ;;  %127 = sbr.rel (%p869_p4) target bundleno = 37 (0x25), region = 24 }
   0xc   : > { %130 = sbr.rel (!%p29_p3) target bundleno = 37 (0x25), region = 28  ;;  %s132_s20 = sand.u32 (%p29_p3), 1, %s1110_s13  }
   0xd   : > { %s1013_s21 = smul.u32 (%p29_p3), 40, %s1114_s14 }
   0xe   : > { %s1065_s22 = smul.u32 (%p29_p3), 160, %s132_s20 }
   0xf   : > { %s1170_s25 = scalar_lea.vmem (%p29_p3), %s1302_s0, %s1013_s21 }
  0x10   : > { %v154_v0 = vld [vmem:[%s1170_s25] sm:$0xff] (%p29_p3)   ;;  %v158_v1 = vld [vmem:[%s1170_s25 + $0x8] sm:$0xff] (%p29_p3)   ;;  %v162_v2 = vld [vmem:[%s1170_s25 + $0x10] sm:$0xff] (%p29_p3)   ;;  %s1175_s26 = scalar_lea.vmem (%p29_p3), [#allocation2], %s1065_s22 }
  0x11   : > { %155 = vst [vmem:[%s1175_s26] sm:$0xff] %v154_v0   ;;  %v166_v3 = vld [vmem:[%s1170_s25 + $0x18] sm:$0xff]   ;;  %v170_v4 = vld [vmem:[%s1170_s25 + $0x20] sm:$0xff]   ;;  %v178_v6 = vld [vmem:[%s1170_s25 + $0xa8] sm:$0xff]  }
  0x12   : > { %159 = vst [vmem:[%s1175_s26 + $0x8] sm:$0xff] %v158_v1   ;;  %v174_v5 = vld [vmem:[%s1170_s25 + $0xa0] sm:$0xff]   ;;  %v182_v7 = vld [vmem:[%s1170_s25 + $0xb0] sm:$0xff]   ;;  %v186_v8 = vld [vmem:[%s1170_s25 + $0xb8] sm:$0xff]  }
  0x13   : > { %163 = vst [vmem:[%s1175_s26 + $0x10] sm:$0xff] %v162_v2   ;;  %v190_v9 = vld [vmem:[%s1170_s25 + $0xc0] sm:$0xff]   ;;  %v198_v11 = vld [vmem:[%s1170_s25 + $0x148] sm:$0xff]   ;;  %v202_v12 = vld [vmem:[%s1170_s25 + $0x150] sm:$0xff]  }
  0x14   : > { %167 = vst [vmem:[%s1175_s26 + $0x18] sm:$0xff] %v166_v3   ;;  %v194_v10 = vld [vmem:[%s1170_s25 + $0x140] sm:$0xff]   ;;  %v206_v13 = vld [vmem:[%s1170_s25 + $0x158] sm:$0xff]   ;;  %v218_v16 = vld [vmem:[%s1170_s25 + $0x1e8] sm:$0xff]  }
  0x15   : > { %171 = vst [vmem:[%s1175_s26 + $0x20] sm:$0xff] %v170_v4   ;;  %v210_v14 = vld [vmem:[%s1170_s25 + $0x160] sm:$0xff]   ;;  %v222_v17 = vld [vmem:[%s1170_s25 + $0x1f0] sm:$0xff]   ;;  %v226_v18 = vld [vmem:[%s1170_s25 + $0x1f8] sm:$0xff]  }
  0x16   : > { %175 = vst [vmem:[%s1175_s26 + $0x28] sm:$0xff] %v174_v5   ;;  %v214_v15 = vld [vmem:[%s1170_s25 + $0x1e0] sm:$0xff]  }
  0x17   : > { %179 = vst [vmem:[%s1175_s26 + $0x30] sm:$0xff] %v178_v6   ;;  %v230_v19 = vld [vmem:[%s1170_s25 + $0x200] sm:$0xff]  }
  0x18   : > { %183 = vst [vmem:[%s1175_s26 + $0x38] sm:$0xff] %v182_v7  }
  0x19   : > { %187 = vst [vmem:[%s1175_s26 + $0x40] sm:$0xff] %v186_v8  }
  0x1a   : > { %191 = vst [vmem:[%s1175_s26 + $0x48] sm:$0xff] %v190_v9  }
  0x1b   : > { %195 = vst [vmem:[%s1175_s26 + $0x50] sm:$0xff] %v194_v10  }
  0x1c   : > { %199 = vst [vmem:[%s1175_s26 + $0x58] sm:$0xff] %v198_v11  }
  0x1d   : > { %203 = vst [vmem:[%s1175_s26 + $0x60] sm:$0xff] %v202_v12  }
  0x1e   : > { %207 = vst [vmem:[%s1175_s26 + $0x68] sm:$0xff] %v206_v13  }
  0x1f   : > { %211 = vst [vmem:[%s1175_s26 + $0x70] sm:$0xff] %v210_v14  }
  0x20   : > { %215 = vst [vmem:[%s1175_s26 + $0x78] sm:$0xff] %v214_v15  }
  0x21   : > { %219 = vst [vmem:[%s1175_s26 + $0x80] sm:$0xff] %v218_v16  }
  0x22   : > { %223 = vst [vmem:[%s1175_s26 + $0x88] sm:$0xff] %v222_v17  }
  0x23   : > { %227 = vst [vmem:[%s1175_s26 + $0x90] sm:$0xff] %v226_v18  }
  0x24   : > { %231 = vst [vmem:[%s1175_s26 + $0x98] sm:$0xff] %v230_v19  }
  0x25 PF: > { %p871_p5 = scmp.ge.s32.totalorder %s1114_s14, 1  ;;  %p336_p6 = scmp.lt.s32.totalorder %s1114_s14, 5 }
  0x27   : > { %p337_p7 = pnand %p871_p5, %p336_p6 }
  0x28   : > { %s343_s29 = sand.u32 (!%p337_p7), 1, %s1106_s12   ;;  %s367_s7 = smul.u32 (!%p337_p7), 10, %s866_s15 }
  0x29   : > { %340 = sbr.rel (%p337_p7) target bundleno = 270 (0x10e), region = 69 }
  0x2a   : > { %s1066_s30 = smul.u32 (!%p337_p7), 160, %s343_s29  ;;  %p368_p8 = scmp.lt.s32.totalorder (!%p337_p7), %s367_s7, 39 }
  0x2c   : > { %s1223_s6 = scalar_lea.vmem (!%p337_p7), [#allocation2], %s1066_s30 }
  0x2e   : > { %v1015_v20 = vld [vmem:[%s1303_s1 + $0x8] sm:$0xff]  ;;  %v1014_v21 = vld [vmem:[%s1303_s1] sm:$0xff]  ;;  %vm425_vm0 = vcmask 261120   ;;  %v1026_v24 = vld [vmem:[%s1223_s6 + $0x50] sm:$0xff]  ;;  %s1310_s7 = smov (!%p368_p8, %s367_s7), 39 }
  0x2f   : > { %447 = vmatpush.bf16.msra.mxu0 %v1015_v20  ;;  %532 = vmatpush.bf16.msra.mxu1 %v1015_v20  ;;  %v1016_v22 = vld [vmem:[%s1223_s6] sm:$0xff]  ;;  %v1021_v23 = vld [vmem:[%s1223_s6 + $0x28] sm:$0xff]  ;;  %v1031_v25 = vld [vmem:[%s1223_s6 + $0x78] sm:$0xff]  ;;  %s872_s10 = sshll.u32 %s1310_s7, 2 }
  0x30   : > { %627 = vmatpush.bf16.msra.mxu2 %v1015_v20  ;;  %722 = vmatpush.bf16.msra.mxu3 %v1015_v20  ;;  %v1017_v26 = vld [vmem:[%s1223_s6 + $0x8] sm:$0xff]  ;;  %v1022_v27 = vld [vmem:[%s1223_s6 + $0x30] sm:$0xff]  ;;  %v1027_v28 = vld [vmem:[%s1223_s6 + $0x58] sm:$0xff]  ;;  %s1277_s14 = scalar_lea.vmem %s1305_s3, %s872_s10 }
  0x31   : > { %v1032_v29 = vld [vmem:[%s1223_s6 + $0x80] sm:$0xff]  ;;  %v1018_v30 = vld [vmem:[%s1223_s6 + $0x10] sm:$0xff]  ;;  %v1023_v31 = vld [vmem:[%s1223_s6 + $0x38] sm:$0xff] }
  0x32   : > { %v1028_v32 = vld [vmem:[%s1223_s6 + $0x60] sm:$0xff]  ;;  %v1033_v33 = vld [vmem:[%s1223_s6 + $0x88] sm:$0xff]  ;;  %v1019_v34 = vld [vmem:[%s1223_s6 + $0x18] sm:$0xff] }
  0x33   : > { %448 = vmatpush.bf16.msra.mxu0 %v1014_v21  ;;  %533 = vmatpush.bf16.msra.mxu1 %v1014_v21  ;;  %v1024_v35 = vld [vmem:[%s1223_s6 + $0x40] sm:$0xff]  ;;  %v1029_v36 = vld [vmem:[%s1223_s6 + $0x68] sm:$0xff]  ;;  %v1034_v37 = vld [vmem:[%s1223_s6 + $0x90] sm:$0xff] }
  0x34   : > { %628 = vmatpush.bf16.msra.mxu2 %v1014_v21  ;;  %723 = vmatpush.bf16.msra.mxu3 %v1014_v21  ;;  %v1020_v38 = vld [vmem:[%s1223_s6 + $0x20] sm:$0xff]  ;;  %v1025_v39 = vld [vmem:[%s1223_s6 + $0x48] sm:$0xff]  ;;  %v1030_v40 = vld [vmem:[%s1223_s6 + $0x70] sm:$0xff] }
  0x35   : > { %v1035_v41 = vld [vmem:[%s1223_s6 + $0x98] sm:$0xff]  ;;  %v1270_v51 = vld [vmem:[%s1304_s2] ss:$0 sm:$0xff] }
  0x36   : > { %901 = vmatmul.msk.bf16.vlgmr.msra.gmra.mxu0 %vm425_vm0, %v1016_v22  ;;  %936 = vmatmul.msk.bf16.vlgmr.msra.gmra.mxu1 %vm425_vm0, %v1021_v23 }
  0x37   : > { %971 = vmatmul.msk.bf16.vlgmr.msra.gmra.mxu2 %vm425_vm0, %v1026_v24  ;;  %1006 = vmatmul.msk.bf16.vlgmr.msra.gmra.mxu3 %vm425_vm0, %v1031_v25 }
  0x46   : > { %902 = vmatmul.msk.bf16.gmra.mxu0 %vm425_vm0, %v1017_v26  ;;  %937 = vmatmul.msk.bf16.gmra.mxu1 %vm425_vm0, %v1022_v27 }
  0x47   : > { %972 = vmatmul.msk.bf16.gmra.mxu2 %vm425_vm0, %v1027_v28  ;;  %1007 = vmatmul.msk.bf16.gmra.mxu3 %vm425_vm0, %v1032_v29 }
  0x56   : > { %903 = vmatmul.msk.bf16.gmra.mxu0 %vm425_vm0, %v1018_v30  ;;  %938 = vmatmul.msk.bf16.gmra.mxu1 %vm425_vm0, %v1023_v31 }
  0x57   : > { %973 = vmatmul.msk.bf16.gmra.mxu2 %vm425_vm0, %v1028_v32  ;;  %1008 = vmatmul.msk.bf16.gmra.mxu3 %vm425_vm0, %v1033_v33 }
  0x66   : > { %904 = vmatmul.msk.bf16.gmra.mxu0 %vm425_vm0, %v1019_v34  ;;  %939 = vmatmul.msk.bf16.gmra.mxu1 %vm425_vm0, %v1024_v35 }
  0x67   : > { %974 = vmatmul.msk.bf16.gmra.mxu2 %vm425_vm0, %v1029_v36  ;;  %1009 = vmatmul.msk.bf16.gmra.mxu3 %vm425_vm0, %v1034_v37 }
  0x76   : > { %905 = vmatmul.msk.bf16.gmra.mxu0 %vm425_vm0, %v1020_v38  ;;  %940 = vmatmul.msk.bf16.gmra.mxu1 %vm425_vm0, %v1025_v39 }
  0x77   : > { %975 = vmatmul.msk.bf16.gmra.mxu2 %vm425_vm0, %v1030_v40  ;;  %1010 = vmatmul.msk.bf16.gmra.mxu3 %vm425_vm0, %v1035_v41 }
  0xb3   : > { %v450_v42 = vpop.f32.mrf.mxu0  ;;  %v535_v43 = vpop.f32.mrf.mxu1 }
  0xb4   : > { %v560_v44 = vmax.f32 %v450_v42, %v535_v43 }
  0xba   : > { %v630_v45 = vpop.f32.mrf.mxu2  ;;  %v725_v46 = vpop.f32.mrf.mxu3 }
  0xbb   : > { %v452_v47 = vpop.f32.mrf.mxu0  ;;  %v537_v48 = vpop.f32.mrf.mxu1  ;;  %v655_v49 = vmax.f32 %v560_v44, %v630_v45 }
  0xbc   : > { %v561_v52 = vmax.f32 %v452_v47, %v537_v48 }
  0xbd   : > { %v750_v50 = vmax.f32 %v655_v49, %v725_v46 }
  0xbf   : > { %v764_v58 = vadd.f32 %v1270_v51, %v750_v50 }
  0xc1   : > { %v774_v61 = vmax.f32 %v764_v58, 0.0 }
  0xc2   : > { %v632_v53 = vpop.f32.mrf.mxu2  ;;  %v727_v54 = vpop.f32.mrf.mxu3 }
  0xc3   : > { %v656_v55 = vmax.f32 %v561_v52, %v632_v53  ;;  %v455_v56 = vpop.f32.mrf.mxu0  ;;  %v540_v57 = vpop.f32.mrf.mxu1 }
  0xc4   : > { %v562_v63 = vmax.f32 %v455_v56, %v540_v57 }
  0xc5   : > { %v751_v59 = vmax.f32 %v656_v55, %v727_v54 }
  0xc7   : > { %v765_v60 = vadd.f32 %v1270_v51, %v751_v59 }
  0xc9   : > { %v775_v62 = vmax.f32 %v765_v60, 0.0 }
  0xca   : > { %v635_v0 = vpop.f32.mrf.mxu2  ;;  %v730_v1 = vpop.f32.mrf.mxu3 }
  0xcb   : > { %v1039_v2 = vpack.c.bf16 %v775_v62, %v774_v61  ;;  %v457_v3 = vpop.f32.mrf.mxu0  ;;  %v542_v4 = vpop.f32.mrf.mxu1  ;;  %v657_v5 = vmax.f32 %v562_v63, %v635_v0 }
  0xcc   : > { %v563_v7 = vmax.f32 %v457_v3, %v542_v4 }
  0xcd   : > { %1040 = vst [vmem:[%s1277_s14] sm:$0xff] %v1039_v2   ;;  %v752_v6 = vmax.f32 %v657_v5, %v730_v1 }
  0xcf   : > { %v766_v13 = vadd.f32 %v1270_v51, %v752_v6 }
  0xd1   : > { %v776_v16 = vmax.f32 %v766_v13, 0.0 }
  0xd2   : > { %v637_v8 = vpop.f32.mrf.mxu2  ;;  %v732_v9 = vpop.f32.mrf.mxu3 }
  0xd3   : > { %v658_v10 = vmax.f32 %v563_v7, %v637_v8  ;;  %v460_v11 = vpop.f32.mrf.mxu0  ;;  %v545_v12 = vpop.f32.mrf.mxu1 }
  0xd4   : > { %v564_v18 = vmax.f32 %v460_v11, %v545_v12 }
  0xd5   : > { %v753_v14 = vmax.f32 %v658_v10, %v732_v9 }
  0xd7   : > { %v767_v15 = vadd.f32 %v1270_v51, %v753_v14 }
  0xd9   : > { %v777_v17 = vmax.f32 %v767_v15, 0.0 }
  0xda   : > { %v640_v19 = vpop.f32.mrf.mxu2  ;;  %v735_v20 = vpop.f32.mrf.mxu3 }
  0xdb   : > { %v1044_v21 = vpack.c.bf16 %v777_v17, %v776_v16  ;;  %v462_v22 = vpop.f32.mrf.mxu0  ;;  %v547_v23 = vpop.f32.mrf.mxu1  ;;  %v659_v24 = vmax.f32 %v564_v18, %v640_v19 }
  0xdc   : > { %v565_v26 = vmax.f32 %v462_v22, %v547_v23 }
  0xdd   : > { %1061 = vst [vmem:[%s1277_s14 + $0x8] sm:$0xff] %v1044_v21   ;;  %v754_v25 = vmax.f32 %v659_v24, %v735_v20 }
  0xdf   : > { %v768_v32 = vadd.f32 %v1270_v51, %v754_v25 }
  0xe1   : > { %v778_v35 = vmax.f32 %v768_v32, 0.0 }
  0xe2   : > { %v642_v27 = vpop.f32.mrf.mxu2  ;;  %v737_v28 = vpop.f32.mrf.mxu3 }
  0xe3   : > { %v660_v29 = vmax.f32 %v565_v26, %v642_v27  ;;  %v465_v30 = vpop.f32.mrf.mxu0  ;;  %v550_v31 = vpop.f32.mrf.mxu1 }
  0xe4   : > { %v566_v37 = vmax.f32 %v465_v30, %v550_v31 }
  0xe5   : > { %v755_v33 = vmax.f32 %v660_v29, %v737_v28 }
  0xe7   : > { %v769_v34 = vadd.f32 %v1270_v51, %v755_v33 }
  0xe9   : > { %v779_v36 = vmax.f32 %v769_v34, 0.0 }
  0xea   : > { %v645_v38 = vpop.f32.mrf.mxu2  ;;  %v740_v39 = vpop.f32.mrf.mxu3 }
  0xeb   : > { %v1049_v40 = vpack.c.bf16 %v779_v36, %v778_v35  ;;  %v467_v41 = vpop.f32.mrf.mxu0  ;;  %v552_v42 = vpop.f32.mrf.mxu1  ;;  %v661_v43 = vmax.f32 %v566_v37, %v645_v38 }
  0xec   : > { %v567_v45 = vmax.f32 %v467_v41, %v552_v42 }
  0xed   : > { %1062 = vst [vmem:[%s1277_s14 + $0x10] sm:$0xff] %v1049_v40   ;;  %v756_v44 = vmax.f32 %v661_v43, %v740_v39 }
  0xef   : > { %v770_v52 = vadd.f32 %v1270_v51, %v756_v44 }
  0xf1   : > { %v780_v55 = vmax.f32 %v770_v52, 0.0 }
  0xf2   : > { %v647_v46 = vpop.f32.mrf.mxu2  ;;  %v742_v47 = vpop.f32.mrf.mxu3 }
  0xf3   : > { %v662_v48 = vmax.f32 %v567_v45, %v647_v46  ;;  %v470_v49 = vpop.f32.mrf.mxu0  ;;  %v555_v50 = vpop.f32.mrf.mxu1 }
  0xf4   : > { %v568_v57 = vmax.f32 %v470_v49, %v555_v50 }
  0xf5   : > { %v757_v53 = vmax.f32 %v662_v48, %v742_v47 }
  0xf7   : > { %v771_v54 = vadd.f32 %v1270_v51, %v757_v53 }
  0xf9   : > { %v781_v56 = vmax.f32 %v771_v54, 0.0 }
  0xfa   : > { %v650_v58 = vpop.f32.mrf.mxu2  ;;  %v745_v59 = vpop.f32.mrf.mxu3 }
  0xfb   : > { %v1054_v60 = vpack.c.bf16 %v781_v56, %v780_v55  ;;  %v663_v61 = vmax.f32 %v568_v57, %v650_v58  ;;  %v472_v62 = vpop.f32.mrf.mxu0  ;;  %v557_v63 = vpop.f32.mrf.mxu1 }
  0xfc   : > { %v569_v1 = vmax.f32 %v472_v62, %v557_v63 }
  0xfd   : > { %1063 = vst [vmem:[%s1277_s14 + $0x18] sm:$0xff] %v1054_v60   ;;  %v758_v0 = vmax.f32 %v663_v61, %v745_v59 }
  0xff   : > { %v772_v5 = vadd.f32 %v1270_v51, %v758_v0 }
 0x101   : > { %v782_v8 = vmax.f32 %v772_v5, 0.0 }
 0x102   : > { %v652_v2 = vpop.f32.mrf.mxu2  ;;  %v747_v4 = vpop.f32.mrf.mxu3 }
 0x103   : > { %v664_v3 = vmax.f32 %v569_v1, %v652_v2 }
 0x105   : > { %v759_v6 = vmax.f32 %v664_v3, %v747_v4 }
 0x107   : > { %v773_v7 = vadd.f32 %v1270_v51, %v759_v6 }
 0x109   : > { %v783_v9 = vmax.f32 %v773_v7, 0.0 }
 0x10b   : > { %v1059_v10 = vpack.c.bf16 %v783_v9, %v782_v8 }
 0x10d   : > { %1064 = vst [vmem:[%s1277_s14 + $0x20] sm:$0xff] %v1059_v10  }
 0x10e PF: > { %p10_p9 = scmp.ge.s32.totalorder %s1153_s16, 6   ;;  %s1306_s12 = smov %s1110_s13 }
 0x10f   : > { %s1307_s13 = smov %s1162_s19  ;;  %s1308_s14 = smov %s1153_s16 }
 0x110   :  { %12 = sbr.rel (!%p10_p9) target bundleno = 2 (0x2), region = 111 }

// kernel: net_forward.4
= control target key start
LH: loop header
LB: loop body
LE: loop exit
PB: predicated region body
PF: predicated region fallthrough
CT: control target
= control target key end

     0   :  { %s1225_s12 = smov 0   ;;  %s1227_s13 = smov 0   ;;  %s1620_s0 = inlined_call_operand.vmem [shape: bf16[4,32,512], index: 0, kind: input, shape index: {}]   ;;  %s1621_s1 = inlined_call_operand.vmem [shape: bf16[512,128], index: 1, kind: input, shape index: {}]   ;;  %s1622_s2 = inlined_call_operand.vmem [shape: f32[1,128], index: 2, kind: input, shape index: {}]   ;;  %s1623_s3 = inlined_call_operand.vmem [shape: bf16[32,128], index: 3, kind: output, shape index: {}]  }
   0x1   :  { %s1229_s14 = smov 0  }
   0x2 LB: > { %s883_s15 = sadd.s32 4294967295, %s1203_s14   ;;  %s1242_s16 = sadd.s32 1, %s1203_s14   ;;  %s1203_s14 = sphi %s1229_s14, %s1626_s14   ;;  %s1199_s13 = sphi %s1227_s13, %s1625_s13   ;;  %s1195_s12 = sphi %s1225_s12, %s1624_s12  }
   0x3   : > { %s17_s17 = ssub.s32 %s1203_s14, %s1242_s16  ;;  %s20_s18 = sadd.s32 1, %s1199_s13 }
   0x4   : > { %p18_p0 = scmp.eq.s32.totalorder %s17_s17, 0  ;;  %p27_p1 = scmp.ne.s32.totalorder %s1199_s13, %s1195_s12 }
   0x5   : > { %p28_p2 = scmp.eq.s32.totalorder %s1203_s14, 0  ;;  %p886_p4 = scmp.ge.s32.totalorder %s1203_s14, 2 }
   0x6   : > { %s1251_s19 = scalar_select %p18_p0, %s1199_s13, %s20_s18  }
   0x7   : > { %p29_p3 = por %p28_p2, %p27_p1  ;;  %127 = sbr.rel (%p886_p4) target bundleno = 32 (0x20), region = 24 }
   0xc   : > { %130 = sbr.rel (!%p29_p3) target bundleno = 32 (0x20), region = 28  ;;  %s132_s20 = sand.u32 (%p29_p3), 1, %s1199_s13  }
   0xd   : > { %s1102_s21 = sshll.u32 (%p29_p3), %s1203_s14, 5  ;;  %s887_s22 = sshll.u32 (%p29_p3), %s132_s20, 7 }
   0xe   : > { %s1259_s25 = scalar_lea.vmem (%p29_p3), %s1620_s0, %s1102_s21  ;;  %s134_s26 = scalar_lea.vmem (%p29_p3), [#allocation2], %s887_s22 }
   0xf   : > { %v151_v0 = vld [vmem:[%s1259_s25] sm:$0xff] (%p29_p3)  ;;  %v153_v1 = vld [vmem:[%s1259_s25 + $0x8] sm:$0xff] (%p29_p3)  ;;  %v155_v2 = vld [vmem:[%s1259_s25 + $0x10] sm:$0xff] (%p29_p3) }
  0x10   : > { %152 = vst [vmem:[%s134_s26] sm:$0xff] (%p29_p3), %v151_v0  ;;  %v157_v3 = vld [vmem:[%s1259_s25 + $0x18] sm:$0xff] (%p29_p3)  ;;  %v159_v4 = vld [vmem:[%s1259_s25 + $0x40] sm:$0xff] (%p29_p3)  ;;  %v161_v5 = vld [vmem:[%s1259_s25 + $0x48] sm:$0xff] (%p29_p3) }
  0x11   : > { %154 = vst [vmem:[%s134_s26 + $0x8] sm:$0xff] %v153_v1  ;;  %v163_v6 = vld [vmem:[%s1259_s25 + $0x50] sm:$0xff]  ;;  %v165_v7 = vld [vmem:[%s1259_s25 + $0x58] sm:$0xff]  ;;  %v167_v8 = vld [vmem:[%s1259_s25 + $0x80] sm:$0xff] }
  0x12   : > { %156 = vst [vmem:[%s134_s26 + $0x10] sm:$0xff] %v155_v2  ;;  %v169_v9 = vld [vmem:[%s1259_s25 + $0x88] sm:$0xff]  ;;  %v171_v10 = vld [vmem:[%s1259_s25 + $0x90] sm:$0xff]  ;;  %v173_v11 = vld [vmem:[%s1259_s25 + $0x98] sm:$0xff] }
  0x13   : > { %158 = vst [vmem:[%s134_s26 + $0x18] sm:$0xff] %v157_v3  ;;  %v175_v12 = vld [vmem:[%s1259_s25 + $0xc0] sm:$0xff]  ;;  %v177_v13 = vld [vmem:[%s1259_s25 + $0xc8] sm:$0xff]  ;;  %v179_v14 = vld [vmem:[%s1259_s25 + $0xd0] sm:$0xff] }
  0x14   : > { %160 = vst [vmem:[%s134_s26 + $0x20] sm:$0xff] %v159_v4  ;;  %v181_v15 = vld [vmem:[%s1259_s25 + $0xd8] sm:$0xff] }
  0x15   : > { %162 = vst [vmem:[%s134_s26 + $0x28] sm:$0xff] %v161_v5 }
  0x16   : > { %164 = vst [vmem:[%s134_s26 + $0x30] sm:$0xff] %v163_v6 }
  0x17   : > { %166 = vst [vmem:[%s134_s26 + $0x38] sm:$0xff] %v165_v7 }
  0x18   : > { %168 = vst [vmem:[%s134_s26 + $0x40] sm:$0xff] %v167_v8 }
  0x19   : > { %170 = vst [vmem:[%s134_s26 + $0x48] sm:$0xff] %v169_v9 }
  0x1a   : > { %172 = vst [vmem:[%s134_s26 + $0x50] sm:$0xff] %v171_v10 }
  0x1b   : > { %174 = vst [vmem:[%s134_s26 + $0x58] sm:$0xff] %v173_v11 }
  0x1c   : > { %176 = vst [vmem:[%s134_s26 + $0x60] sm:$0xff] %v175_v12 }
  0x1d   : > { %178 = vst [vmem:[%s134_s26 + $0x68] sm:$0xff] %v177_v13 }
  0x1e   : > { %180 = vst [vmem:[%s134_s26 + $0x70] sm:$0xff] %v179_v14 }
  0x1f   : > { %182 = vst [vmem:[%s134_s26 + $0x78] sm:$0xff] %v181_v15 }
  0x20 PF: > { %p891_p5 = scmp.ge.s32.totalorder %s1203_s14, 1  ;;  %p187_p6 = scmp.lt.s32.totalorder %s1203_s14, 3 }
  0x22   : > { %p188_p7 = pnand %p891_p5, %p187_p6 }
  0x23   : > { %s194_s25 = sand.u32 (!%p188_p7), 1, %s1195_s12   ;;  %s893_s30 = sshll.u32 (!%p188_p7), %s883_s15, 1 }
  0x24   : > { %191 = sbr.rel (%p188_p7) target bundleno = 324 (0x144), region = 51  ;;  %s892_s6 = sshll.u32 (!%p188_p7), %s194_s25, 7 }
  0x25   : > { %s1466_s29 = scalar_lea.vmem (!%p188_p7), [#allocation2], %s892_s6  ;;  %p219_p8 = scmp.lt.s32.totalorder (!%p188_p7), %s893_s30, 3 }
  0x29   : > { %v1282_v16 = vld [vmem:[%s1621_s1 + $0x38] sm:$0xff]  ;;  %v1304_v20 = vld [vmem:[%s1621_s1 + $0x30] sm:$0xff]  ;;  %v1328_v24 = vld [vmem:[%s1621_s1 + $0x28] sm:$0xff]  ;;  %s1628_s30 = smov (!%p219_p8, %s893_s30), 3 }
  0x2a   : > { %v1287_v17 = vld [vmem:[%s1621_s1 + $0x78] sm:$0xff]  ;;  %504 = vmatpush.bf16.msra.mxu0 %v1282_v16  ;;  %v1309_v21 = vld [vmem:[%s1621_s1 + $0x70] sm:$0xff]  ;;  %v1333_v25 = vld [vmem:[%s1621_s1 + $0x68] sm:$0xff]  ;;  %s894_s14 = sshll.u32 %s1628_s30, 2 }
  0x2b   : > { %v1292_v18 = vld [vmem:[%s1621_s1 + $0xb8] sm:$0xff]  ;;  %518 = vmatpush.bf16.msra.mxu1 %v1287_v17  ;;  %v1316_v22 = vld [vmem:[%s1621_s1 + $0xb0] sm:$0xff]  ;;  %v1340_v26 = vld [vmem:[%s1621_s1 + $0xa8] sm:$0xff]  ;;  %s222_s6 = scalar_lea.vmem %s1623_s3, %s894_s14 }
  0x2c   : > { %v1297_v19 = vld [vmem:[%s1621_s1 + $0xf8] sm:$0xff]  ;;  %532 = vmatpush.bf16.msra.mxu2 %v1292_v18  ;;  %v1321_v23 = vld [vmem:[%s1621_s1 + $0xf0] sm:$0xff]  ;;  %v1345_v27 = vld [vmem:[%s1621_s1 + $0xe8] sm:$0xff] }
  0x2d   : > { %546 = vmatpush.bf16.msra.mxu3 %v1297_v19  ;;  %v1352_v28 = vld [vmem:[%s1621_s1 + $0x20] sm:$0xff]  ;;  %v1376_v32 = vld [vmem:[%s1621_s1 + $0x18] sm:$0xff]  ;;  %v1401_v36 = vld [vmem:[%s1621_s1 + $0x10] sm:$0xff] }
  0x2e   : > { %505 = vmatpush.bf16.msra.mxu0 %v1304_v20  ;;  %v1357_v29 = vld [vmem:[%s1621_s1 + $0x60] sm:$0xff]  ;;  %v1381_v33 = vld [vmem:[%s1621_s1 + $0x58] sm:$0xff]  ;;  %v1406_v37 = vld [vmem:[%s1621_s1 + $0x50] sm:$0xff] }
  0x2f   : > { %519 = vmatpush.bf16.msra.mxu1 %v1309_v21  ;;  %v1364_v30 = vld [vmem:[%s1621_s1 + $0xa0] sm:$0xff]  ;;  %v1388_v34 = vld [vmem:[%s1621_s1 + $0x98] sm:$0xff]  ;;  %v1413_v38 = vld [vmem:[%s1621_s1 + $0x90] sm:$0xff] }
  0x30   : > { %533 = vmatpush.bf16.msra.mxu2 %v1316_v22  ;;  %v1369_v31 = vld [vmem:[%s1621_s1 + $0xe0] sm:$0xff]  ;;  %v1393_v35 = vld [vmem:[%s1621_s1 + $0xd8] sm:$0xff]  ;;  %v1418_v39 = vld [vmem:[%s1621_s1 + $0xd0] sm:$0xff] }
  0x31   : > { %547 = vmatpush.bf16.msra.mxu3 %v1321_v23  ;;  %v1425_v40 = vld [vmem:[%s1621_s1 + $0x8] sm:$0xff]  ;;  %v1447_v44 = vld [vmem:[%s1621_s1] sm:$0xff]  ;;  %v1138_v49 = vld [vmem:[%s1466_s29 + $0x14] sm:$0xf0] }
  0x32   : > { %506 = vmatpush.bf16.msra.mxu0 %v1328_v24  ;;  %v1430_v41 = vld [vmem:[%s1621_s1 + $0x48] sm:$0xff]  ;;  %v1452_v45 = vld [vmem:[%s1621_s1 + $0x40] sm:$0xff]  ;;  %v907_v51 = vld [vmem:[%s1466_s29 + $0x18] sm:$0xf0] }
  0x33   : > { %520 = vmatpush.bf16.msra.mxu1 %v1333_v25  ;;  %v1437_v42 = vld [vmem:[%s1621_s1 + $0x88] sm:$0xff]  ;;  %v1457_v46 = vld [vmem:[%s1621_s1 + $0x80] sm:$0xff]  ;;  %v1137_v53 = vld [vmem:[%s1466_s29 + $0xc] sm:$0xf0] }
  0x34   : > { %534 = vmatpush.bf16.msra.mxu2 %v1340_v26  ;;  %v1442_v43 = vld [vmem:[%s1621_s1 + $0xc8] sm:$0xff]  ;;  %v1464_v47 = vld [vmem:[%s1621_s1 + $0xc0] sm:$0xff]  ;;  %v899_v55 = vld [vmem:[%s1466_s29 + $0x10] sm:$0xf0] }
  0x35   : > { %548 = vmatpush.bf16.msra.mxu3 %v1345_v27  ;;  %v905_v48 = vld [vmem:[%s1466_s29 + $0x8] sm:$0xf]  ;;  %v1136_v50 = vld [vmem:[%s1466_s29 + $0xc] sm:$0xf]  ;;  %v897_v52 = vld [vmem:[%s1466_s29] sm:$0xf] }
  0x36   : > { %507 = vmatpush.bf16.msra.mxu0 %v1352_v28  ;;  %v1135_v54 = vld [vmem:[%s1466_s29 + $0x4] sm:$0xf]  ;;  %v906_v56 = vor.u32 %v1138_v49, %v905_v48  ;;  %v910_v57 = vor.u32 %v1136_v50, %v907_v51  ;;  %v898_v58 = vor.u32 %v1137_v53, %v897_v52  ;;  %v1053_v60 = vld [vmem:[%s1466_s29 + $0x28] sm:$0xf]  ;;  %v1142_v61 = vld [vmem:[%s1466_s29 + $0x34] sm:$0xf0] }
  0x37   : > { %521 = vmatpush.bf16.msra.mxu1 %v1357_v29  ;;  %v902_v59 = vor.u32 %v1135_v54, %v899_v55  ;;  %v1140_v62 = vld [vmem:[%s1466_s29 + $0x2c] sm:$0xf]  ;;  %v1055_v63 = vld [vmem:[%s1466_s29 + $0x38] sm:$0xf0]  ;;  %v1045_v0 = vld [vmem:[%s1466_s29 + $0x20] sm:$0xf]  ;;  %v1054_v4 = vor.u32 %v1142_v61, %v1053_v60 }
  0x38   : > { %535 = vmatpush.bf16.msra.mxu2 %v1364_v30  ;;  %v1141_v1 = vld [vmem:[%s1466_s29 + $0x2c] sm:$0xf0]  ;;  %v1139_v2 = vld [vmem:[%s1466_s29 + $0x24] sm:$0xf]  ;;  %v1047_v3 = vld [vmem:[%s1466_s29 + $0x30] sm:$0xf0]  ;;  %v1058_v5 = vor.u32 %v1140_v62, %v1055_v63 }
  0x39   : > { %549 = vmatpush.bf16.msra.mxu3 %v1369_v31  ;;  %v1046_v6 = vor.u32 %v1141_v1, %v1045_v0  ;;  %v1050_v7 = vor.u32 %v1139_v2, %v1047_v3  ;;  %v1073_v8 = vld [vmem:[%s1466_s29 + $0x48] sm:$0xf]  ;;  %v1146_v9 = vld [vmem:[%s1466_s29 + $0x54] sm:$0xf0]  ;;  %v1144_v10 = vld [vmem:[%s1466_s29 + $0x4c] sm:$0xf] }
  0x3a   : > { %508 = vmatpush.bf16.msra.mxu0 %v1376_v32  ;;  %v1075_v11 = vld [vmem:[%s1466_s29 + $0x58] sm:$0xf0]  ;;  %v1065_v12 = vld [vmem:[%s1466_s29 + $0x40] sm:$0xf]  ;;  %v1145_v13 = vld [vmem:[%s1466_s29 + $0x4c] sm:$0xf0]  ;;  %v1074_v48 = vor.u32 %v1146_v9, %v1073_v8 }
  0x3b   : > { %522 = vmatpush.bf16.msra.mxu1 %v1381_v33  ;;  %v1143_v14 = vld [vmem:[%s1466_s29 + $0x44] sm:$0xf]  ;;  %v1067_v15 = vld [vmem:[%s1466_s29 + $0x50] sm:$0xf0]  ;;  %v1078_v49 = vor.u32 %v1144_v10, %v1075_v11  ;;  %v1066_v50 = vor.u32 %v1145_v13, %v1065_v12 }
  0x3c   : > { %536 = vmatpush.bf16.msra.mxu2 %v1388_v34  ;;  %v1070_v51 = vor.u32 %v1143_v14, %v1067_v15 }
  0x3d   : > { %550 = vmatpush.bf16.msra.mxu3 %v1393_v35 }
  0x3e   : > { %509 = vmatpush.bf16.msra.mxu0 %v1401_v36 }
  0x3f   : > { %523 = vmatpush.bf16.msra.mxu1 %v1406_v37 }
  0x40   : > { %537 = vmatpush.bf16.msra.mxu2 %v1413_v38 }
  0x41   : > { %551 = vmatpush.bf16.msra.mxu3 %v1418_v39 }
  0x42   : > { %510 = vmatpush.bf16.msra.mxu0 %v1425_v40 }
  0x43   : > { %524 = vmatpush.bf16.msra.mxu1 %v1430_v41 }
  0x44   : > { %538 = vmatpush.bf16.msra.mxu2 %v1437_v42 }
  0x45   : > { %552 = vmatpush.bf16.msra.mxu3 %v1442_v43 }
  0x46   : > { %511 = vmatpush.bf16.msra.mxu0 %v1447_v44 }
  0x47   : > { %525 = vmatpush.bf16.msra.mxu1 %v1452_v45 }
  0x48   : > { %539 = vmatpush.bf16.msra.mxu2 %v1457_v46 }
  0x49   : > { %553 = vmatpush.bf16.msra.mxu3 %v1464_v47  ;;  %512 = vmatmul.bf16.vlgmr.msra.gmra.mxu0 %v898_v58 }
  0x4a   : > { %585 = vmatpush.bf16.msrb.mxu0 %v1282_v16  ;;  %526 = vmatmul.bf16.vlgmr.msra.gmra.mxu1 %v902_v59 }
  0x4b   : > { %599 = vmatpush.bf16.msrb.mxu1 %v1287_v17  ;;  %540 = vmatmul.bf16.vlgmr.msra.gmra.mxu2 %v906_v56 }
  0x4c   : > { %613 = vmatpush.bf16.msrb.mxu2 %v1292_v18  ;;  %554 = vmatmul.bf16.vlgmr.msra.gmra.mxu3 %v910_v57 }
  0x4d   : > { %627 = vmatpush.bf16.msrb.mxu3 %v1297_v19 }
  0x4e   : > { %586 = vmatpush.bf16.msrb.mxu0 %v1304_v20 }
  0x4f   : > { %600 = vmatpush.bf16.msrb.mxu1 %v1309_v21 }
  0x50   : > { %614 = vmatpush.bf16.msrb.mxu2 %v1316_v22 }
  0x51   : > { %628 = vmatpush.bf16.msrb.mxu3 %v1321_v23 }
  0x52   : > { %587 = vmatpush.bf16.msrb.mxu0 %v1328_v24 }
  0x53   : > { %601 = vmatpush.bf16.msrb.mxu1 %v1333_v25 }
  0x54   : > { %615 = vmatpush.bf16.msrb.mxu2 %v1340_v26 }
  0x55   : > { %629 = vmatpush.bf16.msrb.mxu3 %v1345_v27 }
  0x56   : > { %588 = vmatpush.bf16.msrb.mxu0 %v1352_v28 }
  0x57   : > { %602 = vmatpush.bf16.msrb.mxu1 %v1357_v29 }
  0x58   : > { %616 = vmatpush.bf16.msrb.mxu2 %v1364_v30 }
  0x59   : > { %630 = vmatpush.bf16.msrb.mxu3 %v1369_v31 }
  0x5a   : > { %589 = vmatpush.bf16.msrb.mxu0 %v1376_v32 }
  0x5b   : > { %603 = vmatpush.bf16.msrb.mxu1 %v1381_v33 }
  0x5c   : > { %617 = vmatpush.bf16.msrb.mxu2 %v1388_v34 }
  0x5d   : > { %631 = vmatpush.bf16.msrb.mxu3 %v1393_v35 }
  0x5e   : > { %590 = vmatpush.bf16.msrb.mxu0 %v1401_v36 }
  0x5f   : > { %604 = vmatpush.bf16.msrb.mxu1 %v1406_v37 }
  0x60   : > { %618 = vmatpush.bf16.msrb.mxu2 %v1413_v38 }
  0x61   : > { %632 = vmatpush.bf16.msrb.mxu3 %v1418_v39 }
  0x62   : > { %591 = vmatpush.bf16.msrb.mxu0 %v1425_v40 }
  0x63   : > { %605 = vmatpush.bf16.msrb.mxu1 %v1430_v41 }
  0x64   : > { %619 = vmatpush.bf16.msrb.mxu2 %v1437_v42 }
  0x65   : > { %633 = vmatpush.bf16.msrb.mxu3 %v1442_v43 }
  0x66   : > { %592 = vmatpush.bf16.msrb.mxu0 %v1447_v44 }
  0x67   : > { %606 = vmatpush.bf16.msrb.mxu1 %v1452_v45 }
  0x68   : > { %620 = vmatpush.bf16.msrb.mxu2 %v1457_v46 }
  0x69   : > { %634 = vmatpush.bf16.msrb.mxu3 %v1464_v47  ;;  %593 = vmatmul.bf16.vlgmr.msrb.gmra.mxu0 %v1046_v6 }
  0x6a   : > { %668 = vmatpush.bf16.msra.mxu0 %v1282_v16  ;;  %607 = vmatmul.bf16.vlgmr.msrb.gmra.mxu1 %v1050_v7 }
  0x6b   : > { %682 = vmatpush.bf16.msra.mxu1 %v1287_v17  ;;  %621 = vmatmul.bf16.vlgmr.msrb.gmra.mxu2 %v1054_v4 }
  0x6c   : > { %696 = vmatpush.bf16.msra.mxu2 %v1292_v18  ;;  %635 = vmatmul.bf16.vlgmr.msrb.gmra.mxu3 %v1058_v5 }
  0x6d   : > { %710 = vmatpush.bf16.msra.mxu3 %v1297_v19 }
  0x6e   : > { %669 = vmatpush.bf16.msra.mxu0 %v1304_v20 }
  0x6f   : > { %683 = vmatpush.bf16.msra.mxu1 %v1309_v21 }
  0x70   : > { %697 = vmatpush.bf16.msra.mxu2 %v1316_v22 }
  0x71   : > { %711 = vmatpush.bf16.msra.mxu3 %v1321_v23 }
  0x72   : > { %670 = vmatpush.bf16.msra.mxu0 %v1328_v24 }
  0x73   : > { %684 = vmatpush.bf16.msra.mxu1 %v1333_v25 }
  0x74   : > { %698 = vmatpush.bf16.msra.mxu2 %v1340_v26 }
  0x75   : > { %712 = vmatpush.bf16.msra.mxu3 %v1345_v27 }
  0x76   : > { %671 = vmatpush.bf16.msra.mxu0 %v1352_v28 }
  0x77   : > { %685 = vmatpush.bf16.msra.mxu1 %v1357_v29 }
  0x78   : > { %699 = vmatpush.bf16.msra.mxu2 %v1364_v30 }
  0x79   : > { %713 = vmatpush.bf16.msra.mxu3 %v1369_v31 }
  0x7a   : > { %672 = vmatpush.bf16.msra.mxu0 %v1376_v32 }
  0x7b   : > { %686 = vmatpush.bf16.msra.mxu1 %v1381_v33 }
  0x7c   : > { %700 = vmatpush.bf16.msra.mxu2 %v1388_v34 }
  0x7d   : > { %714 = vmatpush.bf16.msra.mxu3 %v1393_v35 }
  0x7e   : > { %673 = vmatpush.bf16.msra.mxu0 %v1401_v36 }
  0x7f   : > { %687 = vmatpush.bf16.msra.mxu1 %v1406_v37 }
  0x80   : > { %701 = vmatpush.bf16.msra.mxu2 %v1413_v38 }
  0x81   : > { %715 = vmatpush.bf16.msra.mxu3 %v1418_v39 }
  0x82   : > { %674 = vmatpush.bf16.msra.mxu0 %v1425_v40 }
  0x83   : > { %688 = vmatpush.bf16.msra.mxu1 %v1430_v41 }
  0x84   : > { %702 = vmatpush.bf16.msra.mxu2 %v1437_v42 }
  0x85   : > { %716 = vmatpush.bf16.msra.mxu3 %v1442_v43 }
  0x86   : > { %675 = vmatpush.bf16.msra.mxu0 %v1447_v44 }
  0x87   : > { %689 = vmatpush.bf16.msra.mxu1 %v1452_v45 }
  0x88   : > { %703 = vmatpush.bf16.msra.mxu2 %v1457_v46 }
  0x89   : > { %717 = vmatpush.bf16.msra.mxu3 %v1464_v47  ;;  %676 = vmatmul.bf16.vlgmr.msra.gmra.mxu0 %v1066_v50 }
  0x8a   : > { %751 = vmatpush.bf16.msrb.mxu0 %v1282_v16  ;;  %690 = vmatmul.bf16.vlgmr.msra.gmra.mxu1 %v1070_v51  ;;  %v1085_v16 = vld [vmem:[%s1466_s29 + $0x60] sm:$0xf] }
  0x8b   : > { %765 = vmatpush.bf16.msrb.mxu1 %v1287_v17  ;;  %704 = vmatmul.bf16.vlgmr.msra.gmra.mxu2 %v1074_v48  ;;  %v1149_v17 = vld [vmem:[%s1466_s29 + $0x6c] sm:$0xf0] }
  0x8c   : > { %779 = vmatpush.bf16.msrb.mxu2 %v1292_v18  ;;  %718 = vmatmul.bf16.vlgmr.msra.gmra.mxu3 %v1078_v49  ;;  %v1147_v18 = vld [vmem:[%s1466_s29 + $0x64] sm:$0xf] }
  0x8d   : > { %793 = vmatpush.bf16.msrb.mxu3 %v1297_v19  ;;  %v1087_v19 = vld [vmem:[%s1466_s29 + $0x70] sm:$0xf0] }
  0x8e   : > { %752 = vmatpush.bf16.msrb.mxu0 %v1304_v20  ;;  %v1093_v20 = vld [vmem:[%s1466_s29 + $0x68] sm:$0xf] }
  0x8f   : > { %766 = vmatpush.bf16.msrb.mxu1 %v1309_v21  ;;  %v1150_v21 = vld [vmem:[%s1466_s29 + $0x74] sm:$0xf0] }
  0x90   : > { %780 = vmatpush.bf16.msrb.mxu2 %v1316_v22  ;;  %v1148_v22 = vld [vmem:[%s1466_s29 + $0x6c] sm:$0xf] }
  0x91   : > { %794 = vmatpush.bf16.msrb.mxu3 %v1321_v23  ;;  %v1095_v23 = vld [vmem:[%s1466_s29 + $0x78] sm:$0xf0] }
  0x92   : > { %753 = vmatpush.bf16.msrb.mxu0 %v1328_v24  ;;  %v1086_v24 = vor.u32 %v1149_v17, %v1085_v16 }
  0x93   : > { %767 = vmatpush.bf16.msrb.mxu1 %v1333_v25  ;;  %v1090_v25 = vor.u32 %v1147_v18, %v1087_v19 }
  0x94   : > { %781 = vmatpush.bf16.msrb.mxu2 %v1340_v26  ;;  %v1094_v26 = vor.u32 %v1150_v21, %v1093_v20  ;;  %v1180_v21 = vld [vmem:[%s1622_s2] ss:$0 sm:$0xff] }
  0x95   : > { %795 = vmatpush.bf16.msrb.mxu3 %v1345_v27  ;;  %v1098_v27 = vor.u32 %v1148_v22, %v1095_v23 }
  0x96   : > { %754 = vmatpush.bf16.msrb.mxu0 %v1352_v28 }
  0x97   : > { %768 = vmatpush.bf16.msrb.mxu1 %v1357_v29 }
  0x98   : > { %782 = vmatpush.bf16.msrb.mxu2 %v1364_v30 }
  0x99   : > { %796 = vmatpush.bf16.msrb.mxu3 %v1369_v31 }
  0x9a   : > { %755 = vmatpush.bf16.msrb.mxu0 %v1376_v32 }
  0x9b   : > { %769 = vmatpush.bf16.msrb.mxu1 %v1381_v33 }
  0x9c   : > { %783 = vmatpush.bf16.msrb.mxu2 %v1388_v34 }
  0x9d   : > { %797 = vmatpush.bf16.msrb.mxu3 %v1393_v35 }
  0x9e   : > { %756 = vmatpush.bf16.msrb.mxu0 %v1401_v36 }
  0x9f   : > { %770 = vmatpush.bf16.msrb.mxu1 %v1406_v37 }
  0xa0   : > { %784 = vmatpush.bf16.msrb.mxu2 %v1413_v38 }
  0xa1   : > { %798 = vmatpush.bf16.msrb.mxu3 %v1418_v39 }
  0xa2   : > { %757 = vmatpush.bf16.msrb.mxu0 %v1425_v40 }
  0xa3   : > { %771 = vmatpush.bf16.msrb.mxu1 %v1430_v41 }
  0xa4   : > { %785 = vmatpush.bf16.msrb.mxu2 %v1437_v42 }
  0xa5   : > { %799 = vmatpush.bf16.msrb.mxu3 %v1442_v43 }
  0xa6   : > { %758 = vmatpush.bf16.msrb.mxu0 %v1447_v44 }
  0xa7   : > { %772 = vmatpush.bf16.msrb.mxu1 %v1452_v45 }
  0xa8   : > { %786 = vmatpush.bf16.msrb.mxu2 %v1457_v46 }
  0xa9   : > { %800 = vmatpush.bf16.msrb.mxu3 %v1464_v47  ;;  %759 = vmatmul.bf16.vlgmr.msrb.gmra.mxu0 %v1086_v24 }
  0xaa   : > { %773 = vmatmul.bf16.vlgmr.msrb.gmra.mxu1 %v1090_v25 }
  0xab   : > { %787 = vmatmul.bf16.vlgmr.msrb.gmra.mxu2 %v1094_v26 }
  0xac   : > { %801 = vmatmul.bf16.vlgmr.msrb.gmra.mxu3 %v1098_v27 }
  0xc6   : > { %v513_v28 = vpop.f32.mrf.mxu0 }
  0xc7   : > { %v527_v29 = vpop.f32.mrf.mxu1 }
  0xc8   : > { %v528_v59 = vadd.f32 %v527_v29, %v513_v28 }
  0xce   : > { %v541_v30 = vpop.f32.mrf.mxu2  ;;  %v515_v32 = vpop.f32.mrf.mxu0 }
  0xcf   : > { %v555_v31 = vpop.f32.mrf.mxu3  ;;  %v529_v33 = vpop.f32.mrf.mxu1  ;;  %v542_v0 = vadd.f32 %v541_v30, %v528_v59 }
  0xd0   : > { %v530_v1 = vadd.f32 %v529_v33, %v515_v32 }
  0xd1   : > { %v556_v9 = vadd.f32 %v555_v31, %v542_v0 }
  0xd6   : > { %v543_v34 = vpop.f32.mrf.mxu2 }
  0xd7   : > { %v557_v35 = vpop.f32.mrf.mxu3  ;;  %v544_v10 = vadd.f32 %v543_v34, %v530_v1 }
  0xd9   : > { %v558_v50 = vadd.f32 %v557_v35, %v544_v10 }
  0xe6   : > { %v594_v36 = vpop.f32.mrf.mxu0 }
  0xe7   : > { %v608_v37 = vpop.f32.mrf.mxu1 }
  0xe8   : > { %v609_v56 = vadd.f32 %v608_v37, %v594_v36 }
  0xee   : > { %v622_v38 = vpop.f32.mrf.mxu2  ;;  %v596_v40 = vpop.f32.mrf.mxu0 }
  0xef   : > { %v636_v39 = vpop.f32.mrf.mxu3  ;;  %v610_v41 = vpop.f32.mrf.mxu1  ;;  %v623_v61 = vadd.f32 %v622_v38, %v609_v56 }
  0xf0   : > { %v611_v62 = vadd.f32 %v610_v41, %v596_v40 }
  0xf1   : > { %v637_v6 = vadd.f32 %v636_v39, %v623_v61 }
  0xf3   : > { %v641_v15 = vmax.f32 %v556_v9, %v637_v6 }
  0xf6   : > { %v624_v42 = vpop.f32.mrf.mxu2 }
  0xf7   : > { %v638_v43 = vpop.f32.mrf.mxu3  ;;  %v625_v7 = vadd.f32 %v624_v42, %v611_v62 }
  0xf9   : > { %v639_v48 = vadd.f32 %v638_v43, %v625_v7 }
  0xfb   : > { %v642_v19 = vmax.f32 %v558_v50, %v639_v48 }
 0x106   : > { %v677_v44 = vpop.f32.mrf.mxu0 }
 0x107   : > { %v691_v45 = vpop.f32.mrf.mxu1 }
 0x108   : > { %v692_v60 = vadd.f32 %v691_v45, %v677_v44 }
 0x10e   : > { %v705_v46 = vpop.f32.mrf.mxu2  ;;  %v679_v52 = vpop.f32.mrf.mxu0 }
 0x10f   : > { %v719_v47 = vpop.f32.mrf.mxu3  ;;  %v693_v53 = vpop.f32.mrf.mxu1  ;;  %v706_v2 = vadd.f32 %v705_v46, %v692_v60 }
 0x110   : > { %v694_v3 = vadd.f32 %v693_v53, %v679_v52 }
 0x111   : > { %v720_v11 = vadd.f32 %v719_v47, %v706_v2 }
 0x113   : > { %v724_v51 = vmax.f32 %v641_v15, %v720_v11 }
 0x116   : > { %v707_v54 = vpop.f32.mrf.mxu2 }
 0x117   : > { %v721_v55 = vpop.f32.mrf.mxu3  ;;  %v708_v12 = vadd.f32 %v707_v54, %v694_v3 }
 0x119   : > { %v722_v16 = vadd.f32 %v721_v55, %v708_v12 }
 0x11b   : > { %v725_v24 = vmax.f32 %v642_v19, %v722_v16 }
 0x126   : > { %v760_v57 = vpop.f32.mrf.mxu0 }
 0x127   : > { %v774_v58 = vpop.f32.mrf.mxu1 }
 0x128   : > { %v775_v63 = vadd.f32 %v774_v58, %v760_v57 }
 0x12e   : > { %v788_v4 = vpop.f32.mrf.mxu2  ;;  %v762_v13 = vpop.f32.mrf.mxu0 }
 0x12f   : > { %v802_v5 = vpop.f32.mrf.mxu3  ;;  %v789_v8 = vadd.f32 %v788_v4, %v775_v63  ;;  %v776_v14 = vpop.f32.mrf.mxu1 }
 0x130   : > { %v777_v17 = vadd.f32 %v776_v14, %v762_v13 }
 0x131   : > { %v803_v49 = vadd.f32 %v802_v5, %v789_v8 }
 0x133   : > { %v807_v20 = vmax.f32 %v724_v51, %v803_v49 }
 0x135   : > { %v813_v26 = vadd.f32 %v1180_v21, %v807_v20 }
 0x136   : > { %v790_v18 = vpop.f32.mrf.mxu2 }
 0x137   : > { %v791_v22 = vadd.f32 %v790_v18, %v777_v17  ;;  %v804_v23 = vpop.f32.mrf.mxu3  ;;  %v815_v29 = vmax.f32 %v813_v26, 0.0 }
 0x139   : > { %v805_v25 = vadd.f32 %v804_v23, %v791_v22 }
 0x13b   : > { %v808_v27 = vmax.f32 %v725_v24, %v805_v25 }
 0x13d   : > { %v814_v28 = vadd.f32 %v1180_v21, %v808_v27 }
 0x13f   : > { %v816_v30 = vmax.f32 %v814_v28, 0.0 }
 0x141   : > { %v1154_v31 = vpack.c.bf16 %v816_v30, %v815_v29 }
 0x143   : > { %1155 = vst [vmem:[%s222_s6] sm:$0xff] %v1154_v31  }
 0x144 PF: > { %p10_p9 = scmp.ge.s32.totalorder %s1242_s16, 4   ;;  %s1624_s12 = smov %s1199_s13 }
 0x145   : > { %s1625_s13 = smov %s1251_s19  ;;  %s1626_s14 = smov %s1242_s16 }
 0x146   :  { %12 = sbr.rel (!%p10_p9) target bundleno = 2 (0x2), region = 93 }

// kernel: net_forward.5
= control target key start
LH: loop header
LB: loop body
LE: loop exit
PB: predicated region body
PF: predicated region fallthrough
CT: control target
= control target key end

     0   :  { %s17473_s1 = inlined_call_operand.vmem [shape: bf16[640,1024], index: 1, kind: input, shape index: {}]   ;;  %s17474_s0 = inlined_call_operand.vmem [shape: bf16[16,640], index: 0, kind: input, shape index: {}]   ;;  %s17475_s2 = inlined_call_operand.vmem [shape: f32[1,1024], index: 2, kind: input, shape index: {}]   ;;  %s17476_s3 = inlined_call_operand.vmem [shape: bf16[1024,1024], index: 3, kind: input, shape index: {}]   ;;  %s17477_s4 = inlined_call_operand.vmem [shape: f32[1,1024], index: 4, kind: input, shape index: {}]   ;;  %s17478_s5 = inlined_call_operand.vmem [shape: bf16[1024,128], index: 5, kind: input, shape index: {}]   ;;  %s17479_s6 = inlined_call_operand.vmem [shape: f32[1,128], index: 6, kind: input, shape index: {}]   ;;  %s17480_s7 = inlined_call_operand.vmem [shape: f32[16,128], index: 7, kind: output, shape index: {}]  }
   0x1   :  { %v7488_v0 = vld [vmem:[%s17473_s1 + $0x1c0] sm:$0xf] }
   0x2   :  { %v10911_v1 = vld [vmem:[%s17473_s1 + $0x1dc] sm:$0xf0] }
   0x3   :  { %v7744_v2 = vld [vmem:[%s17473_s1 + $0x3c0] sm:$0xf]  ;;  %v7489_v3 = vor.u32 %v10911_v1, %v7488_v0 }
   0x4   :  { %v10975_v4 = vld [vmem:[%s17473_s1 + $0x3dc] sm:$0xf0] }
   0x5   :  { %v8000_v5 = vld [vmem:[%s17473_s1 + $0x5c0] sm:$0xf]  ;;  %v7745_v7 = vor.u32 %v10975_v4, %v7744_v2  ;;  %1996 = vmatpush.bf16.msra.mxu0 %v7489_v3 }
   0x6   :  { %v11039_v6 = vld [vmem:[%s17473_s1 + $0x5dc] sm:$0xf0] }
   0x7   :  { %v8001_v8 = vor.u32 %v11039_v6, %v8000_v5  ;;  %v8256_v9 = vld [vmem:[%s17473_s1 + $0x7c0] sm:$0xf]  ;;  %2010 = vmatpush.bf16.msra.mxu1 %v7745_v7 }
   0x8   :  { %v11103_v10 = vld [vmem:[%s17473_s1 + $0x7dc] sm:$0xf0] }
   0x9   :  { %v7456_v11 = vld [vmem:[%s17473_s1 + $0x180] sm:$0xf]  ;;  %v8257_v12 = vor.u32 %v11103_v10, %v8256_v9  ;;  %2024 = vmatpush.bf16.msra.mxu2 %v8001_v8 }
   0xa   :  { %v10903_v13 = vld [vmem:[%s17473_s1 + $0x19c] sm:$0xf0] }
   0xb   :  { %v7712_v14 = vld [vmem:[%s17473_s1 + $0x380] sm:$0xf]  ;;  %v7457_v16 = vor.u32 %v10903_v13, %v7456_v11  ;;  %2038 = vmatpush.bf16.msra.mxu3 %v8257_v12 }
   0xc   :  { %v10967_v15 = vld [vmem:[%s17473_s1 + $0x39c] sm:$0xf0] }
   0xd   :  { %v7713_v17 = vor.u32 %v10967_v15, %v7712_v14  ;;  %v7968_v18 = vld [vmem:[%s17473_s1 + $0x580] sm:$0xf]  ;;  %1997 = vmatpush.bf16.msra.mxu0 %v7457_v16 }
   0xe   :  { %v11031_v19 = vld [vmem:[%s17473_s1 + $0x59c] sm:$0xf0] }
   0xf   :  { %v8224_v20 = vld [vmem:[%s17473_s1 + $0x780] sm:$0xf]  ;;  %v7969_v21 = vor.u32 %v11031_v19, %v7968_v18  ;;  %2011 = vmatpush.bf16.msra.mxu1 %v7713_v17 }
  0x10   :  { %v11095_v22 = vld [vmem:[%s17473_s1 + $0x79c] sm:$0xf0] }
  0x11   :  { %v7424_v23 = vld [vmem:[%s17473_s1 + $0x140] sm:$0xf]  ;;  %v8225_v25 = vor.u32 %v11095_v22, %v8224_v20  ;;  %2025 = vmatpush.bf16.msra.mxu2 %v7969_v21 }
  0x12   :  { %v10895_v24 = vld [vmem:[%s17473_s1 + $0x15c] sm:$0xf0] }
  0x13   :  { %v7680_v26 = vld [vmem:[%s17473_s1 + $0x340] sm:$0xf]  ;;  %v7425_v29 = vor.u32 %v10895_v24, %v7424_v23  ;;  %2039 = vmatpush.bf16.msra.mxu3 %v8225_v25 }
  0x14   :  { %v10959_v27 = vld [vmem:[%s17473_s1 + $0x35c] sm:$0xf0] }
  0x15   :  { %v7936_v28 = vld [vmem:[%s17473_s1 + $0x540] sm:$0xf]  ;;  %v7681_v33 = vor.u32 %v10959_v27, %v7680_v26  ;;  %1998 = vmatpush.bf16.msra.mxu0 %v7425_v29 }
  0x16   :  { %v11023_v30 = vld [vmem:[%s17473_s1 + $0x55c] sm:$0xf0] }
  0x17   :  { %v8192_v31 = vld [vmem:[%s17473_s1 + $0x740] sm:$0xf]  ;;  %v7937_v34 = vor.u32 %v11023_v30, %v7936_v28  ;;  %2012 = vmatpush.bf16.msra.mxu1 %v7681_v33  ;;  %v10907_v30 = vld [vmem:[%s17473_s1 + $0x1c4] sm:$0xf] }
  0x18   :  { %v11087_v32 = vld [vmem:[%s17473_s1 + $0x75c] sm:$0xf0]  ;;  %v10971_v33 = vld [vmem:[%s17473_s1 + $0x3c4] sm:$0xf] }
  0x19   :  { %v7392_v35 = vld [vmem:[%s17473_s1 + $0x100] sm:$0xf]  ;;  %v8193_v38 = vor.u32 %v11087_v32, %v8192_v31  ;;  %2026 = vmatpush.bf16.msra.mxu2 %v7937_v34  ;;  %v7490_v32 = vld [vmem:[%s17473_s1 + $0x1e0] sm:$0xf0] }
  0x1a   :  { %v10887_v36 = vld [vmem:[%s17473_s1 + $0x11c] sm:$0xf0]  ;;  %v7746_v34 = vld [vmem:[%s17473_s1 + $0x3e0] sm:$0xf0] }
  0x1b   :  { %v7648_v37 = vld [vmem:[%s17473_s1 + $0x300] sm:$0xf]  ;;  %v7393_v44 = vor.u32 %v10887_v36, %v7392_v35  ;;  %2040 = vmatpush.bf16.msra.mxu3 %v8193_v38  ;;  %v8002_v38 = vld [vmem:[%s17473_s1 + $0x5e0] sm:$0xf0] }
  0x1c   :  { %v10951_v39 = vld [vmem:[%s17473_s1 + $0x31c] sm:$0xf0] }
  0x1d   :  { %v7904_v40 = vld [vmem:[%s17473_s1 + $0x500] sm:$0xf]  ;;  %v7649_v45 = vor.u32 %v10951_v39, %v7648_v37  ;;  %1999 = vmatpush.bf16.msra.mxu0 %v7393_v44  ;;  %v11035_v37 = vld [vmem:[%s17473_s1 + $0x5c4] sm:$0xf] }
  0x1e   :  { %v11015_v41 = vld [vmem:[%s17473_s1 + $0x51c] sm:$0xf0] }
  0x1f   :  { %v8160_v42 = vld [vmem:[%s17473_s1 + $0x700] sm:$0xf]  ;;  %v7905_v46 = vor.u32 %v11015_v41, %v7904_v40  ;;  %2013 = vmatpush.bf16.msra.mxu1 %v7649_v45  ;;  %v10899_v45 = vld [vmem:[%s17473_s1 + $0x184] sm:$0xf] }
  0x20   :  { %v11079_v43 = vld [vmem:[%s17473_s1 + $0x71c] sm:$0xf0] }
  0x21   :  { %v7360_v47 = vld [vmem:[%s17473_s1 + $0xc0] sm:$0xf]  ;;  %v8161_v50 = vor.u32 %v11079_v43, %v8160_v42  ;;  %2027 = vmatpush.bf16.msra.mxu2 %v7905_v46  ;;  %v7493_v42 = vor.u32 %v10907_v30, %v7490_v32  ;;  %v7749_v43 = vor.u32 %v10971_v33, %v7746_v34  ;;  %v7458_v46 = vld [vmem:[%s17473_s1 + $0x1a0] sm:$0xf0] }
  0x22   :  { %v10879_v48 = vld [vmem:[%s17473_s1 + $0xdc] sm:$0xf0]  ;;  %v7362_v30 = vld [vmem:[%s17473_s1 + $0xe0] sm:$0xf0] }
  0x23   :  { %v7616_v49 = vld [vmem:[%s17473_s1 + $0x2c0] sm:$0xf]  ;;  %v7361_v56 = vor.u32 %v10879_v48, %v7360_v47  ;;  %2041 = vmatpush.bf16.msra.mxu3 %v8161_v50  ;;  %v8005_v47 = vor.u32 %v11035_v37, %v8002_v38  ;;  %v10963_v48 = vld [vmem:[%s17473_s1 + $0x384] sm:$0xf] }
  0x24   :  { %v10943_v51 = vld [vmem:[%s17473_s1 + $0x2dc] sm:$0xf0]  ;;  %v11027_v50 = vld [vmem:[%s17473_s1 + $0x584] sm:$0xf] }
  0x25   :  { %v7872_v52 = vld [vmem:[%s17473_s1 + $0x4c0] sm:$0xf]  ;;  %v7617_v57 = vor.u32 %v10943_v51, %v7616_v49  ;;  %2000 = vmatpush.bf16.msra.mxu0 %v7361_v56  ;;  %v7714_v49 = vld [vmem:[%s17473_s1 + $0x3a0] sm:$0xf0]  ;;  %v7461_v56 = vor.u32 %v10899_v45, %v7458_v46 }
  0x26   :  { %v11007_v53 = vld [vmem:[%s17473_s1 + $0x4dc] sm:$0xf0]  ;;  %v7970_v51 = vld [vmem:[%s17473_s1 + $0x5a0] sm:$0xf0] }
  0x27   :  { %v8128_v54 = vld [vmem:[%s17473_s1 + $0x6c0] sm:$0xf]  ;;  %v7873_v58 = vor.u32 %v11007_v53, %v7872_v52  ;;  %2014 = vmatpush.bf16.msra.mxu1 %v7617_v57  ;;  %v10848_v53 = vld [vmem:[%s17474_s0 + $0x10] sm:$0xf0]  ;;  %v7717_v57 = vor.u32 %v10963_v48, %v7714_v49  ;;  %v7618_v32 = vld [vmem:[%s17473_s1 + $0x2e0] sm:$0xf0] }
  0x28   :  { %v11071_v55 = vld [vmem:[%s17473_s1 + $0x6dc] sm:$0xf0]  ;;  %v11003_v34 = vld [vmem:[%s17473_s1 + $0x4c4] sm:$0xf] }
  0x29   :  { %v7328_v59 = vld [vmem:[%s17473_s1 + $0x80] sm:$0xf]  ;;  %v8129_v62 = vor.u32 %v11071_v55, %v8128_v54  ;;  %2028 = vmatpush.bf16.msra.mxu2 %v7873_v58  ;;  %v7586_v45 = vld [vmem:[%s17473_s1 + $0x2a0] sm:$0xf0] }
  0x2a   :  { %v10871_v60 = vld [vmem:[%s17473_s1 + $0x9c] sm:$0xf0]  ;;  %v10995_v46 = vld [vmem:[%s17473_s1 + $0x484] sm:$0xf] }
  0x2b   :  { %v7584_v61 = vld [vmem:[%s17473_s1 + $0x280] sm:$0xf]  ;;  %v7329_v4 = vor.u32 %v10871_v60, %v7328_v59  ;;  %2042 = vmatpush.bf16.msra.mxu3 %v8129_v62  ;;  %v10891_v60 = vld [vmem:[%s17473_s1 + $0x144] sm:$0xf] }
  0x2c   :  { %v10935_v63 = vld [vmem:[%s17473_s1 + $0x29c] sm:$0xf0]  ;;  %v7426_v62 = vld [vmem:[%s17473_s1 + $0x160] sm:$0xf0] }
  0x2d   :  { %v7840_v0 = vld [vmem:[%s17473_s1 + $0x480] sm:$0xf]  ;;  %v7585_v5 = vor.u32 %v10935_v63, %v7584_v61  ;;  %2001 = vmatpush.bf16.msra.mxu0 %v7329_v4  ;;  %v7973_v61 = vor.u32 %v11027_v50, %v7970_v51  ;;  %v10955_v63 = vld [vmem:[%s17473_s1 + $0x344] sm:$0xf] }
  0x2e   :  { %v10999_v1 = vld [vmem:[%s17473_s1 + $0x49c] sm:$0xf0] }
  0x2f   :  { %v8096_v2 = vld [vmem:[%s17473_s1 + $0x680] sm:$0xf]  ;;  %v7841_v6 = vor.u32 %v10999_v1, %v7840_v0  ;;  %2015 = vmatpush.bf16.msra.mxu1 %v7585_v5  ;;  %v7682_v0 = vld [vmem:[%s17473_s1 + $0x360] sm:$0xf0] }
  0x30   :  { %v11063_v3 = vld [vmem:[%s17473_s1 + $0x69c] sm:$0xf0]  ;;  %v11019_v1 = vld [vmem:[%s17473_s1 + $0x544] sm:$0xf] }
  0x31   :  { %v7296_v7 = vld [vmem:[%s17473_s1 + $0x40] sm:$0xf]  ;;  %v8097_v10 = vor.u32 %v11063_v3, %v8096_v2  ;;  %2029 = vmatpush.bf16.msra.mxu2 %v7841_v6  ;;  %v7938_v2 = vld [vmem:[%s17473_s1 + $0x560] sm:$0xf0] }
  0x32   :  { %v10863_v8 = vld [vmem:[%s17473_s1 + $0x5c] sm:$0xf0]  ;;  %v10883_v6 = vld [vmem:[%s17473_s1 + $0x104] sm:$0xf] }
  0x33   :  { %v7552_v9 = vld [vmem:[%s17473_s1 + $0x240] sm:$0xf]  ;;  %v7297_v16 = vor.u32 %v10863_v8, %v7296_v7  ;;  %2043 = vmatpush.bf16.msra.mxu3 %v8097_v10  ;;  %v7394_v7 = vld [vmem:[%s17473_s1 + $0x120] sm:$0xf0]  ;;  %v7429_v8 = vor.u32 %v10891_v60, %v7426_v62  ;;  %v7252_v10 = vld [vmem:[%s17474_s0 + $0x8] sm:$0xf] }
  0x34   :  { %v10927_v11 = vld [vmem:[%s17473_s1 + $0x25c] sm:$0xf0]  ;;  %v7810_v60 = vld [vmem:[%s17473_s1 + $0x460] sm:$0xf0] }
  0x35   :  { %v7808_v12 = vld [vmem:[%s17473_s1 + $0x440] sm:$0xf]  ;;  %v7553_v19 = vor.u32 %v10927_v11, %v7552_v9  ;;  %2002 = vmatpush.bf16.msra.mxu0 %v7297_v16  ;;  %v7685_v9 = vor.u32 %v10955_v63, %v7682_v0  ;;  %v10849_v11 = vld [vmem:[%s17474_s0 + $0x18] sm:$0xf0]  ;;  %v10851_v0 = vld [vmem:[%s17473_s1 + $0x4] sm:$0xf] }
  0x36   :  { %v10991_v13 = vld [vmem:[%s17473_s1 + $0x45c] sm:$0xf0]  ;;  %v12100_v16 = vor.u32 %v10849_v11, %v7252_v10  ;;  %v8258_v10 = vld [vmem:[%s17473_s1 + $0x7e0] sm:$0xf0] }
  0x37   :  { %v8064_v14 = vld [vmem:[%s17473_s1 + $0x640] sm:$0xf]  ;;  %v7809_v20 = vor.u32 %v10991_v13, %v7808_v12  ;;  %2016 = vmatpush.bf16.msra.mxu1 %v7553_v19  ;;  %v10847_v12 = vld [vmem:[%s17474_s0 + $0xc] sm:$0xf]  ;;  %v7941_v13 = vor.u32 %v11019_v1, %v7938_v2  ;;  %v7906_v19 = vld [vmem:[%s17473_s1 + $0x520] sm:$0xf0] }
  0x38   :  { %v11055_v15 = vld [vmem:[%s17473_s1 + $0x65c] sm:$0xf0]  ;;  %v11163_v11 = vld [vmem:[%s17473_s1 + $0x9c4] sm:$0xf] }
  0x39   :  { %v7264_v17 = vld [vmem:[%s17473_s1] sm:$0xf]  ;;  %v8065_v24 = vor.u32 %v11055_v15, %v8064_v14  ;;  %2030 = vmatpush.bf16.msra.mxu2 %v7809_v20  ;;  %v10947_v14 = vld [vmem:[%s17473_s1 + $0x304] sm:$0xf] }
  0x3a   :  { %v10855_v18 = vld [vmem:[%s17473_s1 + $0x1c] sm:$0xf0]  ;;  %v7650_v15 = vld [vmem:[%s17473_s1 + $0x320] sm:$0xf0] }
  0x3b   :  { %v7520_v21 = vld [vmem:[%s17473_s1 + $0x200] sm:$0xf]  ;;  %v7265_v31 = vor.u32 %v10855_v18, %v7264_v17  ;;  %2044 = vmatpush.bf16.msra.mxu3 %v8065_v24  ;;  %v11011_v18 = vld [vmem:[%s17473_s1 + $0x504] sm:$0xf]  ;;  %v7397_v24 = vor.u32 %v10883_v6, %v7394_v7 }
  0x3c   :  { %v10919_v22 = vld [vmem:[%s17473_s1 + $0x21c] sm:$0xf0]  ;;  %v10979_v7 = vld [vmem:[%s17473_s1 + $0x404] sm:$0xf] }
  0x3d   :  { %v7776_v23 = vld [vmem:[%s17473_s1 + $0x400] sm:$0xf]  ;;  %v7521_v35 = vor.u32 %v10919_v22, %v7520_v21  ;;  %2003 = vmatpush.bf16.msra.mxu0 %v7265_v31  ;;  %v10939_v31 = vld [vmem:[%s17473_s1 + $0x2c4] sm:$0xf] }
  0x3e   :  { %v10983_v25 = vld [vmem:[%s17473_s1 + $0x41c] sm:$0xf0]  ;;  %v7621_v38 = vor.u32 %v10939_v31, %v7618_v32 }
  0x3f   :  { %v8032_v26 = vld [vmem:[%s17473_s1 + $0x600] sm:$0xf]  ;;  %v7777_v36 = vor.u32 %v10983_v25, %v7776_v23  ;;  %2017 = vmatpush.bf16.msra.mxu1 %v7521_v35  ;;  %v7653_v25 = vor.u32 %v10947_v14, %v7650_v15  ;;  %v7874_v35 = vld [vmem:[%s17473_s1 + $0x4e0] sm:$0xf0]  ;;  %v7496_v14 = vld [vmem:[%s17473_s1 + $0x1c8] sm:$0xf] }
  0x40   :  { %v11047_v27 = vld [vmem:[%s17473_s1 + $0x61c] sm:$0xf0]  ;;  %v10912_v15 = vld [vmem:[%s17473_s1 + $0x1e4] sm:$0xf0] }
  0x41   :  { %v8512_v28 = vld [vmem:[%s17473_s1 + $0x9c0] sm:$0xf]  ;;  %v8033_v39 = vor.u32 %v11047_v27, %v8032_v26  ;;  %2031 = vmatpush.bf16.msra.mxu2 %v7777_v36  ;;  %v10875_v26 = vld [vmem:[%s17473_s1 + $0xc4] sm:$0xf] }
  0x42   :  { %v11167_v29 = vld [vmem:[%s17473_s1 + $0x9dc] sm:$0xf0]  ;;  %v10846_v27 = vld [vmem:[%s17474_s0 + $0x4] sm:$0xf]  ;;  %v7365_v37 = vor.u32 %v10875_v26, %v7362_v30 }
  0x43   :  { %v8513_v40 = vor.u32 %v11167_v29, %v8512_v28  ;;  %v8480_v41 = vld [vmem:[%s17473_s1 + $0x980] sm:$0xf]  ;;  %2045 = vmatpush.bf16.msra.mxu3 %v8033_v39  ;;  %2066 = vmatpush.bf16.msrb.mxu1 %v7493_v42  ;;  %v7246_v28 = vld [vmem:[%s17474_s0 + $0x14] sm:$0xf0]  ;;  %v7909_v29 = vor.u32 %v11011_v18, %v7906_v19  ;;  %v7877_v42 = vor.u32 %v11003_v34, %v7874_v35  ;;  %v11155_v30 = vld [vmem:[%s17473_s1 + $0x984] sm:$0xf] }
  0x44   :  { %v11159_v44 = vld [vmem:[%s17473_s1 + $0x99c] sm:$0xf0]  ;;  %2032 = vmatmul.bf16.vlgmr.msra.gmra.mxu2 %v12100_v16  ;;  %v12138_v33 = vor.u32 %v10846_v27, %v7246_v28  ;;  %v7497_v27 = vor.u32 %v10912_v15, %v7496_v14  ;;  %v11091_v28 = vld [vmem:[%s17473_s1 + $0x784] sm:$0xf]  ;;  %v7464_v35 = vld [vmem:[%s17473_s1 + $0x188] sm:$0xf] }
  0x45   :  { %v7244_v52 = vld [vmem:[%s17474_s0] sm:$0xf]  ;;  %2052 = vmatpush.bf16.msrb.mxu0 %v8513_v40  ;;  %v8481_v54 = vor.u32 %v11159_v44, %v8480_v41  ;;  %2080 = vmatpush.bf16.msrb.mxu2 %v7749_v43  ;;  %v10867_v41 = vld [vmem:[%s17473_s1 + $0x84] sm:$0xf] }
  0x46   :  { %v12046_v55 = vor.u32 %v10848_v53, %v7244_v52  ;;  %v8448_v58 = vld [vmem:[%s17473_s1 + $0x940] sm:$0xf]  ;;  %2018 = vmatmul.bf16.vlgmr.msra.gmra.mxu1 %v12138_v33  ;;  %v7330_v43 = vld [vmem:[%s17473_s1 + $0xa0] sm:$0xf0] }
  0x47   :  { %v11151_v59 = vld [vmem:[%s17473_s1 + $0x95c] sm:$0xf0]  ;;  %2094 = vmatpush.bf16.msrb.mxu3 %v8005_v47  ;;  %2067 = vmatpush.bf16.msrb.mxu1 %v7461_v56  ;;  %v10931_v44 = vld [vmem:[%s17473_s1 + $0x284] sm:$0xf]  ;;  %v7333_v49 = vor.u32 %v10867_v41, %v7330_v43 }
  0x48   :  { %2004 = vmatmul.bf16.vlgmr.msra.gmra.mxu0 %v12046_v55  ;;  %v8416_v3 = vld [vmem:[%s17473_s1 + $0x900] sm:$0xf]  ;;  %v8449_v4 = vor.u32 %v11151_v59, %v8448_v58  ;;  %v7842_v47 = vld [vmem:[%s17473_s1 + $0x4a0] sm:$0xf0]  ;;  %v7589_v50 = vor.u32 %v10931_v44, %v7586_v45 }
  0x49   :  { %2053 = vmatpush.bf16.msrb.mxu0 %v8481_v54  ;;  %v11143_v5 = vld [vmem:[%s17473_s1 + $0x91c] sm:$0xf0]  ;;  %2081 = vmatpush.bf16.msrb.mxu2 %v7717_v57  ;;  %v10859_v53 = vld [vmem:[%s17473_s1 + $0x44] sm:$0xf]  ;;  %v7845_v54 = vor.u32 %v10995_v46, %v7842_v47  ;;  %v7432_v47 = vld [vmem:[%s17473_s1 + $0x148] sm:$0xf] }
  0x4a   :  { %v7254_v17 = vld [vmem:[%s17474_s0 + $0x1c] sm:$0xf0]  ;;  %v8417_v21 = vor.u32 %v11143_v5, %v8416_v3  ;;  %v7298_v56 = vld [vmem:[%s17473_s1 + $0x60] sm:$0xf0] }
  0x4b   :  { %2095 = vmatpush.bf16.msrb.mxu3 %v7973_v61  ;;  %v12111_v20 = vor.u32 %v10847_v12, %v7254_v17  ;;  %v8384_v22 = vld [vmem:[%s17473_s1 + $0x8c0] sm:$0xf]  ;;  %2068 = vmatpush.bf16.msrb.mxu1 %v7429_v8  ;;  %v10923_v57 = vld [vmem:[%s17473_s1 + $0x244] sm:$0xf]  ;;  %v7301_v1 = vor.u32 %v10859_v53, %v7298_v56  ;;  %v7752_v17 = vld [vmem:[%s17473_s1 + $0x3c8] sm:$0xf] }
  0x4c   :  { %v11135_v23 = vld [vmem:[%s17473_s1 + $0x8dc] sm:$0xf0]  ;;  %v7554_v58 = vld [vmem:[%s17473_s1 + $0x260] sm:$0xf0] }
  0x4d   :  { %2054 = vmatpush.bf16.msrb.mxu0 %v8449_v4  ;;  %2082 = vmatpush.bf16.msrb.mxu2 %v7685_v9  ;;  %v8385_v36 = vor.u32 %v11135_v23, %v8384_v22  ;;  %v8352_v39 = vld [vmem:[%s17473_s1 + $0x880] sm:$0xf]  ;;  %v10987_v59 = vld [vmem:[%s17473_s1 + $0x444] sm:$0xf]  ;;  %v7557_v2 = vor.u32 %v10923_v57, %v7554_v58  ;;  %v7260_v22 = vld [vmem:[%s17474_s0 + $0x10] sm:$0xf] }
  0x4e   :  { %2046 = vmatmul.bf16.vlgmr.msra.gmra.mxu3 %v12111_v20  ;;  %v11127_v40 = vld [vmem:[%s17473_s1 + $0x89c] sm:$0xf0]  ;;  %v7266_v3 = vld [vmem:[%s17473_s1 + $0x20] sm:$0xf0]  ;;  %v7813_v6 = vor.u32 %v10987_v59, %v7810_v60  ;;  %v7400_v60 = vld [vmem:[%s17473_s1 + $0x108] sm:$0xf] }
  0x4f   :  { %2096 = vmatpush.bf16.msrb.mxu3 %v7941_v13  ;;  %2069 = vmatpush.bf16.msrb.mxu1 %v7397_v24  ;;  %v8353_v48 = vor.u32 %v11127_v40, %v8352_v39  ;;  %v8320_v51 = vld [vmem:[%s17473_s1 + $0x840] sm:$0xf]  ;;  %v10915_v4 = vld [vmem:[%s17473_s1 + $0x204] sm:$0xf]  ;;  %v7269_v18 = vor.u32 %v10851_v0, %v7266_v3 }
  0x50   :  { %v11119_v52 = vld [vmem:[%s17473_s1 + $0x85c] sm:$0xf0]  ;;  %v7522_v5 = vld [vmem:[%s17473_s1 + $0x220] sm:$0xf0] }
  0x51   :  { %2055 = vmatpush.bf16.msrb.mxu0 %v8417_v21  ;;  %2083 = vmatpush.bf16.msrb.mxu2 %v7653_v25  ;;  %v8321_v61 = vor.u32 %v11119_v52, %v8320_v51  ;;  %v8288_v62 = vld [vmem:[%s17473_s1 + $0x800] sm:$0xf]  ;;  %v7778_v8 = vld [vmem:[%s17473_s1 + $0x420] sm:$0xf0]  ;;  %v7525_v19 = vor.u32 %v10915_v4, %v7522_v5  ;;  %v10976_v21 = vld [vmem:[%s17473_s1 + $0x3e4] sm:$0xf0] }
  0x52   :  { %v11111_v63 = vld [vmem:[%s17473_s1 + $0x81c] sm:$0xf0]  ;;  %v11099_v9 = vld [vmem:[%s17473_s1 + $0x7c4] sm:$0xf]  ;;  %v7781_v24 = vor.u32 %v10979_v7, %v7778_v8  ;;  %v7753_v31 = vor.u32 %v10976_v21, %v7752_v17  ;;  %v7368_v8 = vld [vmem:[%s17473_s1 + $0xc8] sm:$0xf] }
  0x53   :  { %2097 = vmatpush.bf16.msrb.mxu3 %v7909_v29  ;;  %2070 = vmatpush.bf16.msrb.mxu1 %v7365_v37  ;;  %v8514_v12 = vld [vmem:[%s17473_s1 + $0x9e0] sm:$0xf0]  ;;  %v8289_v13 = vor.u32 %v11111_v63, %v8288_v62  ;;  %v8261_v25 = vor.u32 %v11099_v9, %v8258_v10  ;;  %v7720_v37 = vld [vmem:[%s17473_s1 + $0x388] sm:$0xf] }
  0x54   :  { %v10850_v23 = vld [vmem:[%s17474_s0 + $0x20] sm:$0xf0]  ;;  %v8517_v26 = vor.u32 %v11163_v11, %v8514_v12  ;;  %v7656_v62 = vld [vmem:[%s17473_s1 + $0x308] sm:$0xf] }
  0x55   :  { %2056 = vmatpush.bf16.msrb.mxu0 %v8385_v36  ;;  %2084 = vmatpush.bf16.msrb.mxu2 %v7621_v38  ;;  %v8226_v29 = vld [vmem:[%s17473_s1 + $0x7a0] sm:$0xf0]  ;;  %v12259_v32 = vor.u32 %v10850_v23, %v7260_v22  ;;  %v10904_v36 = vld [vmem:[%s17473_s1 + $0x1a4] sm:$0xf0] }
  0x56   :  { %v8482_v34 = vld [vmem:[%s17473_s1 + $0x9a0] sm:$0xf0]  ;;  %v10968_v38 = vld [vmem:[%s17473_s1 + $0x3a4] sm:$0xf0]  ;;  %v8229_v39 = vor.u32 %v11091_v28, %v8226_v29  ;;  %v7465_v41 = vor.u32 %v10904_v36, %v7464_v35 }
  0x57   :  { %2098 = vmatpush.bf16.msrb.mxu3 %v7877_v42  ;;  %2071 = vmatpush.bf16.msrb.mxu1 %v7333_v49  ;;  %v8485_v40 = vor.u32 %v11155_v30, %v8482_v34  ;;  %v11083_v42 = vld [vmem:[%s17473_s1 + $0x744] sm:$0xf]  ;;  %v7721_v45 = vor.u32 %v10968_v38, %v7720_v37  ;;  %v7688_v49 = vld [vmem:[%s17473_s1 + $0x348] sm:$0xf] }
  0x58   :  { %v8194_v43 = vld [vmem:[%s17473_s1 + $0x760] sm:$0xf0]  ;;  %v10952_v63 = vld [vmem:[%s17473_s1 + $0x324] sm:$0xf0] }
  0x59   :  { %2057 = vmatpush.bf16.msrb.mxu0 %v8353_v48  ;;  %2085 = vmatpush.bf16.msrb.mxu2 %v7589_v50  ;;  %v11147_v44 = vld [vmem:[%s17473_s1 + $0x944] sm:$0xf]  ;;  %v10896_v48 = vld [vmem:[%s17473_s1 + $0x164] sm:$0xf0]  ;;  %v8197_v51 = vor.u32 %v11083_v42, %v8194_v43 }
  0x5a   :  { %v8450_v46 = vld [vmem:[%s17473_s1 + $0x960] sm:$0xf0]  ;;  %v10960_v50 = vld [vmem:[%s17473_s1 + $0x364] sm:$0xf0]  ;;  %v7433_v53 = vor.u32 %v10896_v48, %v7432_v47 }
  0x5b   :  { %2099 = vmatpush.bf16.msrb.mxu3 %v7845_v54  ;;  %2072 = vmatpush.bf16.msrb.mxu1 %v7301_v1  ;;  %v8453_v52 = vor.u32 %v11147_v44, %v8450_v46  ;;  %v11075_v54 = vld [vmem:[%s17473_s1 + $0x704] sm:$0xf]  ;;  %v7689_v58 = vor.u32 %v10960_v50, %v7688_v49  ;;  %v10880_v9 = vld [vmem:[%s17473_s1 + $0xe4] sm:$0xf0] }
  0x5c   :  { %v8162_v56 = vld [vmem:[%s17473_s1 + $0x720] sm:$0xf0]  ;;  %v7624_v10 = vld [vmem:[%s17473_s1 + $0x2c8] sm:$0xf]  ;;  %v7369_v14 = vor.u32 %v10880_v9, %v7368_v8 }
  0x5d   :  { %2058 = vmatpush.bf16.msrb.mxu0 %v8321_v61  ;;  %2086 = vmatpush.bf16.msrb.mxu2 %v7557_v2  ;;  %v11139_v57 = vld [vmem:[%s17473_s1 + $0x904] sm:$0xf]  ;;  %v10888_v61 = vld [vmem:[%s17473_s1 + $0x124] sm:$0xf0]  ;;  %v8165_v0 = vor.u32 %v11075_v54, %v8162_v56 }
  0x5e   :  { %v8418_v59 = vld [vmem:[%s17473_s1 + $0x920] sm:$0xf0]  ;;  %v7401_v2 = vor.u32 %v10888_v61, %v7400_v60  ;;  %v10944_v11 = vld [vmem:[%s17473_s1 + $0x2e4] sm:$0xf0] }
  0x5f   :  { %2100 = vmatpush.bf16.msrb.mxu3 %v7813_v6  ;;  %2073 = vmatpush.bf16.msrb.mxu1 %v7269_v18  ;;  %v8421_v1 = vor.u32 %v11139_v57, %v8418_v59  ;;  %v11067_v3 = vld [vmem:[%s17473_s1 + $0x6c4] sm:$0xf]  ;;  %v7657_v6 = vor.u32 %v10952_v63, %v7656_v62  ;;  %v7336_v22 = vld [vmem:[%s17473_s1 + $0x88] sm:$0xf]  ;;  %v10908_v62 = vld [vmem:[%s17473_s1 + $0x1cc] sm:$0xf] }
  0x60   :  { %v8130_v4 = vld [vmem:[%s17473_s1 + $0x6e0] sm:$0xf0]  ;;  %v10872_v23 = vld [vmem:[%s17473_s1 + $0xa4] sm:$0xf0]  ;;  %v7498_v63 = vld [vmem:[%s17473_s1 + $0x1e8] sm:$0xf0] }
  0x61   :  { %2059 = vmatpush.bf16.msrb.mxu0 %v8289_v13  ;;  %2087 = vmatpush.bf16.msrb.mxu2 %v7525_v19  ;;  %v11131_v5 = vld [vmem:[%s17473_s1 + $0x8c4] sm:$0xf]  ;;  %v8133_v12 = vor.u32 %v11067_v3, %v8130_v4  ;;  %v7625_v19 = vor.u32 %v10944_v11, %v7624_v10  ;;  %v7337_v28 = vor.u32 %v10872_v23, %v7336_v22  ;;  %v7304_v36 = vld [vmem:[%s17473_s1 + $0x48] sm:$0xf]  ;;  %v10900_v11 = vld [vmem:[%s17473_s1 + $0x18c] sm:$0xf] }
  0x62   :  { %2074 = vmatmul.bf16.vlgmr.msrb.gmra.mxu1 %v12046_v55  ;;  %v8386_v7 = vld [vmem:[%s17473_s1 + $0x8e0] sm:$0xf0]  ;;  %v10864_v37 = vld [vmem:[%s17473_s1 + $0x64] sm:$0xf0] }
  0x63   :  { %2101 = vmatpush.bf16.msrb.mxu3 %v7781_v24  ;;  %2122 = vmatpush.bf16.msra.mxu1 %v8517_v26  ;;  %v8389_v13 = vor.u32 %v11131_v5, %v8386_v7  ;;  %v11059_v15 = vld [vmem:[%s17473_s1 + $0x684] sm:$0xf]  ;;  %v7592_v24 = vld [vmem:[%s17473_s1 + $0x288] sm:$0xf]  ;;  %v7305_v44 = vor.u32 %v10864_v37, %v7304_v36  ;;  %v7501_v7 = vor.u32 %v10908_v62, %v7498_v63 }
  0x64   :  { %2060 = vmatmul.bf16.vlgmr.msrb.gmra.mxu0 %v12259_v32  ;;  %2088 = vmatmul.bf16.vlgmr.msrb.gmra.mxu2 %v12138_v33  ;;  %v8098_v17 = vld [vmem:[%s17473_s1 + $0x6a0] sm:$0xf0]  ;;  %v7560_v38 = vld [vmem:[%s17473_s1 + $0x248] sm:$0xf] }
  0x65   :  { %2108 = vmatpush.bf16.msra.mxu0 %v8261_v25  ;;  %2136 = vmatpush.bf16.msra.mxu2 %v7497_v27  ;;  %v11123_v18 = vld [vmem:[%s17473_s1 + $0x884] sm:$0xf]  ;;  %v10936_v25 = vld [vmem:[%s17473_s1 + $0x2a4] sm:$0xf0]  ;;  %v8101_v26 = vor.u32 %v11059_v15, %v8098_v17 }
  0x66   :  { %2102 = vmatmul.bf16.vlgmr.msrb.gmra.mxu3 %v12100_v16  ;;  %v8354_v21 = vld [vmem:[%s17473_s1 + $0x8a0] sm:$0xf0]  ;;  %v7593_v34 = vor.u32 %v10936_v25, %v7592_v24  ;;  %v7272_v47 = vld [vmem:[%s17473_s1 + $0x8] sm:$0xf]  ;;  %v10892_v25 = vld [vmem:[%s17473_s1 + $0x14c] sm:$0xf] }
  0x67   :  { %2150 = vmatpush.bf16.msra.mxu3 %v7753_v31  ;;  %2123 = vmatpush.bf16.msra.mxu1 %v8485_v40  ;;  %v8357_v27 = vor.u32 %v11123_v18, %v8354_v21  ;;  %v11051_v29 = vld [vmem:[%s17473_s1 + $0x644] sm:$0xf]  ;;  %v10856_v49 = vld [vmem:[%s17473_s1 + $0x24] sm:$0xf0] }
  0x68   :  { %v8066_v30 = vld [vmem:[%s17473_s1 + $0x660] sm:$0xf0]  ;;  %v7528_v50 = vld [vmem:[%s17473_s1 + $0x208] sm:$0xf]  ;;  %v7273_v61 = vor.u32 %v10856_v49, %v7272_v47 }
  0x69   :  { %2109 = vmatpush.bf16.msra.mxu0 %v8229_v39  ;;  %2137 = vmatpush.bf16.msra.mxu2 %v7465_v41  ;;  %v11115_v31 = vld [vmem:[%s17473_s1 + $0x844] sm:$0xf]  ;;  %v10928_v39 = vld [vmem:[%s17473_s1 + $0x264] sm:$0xf0]  ;;  %v8069_v40 = vor.u32 %v11051_v29, %v8066_v30 }
  0x6a   :  { %v8322_v35 = vld [vmem:[%s17473_s1 + $0x860] sm:$0xf0]  ;;  %v7561_v48 = vor.u32 %v10928_v39, %v7560_v38  ;;  %v8264_v54 = vld [vmem:[%s17473_s1 + $0x7c8] sm:$0xf]  ;;  %v10884_v39 = vld [vmem:[%s17473_s1 + $0x10c] sm:$0xf] }
  0x6b   :  { %2151 = vmatpush.bf16.msra.mxu3 %v7721_v45  ;;  %2124 = vmatpush.bf16.msra.mxu1 %v8453_v52  ;;  %v11043_v41 = vld [vmem:[%s17473_s1 + $0x604] sm:$0xf]  ;;  %v8325_v43 = vor.u32 %v11115_v31, %v8322_v35  ;;  %v8008_v52 = vld [vmem:[%s17473_s1 + $0x5c8] sm:$0xf] }
  0x6c   :  { %v8034_v42 = vld [vmem:[%s17473_s1 + $0x620] sm:$0xf0]  ;;  %v11104_v57 = vld [vmem:[%s17473_s1 + $0x7e4] sm:$0xf0] }
  0x6d   :  { %2110 = vmatpush.bf16.msra.mxu0 %v8197_v51  ;;  %2138 = vmatpush.bf16.msra.mxu2 %v7433_v53  ;;  %v11107_v45 = vld [vmem:[%s17473_s1 + $0x804] sm:$0xf]  ;;  %v10920_v51 = vld [vmem:[%s17473_s1 + $0x224] sm:$0xf0]  ;;  %v8037_v56 = vor.u32 %v11043_v41, %v8034_v42 }
  0x6e   :  { %v8290_v46 = vld [vmem:[%s17473_s1 + $0x820] sm:$0xf0]  ;;  %v11040_v53 = vld [vmem:[%s17473_s1 + $0x5e4] sm:$0xf0] }
  0x6f   :  { %2152 = vmatpush.bf16.msra.mxu3 %v7689_v58  ;;  %2125 = vmatpush.bf16.msra.mxu1 %v8421_v1  ;;  %v8520_v58 = vld [vmem:[%s17473_s1 + $0x9c8] sm:$0xf]  ;;  %v8293_v60 = vor.u32 %v11107_v45, %v8290_v46  ;;  %v8009_v1 = vor.u32 %v11040_v53, %v8008_v52  ;;  %v7370_v52 = vld [vmem:[%s17473_s1 + $0xe8] sm:$0xf0] }
  0x70   :  { %v11168_v59 = vld [vmem:[%s17473_s1 + $0x9e4] sm:$0xf0] }
  0x71   :  { %2111 = vmatpush.bf16.msra.mxu0 %v8165_v0  ;;  %2139 = vmatpush.bf16.msra.mxu2 %v7401_v2  ;;  %v7529_v0 = vor.u32 %v10920_v51, %v7528_v50  ;;  %v8265_v2 = vor.u32 %v11104_v57, %v8264_v54  ;;  %v8521_v3 = vor.u32 %v11168_v59, %v8520_v58  ;;  %v7976_v4 = vld [vmem:[%s17473_s1 + $0x588] sm:$0xf]  ;;  %v10876_v51 = vld [vmem:[%s17473_s1 + $0xcc] sm:$0xf] }
  0x72   :  { %v11032_v5 = vld [vmem:[%s17473_s1 + $0x5a4] sm:$0xf0] }
  0x73   :  { %2153 = vmatpush.bf16.msra.mxu3 %v7657_v6  ;;  %2126 = vmatpush.bf16.msra.mxu1 %v8389_v13  ;;  %v8232_v6 = vld [vmem:[%s17473_s1 + $0x788] sm:$0xf]  ;;  %v7977_v13 = vor.u32 %v11032_v5, %v7976_v4 }
  0x74   :  { %v11096_v8 = vld [vmem:[%s17473_s1 + $0x7a4] sm:$0xf0] }
  0x75   :  { %2112 = vmatpush.bf16.msra.mxu0 %v8133_v12  ;;  %2140 = vmatpush.bf16.msra.mxu2 %v7369_v14  ;;  %v8488_v9 = vld [vmem:[%s17473_s1 + $0x988] sm:$0xf]  ;;  %v7466_v12 = vld [vmem:[%s17473_s1 + $0x1a8] sm:$0xf0]  ;;  %v8233_v14 = vor.u32 %v11096_v8, %v8232_v6 }
  0x76   :  { %v11160_v10 = vld [vmem:[%s17473_s1 + $0x9a4] sm:$0xf0]  ;;  %v7469_v21 = vor.u32 %v10900_v11, %v7466_v12  ;;  %v10860_v12 = vld [vmem:[%s17473_s1 + $0x4c] sm:$0xf] }
  0x77   :  { %2154 = vmatpush.bf16.msra.mxu3 %v7625_v19  ;;  %2127 = vmatpush.bf16.msra.mxu1 %v8357_v27  ;;  %v8489_v15 = vor.u32 %v11160_v10, %v8488_v9  ;;  %v7944_v17 = vld [vmem:[%s17473_s1 + $0x548] sm:$0xf] }
  0x78   :  { %v11024_v18 = vld [vmem:[%s17473_s1 + $0x564] sm:$0xf0] }
  0x79   :  { %2113 = vmatpush.bf16.msra.mxu0 %v8101_v26  ;;  %2141 = vmatpush.bf16.msra.mxu2 %v7337_v28  ;;  %v8200_v19 = vld [vmem:[%s17473_s1 + $0x748] sm:$0xf]  ;;  %v7434_v26 = vld [vmem:[%s17473_s1 + $0x168] sm:$0xf0]  ;;  %v7945_v27 = vor.u32 %v11024_v18, %v7944_v17 }
  0x7a   :  { %v11088_v22 = vld [vmem:[%s17473_s1 + $0x764] sm:$0xf0]  ;;  %v7437_v35 = vor.u32 %v10892_v25, %v7434_v26  ;;  %v10852_v26 = vld [vmem:[%s17473_s1 + $0xc] sm:$0xf] }
  0x7b   :  { %2155 = vmatpush.bf16.msra.mxu3 %v7593_v34  ;;  %2128 = vmatpush.bf16.msra.mxu1 %v8325_v43  ;;  %v8456_v23 = vld [vmem:[%s17473_s1 + $0x948] sm:$0xf]  ;;  %v8201_v28 = vor.u32 %v11088_v22, %v8200_v19 }
  0x7c   :  { %v11152_v24 = vld [vmem:[%s17473_s1 + $0x964] sm:$0xf0] }
  0x7d   :  { %2114 = vmatpush.bf16.msra.mxu0 %v8069_v40  ;;  %2142 = vmatpush.bf16.msra.mxu2 %v7305_v44  ;;  %v8457_v29 = vor.u32 %v11152_v24, %v8456_v23  ;;  %v7912_v30 = vld [vmem:[%s17473_s1 + $0x508] sm:$0xf]  ;;  %v7402_v40 = vld [vmem:[%s17473_s1 + $0x128] sm:$0xf0] }
  0x7e   :  { %v11016_v31 = vld [vmem:[%s17473_s1 + $0x524] sm:$0xf0]  ;;  %v7405_v47 = vor.u32 %v10884_v39, %v7402_v40  ;;  %v11164_v39 = vld [vmem:[%s17473_s1 + $0x9cc] sm:$0xf] }
  0x7f   :  { %2156 = vmatpush.bf16.msra.mxu3 %v7561_v48  ;;  %2129 = vmatpush.bf16.msra.mxu1 %v8293_v60  ;;  %v8168_v34 = vld [vmem:[%s17473_s1 + $0x708] sm:$0xf]  ;;  %v7913_v41 = vor.u32 %v11016_v31, %v7912_v30  ;;  %v7373_v60 = vor.u32 %v10876_v51, %v7370_v52  ;;  %v11036_v30 = vld [vmem:[%s17473_s1 + $0x5cc] sm:$0xf] }
  0x80   :  { %v11080_v36 = vld [vmem:[%s17473_s1 + $0x724] sm:$0xf0]  ;;  %v8522_v40 = vld [vmem:[%s17473_s1 + $0x9e8] sm:$0xf0] }
  0x81   :  { %2115 = vmatpush.bf16.msra.mxu0 %v8037_v56  ;;  %2143 = vmatpush.bf16.msra.mxu2 %v7273_v61  ;;  %v8424_v37 = vld [vmem:[%s17473_s1 + $0x908] sm:$0xf]  ;;  %v8169_v42 = vor.u32 %v11080_v36, %v8168_v34  ;;  %v8010_v34 = vld [vmem:[%s17473_s1 + $0x5e8] sm:$0xf0] }
  0x82   :  { %2130 = vmatmul.bf16.vlgmr.msra.gmra.mxu1 %v12259_v32  ;;  %v11144_v38 = vld [vmem:[%s17473_s1 + $0x924] sm:$0xf0]  ;;  %v8266_v36 = vld [vmem:[%s17473_s1 + $0x7e8] sm:$0xf0] }
  0x83   :  { %2157 = vmatpush.bf16.msra.mxu3 %v7529_v0  ;;  %2178 = vmatpush.bf16.msrb.mxu1 %v8265_v2  ;;  %v8425_v43 = vor.u32 %v11144_v38, %v8424_v37  ;;  %v7880_v44 = vld [vmem:[%s17473_s1 + $0x4c8] sm:$0xf]  ;;  %v10868_v0 = vld [vmem:[%s17473_s1 + $0x8c] sm:$0xf] }
  0x84   :  { %2116 = vmatmul.bf16.vlgmr.msra.gmra.mxu0 %v12111_v20  ;;  %2144 = vmatmul.bf16.vlgmr.msra.gmra.mxu2 %v12046_v55  ;;  %v11008_v45 = vld [vmem:[%s17473_s1 + $0x4e4] sm:$0xf0]  ;;  %v8234_v51 = vld [vmem:[%s17473_s1 + $0x7a8] sm:$0xf0] }
  0x85   :  { %2164 = vmatpush.bf16.msrb.mxu0 %v8009_v1  ;;  %2192 = vmatpush.bf16.msrb.mxu2 %v8521_v3  ;;  %v8136_v46 = vld [vmem:[%s17473_s1 + $0x6c8] sm:$0xf]  ;;  %v7881_v53 = vor.u32 %v11008_v45, %v7880_v44  ;;  %v7338_v1 = vld [vmem:[%s17473_s1 + $0xa8] sm:$0xf0] }
  0x86   :  { %2158 = vmatmul.bf16.vlgmr.msra.gmra.mxu3 %v12138_v33  ;;  %v11072_v48 = vld [vmem:[%s17473_s1 + $0x6e4] sm:$0xf0]  ;;  %v7341_v8 = vor.u32 %v10868_v0, %v7338_v1  ;;  %v10964_v45 = vld [vmem:[%s17473_s1 + $0x38c] sm:$0xf] }
  0x87   :  { %2206 = vmatpush.bf16.msrb.mxu3 %v7501_v7  ;;  %2179 = vmatpush.bf16.msrb.mxu1 %v8233_v14  ;;  %v8392_v49 = vld [vmem:[%s17473_s1 + $0x8c8] sm:$0xf]  ;;  %v8137_v54 = vor.u32 %v11072_v48, %v8136_v46  ;;  %v7722_v46 = vld [vmem:[%s17473_s1 + $0x3a8] sm:$0xf0]  ;;  %v8525_v48 = vor.u32 %v11164_v39, %v8522_v40 }
  0x88   :  { %v11136_v50 = vld [vmem:[%s17473_s1 + $0x8e4] sm:$0xf0]  ;;  %v11156_v52 = vld [vmem:[%s17473_s1 + $0x98c] sm:$0xf] }
  0x89   :  { %2165 = vmatpush.bf16.msrb.mxu0 %v7977_v13  ;;  %2193 = vmatpush.bf16.msrb.mxu2 %v8489_v15  ;;  %v8393_v56 = vor.u32 %v11136_v50, %v8392_v49  ;;  %v7848_v57 = vld [vmem:[%s17473_s1 + $0x488] sm:$0xf]  ;;  %v7306_v13 = vld [vmem:[%s17473_s1 + $0x68] sm:$0xf0] }
  0x8a   :  { %v11000_v58 = vld [vmem:[%s17473_s1 + $0x4a4] sm:$0xf0]  ;;  %v7309_v24 = vor.u32 %v10860_v12, %v7306_v13  ;;  %v7978_v49 = vld [vmem:[%s17473_s1 + $0x5a8] sm:$0xf0] }
  0x8b   :  { %2207 = vmatpush.bf16.msrb.mxu3 %v7469_v21  ;;  %2180 = vmatpush.bf16.msrb.mxu1 %v8201_v28  ;;  %v8104_v59 = vld [vmem:[%s17473_s1 + $0x688] sm:$0xf]  ;;  %v7849_v2 = vor.u32 %v11000_v58, %v7848_v57  ;;  %v10972_v28 = vld [vmem:[%s17473_s1 + $0x3cc] sm:$0xf] }
  0x8c   :  { %v11064_v61 = vld [vmem:[%s17473_s1 + $0x6a4] sm:$0xf0]  ;;  %v11092_v50 = vld [vmem:[%s17473_s1 + $0x78c] sm:$0xf] }
  0x8d   :  { %2166 = vmatpush.bf16.msrb.mxu0 %v7945_v27  ;;  %2194 = vmatpush.bf16.msrb.mxu2 %v8457_v29  ;;  %v8360_v62 = vld [vmem:[%s17473_s1 + $0x888] sm:$0xf]  ;;  %v8105_v3 = vor.u32 %v11064_v61, %v8104_v59  ;;  %v7274_v27 = vld [vmem:[%s17473_s1 + $0x28] sm:$0xf0]  ;;  %v8237_v57 = vor.u32 %v11092_v50, %v8234_v51 }
  0x8e   :  { %v11128_v63 = vld [vmem:[%s17473_s1 + $0x8a4] sm:$0xf0]  ;;  %v7754_v29 = vld [vmem:[%s17473_s1 + $0x3e8] sm:$0xf0] }
  0x8f   :  { %2208 = vmatpush.bf16.msrb.mxu3 %v7437_v35  ;;  %2181 = vmatpush.bf16.msrb.mxu1 %v8169_v42  ;;  %v8361_v4 = vor.u32 %v11128_v63, %v8360_v62  ;;  %v7816_v5 = vld [vmem:[%s17473_s1 + $0x448] sm:$0xf]  ;;  %v11100_v35 = vld [vmem:[%s17473_s1 + $0x7cc] sm:$0xf]  ;;  %v7757_v42 = vor.u32 %v10972_v28, %v7754_v29 }
  0x90   :  { %v10992_v6 = vld [vmem:[%s17473_s1 + $0x464] sm:$0xf0]  ;;  %v8269_v44 = vor.u32 %v11100_v35, %v8266_v36  ;;  %v10956_v58 = vld [vmem:[%s17473_s1 + $0x34c] sm:$0xf] }
  0x91   :  { %2167 = vmatpush.bf16.msrb.mxu0 %v7913_v41  ;;  %2195 = vmatpush.bf16.msrb.mxu2 %v8425_v43  ;;  %v8072_v7 = vld [vmem:[%s17473_s1 + $0x648] sm:$0xf]  ;;  %v7817_v14 = vor.u32 %v10992_v6, %v7816_v5  ;;  %v7277_v41 = vor.u32 %v10852_v26, %v7274_v27  ;;  %v8013_v43 = vor.u32 %v11036_v30, %v8010_v34  ;;  %v7690_v59 = vld [vmem:[%s17473_s1 + $0x368] sm:$0xf0] }
  0x92   :  { %v11056_v9 = vld [vmem:[%s17473_s1 + $0x664] sm:$0xf0]  ;;  %v7946_v62 = vld [vmem:[%s17473_s1 + $0x568] sm:$0xf0] }
  0x93   :  { %2209 = vmatpush.bf16.msrb.mxu3 %v7405_v47  ;;  %2182 = vmatpush.bf16.msrb.mxu1 %v8137_v54  ;;  %v8328_v10 = vld [vmem:[%s17473_s1 + $0x848] sm:$0xf]  ;;  %v8073_v18 = vor.u32 %v11056_v9, %v8072_v7  ;;  %v11028_v47 = vld [vmem:[%s17473_s1 + $0x58c] sm:$0xf]  ;;  %v7725_v54 = vor.u32 %v10964_v45, %v7722_v46 }
  0x94   :  { %v11120_v11 = vld [vmem:[%s17473_s1 + $0x864] sm:$0xf0]  ;;  %v11084_v63 = vld [vmem:[%s17473_s1 + $0x74c] sm:$0xf] }
  0x95   :  { %2168 = vmatpush.bf16.msrb.mxu0 %v7881_v53  ;;  %2196 = vmatpush.bf16.msrb.mxu2 %v8393_v56  ;;  %v7784_v15 = vld [vmem:[%s17473_s1 + $0x408] sm:$0xf]  ;;  %v8329_v19 = vor.u32 %v11120_v11, %v8328_v10  ;;  %v8490_v53 = vld [vmem:[%s17473_s1 + $0x9a8] sm:$0xf0]  ;;  %v7981_v56 = vor.u32 %v11028_v47, %v7978_v49 }
  0x96   :  { %v10984_v17 = vld [vmem:[%s17473_s1 + $0x424] sm:$0xf0]  ;;  %v8493_v61 = vor.u32 %v11156_v52, %v8490_v53  ;;  %v8202_v0 = vld [vmem:[%s17473_s1 + $0x768] sm:$0xf0] }
  0x97   :  { %2210 = vmatpush.bf16.msrb.mxu3 %v7373_v60  ;;  %2183 = vmatpush.bf16.msrb.mxu1 %v8105_v3  ;;  %v8040_v21 = vld [vmem:[%s17473_s1 + $0x608] sm:$0xf]  ;;  %v7785_v31 = vor.u32 %v10984_v17, %v7784_v15  ;;  %v11020_v60 = vld [vmem:[%s17473_s1 + $0x54c] sm:$0xf]  ;;  %v7693_v3 = vor.u32 %v10956_v58, %v7690_v59  ;;  %v8205_v5 = vor.u32 %v11084_v63, %v8202_v0 }
  0x98   :  { %v11048_v22 = vld [vmem:[%s17473_s1 + $0x624] sm:$0xf0]  ;;  %v11148_v1 = vld [vmem:[%s17473_s1 + $0x94c] sm:$0xf] }
  0x99   :  { %2169 = vmatpush.bf16.msrb.mxu0 %v7849_v2  ;;  %2197 = vmatpush.bf16.msrb.mxu2 %v8361_v4  ;;  %v8296_v23 = vld [vmem:[%s17473_s1 + $0x808] sm:$0xf]  ;;  %v8041_v37 = vor.u32 %v11048_v22, %v8040_v21  ;;  %v8458_v2 = vld [vmem:[%s17473_s1 + $0x968] sm:$0xf0]  ;;  %v7949_v4 = vor.u32 %v11020_v60, %v7946_v62 }
  0x9a   :  { %v11112_v25 = vld [vmem:[%s17473_s1 + $0x824] sm:$0xf0]  ;;  %v10948_v6 = vld [vmem:[%s17473_s1 + $0x30c] sm:$0xf]  ;;  %v8461_v9 = vor.u32 %v11148_v1, %v8458_v2 }
  0x9b   :  { %2211 = vmatpush.bf16.msrb.mxu3 %v7341_v8  ;;  %2184 = vmatpush.bf16.msrb.mxu1 %v8073_v18  ;;  %v8297_v38 = vor.u32 %v11112_v25, %v8296_v23  ;;  %v7658_v7 = vld [vmem:[%s17473_s1 + $0x328] sm:$0xf0] }
  0x9c   :  { %v11012_v8 = vld [vmem:[%s17473_s1 + $0x50c] sm:$0xf]  ;;  %v7661_v15 = vor.u32 %v10948_v6, %v7658_v7  ;;  %v7760_v6 = vld [vmem:[%s17473_s1 + $0x3d0] sm:$0xf] }
  0x9d   :  { %2170 = vmatpush.bf16.msrb.mxu0 %v7817_v14  ;;  %2198 = vmatpush.bf16.msrb.mxu2 %v8329_v19  ;;  %v7914_v10 = vld [vmem:[%s17473_s1 + $0x528] sm:$0xf0] }
  0x9e   :  { %v11076_v11 = vld [vmem:[%s17473_s1 + $0x70c] sm:$0xf]  ;;  %v7917_v17 = vor.u32 %v11012_v8, %v7914_v10  ;;  %v10977_v8 = vld [vmem:[%s17473_s1 + $0x3ec] sm:$0xf0] }
  0x9f   :  { %2212 = vmatpush.bf16.msrb.mxu3 %v7309_v24  ;;  %2185 = vmatpush.bf16.msrb.mxu1 %v8041_v37  ;;  %v8170_v12 = vld [vmem:[%s17473_s1 + $0x728] sm:$0xf0]  ;;  %v11041_v10 = vld [vmem:[%s17473_s1 + $0x5ec] sm:$0xf0] }
  0xa0   :  { %v11140_v13 = vld [vmem:[%s17473_s1 + $0x90c] sm:$0xf]  ;;  %v8173_v18 = vor.u32 %v11076_v11, %v8170_v12 }
  0xa1   :  { %2171 = vmatpush.bf16.msrb.mxu0 %v7785_v31  ;;  %2199 = vmatpush.bf16.msrb.mxu2 %v8297_v38  ;;  %v8426_v14 = vld [vmem:[%s17473_s1 + $0x928] sm:$0xf0] }
  0xa2   :  { %2186 = vmatmul.bf16.vlgmr.msrb.gmra.mxu1 %v12111_v20  ;;  %v10940_v19 = vld [vmem:[%s17473_s1 + $0x2cc] sm:$0xf]  ;;  %v8429_v23 = vor.u32 %v11140_v13, %v8426_v14  ;;  %v8272_v13 = vld [vmem:[%s17473_s1 + $0x7d0] sm:$0xf] }
  0xa3   :  { %2213 = vmatpush.bf16.msrb.mxu3 %v7277_v41  ;;  %2234 = vmatpush.bf16.msra.mxu1 %v8013_v43  ;;  %v7626_v21 = vld [vmem:[%s17473_s1 + $0x2e8] sm:$0xf0]  ;;  %v11105_v14 = vld [vmem:[%s17473_s1 + $0x7ec] sm:$0xf0] }
  0xa4   :  { %2172 = vmatmul.bf16.vlgmr.msrb.gmra.mxu0 %v12100_v16  ;;  %2200 = vmatmul.bf16.vlgmr.msrb.gmra.mxu2 %v12259_v32  ;;  %v11004_v22 = vld [vmem:[%s17473_s1 + $0x4cc] sm:$0xf]  ;;  %v7629_v29 = vor.u32 %v10940_v19, %v7626_v21  ;;  %v7472_v21 = vld [vmem:[%s17473_s1 + $0x190] sm:$0xf] }
  0xa5   :  { %2220 = vmatpush.bf16.msra.mxu0 %v7757_v42  ;;  %2248 = vmatpush.bf16.msra.mxu2 %v8269_v44  ;;  %v7882_v24 = vld [vmem:[%s17473_s1 + $0x4e8] sm:$0xf0] }
  0xa6   :  { %2214 = vmatmul.bf16.vlgmr.msrb.gmra.mxu3 %v12046_v55  ;;  %v11068_v25 = vld [vmem:[%s17473_s1 + $0x6cc] sm:$0xf]  ;;  %v7885_v30 = vor.u32 %v11004_v22, %v7882_v24  ;;  %v10905_v22 = vld [vmem:[%s17473_s1 + $0x1ac] sm:$0xf0]  ;;  %v8273_v24 = vor.u32 %v11105_v14, %v8272_v13 }
  0xa7   :  { %2262 = vmatpush.bf16.msra.mxu3 %v8525_v48  ;;  %2235 = vmatpush.bf16.msra.mxu1 %v7981_v56  ;;  %v8138_v26 = vld [vmem:[%s17473_s1 + $0x6e8] sm:$0xf0] }
  0xa8   :  { %v11132_v27 = vld [vmem:[%s17473_s1 + $0x8cc] sm:$0xf]  ;;  %v8141_v31 = vor.u32 %v11068_v25, %v8138_v26  ;;  %v10969_v25 = vld [vmem:[%s17473_s1 + $0x3ac] sm:$0xf0] }
  0xa9   :  { %2221 = vmatpush.bf16.msra.mxu0 %v7725_v54  ;;  %2249 = vmatpush.bf16.msra.mxu2 %v8237_v57  ;;  %v8394_v28 = vld [vmem:[%s17473_s1 + $0x8e8] sm:$0xf0]  ;;  %v7984_v26 = vld [vmem:[%s17473_s1 + $0x590] sm:$0xf] }
  0xaa   :  { %v10932_v34 = vld [vmem:[%s17473_s1 + $0x28c] sm:$0xf]  ;;  %v8397_v37 = vor.u32 %v11132_v27, %v8394_v28  ;;  %v11033_v27 = vld [vmem:[%s17473_s1 + $0x5ac] sm:$0xf0] }
  0xab   :  { %2263 = vmatpush.bf16.msra.mxu3 %v8493_v61  ;;  %2236 = vmatpush.bf16.msra.mxu1 %v7949_v4  ;;  %v7594_v35 = vld [vmem:[%s17473_s1 + $0x2a8] sm:$0xf0]  ;;  %v7504_v4 = vld [vmem:[%s17473_s1 + $0x1d0] sm:$0xf] }
  0xac   :  { %v10996_v36 = vld [vmem:[%s17473_s1 + $0x48c] sm:$0xf]  ;;  %v7597_v43 = vor.u32 %v10932_v34, %v7594_v35  ;;  %v8240_v28 = vld [vmem:[%s17473_s1 + $0x790] sm:$0xf]  ;;  %v7985_v34 = vor.u32 %v11033_v27, %v7984_v26 }
  0xad   :  { %2222 = vmatpush.bf16.msra.mxu0 %v7693_v3  ;;  %2250 = vmatpush.bf16.msra.mxu2 %v8205_v5  ;;  %v7850_v38 = vld [vmem:[%s17473_s1 + $0x4a8] sm:$0xf0]  ;;  %v10913_v5 = vld [vmem:[%s17473_s1 + $0x1ec] sm:$0xf0] }
  0xae   :  { %v11060_v39 = vld [vmem:[%s17473_s1 + $0x68c] sm:$0xf]  ;;  %v7853_v44 = vor.u32 %v10996_v36, %v7850_v38  ;;  %v7440_v35 = vld [vmem:[%s17473_s1 + $0x150] sm:$0xf] }
  0xaf   :  { %2264 = vmatpush.bf16.msra.mxu3 %v8461_v9  ;;  %2237 = vmatpush.bf16.msra.mxu1 %v7917_v17  ;;  %v8106_v40 = vld [vmem:[%s17473_s1 + $0x6a8] sm:$0xf0]  ;;  %v8016_v9 = vld [vmem:[%s17473_s1 + $0x5d0] sm:$0xf]  ;;  %v7505_v17 = vor.u32 %v10913_v5, %v7504_v4 }
  0xb0   :  { %v11124_v41 = vld [vmem:[%s17473_s1 + $0x88c] sm:$0xf]  ;;  %v8109_v45 = vor.u32 %v11060_v39, %v8106_v40  ;;  %v8017_v19 = vor.u32 %v11041_v10, %v8016_v9  ;;  %v10897_v36 = vld [vmem:[%s17473_s1 + $0x16c] sm:$0xf0] }
  0xb1   :  { %2223 = vmatpush.bf16.msra.mxu0 %v7661_v15  ;;  %2251 = vmatpush.bf16.msra.mxu2 %v8173_v18  ;;  %v8362_v42 = vld [vmem:[%s17473_s1 + $0x8a8] sm:$0xf0]  ;;  %v7761_v18 = vor.u32 %v10977_v8, %v7760_v6  ;;  %v10961_v39 = vld [vmem:[%s17473_s1 + $0x36c] sm:$0xf0] }
  0xb2   :  { %v10924_v46 = vld [vmem:[%s17473_s1 + $0x24c] sm:$0xf]  ;;  %v8365_v49 = vor.u32 %v11124_v41, %v8362_v42  ;;  %v7952_v40 = vld [vmem:[%s17473_s1 + $0x550] sm:$0xf] }
  0xb3   :  { %2265 = vmatpush.bf16.msra.mxu3 %v8429_v23  ;;  %2238 = vmatpush.bf16.msra.mxu1 %v7885_v30  ;;  %v7562_v47 = vld [vmem:[%s17473_s1 + $0x268] sm:$0xf0]  ;;  %v7728_v23 = vld [vmem:[%s17473_s1 + $0x390] sm:$0xf]  ;;  %v7473_v30 = vor.u32 %v10905_v22, %v7472_v21 }
  0xb4   :  { %v10988_v48 = vld [vmem:[%s17473_s1 + $0x44c] sm:$0xf]  ;;  %v7565_v56 = vor.u32 %v10924_v46, %v7562_v47  ;;  %v11025_v41 = vld [vmem:[%s17473_s1 + $0x56c] sm:$0xf0] }
  0xb5   :  { %2224 = vmatpush.bf16.msra.mxu0 %v7629_v29  ;;  %2252 = vmatpush.bf16.msra.mxu2 %v8141_v31  ;;  %v7818_v50 = vld [vmem:[%s17473_s1 + $0x468] sm:$0xf0]  ;;  %v11097_v29 = vld [vmem:[%s17473_s1 + $0x7ac] sm:$0xf0]  ;;  %v7729_v31 = vor.u32 %v10969_v25, %v7728_v23  ;;  %v7953_v46 = vor.u32 %v11025_v41, %v7952_v40 }
  0xb6   :  { %v11052_v51 = vld [vmem:[%s17473_s1 + $0x64c] sm:$0xf]  ;;  %v7821_v59 = vor.u32 %v10988_v48, %v7818_v50  ;;  %v8241_v38 = vor.u32 %v11097_v29, %v8240_v28  ;;  %v8208_v42 = vld [vmem:[%s17473_s1 + $0x750] sm:$0xf] }
  0xb7   :  { %2266 = vmatpush.bf16.msra.mxu3 %v8397_v37  ;;  %v8074_v52 = vld [vmem:[%s17473_s1 + $0x668] sm:$0xf0]  ;;  %2239 = vmatpush.bf16.msra.mxu1 %v7853_v44  ;;  %v7696_v37 = vld [vmem:[%s17473_s1 + $0x350] sm:$0xf]  ;;  %v7441_v44 = vor.u32 %v10897_v36, %v7440_v35 }
  0xb8   :  { %v11116_v53 = vld [vmem:[%s17473_s1 + $0x84c] sm:$0xf]  ;;  %v8077_v60 = vor.u32 %v11052_v51, %v8074_v52  ;;  %v7408_v47 = vld [vmem:[%s17473_s1 + $0x110] sm:$0xf] }
  0xb9   :  { %v8330_v54 = vld [vmem:[%s17473_s1 + $0x868] sm:$0xf0]  ;;  %2225 = vmatpush.bf16.msra.mxu0 %v7597_v43  ;;  %2253 = vmatpush.bf16.msra.mxu2 %v8109_v45  ;;  %v11089_v43 = vld [vmem:[%s17473_s1 + $0x76c] sm:$0xf0]  ;;  %v7697_v45 = vor.u32 %v10961_v39, %v7696_v37 }
  0xba   :  { %v10916_v57 = vld [vmem:[%s17473_s1 + $0x20c] sm:$0xf]  ;;  %v8333_v0 = vor.u32 %v11116_v53, %v8330_v54  ;;  %v10889_v48 = vld [vmem:[%s17473_s1 + $0x12c] sm:$0xf0]  ;;  %v8209_v50 = vor.u32 %v11089_v43, %v8208_v42 }
  0xbb   :  { %v7530_v58 = vld [vmem:[%s17473_s1 + $0x228] sm:$0xf0]  ;;  %2267 = vmatpush.bf16.msra.mxu3 %v8365_v49  ;;  %2240 = vmatpush.bf16.msra.mxu1 %v7821_v59  ;;  %v7664_v49 = vld [vmem:[%s17473_s1 + $0x310] sm:$0xf] }
  0xbc   :  { %v10980_v61 = vld [vmem:[%s17473_s1 + $0x40c] sm:$0xf]  ;;  %v7533_v7 = vor.u32 %v10916_v57, %v7530_v58  ;;  %v10953_v51 = vld [vmem:[%s17473_s1 + $0x32c] sm:$0xf0]  ;;  %v12919_v57 = vld [vmem:[%s17475_s2] sm:$0xff]  ;;  %v7409_v58 = vor.u32 %v10889_v48, %v7408_v47 }
  0xbd   :  { %v7786_v62 = vld [vmem:[%s17473_s1 + $0x428] sm:$0xf0]  ;;  %2226 = vmatpush.bf16.msra.mxu0 %v7565_v56  ;;  %2254 = vmatpush.bf16.msra.mxu2 %v8077_v60  ;;  %v7920_v52 = vld [vmem:[%s17473_s1 + $0x510] sm:$0xf]  ;;  %v7665_v60 = vor.u32 %v10953_v51, %v7664_v49  ;;  %v354_v4 = vperm.slane %v12919_v57, 0 }
  0xbe   :  { %v11044_v63 = vld [vmem:[%s17473_s1 + $0x60c] sm:$0xf]  ;;  %v7789_v11 = vor.u32 %v10980_v61, %v7786_v62  ;;  %v11017_v53 = vld [vmem:[%s17473_s1 + $0x52c] sm:$0xf0]  ;;  %v11415_v57 = vld [vmem:[%s17476_s3 + $0x79c] sm:$0xf0] }
  0xbf   :  { %v8042_v1 = vld [vmem:[%s17473_s1 + $0x628] sm:$0xf0]  ;;  %2268 = vmatpush.bf16.msra.mxu3 %v8333_v0  ;;  %v8176_v54 = vld [vmem:[%s17473_s1 + $0x710] sm:$0xf]  ;;  %v7921_v61 = vor.u32 %v11017_v53, %v7920_v52 }
  0xc0   :  { %v11108_v2 = vld [vmem:[%s17473_s1 + $0x80c] sm:$0xf]  ;;  %v8045_v12 = vor.u32 %v11044_v63, %v8042_v1  ;;  %2241 = vmatpush.bf16.msra.mxu1 %v7789_v11  ;;  %v11081_v56 = vld [vmem:[%s17473_s1 + $0x72c] sm:$0xf0] }
  0xc1   :  { %v8298_v3 = vld [vmem:[%s17473_s1 + $0x828] sm:$0xf0]  ;;  %2227 = vmatpush.bf16.msra.mxu0 %v7533_v7  ;;  %v7376_v59 = vld [vmem:[%s17473_s1 + $0xd0] sm:$0xf]  ;;  %v8177_v1 = vor.u32 %v11081_v56, %v8176_v54 }
  0xc2   :  { %v8301_v15 = vor.u32 %v11108_v2, %v8298_v3  ;;  %2255 = vmatpush.bf16.msra.mxu2 %v8045_v12  ;;  %v10881_v62 = vld [vmem:[%s17473_s1 + $0xec] sm:$0xf0] }
  0xc3   :  { %2242 = vmatmul.bf16.vlgmr.msra.gmra.mxu1 %v12100_v16  ;;  %v7632_v63 = vld [vmem:[%s17473_s1 + $0x2d0] sm:$0xf]  ;;  %v7377_v7 = vor.u32 %v10881_v62, %v7376_v59  ;;  %v2019_v29 = vpop.f32.mrf.mxu1  ;;  %v10973_v62 = vld [vmem:[%s17473_s1 + $0x3d4] sm:$0xf] }
  0xc4   :  { %2269 = vmatpush.bf16.msra.mxu3 %v8301_v15  ;;  %2290 = vmatpush.bf16.msrb.mxu1 %v7761_v18  ;;  %v10945_v0 = vld [vmem:[%s17473_s1 + $0x2ec] sm:$0xf0] }
  0xc5   :  { %2276 = vmatpush.bf16.msrb.mxu0 %v7505_v17  ;;  %2256 = vmatmul.bf16.vlgmr.msra.gmra.mxu2 %v12111_v20  ;;  %v7888_v2 = vld [vmem:[%s17473_s1 + $0x4d0] sm:$0xf]  ;;  %v7633_v8 = vor.u32 %v10945_v0, %v7632_v63  ;;  %v2005_v13 = vpop.f32.mrf.mxu0  ;;  %v7762_v63 = vld [vmem:[%s17473_s1 + $0x3f0] sm:$0xf0] }
  0xc6   :  { %2304 = vmatpush.bf16.msrb.mxu2 %v8017_v19  ;;  %2228 = vmatmul.bf16.vlgmr.msra.gmra.mxu0 %v12138_v33  ;;  %v11009_v3 = vld [vmem:[%s17473_s1 + $0x4ec] sm:$0xf0]  ;;  %v2006_v19 = vadd.f32 %v2005_v13, %v354_v4  ;;  %v7474_v13 = vld [vmem:[%s17473_s1 + $0x1b0] sm:$0xf0] }
  0xc7   :  { %2270 = vmatmul.bf16.vlgmr.msra.gmra.mxu3 %v12259_v32  ;;  %v8144_v5 = vld [vmem:[%s17473_s1 + $0x6d0] sm:$0xf]  ;;  %v7889_v9 = vor.u32 %v11009_v3, %v7888_v2  ;;  %v2033_v39 = vpop.f32.mrf.mxu2  ;;  %v11037_v2 = vld [vmem:[%s17473_s1 + $0x5d4] sm:$0xf] }
  0xc8   :  { %2318 = vmatpush.bf16.msrb.mxu3 %v8273_v24  ;;  %2291 = vmatpush.bf16.msrb.mxu1 %v7729_v31  ;;  %v11073_v6 = vld [vmem:[%s17473_s1 + $0x6ec] sm:$0xf0]  ;;  %v2020_v36 = vadd.f32 %v2019_v29, %v2006_v19  ;;  %v8018_v3 = vld [vmem:[%s17473_s1 + $0x5f0] sm:$0xf0] }
  0xc9   :  { %2277 = vmatpush.bf16.msrb.mxu0 %v7473_v30  ;;  %v7344_v10 = vld [vmem:[%s17473_s1 + $0x90] sm:$0xf]  ;;  %v8145_v14 = vor.u32 %v11073_v6, %v8144_v5  ;;  %v7698_v29 = vld [vmem:[%s17473_s1 + $0x370] sm:$0xf0] }
  0xca   :  { %2305 = vmatpush.bf16.msrb.mxu2 %v7985_v34  ;;  %v10873_v11 = vld [vmem:[%s17473_s1 + $0xac] sm:$0xf0]  ;;  %v2034_v43 = vadd.f32 %v2033_v39, %v2020_v36  ;;  %v10885_v39 = vld [vmem:[%s17473_s1 + $0x114] sm:$0xf] }
  0xcb   :  { %v7600_v12 = vld [vmem:[%s17473_s1 + $0x290] sm:$0xf]  ;;  %v7345_v23 = vor.u32 %v10873_v11, %v7344_v10  ;;  %v10901_v11 = vld [vmem:[%s17473_s1 + $0x194] sm:$0xf] }
  0xcc   :  { %2319 = vmatpush.bf16.msrb.mxu3 %v8241_v38  ;;  %2292 = vmatpush.bf16.msrb.mxu1 %v7697_v45  ;;  %v10937_v15 = vld [vmem:[%s17473_s1 + $0x2ac] sm:$0xf0] }
  0xcd   :  { %2278 = vmatpush.bf16.msrb.mxu0 %v7441_v44  ;;  %v7856_v17 = vld [vmem:[%s17473_s1 + $0x490] sm:$0xf]  ;;  %v7601_v24 = vor.u32 %v10937_v15, %v7600_v12  ;;  %v8021_v12 = vor.u32 %v11037_v2, %v8018_v3  ;;  %v7730_v15 = vld [vmem:[%s17473_s1 + $0x3b0] sm:$0xf0] }
  0xce   :  { %2306 = vmatpush.bf16.msrb.mxu2 %v7953_v46  ;;  %v11001_v18 = vld [vmem:[%s17473_s1 + $0x4ac] sm:$0xf0]  ;;  %v10869_v2 = vld [vmem:[%s17473_s1 + $0x94] sm:$0xf] }
  0xcf   :  { %v8112_v21 = vld [vmem:[%s17473_s1 + $0x690] sm:$0xf]  ;;  %v7857_v25 = vor.u32 %v11001_v18, %v7856_v17  ;;  %v11029_v17 = vld [vmem:[%s17473_s1 + $0x594] sm:$0xf] }
  0xd0   :  { %2320 = vmatpush.bf16.msrb.mxu3 %v8209_v50  ;;  %2293 = vmatpush.bf16.msrb.mxu1 %v7665_v60  ;;  %v11065_v22 = vld [vmem:[%s17473_s1 + $0x6ac] sm:$0xf0]  ;;  %v7986_v18 = vld [vmem:[%s17473_s1 + $0x5b0] sm:$0xf0] }
  0xd1   :  { %2279 = vmatpush.bf16.msrb.mxu0 %v7409_v58  ;;  %v7312_v26 = vld [vmem:[%s17473_s1 + $0x50] sm:$0xf]  ;;  %v8113_v30 = vor.u32 %v11065_v22, %v8112_v21  ;;  %v2047_v53 = vpop.f32.mrf.mxu3  ;;  %v10909_v58 = vld [vmem:[%s17473_s1 + $0x1d4] sm:$0xf]  ;;  %v7477_v21 = vor.u32 %v10901_v11, %v7474_v13 }
  0xd2   :  { %2307 = vmatpush.bf16.msrb.mxu2 %v7921_v61  ;;  %v10865_v27 = vld [vmem:[%s17473_s1 + $0x6c] sm:$0xf0]  ;;  %v13029_v59 = vadd.f32 %v2047_v53, %v2034_v43  ;;  %v7506_v61 = vld [vmem:[%s17473_s1 + $0x1f0] sm:$0xf0] }
  0xd3   :  { %v7568_v28 = vld [vmem:[%s17473_s1 + $0x250] sm:$0xf]  ;;  %v7313_v40 = vor.u32 %v10865_v27, %v7312_v26  ;;  %v7989_v26 = vor.u32 %v11029_v17, %v7986_v18  ;;  %v7442_v27 = vld [vmem:[%s17473_s1 + $0x170] sm:$0xf0] }
  0xd4   :  { %2321 = vmatpush.bf16.msrb.mxu3 %v8177_v1  ;;  %2294 = vmatpush.bf16.msrb.mxu1 %v7633_v8  ;;  %v10929_v31 = vld [vmem:[%s17473_s1 + $0x26c] sm:$0xf0]  ;;  %v7765_v8 = vor.u32 %v10973_v62, %v7762_v63  ;;  %v7666_v43 = vld [vmem:[%s17473_s1 + $0x330] sm:$0xf0] }
  0xd5   :  { %2280 = vmatpush.bf16.msrb.mxu0 %v7377_v7  ;;  %v7824_v34 = vld [vmem:[%s17473_s1 + $0x450] sm:$0xf]  ;;  %v7569_v44 = vor.u32 %v10929_v31, %v7568_v28  ;;  %v7509_v7 = vor.u32 %v10909_v58, %v7506_v61  ;;  %v10957_v28 = vld [vmem:[%s17473_s1 + $0x354] sm:$0xf] }
  0xd6   :  { %2308 = vmatpush.bf16.msrb.mxu2 %v7889_v9  ;;  %v10993_v35 = vld [vmem:[%s17473_s1 + $0x46c] sm:$0xf0]  ;;  %v7954_v31 = vld [vmem:[%s17473_s1 + $0x570] sm:$0xf0]  ;;  %v7701_v36 = vor.u32 %v10957_v28, %v7698_v29 }
  0xd7   :  { %v8080_v37 = vld [vmem:[%s17473_s1 + $0x650] sm:$0xf]  ;;  %v7825_v45 = vor.u32 %v10993_v35, %v7824_v34  ;;  %v7378_v53 = vld [vmem:[%s17473_s1 + $0xf0] sm:$0xf0] }
  0xd8   :  { %2322 = vmatpush.bf16.msrb.mxu3 %v8145_v14  ;;  %v11057_v38 = vld [vmem:[%s17473_s1 + $0x66c] sm:$0xf0]  ;;  %2295 = vmatpush.bf16.msrb.mxu1 %v7601_v24  ;;  %v10965_v14 = vld [vmem:[%s17473_s1 + $0x394] sm:$0xf] }
  0xd9   :  { %2281 = vmatpush.bf16.msrb.mxu0 %v7345_v23  ;;  %v7280_v41 = vld [vmem:[%s17473_s1 + $0x10] sm:$0xf]  ;;  %v8081_v49 = vor.u32 %v11057_v38, %v8080_v37  ;;  %v7733_v22 = vor.u32 %v10965_v14, %v7730_v15  ;;  %v11005_v58 = vld [vmem:[%s17473_s1 + $0x4d4] sm:$0xf] }
  0xda   :  { %v10857_v42 = vld [vmem:[%s17473_s1 + $0x2c] sm:$0xf0]  ;;  %2309 = vmatpush.bf16.msrb.mxu2 %v7857_v25  ;;  %v10893_v25 = vld [vmem:[%s17473_s1 + $0x154] sm:$0xf] }
  0xdb   :  { %v7536_v46 = vld [vmem:[%s17473_s1 + $0x210] sm:$0xf]  ;;  %v7281_v60 = vor.u32 %v10857_v42, %v7280_v41  ;;  %v7445_v35 = vor.u32 %v10893_v25, %v7442_v27  ;;  %v7410_v41 = vld [vmem:[%s17473_s1 + $0x130] sm:$0xf0] }
  0xdc   :  { %v10921_v47 = vld [vmem:[%s17473_s1 + $0x22c] sm:$0xf0]  ;;  %2323 = vmatpush.bf16.msrb.mxu3 %v8113_v30  ;;  %2296 = vmatpush.bf16.msrb.mxu1 %v7569_v44  ;;  %v11021_v30 = vld [vmem:[%s17473_s1 + $0x554] sm:$0xf] }
  0xdd   :  { %v7792_v48 = vld [vmem:[%s17473_s1 + $0x410] sm:$0xf]  ;;  %2282 = vmatpush.bf16.msrb.mxu0 %v7313_v40  ;;  %v7537_v0 = vor.u32 %v10921_v47, %v7536_v46  ;;  %v7957_v40 = vor.u32 %v11021_v30, %v7954_v31  ;;  %v10949_v42 = vld [vmem:[%s17473_s1 + $0x314] sm:$0xf]  ;;  %v7413_v47 = vor.u32 %v10885_v39, %v7410_v41 }
  0xde   :  { %v10985_v50 = vld [vmem:[%s17473_s1 + $0x42c] sm:$0xf0]  ;;  %2310 = vmatpush.bf16.msrb.mxu2 %v7825_v45  ;;  %v11013_v44 = vld [vmem:[%s17473_s1 + $0x514] sm:$0xf] }
  0xdf   :  { %v8048_v51 = vld [vmem:[%s17473_s1 + $0x610] sm:$0xf]  ;;  %v7793_v1 = vor.u32 %v10985_v50, %v7792_v48  ;;  %v7922_v45 = vld [vmem:[%s17473_s1 + $0x530] sm:$0xf0]  ;;  %v7669_v48 = vor.u32 %v10949_v42, %v7666_v43  ;;  %v7512_v43 = vld [vmem:[%s17473_s1 + $0x1d8] sm:$0xf] }
  0xe0   :  { %v11049_v52 = vld [vmem:[%s17473_s1 + $0x62c] sm:$0xf0]  ;;  %2324 = vmatpush.bf16.msrb.mxu3 %v8081_v49  ;;  %2297 = vmatpush.bf16.msrb.mxu1 %v7537_v0  ;;  %v10861_v15 = vld [vmem:[%s17473_s1 + $0x54] sm:$0xf] }
  0xe1   :  { %v8528_v54 = vld [vmem:[%s17473_s1 + $0x9d0] sm:$0xf]  ;;  %v8049_v5 = vor.u32 %v11049_v52, %v8048_v51  ;;  %2283 = vmatpush.bf16.msrb.mxu0 %v7281_v60  ;;  %v10877_v51 = vld [vmem:[%s17473_s1 + $0xd4] sm:$0xf]  ;;  %v7925_v52 = vor.u32 %v11013_v44, %v7922_v45  ;;  %v10914_v44 = vld [vmem:[%s17473_s1 + $0x1f4] sm:$0xf0] }
  0xe2   :  { %v11169_v56 = vld [vmem:[%s17473_s1 + $0x9ec] sm:$0xf0]  ;;  %2311 = vmatpush.bf16.msrb.mxu2 %v7793_v1  ;;  %v7890_v60 = vld [vmem:[%s17473_s1 + $0x4f0] sm:$0xf0]  ;;  %v7381_v62 = vor.u32 %v10877_v51, %v7378_v53 }
  0xe3   :  { %v8529_v6 = vor.u32 %v11169_v56, %v8528_v54  ;;  %v8496_v9 = vld [vmem:[%s17473_s1 + $0x990] sm:$0xf]  ;;  %2298 = vmatmul.bf16.vlgmr.msrb.gmra.mxu1 %v12138_v33  ;;  %v10941_v54 = vld [vmem:[%s17473_s1 + $0x2d4] sm:$0xf]  ;;  %v7893_v3 = vor.u32 %v11005_v58, %v7890_v60 }
  0xe4   :  { %v11161_v10 = vld [vmem:[%s17473_s1 + $0x9ac] sm:$0xf0]  ;;  %2325 = vmatpush.bf16.msrb.mxu3 %v8049_v5  ;;  %2346 = vmatpush.bf16.msra.mxu1 %v7509_v7  ;;  %v7634_v56 = vld [vmem:[%s17473_s1 + $0x2f0] sm:$0xf0] }
  0xe5   :  { %2332 = vmatpush.bf16.msra.mxu0 %v8529_v6  ;;  %v8497_v19 = vor.u32 %v11161_v10, %v8496_v9  ;;  %v8464_v23 = vld [vmem:[%s17473_s1 + $0x950] sm:$0xf]  ;;  %2312 = vmatmul.bf16.vlgmr.msrb.gmra.mxu2 %v12100_v16  ;;  %v7637_v63 = vor.u32 %v10941_v54, %v7634_v56  ;;  %v7346_v5 = vld [vmem:[%s17473_s1 + $0xb0] sm:$0xf0] }
  0xe6   :  { %2360 = vmatpush.bf16.msra.mxu2 %v7765_v8  ;;  %v11153_v24 = vld [vmem:[%s17473_s1 + $0x96c] sm:$0xf0]  ;;  %2284 = vmatmul.bf16.vlgmr.msrb.gmra.mxu0 %v12046_v55  ;;  %v10933_v6 = vld [vmem:[%s17473_s1 + $0x294] sm:$0xf]  ;;  %v7349_v11 = vor.u32 %v10869_v2, %v7346_v5 }
  0xe7   :  { %2326 = vmatmul.bf16.vlgmr.msrb.gmra.mxu3 %v12111_v20  ;;  %v8465_v34 = vor.u32 %v11153_v24, %v8464_v23  ;;  %v8432_v37 = vld [vmem:[%s17473_s1 + $0x910] sm:$0xf]  ;;  %v7602_v7 = vld [vmem:[%s17473_s1 + $0x2b0] sm:$0xf0] }
  0xe8   :  { %2374 = vmatpush.bf16.msra.mxu3 %v8021_v12  ;;  %2347 = vmatpush.bf16.msra.mxu1 %v7477_v21  ;;  %v11145_v38 = vld [vmem:[%s17473_s1 + $0x92c] sm:$0xf0]  ;;  %v10997_v8 = vld [vmem:[%s17473_s1 + $0x494] sm:$0xf]  ;;  %v7605_v12 = vor.u32 %v10933_v6, %v7602_v7 }
  0xe9   :  { %2333 = vmatpush.bf16.msra.mxu0 %v8497_v19  ;;  %v8433_v46 = vor.u32 %v11145_v38, %v8432_v37  ;;  %v8400_v49 = vld [vmem:[%s17473_s1 + $0x8d0] sm:$0xf]  ;;  %v7858_v9 = vld [vmem:[%s17473_s1 + $0x4b0] sm:$0xf0] }
  0xea   :  { %2361 = vmatpush.bf16.msra.mxu2 %v7733_v22  ;;  %v11137_v50 = vld [vmem:[%s17473_s1 + $0x8ec] sm:$0xf0]  ;;  %v7861_v17 = vor.u32 %v10997_v8, %v7858_v9  ;;  %v7314_v18 = vld [vmem:[%s17473_s1 + $0x70] sm:$0xf0] }
  0xeb   :  { %v8401_v61 = vor.u32 %v11137_v50, %v8400_v49  ;;  %v8368_v0 = vld [vmem:[%s17473_s1 + $0x890] sm:$0xf]  ;;  %v10925_v19 = vld [vmem:[%s17473_s1 + $0x254] sm:$0xf]  ;;  %v7317_v27 = vor.u32 %v10861_v15, %v7314_v18 }
  0xec   :  { %2375 = vmatpush.bf16.msra.mxu3 %v7989_v26  ;;  %2348 = vmatpush.bf16.msra.mxu1 %v7445_v35  ;;  %v11129_v1 = vld [vmem:[%s17473_s1 + $0x8ac] sm:$0xf0]  ;;  %v7570_v21 = vld [vmem:[%s17473_s1 + $0x270] sm:$0xf0] }
  0xed   :  { %2334 = vmatpush.bf16.msra.mxu0 %v8465_v34  ;;  %v8369_v10 = vor.u32 %v11129_v1, %v8368_v0  ;;  %v8336_v13 = vld [vmem:[%s17473_s1 + $0x850] sm:$0xf]  ;;  %v10989_v22 = vld [vmem:[%s17473_s1 + $0x454] sm:$0xf]  ;;  %v7573_v28 = vor.u32 %v10925_v19, %v7570_v21  ;;  %v10970_v0 = vld [vmem:[%s17473_s1 + $0x3b4] sm:$0xf0] }
  0xee   :  { %2362 = vmatpush.bf16.msra.mxu2 %v7701_v36  ;;  %v11121_v14 = vld [vmem:[%s17473_s1 + $0x86c] sm:$0xf0]  ;;  %v7826_v23 = vld [vmem:[%s17473_s1 + $0x470] sm:$0xf0] }
  0xef   :  { %v8337_v24 = vor.u32 %v11121_v14, %v8336_v13  ;;  %v8304_v25 = vld [vmem:[%s17473_s1 + $0x810] sm:$0xf]  ;;  %v10853_v29 = vld [vmem:[%s17473_s1 + $0x14] sm:$0xf]  ;;  %v7829_v34 = vor.u32 %v10989_v22, %v7826_v23  ;;  %v10962_v13 = vld [vmem:[%s17473_s1 + $0x374] sm:$0xf0] }
  0xf0   :  { %2376 = vmatpush.bf16.msra.mxu3 %v7957_v40  ;;  %2349 = vmatpush.bf16.msra.mxu1 %v7413_v47  ;;  %v11113_v26 = vld [vmem:[%s17473_s1 + $0x82c] sm:$0xf0]  ;;  %v7282_v30 = vld [vmem:[%s17473_s1 + $0x30] sm:$0xf0]  ;;  %v7768_v47 = vld [vmem:[%s17473_s1 + $0x3d8] sm:$0xf] }
  0xf1   :  { %2335 = vmatpush.bf16.msra.mxu0 %v8433_v46  ;;  %v10917_v31 = vld [vmem:[%s17473_s1 + $0x214] sm:$0xf]  ;;  %v8305_v41 = vor.u32 %v11113_v26, %v8304_v25  ;;  %v7285_v45 = vor.u32 %v10853_v29, %v7282_v30  ;;  %v10890_v25 = vld [vmem:[%s17473_s1 + $0x134] sm:$0xf0] }
  0xf2   :  { %2363 = vmatpush.bf16.msra.mxu2 %v7669_v48  ;;  %v7538_v35 = vld [vmem:[%s17473_s1 + $0x230] sm:$0xf0]  ;;  %v10978_v48 = vld [vmem:[%s17473_s1 + $0x3f4] sm:$0xf0] }
  0xf3   :  { %v10981_v36 = vld [vmem:[%s17473_s1 + $0x414] sm:$0xf]  ;;  %v7541_v46 = vor.u32 %v10917_v31, %v7538_v35  ;;  %v7769_v58 = vor.u32 %v10978_v48, %v7768_v47  ;;  %v7672_v26 = vld [vmem:[%s17473_s1 + $0x318] sm:$0xf] }
  0xf4   :  { %2377 = vmatpush.bf16.msra.mxu3 %v7925_v52  ;;  %2350 = vmatpush.bf16.msra.mxu1 %v7381_v62  ;;  %v7794_v37 = vld [vmem:[%s17473_s1 + $0x430] sm:$0xf0]  ;;  %v7513_v52 = vor.u32 %v10914_v44, %v7512_v43  ;;  %v10906_v62 = vld [vmem:[%s17473_s1 + $0x1b4] sm:$0xf0] }
  0xf5   :  { %2336 = vmatpush.bf16.msra.mxu0 %v8401_v61  ;;  %v11101_v38 = vld [vmem:[%s17473_s1 + $0x7d4] sm:$0xf]  ;;  %v7797_v49 = vor.u32 %v10981_v36, %v7794_v37  ;;  %v7480_v61 = vld [vmem:[%s17473_s1 + $0x198] sm:$0xf] }
  0xf6   :  { %2364 = vmatpush.bf16.msra.mxu2 %v7637_v63  ;;  %v8274_v39 = vld [vmem:[%s17473_s1 + $0x7f0] sm:$0xf0]  ;;  %v7736_v63 = vld [vmem:[%s17473_s1 + $0x398] sm:$0xf] }
  0xf7   :  { %v11165_v40 = vld [vmem:[%s17473_s1 + $0x9d4] sm:$0xf]  ;;  %v8277_v50 = vor.u32 %v11101_v38, %v8274_v39  ;;  %v7737_v8 = vor.u32 %v10970_v0, %v7736_v63  ;;  %v7384_v38 = vld [vmem:[%s17473_s1 + $0xd8] sm:$0xf] }
  0xf8   :  { %2378 = vmatpush.bf16.msra.mxu3 %v7893_v3  ;;  %2351 = vmatpush.bf16.msra.mxu1 %v7349_v11  ;;  %v8530_v42 = vld [vmem:[%s17473_s1 + $0x9f0] sm:$0xf0]  ;;  %v7481_v3 = vor.u32 %v10906_v62, %v7480_v61  ;;  %v10898_v11 = vld [vmem:[%s17473_s1 + $0x174] sm:$0xf0] }
  0xf9   :  { %2337 = vmatpush.bf16.msra.mxu0 %v8369_v10  ;;  %v8533_v51 = vor.u32 %v11165_v40, %v8530_v42  ;;  %v11093_v53 = vld [vmem:[%s17473_s1 + $0x794] sm:$0xf]  ;;  %v7448_v10 = vld [vmem:[%s17473_s1 + $0x158] sm:$0xf] }
  0xfa   :  { %2365 = vmatpush.bf16.msra.mxu2 %v7605_v12  ;;  %v8242_v54 = vld [vmem:[%s17473_s1 + $0x7b0] sm:$0xf0]  ;;  %v7704_v12 = vld [vmem:[%s17473_s1 + $0x358] sm:$0xf] }
  0xfb   :  { %v11157_v56 = vld [vmem:[%s17473_s1 + $0x994] sm:$0xf]  ;;  %v8245_v1 = vor.u32 %v11093_v53, %v8242_v54  ;;  %v7705_v22 = vor.u32 %v10962_v13, %v7704_v12  ;;  %v10882_v39 = vld [vmem:[%s17473_s1 + $0xf4] sm:$0xf0] }
  0xfc   :  { %2379 = vmatpush.bf16.msra.mxu3 %v7861_v17  ;;  %2352 = vmatpush.bf16.msra.mxu1 %v7317_v27  ;;  %v8498_v60 = vld [vmem:[%s17473_s1 + $0x9b0] sm:$0xf0]  ;;  %v7449_v17 = vor.u32 %v10898_v11, %v7448_v10  ;;  %v10954_v27 = vld [vmem:[%s17473_s1 + $0x334] sm:$0xf0]  ;;  %v7385_v44 = vor.u32 %v10882_v39, %v7384_v38 }
  0xfd   :  { %2338 = vmatpush.bf16.msra.mxu0 %v8337_v24  ;;  %v8501_v2 = vor.u32 %v11157_v56, %v8498_v60  ;;  %v11085_v5 = vld [vmem:[%s17473_s1 + $0x754] sm:$0xf]  ;;  %v7416_v24 = vld [vmem:[%s17473_s1 + $0x118] sm:$0xf]  ;;  %v7673_v36 = vor.u32 %v10954_v27, %v7672_v26  ;;  %v13432_v27 = vpop.f32.mrf.mxu0 }
  0xfe   :  { %2366 = vmatpush.bf16.msra.mxu2 %v7573_v28  ;;  %v8210_v6 = vld [vmem:[%s17473_s1 + $0x770] sm:$0xf0]  ;;  %v7417_v30 = vor.u32 %v10890_v25, %v7416_v24  ;;  %v7640_v40 = vld [vmem:[%s17473_s1 + $0x2d8] sm:$0xf] }
  0xff   :  { %v11149_v7 = vld [vmem:[%s17473_s1 + $0x954] sm:$0xf]  ;;  %v8213_v14 = vor.u32 %v11085_v5, %v8210_v6  ;;  %v10938_v53 = vld [vmem:[%s17473_s1 + $0x2b4] sm:$0xf0] }
 0x100   :  { %2380 = vmatpush.bf16.msra.mxu3 %v7829_v34  ;;  %2353 = vmatpush.bf16.msra.mxu1 %v7285_v45  ;;  %v8466_v9 = vld [vmem:[%s17473_s1 + $0x970] sm:$0xf0]  ;;  %v10930_v5 = vld [vmem:[%s17473_s1 + $0x274] sm:$0xf0] }
 0x101   :  { %2339 = vmatpush.bf16.msra.mxu0 %v8305_v41  ;;  %v8469_v15 = vor.u32 %v11149_v7, %v8466_v9  ;;  %v11077_v18 = vld [vmem:[%s17473_s1 + $0x714] sm:$0xf]  ;;  %v10946_v41 = vld [vmem:[%s17473_s1 + $0x2f4] sm:$0xf0] }
 0x102   :  { %2367 = vmatpush.bf16.msra.mxu2 %v7541_v46  ;;  %v8178_v19 = vld [vmem:[%s17473_s1 + $0x730] sm:$0xf0]  ;;  %v7641_v48 = vor.u32 %v10946_v41, %v7640_v40  ;;  %v7288_v13 = vld [vmem:[%s17473_s1 + $0x18] sm:$0xf] }
 0x103   :  { %2354 = vmatmul.bf16.vlgmr.msra.gmra.mxu1 %v12046_v55  ;;  %v11141_v21 = vld [vmem:[%s17473_s1 + $0x914] sm:$0xf]  ;;  %v8181_v28 = vor.u32 %v11077_v18, %v8178_v19  ;;  %v10922_v18 = vld [vmem:[%s17473_s1 + $0x234] sm:$0xf0] }
 0x104   :  { %2381 = vmatpush.bf16.msra.mxu3 %v7797_v49  ;;  %2402 = vmatpush.bf16.msrb.mxu1 %v8533_v51  ;;  %v8434_v23 = vld [vmem:[%s17473_s1 + $0x930] sm:$0xf0]  ;;  %v10874_v51 = vld [vmem:[%s17473_s1 + $0xb4] sm:$0xf0] }
 0x105   :  { %2388 = vmatpush.bf16.msrb.mxu0 %v8277_v50  ;;  %2368 = vmatmul.bf16.vlgmr.msra.gmra.mxu2 %v12138_v33  ;;  %v8437_v29 = vor.u32 %v11141_v21, %v8434_v23  ;;  %v11069_v31 = vld [vmem:[%s17473_s1 + $0x6d4] sm:$0xf]  ;;  %v7352_v50 = vld [vmem:[%s17473_s1 + $0x98] sm:$0xf] }
 0x106   :  { %2416 = vmatpush.bf16.msrb.mxu2 %v7513_v52  ;;  %2340 = vmatmul.bf16.vlgmr.msra.gmra.mxu0 %v12259_v32  ;;  %v8146_v34 = vld [vmem:[%s17473_s1 + $0x6f0] sm:$0xf0]  ;;  %v7608_v52 = vld [vmem:[%s17473_s1 + $0x298] sm:$0xf] }
 0x107   :  { %2382 = vmatmul.bf16.vlgmr.msra.gmra.mxu3 %v12100_v16  ;;  %v11133_v35 = vld [vmem:[%s17473_s1 + $0x8d4] sm:$0xf]  ;;  %v8149_v42 = vor.u32 %v11069_v31, %v8146_v34  ;;  %v7609_v63 = vor.u32 %v10938_v53, %v7608_v52  ;;  %v8024_v19 = vld [vmem:[%s17473_s1 + $0x5d8] sm:$0xf]  ;;  %v7514_v31 = vld [vmem:[%s17473_s1 + $0x1f8] sm:$0xf0] }
 0x108   :  { %2430 = vmatpush.bf16.msrb.mxu3 %v7769_v58  ;;  %2403 = vmatpush.bf16.msrb.mxu1 %v8501_v2  ;;  %v8402_v37 = vld [vmem:[%s17473_s1 + $0x8f0] sm:$0xf0]  ;;  %v7353_v58 = vor.u32 %v10874_v51, %v7352_v50  ;;  %v10866_v2 = vld [vmem:[%s17473_s1 + $0x74] sm:$0xf0] }
 0x109   :  { %2389 = vmatpush.bf16.msrb.mxu0 %v8245_v1  ;;  %v8405_v43 = vor.u32 %v11133_v35, %v8402_v37  ;;  %v11061_v45 = vld [vmem:[%s17473_s1 + $0x694] sm:$0xf]  ;;  %v7320_v1 = vld [vmem:[%s17473_s1 + $0x58] sm:$0xf] }
 0x10a   :  { %2417 = vmatpush.bf16.msrb.mxu2 %v7481_v3  ;;  %v8114_v46 = vld [vmem:[%s17473_s1 + $0x6b0] sm:$0xf0]  ;;  %v7576_v3 = vld [vmem:[%s17473_s1 + $0x258] sm:$0xf]  ;;  %v7321_v10 = vor.u32 %v10866_v2, %v7320_v1  ;;  %v13496_v1 = vpop.f32.mrf.mxu0  ;;  %v13498_v2 = vpop.f32.mrf.mxu3 }
 0x10b   :  { %v11125_v47 = vld [vmem:[%s17473_s1 + $0x894] sm:$0xf]  ;;  %v8117_v54 = vor.u32 %v11061_v45, %v8114_v46  ;;  %v11042_v21 = vld [vmem:[%s17473_s1 + $0x5f4] sm:$0xf0]  ;;  %v13458_v45 = vpop.f32.mrf.mxu1  ;;  %v10902_v46 = vld [vmem:[%s17473_s1 + $0x19c] sm:$0xf] }
 0x10c   :  { %2431 = vmatpush.bf16.msrb.mxu3 %v7737_v8  ;;  %2404 = vmatpush.bf16.msrb.mxu1 %v8469_v15  ;;  %v8370_v49 = vld [vmem:[%s17473_s1 + $0x8b0] sm:$0xf0]  ;;  %v10858_v15 = vld [vmem:[%s17473_s1 + $0x34] sm:$0xf0]  ;;  %v8025_v35 = vor.u32 %v11042_v21, %v8024_v19 }
 0x10d   :  { %2390 = vmatpush.bf16.msrb.mxu0 %v8213_v14  ;;  %v8373_v56 = vor.u32 %v11125_v47, %v8370_v49  ;;  %v11053_v60 = vld [vmem:[%s17473_s1 + $0x654] sm:$0xf]  ;;  %v7577_v14 = vor.u32 %v10930_v5, %v7576_v3  ;;  %v11106_v24 = vld [vmem:[%s17473_s1 + $0x7f4] sm:$0xf0]  ;;  %v7482_v47 = vld [vmem:[%s17473_s1 + $0x1b8] sm:$0xf0]  ;;  %v13466_v49 = vpop.f32.mrf.mxu2 }
 0x10e   :  { %2418 = vmatpush.bf16.msrb.mxu2 %v7449_v17  ;;  %v8082_v61 = vld [vmem:[%s17473_s1 + $0x670] sm:$0xf0]  ;;  %v7544_v17 = vld [vmem:[%s17473_s1 + $0x218] sm:$0xf] }
 0x10f   :  { %v11117_v62 = vld [vmem:[%s17473_s1 + $0x854] sm:$0xf]  ;;  %v8085_v6 = vor.u32 %v11053_v60, %v8082_v61  ;;  %v8536_v25 = vld [vmem:[%s17473_s1 + $0x9d8] sm:$0xf]  ;;  %v7545_v34 = vor.u32 %v10922_v18, %v7544_v17 }
 0x110   :  { %2432 = vmatpush.bf16.msrb.mxu3 %v7705_v22  ;;  %2405 = vmatpush.bf16.msrb.mxu1 %v8437_v29  ;;  %v8338_v0 = vld [vmem:[%s17473_s1 + $0x870] sm:$0xf0]  ;;  %v8280_v22 = vld [vmem:[%s17473_s1 + $0x7d8] sm:$0xf]  ;;  %v7289_v29 = vor.u32 %v10858_v15, %v7288_v13  ;;  %v7418_v15 = vld [vmem:[%s17473_s1 + $0x138] sm:$0xf0] }
 0x111   :  { %2391 = vmatpush.bf16.msrb.mxu0 %v8181_v28  ;;  %v11045_v7 = vld [vmem:[%s17473_s1 + $0x614] sm:$0xf]  ;;  %v8341_v9 = vor.u32 %v11117_v62, %v8338_v0  ;;  %v11170_v26 = vld [vmem:[%s17473_s1 + $0x9f4] sm:$0xf0]  ;;  %v10894_v62 = vld [vmem:[%s17473_s1 + $0x15c] sm:$0xf] }
 0x112   :  { %2419 = vmatpush.bf16.msrb.mxu2 %v7417_v30  ;;  %v8050_v8 = vld [vmem:[%s17473_s1 + $0x630] sm:$0xf0]  ;;  %v10910_v30 = vld [vmem:[%s17473_s1 + $0x1dc] sm:$0xf]  ;;  %v8537_v37 = vor.u32 %v11170_v26, %v8536_v25  ;;  %v7992_v38 = vld [vmem:[%s17473_s1 + $0x598] sm:$0xf] }
 0x113   :  { %v11109_v11 = vld [vmem:[%s17473_s1 + $0x814] sm:$0xf]  ;;  %v8053_v23 = vor.u32 %v11045_v7, %v8050_v8  ;;  %v11034_v39 = vld [vmem:[%s17473_s1 + $0x5b4] sm:$0xf0]  ;;  %v7517_v41 = vor.u32 %v10910_v30, %v7514_v31  ;;  %v13518_v13 = vpop.f32.mrf.mxu1  ;;  %v10878_v30 = vld [vmem:[%s17473_s1 + $0xdc] sm:$0xf] }
 0x114   :  { %2433 = vmatpush.bf16.msrb.mxu3 %v7673_v36  ;;  %2406 = vmatpush.bf16.msrb.mxu1 %v8405_v43  ;;  %v8306_v12 = vld [vmem:[%s17473_s1 + $0x830] sm:$0xf0]  ;;  %v8281_v36 = vor.u32 %v11106_v24, %v8280_v22  ;;  %v8248_v40 = vld [vmem:[%s17473_s1 + $0x798] sm:$0xf]  ;;  %v7386_v31 = vld [vmem:[%s17473_s1 + $0xf8] sm:$0xf0] }
 0x115   :  { %2392 = vmatpush.bf16.msrb.mxu0 %v8149_v42  ;;  %v8309_v28 = vor.u32 %v11109_v11, %v8306_v12  ;;  %v11098_v42 = vld [vmem:[%s17473_s1 + $0x7b4] sm:$0xf0]  ;;  %v13526_v18 = vpop.f32.mrf.mxu2 }
 0x116   :  { %2420 = vmatpush.bf16.msrb.mxu2 %v7385_v44  ;;  %v8504_v43 = vld [vmem:[%s17473_s1 + $0x998] sm:$0xf]  ;;  %v8249_v50 = vor.u32 %v11098_v42, %v8248_v40 }
 0x117   :  { %v11162_v44 = vld [vmem:[%s17473_s1 + $0x9b4] sm:$0xf0] }
 0x118   :  { %2434 = vmatpush.bf16.msrb.mxu3 %v7641_v48  ;;  %2407 = vmatpush.bf16.msrb.mxu1 %v8373_v56  ;;  %v7993_v48 = vor.u32 %v11034_v39, %v7992_v38  ;;  %v8505_v51 = vor.u32 %v11162_v44, %v8504_v43  ;;  %v7960_v52 = vld [vmem:[%s17473_s1 + $0x558] sm:$0xf]  ;;  %v7485_v56 = vor.u32 %v10902_v46, %v7482_v47  ;;  %v13572_v46 = vpop.f32.mrf.mxu0  ;;  %v10870_v47 = vld [vmem:[%s17473_s1 + $0x9c] sm:$0xf] }
 0x119   :  { %2393 = vmatpush.bf16.msrb.mxu0 %v8117_v54  ;;  %v11026_v53 = vld [vmem:[%s17473_s1 + $0x574] sm:$0xf0] }
 0x11a   :  { %2421 = vmatpush.bf16.msrb.mxu2 %v7353_v58  ;;  %v8216_v54 = vld [vmem:[%s17473_s1 + $0x758] sm:$0xf]  ;;  %v7961_v0 = vor.u32 %v11026_v53, %v7960_v52 }
 0x11b   :  { %v11090_v58 = vld [vmem:[%s17473_s1 + $0x774] sm:$0xf0] }
 0x11c   :  { %2435 = vmatpush.bf16.msrb.mxu3 %v7609_v63  ;;  %2408 = vmatpush.bf16.msrb.mxu1 %v8341_v9  ;;  %v8472_v60 = vld [vmem:[%s17473_s1 + $0x958] sm:$0xf]  ;;  %v7450_v63 = vld [vmem:[%s17473_s1 + $0x178] sm:$0xf0]  ;;  %v8217_v3 = vor.u32 %v11090_v58, %v8216_v54 }
 0x11d   :  { %2394 = vmatpush.bf16.msrb.mxu0 %v8085_v6  ;;  %v11154_v61 = vld [vmem:[%s17473_s1 + $0x974] sm:$0xf0]  ;;  %v7453_v9 = vor.u32 %v10894_v62, %v7450_v63 }
 0x11e   :  { %2422 = vmatpush.bf16.msrb.mxu2 %v7321_v10  ;;  %v8473_v5 = vor.u32 %v11154_v61, %v8472_v60  ;;  %v7928_v6 = vld [vmem:[%s17473_s1 + $0x518] sm:$0xf] }
 0x11f   :  { %v11018_v7 = vld [vmem:[%s17473_s1 + $0x534] sm:$0xf0] }
 0x120   :  { %2436 = vmatpush.bf16.msrb.mxu3 %v7577_v14  ;;  %2409 = vmatpush.bf16.msrb.mxu1 %v8309_v28  ;;  %v8184_v8 = vld [vmem:[%s17473_s1 + $0x718] sm:$0xf]  ;;  %v10886_v14 = vld [vmem:[%s17473_s1 + $0x11c] sm:$0xf]  ;;  %v7929_v17 = vor.u32 %v11018_v7, %v7928_v6 }
 0x121   :  { %2395 = vmatpush.bf16.msrb.mxu0 %v8053_v23  ;;  %v11082_v10 = vld [vmem:[%s17473_s1 + $0x734] sm:$0xf0]  ;;  %v7421_v25 = vor.u32 %v10886_v14, %v7418_v15 }
 0x122   :  { %2423 = vmatpush.bf16.msrb.mxu2 %v7289_v29  ;;  %v8440_v11 = vld [vmem:[%s17473_s1 + $0x918] sm:$0xf]  ;;  %v8185_v19 = vor.u32 %v11082_v10, %v8184_v8 }
 0x123   :  { %2410 = vmatmul.bf16.vlgmr.msrb.gmra.mxu1 %v12259_v32  ;;  %v11146_v12 = vld [vmem:[%s17473_s1 + $0x934] sm:$0xf0] }
 0x124   :  { %2437 = vmatpush.bf16.msrb.mxu3 %v7545_v34  ;;  %2458 = vmatpush.bf16.msra.mxu1 %v8281_v36  ;;  %v8441_v21 = vor.u32 %v11146_v12, %v8440_v11  ;;  %v7896_v22 = vld [vmem:[%s17473_s1 + $0x4d8] sm:$0xf] }
 0x125   :  { %2444 = vmatpush.bf16.msra.mxu0 %v8025_v35  ;;  %2424 = vmatmul.bf16.vlgmr.msrb.gmra.mxu2 %v12046_v55  ;;  %v11010_v23 = vld [vmem:[%s17473_s1 + $0x4f4] sm:$0xf0]  ;;  %v13552_v35 = vpop.f32.mrf.mxu3 }
 0x126   :  { %2472 = vmatpush.bf16.msra.mxu2 %v8537_v37  ;;  %2396 = vmatmul.bf16.vlgmr.msrb.gmra.mxu0 %v12111_v20  ;;  %v8152_v24 = vld [vmem:[%s17473_s1 + $0x6d8] sm:$0xf]  ;;  %v7897_v34 = vor.u32 %v11010_v23, %v7896_v22  ;;  %v13632_v22 = vpop.f32.mrf.mxu0 }
 0x127   :  { %2438 = vmatmul.bf16.vlgmr.msrb.gmra.mxu3 %v12138_v33  ;;  %v11074_v26 = vld [vmem:[%s17473_s1 + $0x6f4] sm:$0xf0] }
 0x128   :  { %2486 = vmatpush.bf16.msra.mxu3 %v7517_v41  ;;  %2459 = vmatpush.bf16.msra.mxu1 %v8249_v50  ;;  %v8408_v28 = vld [vmem:[%s17473_s1 + $0x8d8] sm:$0xf]  ;;  %v8153_v36 = vor.u32 %v11074_v26, %v8152_v24  ;;  %v7389_v41 = vor.u32 %v10878_v30, %v7386_v31  ;;  %v10974_v24 = vld [vmem:[%s17473_s1 + $0x3dc] sm:$0xf] }
 0x129   :  { %2445 = vmatpush.bf16.msra.mxu0 %v7993_v48  ;;  %v11138_v29 = vld [vmem:[%s17473_s1 + $0x8f4] sm:$0xf0]  ;;  %v7354_v48 = vld [vmem:[%s17473_s1 + $0xb8] sm:$0xf0] }
 0x12a   :  { %2473 = vmatpush.bf16.msra.mxu2 %v8505_v51  ;;  %v8409_v37 = vor.u32 %v11138_v29, %v8408_v28  ;;  %v7864_v38 = vld [vmem:[%s17473_s1 + $0x498] sm:$0xf]  ;;  %v13580_v51 = vpop.f32.mrf.mxu1  ;;  %v7357_v60 = vor.u32 %v10870_v47, %v7354_v48  ;;  %v11038_v26 = vld [vmem:[%s17473_s1 + $0x5dc] sm:$0xf] }
 0x12b   :  { %v11002_v39 = vld [vmem:[%s17473_s1 + $0x4b4] sm:$0xf0]  ;;  %v8026_v29 = vld [vmem:[%s17473_s1 + $0x5f8] sm:$0xf0] }
 0x12c   :  { %2487 = vmatpush.bf16.msra.mxu3 %v7485_v56  ;;  %2460 = vmatpush.bf16.msra.mxu1 %v8217_v3  ;;  %v8120_v40 = vld [vmem:[%s17473_s1 + $0x698] sm:$0xf]  ;;  %v7865_v50 = vor.u32 %v11002_v39, %v7864_v38  ;;  %v10862_v3 = vld [vmem:[%s17473_s1 + $0x5c] sm:$0xf] }
 0x12d   :  { %2446 = vmatpush.bf16.msra.mxu0 %v7961_v0  ;;  %v11066_v42 = vld [vmem:[%s17473_s1 + $0x6b4] sm:$0xf0]  ;;  %v13600_v0 = vpop.f32.mrf.mxu2  ;;  %v13634_v23 = vpop.f32.mrf.mxu3  ;;  %v11102_v30 = vld [vmem:[%s17473_s1 + $0x7dc] sm:$0xf] }
 0x12e   :  { %2474 = vmatpush.bf16.msra.mxu2 %v8473_v5  ;;  %v8376_v43 = vld [vmem:[%s17473_s1 + $0x898] sm:$0xf]  ;;  %v8121_v52 = vor.u32 %v11066_v42, %v8120_v40  ;;  %v7322_v5 = vld [vmem:[%s17473_s1 + $0x78] sm:$0xf0] }
 0x12f   :  { %v11130_v44 = vld [vmem:[%s17473_s1 + $0x8b4] sm:$0xf0]  ;;  %v7325_v15 = vor.u32 %v10862_v3, %v7322_v5  ;;  %v8282_v31 = vld [vmem:[%s17473_s1 + $0x7f8] sm:$0xf0] }
 0x130   :  { %2488 = vmatpush.bf16.msra.mxu3 %v7453_v9  ;;  %2461 = vmatpush.bf16.msra.mxu1 %v8185_v19  ;;  %v8377_v53 = vor.u32 %v11130_v44, %v8376_v43  ;;  %v7832_v54 = vld [vmem:[%s17473_s1 + $0x458] sm:$0xf]  ;;  %v10854_v19 = vld [vmem:[%s17473_s1 + $0x1c] sm:$0xf]  ;;  %v8029_v43 = vor.u32 %v11038_v26, %v8026_v29  ;;  %v8285_v44 = vor.u32 %v11102_v30, %v8282_v31 }
 0x131   :  { %2447 = vmatpush.bf16.msra.mxu0 %v7929_v17  ;;  %v10994_v56 = vld [vmem:[%s17473_s1 + $0x474] sm:$0xf0]  ;;  %v8538_v38 = vld [vmem:[%s17473_s1 + $0x9f8] sm:$0xf0] }
 0x132   :  { %2475 = vmatpush.bf16.msra.mxu2 %v8441_v21  ;;  %v8088_v58 = vld [vmem:[%s17473_s1 + $0x658] sm:$0xf]  ;;  %v7833_v6 = vor.u32 %v10994_v56, %v7832_v54  ;;  %v7290_v21 = vld [vmem:[%s17473_s1 + $0x38] sm:$0xf0] }
 0x133   :  { %v11058_v61 = vld [vmem:[%s17473_s1 + $0x674] sm:$0xf0]  ;;  %v7293_v39 = vor.u32 %v10854_v19, %v7290_v21  ;;  %v10966_v47 = vld [vmem:[%s17473_s1 + $0x39c] sm:$0xf] }
 0x134   :  { %2489 = vmatpush.bf16.msra.mxu3 %v7421_v25  ;;  %2462 = vmatpush.bf16.msra.mxu1 %v8153_v36  ;;  %v8344_v62 = vld [vmem:[%s17473_s1 + $0x858] sm:$0xf]  ;;  %v8089_v9 = vor.u32 %v11058_v61, %v8088_v58  ;;  %v7770_v25 = vld [vmem:[%s17473_s1 + $0x3f8] sm:$0xf0] }
 0x135   :  { %2448 = vmatpush.bf16.msra.mxu0 %v7897_v34  ;;  %v11122_v63 = vld [vmem:[%s17473_s1 + $0x874] sm:$0xf0]  ;;  %v7773_v40 = vor.u32 %v10974_v24, %v7770_v25  ;;  %v13662_v42 = vpop.f32.mrf.mxu2  ;;  %v7738_v48 = vld [vmem:[%s17473_s1 + $0x3b8] sm:$0xf0] }
 0x136   :  { %2476 = vmatpush.bf16.msra.mxu2 %v8409_v37  ;;  %v7800_v7 = vld [vmem:[%s17473_s1 + $0x418] sm:$0xf]  ;;  %v8345_v10 = vor.u32 %v11122_v63, %v8344_v62  ;;  %v11166_v37 = vld [vmem:[%s17473_s1 + $0x9dc] sm:$0xf]  ;;  %v7741_v61 = vor.u32 %v10966_v47, %v7738_v48  ;;  %v13688_v62 = vpop.f32.mrf.mxu3 }
 0x137   :  { %v10986_v8 = vld [vmem:[%s17473_s1 + $0x434] sm:$0xf0]  ;;  %v11094_v54 = vld [vmem:[%s17473_s1 + $0x79c] sm:$0xf] }
 0x138   :  { %2490 = vmatpush.bf16.msra.mxu3 %v7389_v41  ;;  %2463 = vmatpush.bf16.msra.mxu1 %v8121_v52  ;;  %v8056_v11 = vld [vmem:[%s17473_s1 + $0x618] sm:$0xf]  ;;  %v7801_v28 = vor.u32 %v10986_v8, %v7800_v7  ;;  %v13660_v41 = vpop.f32.mrf.mxu1  ;;  %v8541_v52 = vor.u32 %v11166_v37, %v8538_v38  ;;  %v8250_v56 = vld [vmem:[%s17473_s1 + $0x7b8] sm:$0xf0] }
 0x139   :  { %2449 = vmatpush.bf16.msra.mxu0 %v7865_v50  ;;  %v11050_v12 = vld [vmem:[%s17473_s1 + $0x634] sm:$0xf0]  ;;  %v11030_v50 = vld [vmem:[%s17473_s1 + $0x59c] sm:$0xf]  ;;  %v8253_v3 = vor.u32 %v11094_v54, %v8250_v56 }
 0x13a   :  { %2477 = vmatpush.bf16.msra.mxu2 %v8377_v53  ;;  %v8312_v14 = vld [vmem:[%s17473_s1 + $0x818] sm:$0xf]  ;;  %v8057_v34 = vor.u32 %v11050_v12, %v8056_v11  ;;  %v7994_v53 = vld [vmem:[%s17473_s1 + $0x5b8] sm:$0xf0]  ;;  %v13709_v12 = vpop.f32.mrf.mxu0 }
 0x13b   :  { %v11114_v17 = vld [vmem:[%s17473_s1 + $0x834] sm:$0xf0]  ;;  %v11158_v58 = vld [vmem:[%s17473_s1 + $0x99c] sm:$0xf]  ;;  %v7997_v63 = vor.u32 %v11030_v50, %v7994_v53 }
 0x13c   :  { %2491 = vmatpush.bf16.msra.mxu3 %v7357_v60  ;;  %2464 = vmatpush.bf16.msra.mxu1 %v8089_v9  ;;  %v8313_v36 = vor.u32 %v11114_v17, %v8312_v14  ;;  %v8506_v60 = vld [vmem:[%s17473_s1 + $0x9b8] sm:$0xf0] }
 0x13d   :  { %2450 = vmatpush.bf16.msra.mxu0 %v7833_v6  ;;  %v10958_v5 = vld [vmem:[%s17473_s1 + $0x35c] sm:$0xf]  ;;  %v8509_v8 = vor.u32 %v11158_v58, %v8506_v60 }
 0x13e   :  { %2478 = vmatpush.bf16.msra.mxu2 %v8345_v10  ;;  %v7706_v6 = vld [vmem:[%s17473_s1 + $0x378] sm:$0xf0]  ;;  %v13768_v56 = vpop.f32.mrf.mxu3 }
 0x13f   :  { %v11022_v7 = vld [vmem:[%s17473_s1 + $0x55c] sm:$0xf]  ;;  %v7709_v17 = vor.u32 %v10958_v5, %v7706_v6 }
 0x140   :  { %2492 = vmatpush.bf16.msra.mxu3 %v7325_v15  ;;  %2465 = vmatpush.bf16.msra.mxu1 %v8057_v34  ;;  %v7962_v9 = vld [vmem:[%s17473_s1 + $0x578] sm:$0xf0]  ;;  %v13738_v31 = vpop.f32.mrf.mxu1  ;;  %v13740_v34 = vpop.f32.mrf.mxu2 }
 0x141   :  { %2451 = vmatpush.bf16.msra.mxu0 %v7801_v28  ;;  %v11086_v10 = vld [vmem:[%s17473_s1 + $0x75c] sm:$0xf]  ;;  %v7965_v19 = vor.u32 %v11022_v7, %v7962_v9 }
 0x142   :  { %2479 = vmatpush.bf16.msra.mxu2 %v8313_v36  ;;  %v8218_v11 = vld [vmem:[%s17473_s1 + $0x778] sm:$0xf0]  ;;  %v13766_v54 = vpop.f32.mrf.mxu0 }
 0x143   :  { %2466 = vmatmul.bf16.vlgmr.msra.gmra.mxu1 %v12111_v20  ;;  %v11150_v14 = vld [vmem:[%s17473_s1 + $0x95c] sm:$0xf]  ;;  %v8221_v21 = vor.u32 %v11086_v10, %v8218_v11 }
 0x144   :  { %2493 = vmatpush.bf16.msra.mxu3 %v7293_v39  ;;  %2514 = vmatpush.bf16.msrb.mxu1 %v8029_v43  ;;  %v8474_v15 = vld [vmem:[%s17473_s1 + $0x978] sm:$0xf0] }
 0x145   :  { %2500 = vmatpush.bf16.msrb.mxu0 %v7773_v40  ;;  %2480 = vmatmul.bf16.vlgmr.msra.gmra.mxu2 %v12259_v32  ;;  %v10950_v24 = vld [vmem:[%s17473_s1 + $0x31c] sm:$0xf]  ;;  %v8477_v28 = vor.u32 %v11150_v14, %v8474_v15 }
 0x146   :  { %2528 = vmatpush.bf16.msrb.mxu2 %v8285_v44  ;;  %2452 = vmatmul.bf16.vlgmr.msra.gmra.mxu0 %v12100_v16  ;;  %v7674_v25 = vld [vmem:[%s17473_s1 + $0x338] sm:$0xf0] }
 0x147   :  { %2494 = vmatmul.bf16.vlgmr.msra.gmra.mxu3 %v12046_v55  ;;  %v11014_v26 = vld [vmem:[%s17473_s1 + $0x51c] sm:$0xf]  ;;  %v7677_v38 = vor.u32 %v10950_v24, %v7674_v25 }
 0x148   :  { %2542 = vmatpush.bf16.msrb.mxu3 %v8541_v52  ;;  %2515 = vmatpush.bf16.msrb.mxu1 %v7997_v63  ;;  %v7930_v55 = vld [vmem:[%s17473_s1 + $0x538] sm:$0xf0]  ;;  %v13794_v14 = vpop.f32.mrf.mxu1 }
 0x149   :  { %2501 = vmatpush.bf16.msrb.mxu0 %v7741_v61  ;;  %v11078_v29 = vld [vmem:[%s17473_s1 + $0x71c] sm:$0xf]  ;;  %v7933_v39 = vor.u32 %v11014_v26, %v7930_v55 }
 0x14a   :  { %2529 = vmatpush.bf16.msrb.mxu2 %v8253_v3  ;;  %v8186_v30 = vld [vmem:[%s17473_s1 + $0x738] sm:$0xf0] }
 0x14b   :  { %v11142_v36 = vld [vmem:[%s17473_s1 + $0x91c] sm:$0xf]  ;;  %v8189_v40 = vor.u32 %v11078_v29, %v8186_v30 }
 0x14c   :  { %2543 = vmatpush.bf16.msrb.mxu3 %v8509_v8  ;;  %v8442_v37 = vld [vmem:[%s17473_s1 + $0x938] sm:$0xf0]  ;;  %2516 = vmatpush.bf16.msrb.mxu1 %v7965_v19 }
 0x14d   :  { %2502 = vmatpush.bf16.msrb.mxu0 %v7709_v17  ;;  %v10942_v43 = vld [vmem:[%s17473_s1 + $0x2dc] sm:$0xf]  ;;  %v8445_v48 = vor.u32 %v11142_v36, %v8442_v37 }
 0x14e   :  { %2530 = vmatpush.bf16.msrb.mxu2 %v8221_v21  ;;  %v7642_v44 = vld [vmem:[%s17473_s1 + $0x2f8] sm:$0xf0]  ;;  %v13802_v21 = vpop.f32.mrf.mxu2 }
 0x14f   :  { %v11006_v47 = vld [vmem:[%s17473_s1 + $0x4dc] sm:$0xf]  ;;  %v7645_v61 = vor.u32 %v10942_v43, %v7642_v44 }
 0x150   :  { %2544 = vmatpush.bf16.msrb.mxu3 %v8477_v28  ;;  %v7898_v50 = vld [vmem:[%s17473_s1 + $0x4f8] sm:$0xf0]  ;;  %2517 = vmatpush.bf16.msrb.mxu1 %v7933_v39 }
 0x151   :  { %v11070_v52 = vld [vmem:[%s17473_s1 + $0x6dc] sm:$0xf]  ;;  %2503 = vmatpush.bf16.msrb.mxu0 %v7677_v38  ;;  %v7901_v63 = vor.u32 %v11006_v47, %v7898_v50  ;;  %v13822_v38 = vpop.f32.mrf.mxu3 }
 0x152   :  { %v8154_v53 = vld [vmem:[%s17473_s1 + $0x6f8] sm:$0xf0]  ;;  %2531 = vmatpush.bf16.msrb.mxu2 %v8189_v40 }
 0x153   :  { %v11134_v58 = vld [vmem:[%s17473_s1 + $0x8dc] sm:$0xf]  ;;  %v8157_v3 = vor.u32 %v11070_v52, %v8154_v53 }
 0x154   :  { %v8410_v60 = vld [vmem:[%s17473_s1 + $0x8f8] sm:$0xf0]  ;;  %2545 = vmatpush.bf16.msrb.mxu3 %v8445_v48  ;;  %2518 = vmatpush.bf16.msrb.mxu1 %v7901_v63  ;;  %v13836_v48 = vpop.f32.mrf.mxu0 }
 0x155   :  { %v10934_v5 = vld [vmem:[%s17473_s1 + $0x29c] sm:$0xf]  ;;  %v8413_v8 = vor.u32 %v11134_v58, %v8410_v60  ;;  %2504 = vmatpush.bf16.msrb.mxu0 %v7645_v61 }
 0x156   :  { %v7610_v6 = vld [vmem:[%s17473_s1 + $0x2b8] sm:$0xf0]  ;;  %2532 = vmatpush.bf16.msrb.mxu2 %v8157_v3 }
 0x157   :  { %v10998_v7 = vld [vmem:[%s17473_s1 + $0x49c] sm:$0xf]  ;;  %v7613_v19 = vor.u32 %v10934_v5, %v7610_v6  ;;  %v8768_v6 = vld [vmem:[%s17476_s3 + $0x1c0] sm:$0xf] }
 0x158   :  { %v7866_v9 = vld [vmem:[%s17473_s1 + $0x4b8] sm:$0xf0]  ;;  %2546 = vmatpush.bf16.msrb.mxu3 %v8413_v8  ;;  %v9024_v8 = vld [vmem:[%s17476_s3 + $0x3c0] sm:$0xf] }
 0x159   :  { %v11062_v10 = vld [vmem:[%s17473_s1 + $0x69c] sm:$0xf]  ;;  %v7869_v24 = vor.u32 %v10998_v7, %v7866_v9  ;;  %2505 = vmatpush.bf16.msrb.mxu0 %v7613_v19  ;;  %v11231_v7 = vld [vmem:[%s17476_s3 + $0x1dc] sm:$0xf0] }
 0x15a   :  { %v8122_v11 = vld [vmem:[%s17473_s1 + $0x6b8] sm:$0xf0] }
 0x15b   :  { %v11126_v15 = vld [vmem:[%s17473_s1 + $0x89c] sm:$0xf]  ;;  %v8125_v25 = vor.u32 %v11062_v10, %v8122_v11  ;;  %2519 = vmatpush.bf16.msrb.mxu1 %v7869_v24  ;;  %v11295_v10 = vld [vmem:[%s17476_s3 + $0x3dc] sm:$0xf0] }
 0x15c   :  { %v8378_v17 = vld [vmem:[%s17473_s1 + $0x8b8] sm:$0xf0]  ;;  %v9280_v11 = vld [vmem:[%s17476_s3 + $0x5c0] sm:$0xf] }
 0x15d   :  { %v10926_v26 = vld [vmem:[%s17473_s1 + $0x25c] sm:$0xf]  ;;  %v8381_v29 = vor.u32 %v11126_v15, %v8378_v17  ;;  %2533 = vmatpush.bf16.msrb.mxu2 %v8125_v25  ;;  %v11359_v15 = vld [vmem:[%s17476_s3 + $0x5dc] sm:$0xf0]  ;;  %v13874_v17 = vpop.f32.mrf.mxu1 }
 0x15e   :  { %v7578_v28 = vld [vmem:[%s17473_s1 + $0x278] sm:$0xf0]  ;;  %v9536_v25 = vld [vmem:[%s17476_s3 + $0x7c0] sm:$0xf] }
 0x15f   :  { %v10990_v55 = vld [vmem:[%s17473_s1 + $0x45c] sm:$0xf]  ;;  %v7581_v43 = vor.u32 %v10926_v26, %v7578_v28  ;;  %2547 = vmatpush.bf16.msrb.mxu3 %v8381_v29  ;;  %v11423_v26 = vld [vmem:[%s17476_s3 + $0x7dc] sm:$0xf0]  ;;  %v13882_v29 = vpop.f32.mrf.mxu2 }
 0x160   :  { %v7834_v30 = vld [vmem:[%s17473_s1 + $0x478] sm:$0xf0] }
 0x161   :  { %v11054_v36 = vld [vmem:[%s17473_s1 + $0x65c] sm:$0xf]  ;;  %v7837_v50 = vor.u32 %v10990_v55, %v7834_v30  ;;  %2506 = vmatpush.bf16.msrb.mxu0 %v7581_v43  ;;  %v8769_v55 = vor.u32 %v11231_v7, %v8768_v6  ;;  %v9025_v30 = vor.u32 %v11295_v10, %v9024_v8  ;;  %v9537_v43 = vor.u32 %v11423_v26, %v9536_v25  ;;  %v8704_v6 = vld [vmem:[%s17476_s3 + $0x140] sm:$0xf] }
 0x162   :  { %v8090_v37 = vld [vmem:[%s17473_s1 + $0x678] sm:$0xf0]  ;;  %v11215_v7 = vld [vmem:[%s17476_s3 + $0x15c] sm:$0xf0] }
 0x163   :  { %v11118_v39 = vld [vmem:[%s17473_s1 + $0x85c] sm:$0xf]  ;;  %v8093_v52 = vor.u32 %v11054_v36, %v8090_v37  ;;  %2520 = vmatpush.bf16.msrb.mxu1 %v7837_v50  ;;  %v9281_v36 = vor.u32 %v11359_v15, %v9280_v11  ;;  %v8736_v37 = vld [vmem:[%s17476_s3 + $0x180] sm:$0xf] }
 0x164   :  { %v8346_v40 = vld [vmem:[%s17473_s1 + $0x878] sm:$0xf0]  ;;  %v11351_v50 = vld [vmem:[%s17476_s3 + $0x59c] sm:$0xf0] }
 0x165   :  { %v10918_v44 = vld [vmem:[%s17473_s1 + $0x21c] sm:$0xf]  ;;  %v8349_v61 = vor.u32 %v11118_v39, %v8346_v40  ;;  %2534 = vmatpush.bf16.msrb.mxu2 %v8093_v52  ;;  %v11223_v39 = vld [vmem:[%s17476_s3 + $0x19c] sm:$0xf0]  ;;  %v2008_v52 = vadd.f32 %v13432_v27, %v354_v4 }
 0x166   :  { %v7546_v47 = vld [vmem:[%s17473_s1 + $0x238] sm:$0xf0]  ;;  %v8992_v40 = vld [vmem:[%s17476_s3 + $0x380] sm:$0xf]  ;;  %v8737_v27 = vor.u32 %v11223_v39, %v8736_v37 }
 0x167   :  { %v10982_v53 = vld [vmem:[%s17473_s1 + $0x41c] sm:$0xf]  ;;  %v7549_v9 = vor.u32 %v10918_v44, %v7546_v47  ;;  %2548 = vmatpush.bf16.msrb.mxu3 %v8349_v61  ;;  %v11287_v44 = vld [vmem:[%s17476_s3 + $0x39c] sm:$0xf0]  ;;  %v13911_v61 = vpop.f32.mrf.mxu0 }
 0x168   :  { %v7802_v58 = vld [vmem:[%s17473_s1 + $0x438] sm:$0xf0]  ;;  %v9248_v47 = vld [vmem:[%s17476_s3 + $0x580] sm:$0xf] }
 0x169   :  { %v11046_v60 = vld [vmem:[%s17473_s1 + $0x61c] sm:$0xf]  ;;  %v7805_v19 = vor.u32 %v10982_v53, %v7802_v58  ;;  %2507 = vmatpush.bf16.msrb.mxu0 %v7549_v9  ;;  %v13908_v53 = vld [vmem:[%s17475_s2] sm:$0xff] }
 0x16a   :  { %v8058_v63 = vld [vmem:[%s17473_s1 + $0x638] sm:$0xf0]  ;;  %v355_v58 = vperm.slane %v13908_v53, 1  ;;  %v356_v4 = vperm.slane %v13908_v53, 2  ;;  %v8960_v8 = vld [vmem:[%s17476_s3 + $0x340] sm:$0xf] }
 0x16b   :  { %v11110_v3 = vld [vmem:[%s17473_s1 + $0x81c] sm:$0xf]  ;;  %v8061_v24 = vor.u32 %v11046_v60, %v8058_v63  ;;  %v2217_v60 = vpop.f32.mrf.mxu3  ;;  %2521 = vmatpush.bf16.msrb.mxu1 %v7805_v19  ;;  %v9504_v63 = vld [vmem:[%s17476_s3 + $0x780] sm:$0xf]  ;;  %v2022_v19 = vadd.f32 %v13458_v45, %v2008_v52 }
 0x16c   :  { %v8314_v5 = vld [vmem:[%s17473_s1 + $0x838] sm:$0xf0]  ;;  %2508 = vmatmul.bf16.vlgmr.msrb.gmra.mxu0 %v12138_v33  ;;  %v9505_v9 = vor.u32 %v11415_v57, %v9504_v63  ;;  %v11279_v10 = vld [vmem:[%s17476_s3 + $0x35c] sm:$0xf0]  ;;  %v2078_v25 = vadd.f32 %v13580_v51, %v355_v58  ;;  %v13942_v33 = vpop.f32.mrf.mxu1  ;;  %v2146_v45 = vadd.f32 %v13662_v42, %v356_v4  ;;  %v8705_v51 = vor.u32 %v11215_v7, %v8704_v6 }
 0x16d   :  { %v8317_v28 = vor.u32 %v11110_v3, %v8314_v5  ;;  %2535 = vmatpush.bf16.msrb.mxu2 %v8061_v24  ;;  %5670 = vmatpush.bf16.msra.mxu0 %v8769_v55  ;;  %v8993_v3 = vor.u32 %v11287_v44, %v8992_v40  ;;  %v9249_v5 = vor.u32 %v11351_v50, %v9248_v47  ;;  %v9216_v11 = vld [vmem:[%s17476_s3 + $0x540] sm:$0xf]  ;;  %v13955_v55 = vpop.f32.mrf.mxu2 }
 0x16e   :  { %v11343_v15 = vld [vmem:[%s17476_s3 + $0x55c] sm:$0xf0]  ;;  %v2076_v24 = vadd.f32 %v13518_v13, %v355_v58  ;;  %2522 = vmatmul.bf16.vlgmr.msrb.gmra.mxu1 %v12100_v16  ;;  %v357_v13 = vperm.slane %v13908_v53, 3  ;;  %v8961_v16 = vor.u32 %v11279_v10, %v8960_v8  ;;  %v2092_v47 = vadd.f32 %v13600_v0, %v2078_v25 }
 0x16f   :  { %2549 = vmatpush.bf16.msrb.mxu3 %v8317_v28  ;;  %5684 = vmatpush.bf16.msra.mxu1 %v9025_v30  ;;  %v9472_v26 = vld [vmem:[%s17476_s3 + $0x740] sm:$0xf]  ;;  %v2148_v58 = vadd.f32 %v13740_v34, %v356_v4  ;;  %v2160_v63 = vadd.f32 %v13688_v62, %v2146_v45 }
 0x170   :  { %2536 = vmatmul.bf16.vlgmr.msrb.gmra.mxu2 %v12111_v20  ;;  %v11407_v28 = vld [vmem:[%s17476_s3 + $0x75c] sm:$0xf0]  ;;  %v9217_v20 = vor.u32 %v11343_v15, %v9216_v11  ;;  %v2090_v44 = vadd.f32 %v13526_v18, %v2076_v24  ;;  %v2218_v57 = vadd.f32 %v2217_v60, %v357_v13  ;;  %v2231_v18 = vpop.f32.mrf.mxu0  ;;  %v2106_v10 = vadd.f32 %v13634_v23, %v2092_v47 }
 0x171   :  { %5698 = vmatpush.bf16.msra.mxu2 %v9281_v36  ;;  %5671 = vmatpush.bf16.msra.mxu0 %v8737_v27  ;;  %v8672_v30 = vld [vmem:[%s17476_s3 + $0x100] sm:$0xf]  ;;  %v9473_v36 = vor.u32 %v11407_v28, %v9472_v26  ;;  %v2162_v24 = vadd.f32 %v13768_v56, %v2148_v58 }
 0x172   :  { %2550 = vmatmul.bf16.vlgmr.msrb.gmra.mxu3 %v12259_v32  ;;  %v11207_v42 = vld [vmem:[%s17476_s3 + $0x11c] sm:$0xf0]  ;;  %v2232_v25 = vadd.f32 %v2231_v18, %v2218_v57 }
 0x173   :  { %5712 = vmatpush.bf16.msra.mxu3 %v9537_v43  ;;  %5685 = vmatpush.bf16.msra.mxu1 %v8993_v3  ;;  %v8928_v32 = vld [vmem:[%s17476_s3 + $0x300] sm:$0xf]  ;;  %v2036_v43 = vadd.f32 %v13466_v49, %v2022_v19  ;;  %v8673_v27 = vor.u32 %v11207_v42, %v8672_v30  ;;  %v2216_v49 = vadd.f32 %v13822_v38, %v357_v13  ;;  %v13987_v3 = vpop.f32.mrf.mxu3 }
 0x174   :  { %v11271_v37 = vld [vmem:[%s17476_s3 + $0x31c] sm:$0xf0]  ;;  %v2174_v19 = vadd.f32 %v13766_v54, %v2160_v63 }
 0x175   :  { %5699 = vmatpush.bf16.msra.mxu2 %v9249_v5  ;;  %v9184_v39 = vld [vmem:[%s17476_s3 + $0x500] sm:$0xf]  ;;  %5672 = vmatpush.bf16.msra.mxu0 %v8705_v51  ;;  %v8929_v0 = vor.u32 %v11271_v37, %v8928_v32  ;;  %v2050_v8 = vadd.f32 %v13498_v2, %v2036_v43  ;;  %v2230_v2 = vadd.f32 %v13911_v61, %v2216_v49 }
 0x176   :  { %v11335_v40 = vld [vmem:[%s17476_s3 + $0x51c] sm:$0xf0]  ;;  %v2120_v32 = vadd.f32 %v13709_v12, %v2106_v10 }
 0x177   :  { %5713 = vmatpush.bf16.msra.mxu3 %v9505_v9  ;;  %v9440_v50 = vld [vmem:[%s17476_s3 + $0x700] sm:$0xf]  ;;  %5686 = vmatpush.bf16.msra.mxu1 %v8961_v16  ;;  %v9185_v5 = vor.u32 %v11335_v40, %v9184_v39  ;;  %v2104_v9 = vadd.f32 %v13552_v35, %v2090_v44  ;;  %v2245_v35 = vpop.f32.mrf.mxu1  ;;  %v14042_v30 = vadd.f32 %v13572_v46, %v2050_v8 }
 0x178   :  { %v11399_v52 = vld [vmem:[%s17476_s3 + $0x71c] sm:$0xf0]  ;;  %v2188_v40 = vadd.f32 %v13794_v14, %v2174_v19 }
 0x179   :  { %5700 = vmatpush.bf16.msra.mxu2 %v9217_v20  ;;  %v8640_v6 = vld [vmem:[%s17476_s3 + $0xc0] sm:$0xf]  ;;  %v9441_v38 = vor.u32 %v11399_v52, %v9440_v50  ;;  %5673 = vmatpush.bf16.msra.mxu0 %v8673_v27  ;;  %v14039_v20 = vadd.f32 %v13496_v1, %v13029_v59  ;;  %v2118_v42 = vadd.f32 %v13632_v22, %v2104_v9  ;;  %v2564_v27 = vmax.f32 %v14042_v30, 0.0 }
 0x17a   :  { %v11199_v62 = vld [vmem:[%s17476_s3 + $0xdc] sm:$0xf0]  ;;  %v2176_v59 = vadd.f32 %v13836_v48, %v2162_v24  ;;  %v2246_v1 = vadd.f32 %v2245_v35, %v2232_v25  ;;  %v2244_v22 = vadd.f32 %v13942_v33, %v2230_v2  ;;  %v14064_v33 = vpop.f32.mrf.mxu0 }
 0x17b   :  { %v8896_v34 = vld [vmem:[%s17476_s3 + $0x2c0] sm:$0xf]  ;;  %5714 = vmatpush.bf16.msra.mxu3 %v9473_v36  ;;  %v8641_v26 = vor.u32 %v11199_v62, %v8640_v6  ;;  %5687 = vmatpush.bf16.msra.mxu1 %v8929_v0  ;;  %v2259_v36 = vpop.f32.mrf.mxu2  ;;  %v2556_v57 = vmax.f32 %v14039_v20, 0.0  ;;  %v2132_v49 = vadd.f32 %v13660_v41, %v2118_v42  ;;  %v2273_v18 = vpop.f32.mrf.mxu3  ;;  %v2134_v6 = vadd.f32 %v13738_v31, %v2120_v32 }
 0x17c   :  { %v11263_v60 = vld [vmem:[%s17476_s3 + $0x2dc] sm:$0xf0]  ;;  %v2260_v48 = vadd.f32 %v2259_v36, %v2246_v1  ;;  %v2202_v62 = vadd.f32 %v13802_v21, %v2188_v40 }
 0x17d   :  { %v9152_v4 = vld [vmem:[%s17476_s3 + $0x4c0] sm:$0xf]  ;;  %5701 = vmatpush.bf16.msra.mxu2 %v9185_v5  ;;  %v8897_v23 = vor.u32 %v11263_v60, %v8896_v34  ;;  %5674 = vmatpush.bf16.msra.mxu0 %v8641_v26  ;;  %v2190_v34 = vadd.f32 %v13874_v17, %v2176_v59  ;;  %v2258_v60 = vadd.f32 %v13955_v55, %v2244_v22  ;;  %v2557_v25 = vmax.f32 %v2132_v49, 0.0 }
 0x17e   :  { %v11327_v7 = vld [vmem:[%s17476_s3 + $0x4dc] sm:$0xf0]  ;;  %v2274_v9 = vadd.f32 %v2273_v18, %v2260_v48  ;;  %v2565_v26 = vmax.f32 %v2134_v6, 0.0  ;;  %v14144_v59 = vpack.c.bf16 %v2564_v27, %v2556_v57 }
 0x17f   :  { %v9408_v11 = vld [vmem:[%s17476_s3 + $0x6c0] sm:$0xf]  ;;  %v9153_v28 = vor.u32 %v11327_v7, %v9152_v4  ;;  %5715 = vmatpush.bf16.msra.mxu3 %v9441_v38  ;;  %5688 = vmatpush.bf16.msra.mxu1 %v8897_v23  ;;  %v2204_v8 = vadd.f32 %v13882_v29, %v2190_v34  ;;  %v2299_v20 = vpop.f32.mrf.mxu1 }
 0x180   :  { %v11391_v15 = vld [vmem:[%s17476_s3 + $0x6dc] sm:$0xf0]  ;;  %v14146_v22 = vpack.c.bf16 %v2565_v26, %v2557_v25 }
 0x181   :  { %v8608_v45 = vld [vmem:[%s17476_s3 + $0x80] sm:$0xf]  ;;  %v9409_v13 = vor.u32 %v11391_v15, %v9408_v11  ;;  %5702 = vmatpush.bf16.msra.mxu2 %v9153_v28  ;;  %v2558_v28 = vmax.f32 %v2202_v62, 0.0 }
 0x182   :  { %v11191_v54 = vld [vmem:[%s17476_s3 + $0x9c] sm:$0xf0]  ;;  %v2287_v36 = vpop.f32.mrf.mxu0 }
 0x183   :  { %v8864_v56 = vld [vmem:[%s17476_s3 + $0x280] sm:$0xf]  ;;  %v8609_v46 = vor.u32 %v11191_v54, %v8608_v45  ;;  %5716 = vmatpush.bf16.msra.mxu3 %v9409_v13  ;;  %v2272_v45 = vadd.f32 %v13987_v3, %v2258_v60  ;;  %v2566_v13 = vmax.f32 %v2204_v8, 0.0 }
 0x184   :  { %v11255_v61 = vld [vmem:[%s17476_s3 + $0x29c] sm:$0xf0] }
 0x185   :  { %v9120_v51 = vld [vmem:[%s17476_s3 + $0x480] sm:$0xf]  ;;  %v8865_v12 = vor.u32 %v11255_v61, %v8864_v56  ;;  %5675 = vmatpush.bf16.msra.mxu0 %v8609_v46  ;;  %v2567_v61 = vmax.f32 %v2274_v9, 0.0  ;;  %v2559_v1 = vmax.f32 %v2272_v45, 0.0 }
 0x186   :  { %v11319_v16 = vld [vmem:[%s17476_s3 + $0x49c] sm:$0xf0] }
 0x187   :  { %v9376_v37 = vld [vmem:[%s17476_s3 + $0x680] sm:$0xf]  ;;  %v9121_v43 = vor.u32 %v11319_v16, %v9120_v51  ;;  %5689 = vmatpush.bf16.msra.mxu1 %v8865_v12  ;;  %v14148_v12 = vpack.c.bf16 %v2566_v13, %v2558_v28 }
 0x188   :  { %v11383_v39 = vld [vmem:[%s17476_s3 + $0x69c] sm:$0xf0] }
 0x189   :  { %v8576_v44 = vld [vmem:[%s17476_s3 + $0x40] sm:$0xf]  ;;  %v9377_v50 = vor.u32 %v11383_v39, %v9376_v37  ;;  %5703 = vmatpush.bf16.msra.mxu2 %v9121_v43  ;;  %v358_v43 = vperm.slane %v13908_v53, 4 }
 0x18a   :  { %v11183_v47 = vld [vmem:[%s17476_s3 + $0x5c] sm:$0xf0] }
 0x18b   :  { %v8832_v14 = vld [vmem:[%s17476_s3 + $0x240] sm:$0xf]  ;;  %v8577_v38 = vor.u32 %v11183_v47, %v8576_v44  ;;  %5717 = vmatpush.bf16.msra.mxu3 %v9377_v50  ;;  %v2313_v47 = vpop.f32.mrf.mxu2  ;;  %v2288_v6 = vadd.f32 %v2287_v36, %v358_v43 }
 0x18c   :  { %v11247_v52 = vld [vmem:[%s17476_s3 + $0x25c] sm:$0xf0] }
 0x18d   :  { %v9088_v58 = vld [vmem:[%s17476_s3 + $0x440] sm:$0xf]  ;;  %v8833_v4 = vor.u32 %v11247_v52, %v8832_v14  ;;  %5676 = vmatpush.bf16.msra.mxu0 %v8577_v38  ;;  %v14151_v14 = vpack.c.bf16 %v2567_v61, %v2559_v1 }
 0x18e   :  { %v11311_v63 = vld [vmem:[%s17476_s3 + $0x45c] sm:$0xf0] }
 0x18f   :  { %v9344_v0 = vld [vmem:[%s17476_s3 + $0x640] sm:$0xf]  ;;  %v9089_v7 = vor.u32 %v11311_v63, %v9088_v58  ;;  %5690 = vmatpush.bf16.msra.mxu1 %v8833_v4 }
 0x190   :  { %v11375_v5 = vld [vmem:[%s17476_s3 + $0x65c] sm:$0xf0] }
 0x191   :  { %v8544_v41 = vld [vmem:[%s17476_s3] sm:$0xf]  ;;  %v9345_v55 = vor.u32 %v11375_v5, %v9344_v0  ;;  %5704 = vmatpush.bf16.msra.mxu2 %v9089_v7  ;;  %v2327_v0 = vpop.f32.mrf.mxu3  ;;  %v2286_v5 = vadd.f32 %v14064_v33, %v358_v43  ;;  %v2301_v33 = vpop.f32.mrf.mxu1 }
 0x192   :  { %v11175_v31 = vld [vmem:[%s17476_s3 + $0x1c] sm:$0xf0] }
 0x193   :  { %v8800_v21 = vld [vmem:[%s17476_s3 + $0x200] sm:$0xf]  ;;  %v8545_v2 = vor.u32 %v11175_v31, %v8544_v41  ;;  %5718 = vmatpush.bf16.msra.mxu3 %v9345_v55  ;;  %v2300_v8 = vadd.f32 %v2299_v20, %v2286_v5  ;;  %v2302_v55 = vadd.f32 %v2301_v33, %v2288_v6 }
 0x194   :  { %v11239_v17 = vld [vmem:[%s17476_s3 + $0x21c] sm:$0xf0] }
 0x195   :  { %v9056_v10 = vld [vmem:[%s17476_s3 + $0x400] sm:$0xf]  ;;  %v8801_v54 = vor.u32 %v11239_v17, %v8800_v21  ;;  %5677 = vmatpush.bf16.msra.mxu0 %v8545_v2  ;;  %v2341_v21 = vpop.f32.mrf.mxu0 }
 0x196   :  { %v11303_v11 = vld [vmem:[%s17476_s3 + $0x41c] sm:$0xf0] }
 0x197   :  { %v9312_v15 = vld [vmem:[%s17476_s3 + $0x600] sm:$0xf]  ;;  %v9057_v56 = vor.u32 %v11303_v11, %v9056_v10  ;;  %5691 = vmatpush.bf16.msra.mxu1 %v8801_v54 }
 0x198   :  { %v11367_v19 = vld [vmem:[%s17476_s3 + $0x61c] sm:$0xf0]  ;;  %5678 = vmatmul.bf16.vlgmr.msra.gmra.mxu0 %v14144_v59 }
 0x199   :  { %v9792_v29 = vld [vmem:[%s17476_s3 + $0x9c0] sm:$0xf]  ;;  %v9313_v51 = vor.u32 %v11367_v19, %v9312_v15  ;;  %5705 = vmatpush.bf16.msra.mxu2 %v9057_v56  ;;  %v2315_v19 = vpop.f32.mrf.mxu2  ;;  %v2329_v13 = vpop.f32.mrf.mxu3 }
 0x19a   :  { %v11487_v24 = vld [vmem:[%s17476_s3 + $0x9dc] sm:$0xf0]  ;;  %5692 = vmatmul.bf16.vlgmr.msra.gmra.mxu1 %v14146_v22 }
 0x19b   :  { %v10048_v35 = vld [vmem:[%s17476_s3 + $0xbc0] sm:$0xf]  ;;  %v9793_v16 = vor.u32 %v11487_v24, %v9792_v29  ;;  %5719 = vmatpush.bf16.msra.mxu3 %v9313_v51 }
 0x19c   :  { %v11551_v23 = vld [vmem:[%s17476_s3 + $0xbdc] sm:$0xf0]  ;;  %5706 = vmatmul.bf16.vlgmr.msra.gmra.mxu2 %v14148_v12 }
 0x19d   :  { %v10049_v30 = vor.u32 %v11551_v23, %v10048_v35  ;;  %v9760_v42 = vld [vmem:[%s17476_s3 + $0x980] sm:$0xf]  ;;  %5726 = vmatpush.bf16.msrb.mxu0 %v9793_v16  ;;  %v2314_v35 = vadd.f32 %v2313_v47, %v2300_v8  ;;  %v2316_v23 = vadd.f32 %v2315_v19, %v2302_v55  ;;  %v11283_v55 = vld [vmem:[%s17476_s3 + $0x384] sm:$0xf] }
 0x19e   :  { %v11479_v32 = vld [vmem:[%s17476_s3 + $0x99c] sm:$0xf0]  ;;  %5720 = vmatmul.bf16.vlgmr.msra.gmra.mxu3 %v14151_v14 }
 0x19f   :  { %v10016_v3 = vld [vmem:[%s17476_s3 + $0xb80] sm:$0xf]  ;;  %v9761_v44 = vor.u32 %v11479_v32, %v9760_v42  ;;  %5740 = vmatpush.bf16.msrb.mxu1 %v10049_v30  ;;  %v2328_v42 = vadd.f32 %v2327_v0, %v2314_v35  ;;  %v2330_v32 = vadd.f32 %v2329_v13, %v2316_v23  ;;  %v8770_v0 = vld [vmem:[%s17476_s3 + $0x1e0] sm:$0xf0] }
 0x1a0   :  { %v11543_v37 = vld [vmem:[%s17476_s3 + $0xb9c] sm:$0xf0]  ;;  %v11211_v13 = vld [vmem:[%s17476_s3 + $0x144] sm:$0xf] }
 0x1a1   :  { %v10304_v39 = vld [vmem:[%s17476_s3 + $0xdc0] sm:$0xf]  ;;  %v10017_v48 = vor.u32 %v11543_v37, %v10016_v3  ;;  %5727 = vmatpush.bf16.msrb.mxu0 %v9761_v44  ;;  %v2369_v8 = vpop.f32.mrf.mxu2 }
 0x1a2   :  { %v11615_v40 = vld [vmem:[%s17476_s3 + $0xddc] sm:$0xf0] }
 0x1a3   :  { %v10305_v46 = vor.u32 %v11615_v40, %v10304_v39  ;;  %v9728_v50 = vld [vmem:[%s17476_s3 + $0x940] sm:$0xf]  ;;  %5741 = vmatpush.bf16.msrb.mxu1 %v10017_v48  ;;  %v2343_v40 = vpop.f32.mrf.mxu0 }
 0x1a4   :  { %v11471_v52 = vld [vmem:[%s17476_s3 + $0x95c] sm:$0xf0] }
 0x1a5   :  { %v9984_v58 = vld [vmem:[%s17476_s3 + $0xb40] sm:$0xf]  ;;  %5754 = vmatpush.bf16.msrb.mxu2 %v10305_v46  ;;  %v9729_v18 = vor.u32 %v11471_v52, %v9728_v50  ;;  %v2355_v46 = vpop.f32.mrf.mxu1 }
 0x1a6   :  { %v11535_v63 = vld [vmem:[%s17476_s3 + $0xb5c] sm:$0xf0] }
 0x1a7   :  { %v10272_v57 = vld [vmem:[%s17476_s3 + $0xd80] sm:$0xf]  ;;  %v9985_v62 = vor.u32 %v11535_v63, %v9984_v58  ;;  %5728 = vmatpush.bf16.msrb.mxu0 %v9729_v18  ;;  %v2342_v58 = vadd.f32 %v2341_v21, %v2328_v42  ;;  %v2344_v63 = vadd.f32 %v2343_v40, %v2330_v32  ;;  %v11227_v18 = vld [vmem:[%s17476_s3 + $0x1c4] sm:$0xf] }
 0x1a8   :  { %v11607_v27 = vld [vmem:[%s17476_s3 + $0xd9c] sm:$0xf0]  ;;  %v11219_v21 = vld [vmem:[%s17476_s3 + $0x184] sm:$0xf] }
 0x1a9   :  { %v10273_v49 = vor.u32 %v11607_v27, %v10272_v57  ;;  %v9696_v34 = vld [vmem:[%s17476_s3 + $0x900] sm:$0xf]  ;;  %5742 = vmatpush.bf16.msrb.mxu1 %v9985_v62  ;;  %v11291_v62 = vld [vmem:[%s17476_s3 + $0x3c4] sm:$0xf]  ;;  %v2560_v33 = vmax.f32 %v2342_v58, 0.0 }
 0x1aa   :  { %v11463_v38 = vld [vmem:[%s17476_s3 + $0x91c] sm:$0xf0]  ;;  %v9250_v42 = vld [vmem:[%s17476_s3 + $0x5a0] sm:$0xf0] }
 0x1ab   :  { %v9952_v41 = vld [vmem:[%s17476_s3 + $0xb00] sm:$0xf]  ;;  %5755 = vmatpush.bf16.msrb.mxu2 %v10273_v49  ;;  %v9697_v17 = vor.u32 %v11463_v38, %v9696_v34  ;;  %v9026_v34 = vld [vmem:[%s17476_s3 + $0x3e0] sm:$0xf0] }
 0x1ac   :  { %v11527_v60 = vld [vmem:[%s17476_s3 + $0xb1c] sm:$0xf0]  ;;  %v9218_v58 = vld [vmem:[%s17476_s3 + $0x560] sm:$0xf0] }
 0x1ad   :  { %v10240_v4 = vld [vmem:[%s17476_s3 + $0xd40] sm:$0xf]  ;;  %v9953_v9 = vor.u32 %v11527_v60, %v9952_v41  ;;  %5729 = vmatpush.bf16.msrb.mxu0 %v9697_v17  ;;  %v359_v41 = vperm.slane %v13908_v53, 5  ;;  %v8738_v17 = vld [vmem:[%s17476_s3 + $0x1a0] sm:$0xf0] }
 0x1ae   :  { %v11599_v7 = vld [vmem:[%s17476_s3 + $0xd5c] sm:$0xf0]  ;;  %v8741_v23 = vor.u32 %v11219_v21, %v8738_v17 }
 0x1af   :  { %v10241_v31 = vor.u32 %v11599_v7, %v10240_v4  ;;  %v9664_v10 = vld [vmem:[%s17476_s3 + $0x8c0] sm:$0xf]  ;;  %5743 = vmatpush.bf16.msrb.mxu1 %v9953_v9  ;;  %v2568_v4 = vmax.f32 %v2344_v63, 0.0  ;;  %v9029_v9 = vor.u32 %v11291_v62, %v9026_v34  ;;  %v11195_v34 = vld [vmem:[%s17476_s3 + $0xc4] sm:$0xf] }
 0x1b0   :  { %v11455_v11 = vld [vmem:[%s17476_s3 + $0x8dc] sm:$0xf0] }
 0x1b1   :  { %v9920_v15 = vld [vmem:[%s17476_s3 + $0xac0] sm:$0xf]  ;;  %5756 = vmatpush.bf16.msrb.mxu2 %v10241_v31  ;;  %v9665_v2 = vor.u32 %v11455_v11, %v9664_v10  ;;  %v8773_v31 = vor.u32 %v11227_v18, %v8770_v0  ;;  %v14303_v35 = vpack.c.bf16 %v2568_v4, %v2560_v33  ;;  %v8898_v33 = vld [vmem:[%s17476_s3 + $0x2e0] sm:$0xf0] }
 0x1b2   :  { %v11519_v29 = vld [vmem:[%s17476_s3 + $0xadc] sm:$0xf0] }
 0x1b3   :  { %v10208_v24 = vld [vmem:[%s17476_s3 + $0xd00] sm:$0xf]  ;;  %v9921_v28 = vor.u32 %v11519_v29, %v9920_v15  ;;  %5730 = vmatpush.bf16.msrb.mxu0 %v9665_v2  ;;  %v8994_v15 = vld [vmem:[%s17476_s3 + $0x3a0] sm:$0xf0] }
 0x1b4   :  { %v11591_v25 = vld [vmem:[%s17476_s3 + $0xd1c] sm:$0xf0]  ;;  %v11355_v29 = vld [vmem:[%s17476_s3 + $0x5c4] sm:$0xf] }
 0x1b5   :  { %v10209_v26 = vor.u32 %v11591_v25, %v10208_v24  ;;  %v9632_v45 = vld [vmem:[%s17476_s3 + $0x880] sm:$0xf]  ;;  %5744 = vmatpush.bf16.msrb.mxu1 %v9921_v28  ;;  %v9282_v24 = vld [vmem:[%s17476_s3 + $0x5e0] sm:$0xf0]  ;;  %v2356_v25 = vadd.f32 %v2355_v46, %v359_v41  ;;  %v2383_v28 = vpop.f32.mrf.mxu3 }
 0x1b6   :  { %v11447_v54 = vld [vmem:[%s17476_s3 + $0x89c] sm:$0xf0]  ;;  %v9285_v2 = vor.u32 %v11355_v29, %v9282_v24  ;;  %v11203_v46 = vld [vmem:[%s17476_s3 + $0x104] sm:$0xf] }
 0x1b7   :  { %v9888_v56 = vld [vmem:[%s17476_s3 + $0xa80] sm:$0xf]  ;;  %5757 = vmatpush.bf16.msrb.mxu2 %v10209_v26  ;;  %v9633_v30 = vor.u32 %v11447_v54, %v9632_v45  ;;  %v2357_v26 = vpop.f32.mrf.mxu1  ;;  %v2370_v32 = vadd.f32 %v2369_v8, %v2356_v25  ;;  %v11251_v29 = vld [vmem:[%s17476_s3 + $0x284] sm:$0xf] }
 0x1b8   :  { %v11511_v61 = vld [vmem:[%s17476_s3 + $0xa9c] sm:$0xf0]  ;;  %v2358_v40 = vadd.f32 %v2357_v26, %v359_v41  ;;  %v11259_v41 = vld [vmem:[%s17476_s3 + $0x2c4] sm:$0xf] }
 0x1b9   :  { %v10176_v51 = vld [vmem:[%s17476_s3 + $0xcc0] sm:$0xf]  ;;  %v9889_v3 = vor.u32 %v11511_v61, %v9888_v56  ;;  %5731 = vmatpush.bf16.msrb.mxu0 %v9633_v30  ;;  %v8997_v56 = vor.u32 %v11283_v55, %v8994_v15  ;;  %v8706_v61 = vld [vmem:[%s17476_s3 + $0x160] sm:$0xf0]  ;;  %v2384_v63 = vadd.f32 %v2383_v28, %v2370_v32 }
 0x1ba   :  { %v11583_v16 = vld [vmem:[%s17476_s3 + $0xcdc] sm:$0xf0]  ;;  %v11347_v30 = vld [vmem:[%s17476_s3 + $0x584] sm:$0xf] }
 0x1bb   :  { %v10177_v20 = vor.u32 %v11583_v16, %v10176_v51  ;;  %v9600_v36 = vld [vmem:[%s17476_s3 + $0x840] sm:$0xf]  ;;  %5745 = vmatpush.bf16.msrb.mxu1 %v9889_v3  ;;  %v11275_v51 = vld [vmem:[%s17476_s3 + $0x344] sm:$0xf]  ;;  %v9253_v3 = vor.u32 %v11347_v30, %v9250_v42 }
 0x1bc   :  { %v11439_v37 = vld [vmem:[%s17476_s3 + $0x85c] sm:$0xf0]  ;;  %v11187_v15 = vld [vmem:[%s17476_s3 + $0x84] sm:$0xf] }
 0x1bd   :  { %v9856_v39 = vld [vmem:[%s17476_s3 + $0xa40] sm:$0xf]  ;;  %5758 = vmatpush.bf16.msrb.mxu2 %v10177_v20  ;;  %v9601_v48 = vor.u32 %v11439_v37, %v9600_v36  ;;  %v8962_v20 = vld [vmem:[%s17476_s3 + $0x360] sm:$0xf0]  ;;  %v8709_v36 = vor.u32 %v11211_v13, %v8706_v61  ;;  %v2385_v4 = vpop.f32.mrf.mxu3 }
 0x1be   :  { %v11503_v1 = vld [vmem:[%s17476_s3 + $0xa5c] sm:$0xf0]  ;;  %v8866_v25 = vld [vmem:[%s17476_s3 + $0x2a0] sm:$0xf0] }
 0x1bf   :  { %v10144_v43 = vld [vmem:[%s17476_s3 + $0xc80] sm:$0xf]  ;;  %v9857_v57 = vor.u32 %v11503_v1, %v9856_v39  ;;  %5732 = vmatpush.bf16.msrb.mxu0 %v9601_v48  ;;  %v8965_v1 = vor.u32 %v11275_v51, %v8962_v20  ;;  %v8930_v48 = vld [vmem:[%s17476_s3 + $0x320] sm:$0xf0]  ;;  %v8869_v51 = vor.u32 %v11251_v29, %v8866_v25 }
 0x1c0   :  { %v11575_v44 = vld [vmem:[%s17476_s3 + $0xc9c] sm:$0xf0]  ;;  %v11323_v26 = vld [vmem:[%s17476_s3 + $0x4c4] sm:$0xf] }
 0x1c1   :  { %v10145_v47 = vor.u32 %v11575_v44, %v10144_v43  ;;  %v9568_v50 = vld [vmem:[%s17476_s3 + $0x800] sm:$0xf]  ;;  %5746 = vmatpush.bf16.msrb.mxu1 %v9857_v57  ;;  %v8674_v43 = vld [vmem:[%s17476_s3 + $0x120] sm:$0xf0] }
 0x1c2   :  { %v11431_v52 = vld [vmem:[%s17476_s3 + $0x81c] sm:$0xf0]  ;;  %v11267_v44 = vld [vmem:[%s17476_s3 + $0x304] sm:$0xf] }
 0x1c3   :  { %v9824_v27 = vld [vmem:[%s17476_s3 + $0xa00] sm:$0xf]  ;;  %5759 = vmatpush.bf16.msrb.mxu2 %v10145_v47  ;;  %v9569_v60 = vor.u32 %v11431_v52, %v9568_v50  ;;  %v2371_v50 = vpop.f32.mrf.mxu2  ;;  %v11339_v52 = vld [vmem:[%s17476_s3 + $0x544] sm:$0xf] }
 0x1c4   :  { %v11495_v49 = vld [vmem:[%s17476_s3 + $0xa1c] sm:$0xf0]  ;;  %v9221_v57 = vor.u32 %v11339_v52, %v9218_v58  ;;  %v2372_v62 = vadd.f32 %v2371_v50, %v2358_v40  ;;  %v11179_v20 = vld [vmem:[%s17476_s3 + $0x44] sm:$0xf] }
 0x1c5   :  { %v10112_v5 = vld [vmem:[%s17476_s3 + $0xc40] sm:$0xf]  ;;  %v9825_v7 = vor.u32 %v11495_v49, %v9824_v27  ;;  %5733 = vmatpush.bf16.msrb.mxu0 %v9569_v60  ;;  %v2397_v27 = vpop.f32.mrf.mxu0  ;;  %v8677_v49 = vor.u32 %v11203_v46, %v8674_v43  ;;  %v8578_v30 = vld [vmem:[%s17476_s3 + $0x60] sm:$0xf0] }
 0x1c6   :  { %v11567_v6 = vld [vmem:[%s17476_s3 + $0xc5c] sm:$0xf0]  ;;  %v2398_v21 = vadd.f32 %v2397_v27, %v2384_v63  ;;  %v11243_v42 = vld [vmem:[%s17476_s3 + $0x244] sm:$0xf] }
 0x1c7   :  { %v10113_v38 = vor.u32 %v11567_v6, %v10112_v5  ;;  %v10080_v10 = vld [vmem:[%s17476_s3 + $0xc00] sm:$0xf]  ;;  %5747 = vmatpush.bf16.msrb.mxu1 %v9825_v7  ;;  %v8933_v5 = vor.u32 %v11267_v44, %v8930_v48  ;;  %v2411_v6 = vpop.f32.mrf.mxu1  ;;  %v11331_v7 = vld [vmem:[%s17476_s3 + $0x504] sm:$0xf]  ;;  %v8581_v44 = vor.u32 %v11179_v20, %v8578_v30 }
 0x1c8   :  { %v11559_v11 = vld [vmem:[%s17476_s3 + $0xc1c] sm:$0xf0]  ;;  %5734 = vmatmul.bf16.vlgmr.msrb.gmra.mxu0 %v14303_v35  ;;  %v8546_v46 = vld [vmem:[%s17476_s3 + $0x20] sm:$0xf0] }
 0x1c9   :  { %5760 = vmatpush.bf16.msrb.mxu2 %v10113_v38  ;;  %v10081_v19 = vor.u32 %v11559_v11, %v10080_v10  ;;  %5782 = vmatpush.bf16.msra.mxu0 %v8773_v31  ;;  %v10560_v45 = vld [vmem:[%s17476_s3 + $0xfc0] sm:$0xf]  ;;  %v8642_v38 = vld [vmem:[%s17476_s3 + $0xe0] sm:$0xf0]  ;;  %v8901_v10 = vor.u32 %v11259_v41, %v8898_v33  ;;  %v2386_v11 = vadd.f32 %v2385_v4, %v2372_v62 }
 0x1ca   :  { %v11679_v54 = vld [vmem:[%s17476_s3 + $0xfdc] sm:$0xf0]  ;;  %v9186_v31 = vld [vmem:[%s17476_s3 + $0x520] sm:$0xf0]  ;;  %v8645_v8 = vor.u32 %v11195_v34, %v8642_v38 }
 0x1cb   :  { %5796 = vmatpush.bf16.msra.mxu1 %v9029_v9  ;;  %v10561_v16 = vor.u32 %v11679_v54, %v10560_v45  ;;  %v10528_v37 = vld [vmem:[%s17476_s3 + $0xf80] sm:$0xf]  ;;  %v9189_v17 = vor.u32 %v11331_v7, %v9186_v31  ;;  %v8802_v63 = vld [vmem:[%s17476_s3 + $0x220] sm:$0xf0]  ;;  %v2425_v7 = vpop.f32.mrf.mxu2 }
 0x1cc   :  { %v11671_v39 = vld [vmem:[%s17476_s3 + $0xf9c] sm:$0xf0]  ;;  %v10050_v62 = vld [vmem:[%s17476_s3 + $0xbe0] sm:$0xf0] }
 0x1cd   :  { %5761 = vmatpush.bf16.msrb.mxu2 %v10081_v19  ;;  %5768 = vmatpush.bf16.msrb.mxu3 %v10561_v16  ;;  %v10529_v47 = vor.u32 %v11671_v39, %v10528_v37  ;;  %v10496_v18 = vld [vmem:[%s17476_s3 + $0xf40] sm:$0xf]  ;;  %v8610_v19 = vld [vmem:[%s17476_s3 + $0xa0] sm:$0xf0]  ;;  %v2399_v45 = vpop.f32.mrf.mxu0 }
 0x1ce   :  { %5783 = vmatpush.bf16.msra.mxu0 %v8741_v23  ;;  %v11663_v0 = vld [vmem:[%s17476_s3 + $0xf5c] sm:$0xf0]  ;;  %v2412_v23 = vadd.f32 %v2411_v6, %v2398_v21  ;;  %v8613_v54 = vor.u32 %v11187_v15, %v8610_v19  ;;  %v2400_v61 = vadd.f32 %v2399_v45, %v2386_v11  ;;  %v9122_v37 = vld [vmem:[%s17476_s3 + $0x4a0] sm:$0xf0] }
 0x1cf   :  { %5797 = vmatpush.bf16.msra.mxu1 %v8997_v56  ;;  %v10497_v60 = vor.u32 %v11663_v0, %v10496_v18  ;;  %v10464_v9 = vld [vmem:[%s17476_s3 + $0xf00] sm:$0xf]  ;;  %v2413_v16 = vpop.f32.mrf.mxu1  ;;  %v11307_v18 = vld [vmem:[%s17476_s3 + $0x444] sm:$0xf] }
 0x1d0   :  { %v11655_v55 = vld [vmem:[%s17476_s3 + $0xf1c] sm:$0xf0]  ;;  %v2561_v39 = vmax.f32 %v2412_v23, 0.0  ;;  %v2414_v40 = vadd.f32 %v2413_v16, %v2400_v61  ;;  %v9090_v0 = vld [vmem:[%s17476_s3 + $0x460] sm:$0xf0] }
 0x1d1   :  { %5810 = vmatpush.bf16.msra.mxu2 %v9285_v2  ;;  %5769 = vmatpush.bf16.msrb.mxu3 %v10529_v47  ;;  %v10465_v24 = vor.u32 %v11655_v55, %v10464_v9  ;;  %v9154_v2 = vld [vmem:[%s17476_s3 + $0x4e0] sm:$0xf0]  ;;  %v10432_v56 = vld [vmem:[%s17476_s3 + $0xec0] sm:$0xf]  ;;  %v9093_v34 = vor.u32 %v11307_v18, %v9090_v0 }
 0x1d2   :  { %5784 = vmatpush.bf16.msra.mxu0 %v8709_v36  ;;  %v9157_v28 = vor.u32 %v11323_v26, %v9154_v2  ;;  %v11647_v13 = vld [vmem:[%s17476_s3 + $0xedc] sm:$0xf0]  ;;  %v11315_v36 = vld [vmem:[%s17476_s3 + $0x484] sm:$0xf]  ;;  %v2569_v52 = vmax.f32 %v2414_v40, 0.0 }
 0x1d3   :  { %5798 = vmatpush.bf16.msra.mxu1 %v8965_v1  ;;  %v10433_v32 = vor.u32 %v11647_v13, %v10432_v56  ;;  %v11171_v1 = vld [vmem:[%s17476_s3 + $0x4] sm:$0xf]  ;;  %v9125_v43 = vor.u32 %v11315_v36, %v9122_v37  ;;  %v10400_v48 = vld [vmem:[%s17476_s3 + $0xe80] sm:$0xf]  ;;  %v2427_v36 = vpop.f32.mrf.mxu2 }
 0x1d4   :  { %v11235_v47 = vld [vmem:[%s17476_s3 + $0x204] sm:$0xf]  ;;  %v11639_v50 = vld [vmem:[%s17476_s3 + $0xe9c] sm:$0xf0]  ;;  %v8549_v38 = vor.u32 %v11171_v1, %v8546_v46 }
 0x1d5   :  { %5811 = vmatpush.bf16.msra.mxu2 %v9253_v3  ;;  %5770 = vmatpush.bf16.msrb.mxu3 %v10497_v60  ;;  %v8834_v3 = vld [vmem:[%s17476_s3 + $0x260] sm:$0xf0]  ;;  %v10401_v27 = vor.u32 %v11639_v50, %v10400_v48  ;;  %v10368_v41 = vld [vmem:[%s17476_s3 + $0xe40] sm:$0xf]  ;;  %v8805_v33 = vor.u32 %v11235_v47, %v8802_v63 }
 0x1d6   :  { %5785 = vmatpush.bf16.msra.mxu0 %v8677_v49  ;;  %v8837_v58 = vor.u32 %v11243_v42, %v8834_v3  ;;  %v9794_v49 = vld [vmem:[%s17476_s3 + $0x9e0] sm:$0xf0]  ;;  %v11631_v60 = vld [vmem:[%s17476_s3 + $0xe5c] sm:$0xf0] }
 0x1d7   :  { %5799 = vmatpush.bf16.msra.mxu1 %v8933_v5  ;;  %v14456_v5 = vpack.c.bf16 %v2569_v52, %v2561_v39  ;;  %v11547_v6 = vld [vmem:[%s17476_s3 + $0xbc4] sm:$0xf]  ;;  %v10369_v21 = vor.u32 %v11631_v60, %v10368_v41  ;;  %v10336_v19 = vld [vmem:[%s17476_s3 + $0xe00] sm:$0xf] }
 0x1d8   :  { %v11475_v31 = vld [vmem:[%s17476_s3 + $0x984] sm:$0xf]  ;;  %v11623_v29 = vld [vmem:[%s17476_s3 + $0xe1c] sm:$0xf0] }
 0x1d9   :  { %5812 = vmatpush.bf16.msra.mxu2 %v9221_v57  ;;  %5771 = vmatpush.bf16.msrb.mxu3 %v10465_v24  ;;  %v11483_v57 = vld [vmem:[%s17476_s3 + $0x9c4] sm:$0xf]  ;;  %v10337_v26 = vor.u32 %v11623_v29, %v10336_v19 }
 0x1da   :  { %5786 = vmatpush.bf16.msra.mxu0 %v8645_v8  ;;  %v9797_v4 = vor.u32 %v11483_v57, %v9794_v49  ;;  %5748 = vmatmul.bf16.vlgmr.msrb.gmra.mxu1 %v14456_v5  ;;  %v9762_v8 = vld [vmem:[%s17476_s3 + $0x9a0] sm:$0xf0] }
 0x1db   :  { %5800 = vmatpush.bf16.msra.mxu1 %v8901_v10  ;;  %v11299_v9 = vld [vmem:[%s17476_s3 + $0x404] sm:$0xf]  ;;  %v9765_v24 = vor.u32 %v11475_v31, %v9762_v8 }
 0x1dc   :  { %v9058_v55 = vld [vmem:[%s17476_s3 + $0x420] sm:$0xf0] }
 0x1dd   :  { %5813 = vmatpush.bf16.msra.mxu2 %v9189_v17  ;;  %5772 = vmatpush.bf16.msrb.mxu3 %v10433_v32  ;;  %v10053_v17 = vor.u32 %v11547_v6, %v10050_v62  ;;  %v11539_v10 = vld [vmem:[%s17476_s3 + $0xb84] sm:$0xf]  ;;  %v9061_v15 = vor.u32 %v11299_v9, %v9058_v55 }
 0x1de   :  { %5787 = vmatpush.bf16.msra.mxu0 %v8613_v54  ;;  %v10018_v11 = vld [vmem:[%s17476_s3 + $0xba0] sm:$0xf0]  ;;  %v2439_v54 = vpop.f32.mrf.mxu3 }
 0x1df   :  { %5801 = vmatpush.bf16.msra.mxu1 %v8869_v51  ;;  %v11467_v25 = vld [vmem:[%s17476_s3 + $0x944] sm:$0xf]  ;;  %v10021_v2 = vor.u32 %v11539_v10, %v10018_v11  ;;  %v360_v51 = vperm.slane %v13908_v53, 6 }
 0x1e0   :  { %v9730_v23 = vld [vmem:[%s17476_s3 + $0x960] sm:$0xf0] }
 0x1e1   :  { %5814 = vmatpush.bf16.msra.mxu2 %v9157_v28  ;;  %5773 = vmatpush.bf16.msrb.mxu3 %v10401_v27  ;;  %v11419_v28 = vld [vmem:[%s17476_s3 + $0x7c4] sm:$0xf]  ;;  %v9733_v16 = vor.u32 %v11467_v25, %v9730_v23  ;;  %v2426_v40 = vadd.f32 %v2425_v7, %v360_v51  ;;  %v2428_v49 = vadd.f32 %v2427_v36, %v360_v51 }
 0x1e2   :  { %5788 = vmatpush.bf16.msra.mxu0 %v8581_v44  ;;  %v9538_v45 = vld [vmem:[%s17476_s3 + $0x7e0] sm:$0xf0]  ;;  %v2453_v44 = vpop.f32.mrf.mxu0 }
 0x1e3   :  { %5802 = vmatpush.bf16.msra.mxu1 %v8837_v58  ;;  %v11531_v56 = vld [vmem:[%s17476_s3 + $0xb44] sm:$0xf]  ;;  %v9541_v61 = vor.u32 %v11419_v28, %v9538_v45  ;;  %v2467_v58 = vpop.f32.mrf.mxu1  ;;  %v2440_v27 = vadd.f32 %v2439_v54, %v2426_v40 }
 0x1e4   :  { %v9986_v13 = vld [vmem:[%s17476_s3 + $0xb60] sm:$0xf0] }
 0x1e5   :  { %5815 = vmatpush.bf16.msra.mxu2 %v9125_v43  ;;  %5774 = vmatpush.bf16.msrb.mxu3 %v10369_v21  ;;  %v11411_v20 = vld [vmem:[%s17476_s3 + $0x784] sm:$0xf]  ;;  %v9989_v42 = vor.u32 %v11531_v56, %v9986_v13  ;;  %v2454_v7 = vadd.f32 %v2453_v44, %v2440_v27  ;;  %v2481_v21 = vpop.f32.mrf.mxu2  ;;  %v9000_v27 = vld [vmem:[%s17476_s3 + $0x388] sm:$0xf] }
 0x1e6   :  { %5789 = vmatpush.bf16.msra.mxu0 %v8549_v38  ;;  %v9506_v30 = vld [vmem:[%s17476_s3 + $0x7a0] sm:$0xf0]  ;;  %v2441_v18 = vpop.f32.mrf.mxu3 }
 0x1e7   :  { %5803 = vmatpush.bf16.msra.mxu1 %v8805_v33  ;;  %v11459_v32 = vld [vmem:[%s17476_s3 + $0x904] sm:$0xf]  ;;  %v9509_v3 = vor.u32 %v11411_v20, %v9506_v30  ;;  %v2442_v31 = vadd.f32 %v2441_v18, %v2428_v49  ;;  %v2468_v25 = vadd.f32 %v2467_v58, %v2454_v7  ;;  %v11232_v20 = vld [vmem:[%s17476_s3 + $0x1e4] sm:$0xf0] }
 0x1e8   :  { %v9698_v53 = vld [vmem:[%s17476_s3 + $0x920] sm:$0xf0]  ;;  %v11224_v58 = vld [vmem:[%s17476_s3 + $0x1a4] sm:$0xf0] }
 0x1e9   :  { %5816 = vmatpush.bf16.msra.mxu2 %v9093_v34  ;;  %5790 = vmatmul.bf16.vlgmr.msra.gmra.mxu0 %v14144_v59  ;;  %v11523_v37 = vld [vmem:[%s17476_s3 + $0xb04] sm:$0xf]  ;;  %v9701_v1 = vor.u32 %v11459_v32, %v9698_v53  ;;  %v9032_v53 = vld [vmem:[%s17476_s3 + $0x3c8] sm:$0xf] }
 0x1ea   :  { %5838 = vmatpush.bf16.msrb.mxu0 %v9797_v4  ;;  %5775 = vmatpush.bf16.msrb.mxu3 %v10337_v26  ;;  %v9954_v39 = vld [vmem:[%s17476_s3 + $0xb20] sm:$0xf0]  ;;  %v2455_v55 = vpop.f32.mrf.mxu0  ;;  %v11288_v49 = vld [vmem:[%s17476_s3 + $0x3a4] sm:$0xf0] }
 0x1eb   :  { %5852 = vmatpush.bf16.msrb.mxu1 %v10053_v17  ;;  %v11403_v46 = vld [vmem:[%s17476_s3 + $0x744] sm:$0xf]  ;;  %v9957_v47 = vor.u32 %v11523_v37, %v9954_v39  ;;  %v2456_v26 = vadd.f32 %v2455_v55, %v2442_v31  ;;  %v8712_v7 = vld [vmem:[%s17476_s3 + $0x148] sm:$0xf] }
 0x1ec   :  { %v9474_v43 = vld [vmem:[%s17476_s3 + $0x760] sm:$0xf0]  ;;  %5804 = vmatmul.bf16.vlgmr.msra.gmra.mxu1 %v14146_v22  ;;  %v11216_v31 = vld [vmem:[%s17476_s3 + $0x164] sm:$0xf0] }
 0x1ed   :  { %5817 = vmatpush.bf16.msra.mxu2 %v9061_v15  ;;  %v11451_v48 = vld [vmem:[%s17476_s3 + $0x8c4] sm:$0xf]  ;;  %v9477_v52 = vor.u32 %v11403_v46, %v9474_v43  ;;  %v2483_v36 = vpop.f32.mrf.mxu2 }
 0x1ee   :  { %5839 = vmatpush.bf16.msrb.mxu0 %v9765_v24  ;;  %5824 = vmatpush.bf16.msra.mxu3 %v9541_v61  ;;  %v9666_v50 = vld [vmem:[%s17476_s3 + $0x8e0] sm:$0xf0] }
 0x1ef   :  { %5853 = vmatpush.bf16.msrb.mxu1 %v10021_v2  ;;  %v11515_v63 = vld [vmem:[%s17476_s3 + $0xac4] sm:$0xf]  ;;  %v9669_v0 = vor.u32 %v11451_v48, %v9666_v50  ;;  %v2469_v2 = vpop.f32.mrf.mxu1 }
 0x1f0   :  { %v9922_v57 = vld [vmem:[%s17476_s3 + $0xae0] sm:$0xf0]  ;;  %v2470_v32 = vadd.f32 %v2469_v2, %v2456_v26 }
 0x1f1   :  { %v11395_v6 = vld [vmem:[%s17476_s3 + $0x704] sm:$0xf]  ;;  %v9925_v34 = vor.u32 %v11515_v63, %v9922_v57 }
 0x1f2   :  { %5840 = vmatpush.bf16.msrb.mxu0 %v9733_v16  ;;  %5825 = vmatpush.bf16.msra.mxu3 %v9509_v3  ;;  %v9442_v62 = vld [vmem:[%s17476_s3 + $0x720] sm:$0xf0]  ;;  %v8776_v16 = vld [vmem:[%s17476_s3 + $0x1c8] sm:$0xf] }
 0x1f3   :  { %5854 = vmatpush.bf16.msrb.mxu1 %v9989_v42  ;;  %v11443_v38 = vld [vmem:[%s17476_s3 + $0x884] sm:$0xf]  ;;  %v9445_v60 = vor.u32 %v11395_v6, %v9442_v62  ;;  %v2482_v42 = vadd.f32 %v2481_v21, %v2468_v25  ;;  %v11296_v3 = vld [vmem:[%s17476_s3 + $0x3e4] sm:$0xf0]  ;;  %v8777_v43 = vor.u32 %v11232_v20, %v8776_v16  ;;  %v2495_v62 = vpop.f32.mrf.mxu3 }
 0x1f4   :  { %v9634_v41 = vld [vmem:[%s17476_s3 + $0x8a0] sm:$0xf0]  ;;  %v9033_v50 = vor.u32 %v11296_v3, %v9032_v53  ;;  %v8968_v21 = vld [vmem:[%s17476_s3 + $0x348] sm:$0xf] }
 0x1f5   :  { %v11507_v33 = vld [vmem:[%s17476_s3 + $0xa84] sm:$0xf]  ;;  %v9637_v17 = vor.u32 %v11443_v38, %v9634_v41  ;;  %v2562_v63 = vmax.f32 %v2482_v42, 0.0  ;;  %v8904_v16 = vld [vmem:[%s17476_s3 + $0x2c8] sm:$0xf] }
 0x1f6   :  { %5841 = vmatpush.bf16.msrb.mxu0 %v9701_v1  ;;  %5826 = vmatpush.bf16.msra.mxu3 %v9477_v52  ;;  %v9890_v4 = vld [vmem:[%s17476_s3 + $0xaa0] sm:$0xf0]  ;;  %v2484_v1 = vadd.f32 %v2483_v36, %v2470_v32  ;;  %v8744_v52 = vld [vmem:[%s17476_s3 + $0x188] sm:$0xf] }
 0x1f7   :  { %5855 = vmatpush.bf16.msrb.mxu1 %v9957_v47  ;;  %v11387_v8 = vld [vmem:[%s17476_s3 + $0x6c4] sm:$0xf]  ;;  %v9893_v10 = vor.u32 %v11507_v33, %v9890_v4  ;;  %v8745_v38 = vor.u32 %v11224_v58, %v8744_v52  ;;  %v9001_v4 = vor.u32 %v11288_v49, %v9000_v27  ;;  %v11264_v20 = vld [vmem:[%s17476_s3 + $0x2e4] sm:$0xf0]  ;;  %v2523_v3 = vpop.f32.mrf.mxu1  ;;  %v2537_v52 = vpop.f32.mrf.mxu2 }
 0x1f8   :  { %v9410_v9 = vld [vmem:[%s17476_s3 + $0x6e0] sm:$0xf0]  ;;  %v2570_v57 = vmax.f32 %v2484_v1, 0.0  ;;  %v8905_v36 = vor.u32 %v11264_v20, %v8904_v16  ;;  %v8872_v1 = vld [vmem:[%s17476_s3 + $0x288] sm:$0xf] }
 0x1f9   :  { %v11435_v11 = vld [vmem:[%s17476_s3 + $0x844] sm:$0xf]  ;;  %v9413_v19 = vor.u32 %v11387_v8, %v9410_v9  ;;  %v8713_v9 = vor.u32 %v11216_v31, %v8712_v7  ;;  %v8552_v31 = vld [vmem:[%s17476_s3 + $0x8] sm:$0xf] }
 0x1fa   :  { %5842 = vmatpush.bf16.msrb.mxu0 %v9669_v0  ;;  %5827 = vmatpush.bf16.msra.mxu3 %v9445_v60  ;;  %v9602_v15 = vld [vmem:[%s17476_s3 + $0x860] sm:$0xf0]  ;;  %v9768_v16 = vld [vmem:[%s17476_s3 + $0x988] sm:$0xf] }
 0x1fb   :  { %5856 = vmatpush.bf16.msrb.mxu1 %v9925_v34  ;;  %v11499_v29 = vld [vmem:[%s17476_s3 + $0xa44] sm:$0xf]  ;;  %v9605_v23 = vor.u32 %v11435_v11, %v9602_v15  ;;  %v14648_v34 = vpack.c.bf16 %v2570_v57, %v2562_v63  ;;  %v8680_v15 = vld [vmem:[%s17476_s3 + $0x108] sm:$0xf] }
 0x1fc   :  { %v9858_v24 = vld [vmem:[%s17476_s3 + $0xa60] sm:$0xf0]  ;;  %v8584_v63 = vld [vmem:[%s17476_s3 + $0x48] sm:$0xf] }
 0x1fd   :  { %v11427_v28 = vld [vmem:[%s17476_s3 + $0x804] sm:$0xf]  ;;  %v9861_v54 = vor.u32 %v11499_v29, %v9858_v24  ;;  %5762 = vmatmul.bf16.vlgmr.msrb.gmra.mxu2 %v14648_v34  ;;  %v8936_v29 = vld [vmem:[%s17476_s3 + $0x308] sm:$0xf] }
 0x1fe   :  { %5843 = vmatpush.bf16.msrb.mxu0 %v9637_v17  ;;  %5828 = vmatpush.bf16.msra.mxu3 %v9413_v19  ;;  %v11379_v45 = vld [vmem:[%s17476_s3 + $0x684] sm:$0xf]  ;;  %v11280_v17 = vld [vmem:[%s17476_s3 + $0x364] sm:$0xf0] }
 0x1ff   :  { %5857 = vmatpush.bf16.msrb.mxu1 %v9893_v10  ;;  %v9570_v56 = vld [vmem:[%s17476_s3 + $0x820] sm:$0xf0]  ;;  %v8969_v11 = vor.u32 %v11280_v17, %v8968_v21  ;;  %v11208_v19 = vld [vmem:[%s17476_s3 + $0x124] sm:$0xf0] }
 0x200   :  { %v11491_v13 = vld [vmem:[%s17476_s3 + $0xa04] sm:$0xf]  ;;  %v9573_v37 = vor.u32 %v11427_v28, %v9570_v56  ;;  %v11272_v24 = vld [vmem:[%s17476_s3 + $0x324] sm:$0xf0]  ;;  %v8681_v26 = vor.u32 %v11208_v19, %v8680_v15 }
 0x201   :  { %v9378_v61 = vld [vmem:[%s17476_s3 + $0x6a0] sm:$0xf0]  ;;  %v8937_v28 = vor.u32 %v11272_v24, %v8936_v29  ;;  %v11184_v57 = vld [vmem:[%s17476_s3 + $0x64] sm:$0xf0] }
 0x202   :  { %v9826_v51 = vld [vmem:[%s17476_s3 + $0xa20] sm:$0xf0]  ;;  %v9381_v30 = vor.u32 %v11379_v45, %v9378_v61  ;;  %5844 = vmatpush.bf16.msrb.mxu0 %v9605_v23  ;;  %v8648_v45 = vld [vmem:[%s17476_s3 + $0xc8] sm:$0xf]  ;;  %v2497_v61 = vpop.f32.mrf.mxu3 }
 0x203   :  { %v11371_v39 = vld [vmem:[%s17476_s3 + $0x644] sm:$0xf]  ;;  %5858 = vmatpush.bf16.msrb.mxu1 %v9861_v54  ;;  %v9829_v46 = vor.u32 %v11491_v13, %v9826_v51  ;;  %v11200_v54 = vld [vmem:[%s17476_s3 + $0xe4] sm:$0xf0]  ;;  %v2509_v51 = vpop.f32.mrf.mxu0 }
 0x204   :  { %5829 = vmatpush.bf16.msra.mxu3 %v9381_v30  ;;  %v9346_v40 = vld [vmem:[%s17476_s3 + $0x660] sm:$0xf0]  ;;  %v8649_v42 = vor.u32 %v11200_v54, %v8648_v45  ;;  %v11176_v21 = vld [vmem:[%s17476_s3 + $0x24] sm:$0xf0] }
 0x205   :  { %v11611_v44 = vld [vmem:[%s17476_s3 + $0xdc4] sm:$0xf]  ;;  %v9349_v48 = vor.u32 %v11371_v39, %v9346_v40  ;;  %v11192_v39 = vld [vmem:[%s17476_s3 + $0xa4] sm:$0xf0] }
 0x206   :  { %v10306_v47 = vld [vmem:[%s17476_s3 + $0xde0] sm:$0xf0]  ;;  %5845 = vmatpush.bf16.msrb.mxu0 %v9573_v37  ;;  %v8616_v37 = vld [vmem:[%s17476_s3 + $0x88] sm:$0xf] }
 0x207   :  { %v10309_v18 = vor.u32 %v11611_v44, %v10306_v47  ;;  %v11363_v0 = vld [vmem:[%s17476_s3 + $0x604] sm:$0xf]  ;;  %5859 = vmatpush.bf16.msrb.mxu1 %v9829_v46  ;;  %v11256_v46 = vld [vmem:[%s17476_s3 + $0x2a4] sm:$0xf0]  ;;  %v8617_v47 = vor.u32 %v11192_v39, %v8616_v37 }
 0x208   :  { %5830 = vmatpush.bf16.msra.mxu3 %v9349_v48  ;;  %v9314_v6 = vld [vmem:[%s17476_s3 + $0x620] sm:$0xf0]  ;;  %v8873_v58 = vor.u32 %v11256_v46, %v8872_v1  ;;  %v8808_v17 = vld [vmem:[%s17476_s3 + $0x208] sm:$0xf] }
 0x209   :  { %v11603_v41 = vld [vmem:[%s17476_s3 + $0xd84] sm:$0xf]  ;;  %v9317_v33 = vor.u32 %v11363_v0, %v9314_v6  ;;  %5846 = vmatmul.bf16.vlgmr.msrb.gmra.mxu0 %v14303_v35  ;;  %5866 = vmatpush.bf16.msrb.mxu2 %v10309_v18  ;;  %v8840_v0 = vld [vmem:[%s17476_s3 + $0x248] sm:$0xf] }
 0x20a   :  { %5894 = vmatpush.bf16.msra.mxu0 %v8777_v43  ;;  %v10274_v60 = vld [vmem:[%s17476_s3 + $0xda0] sm:$0xf0]  ;;  %5860 = vmatmul.bf16.vlgmr.msrb.gmra.mxu1 %v14456_v5  ;;  %v2551_v49 = vpop.f32.mrf.mxu3  ;;  %v11248_v6 = vld [vmem:[%s17476_s3 + $0x264] sm:$0xf0] }
 0x20b   :  { %5908 = vmatpush.bf16.msra.mxu1 %v9033_v50  ;;  %v10277_v8 = vor.u32 %v11603_v41, %v10274_v60  ;;  %v11595_v55 = vld [vmem:[%s17476_s3 + $0xd44] sm:$0xf]  ;;  %v2511_v18 = vpop.f32.mrf.mxu0  ;;  %v8585_v60 = vor.u32 %v11184_v57, %v8584_v63  ;;  %v8841_v7 = vor.u32 %v11248_v6, %v8840_v0  ;;  %v10056_v19 = vld [vmem:[%s17476_s3 + $0xbc8] sm:$0xf] }
 0x20c   :  { %v10242_v10 = vld [vmem:[%s17476_s3 + $0xd60] sm:$0xf0]  ;;  %5831 = vmatpush.bf16.msra.mxu3 %v9317_v33  ;;  %v11552_v29 = vld [vmem:[%s17476_s3 + $0xbe4] sm:$0xf0] }
 0x20d   :  { %5867 = vmatpush.bf16.msrb.mxu2 %v10277_v8  ;;  %v10245_v25 = vor.u32 %v11595_v55, %v10242_v10  ;;  %v11587_v2 = vld [vmem:[%s17476_s3 + $0xd04] sm:$0xf]  ;;  %v9800_v55 = vld [vmem:[%s17476_s3 + $0x9c8] sm:$0xf] }
 0x20e   :  { %5895 = vmatpush.bf16.msra.mxu0 %v8745_v38  ;;  %v10210_v23 = vld [vmem:[%s17476_s3 + $0xd20] sm:$0xf0]  ;;  %5818 = vmatmul.bf16.vlgmr.msra.gmra.mxu2 %v14148_v12  ;;  %v11488_v10 = vld [vmem:[%s17476_s3 + $0x9e4] sm:$0xf0] }
 0x20f   :  { %5909 = vmatpush.bf16.msra.mxu1 %v9001_v4  ;;  %v11757_v56 = vld [vmem:[%s17475_s2] sm:$0xff]  ;;  %v10213_v30 = vor.u32 %v11587_v2, %v10210_v23  ;;  %v2539_v23 = vpop.f32.mrf.mxu2  ;;  %v9801_v45 = vor.u32 %v11488_v10, %v9800_v55  ;;  %v9288_v54 = vld [vmem:[%s17476_s3 + $0x5c8] sm:$0xf] }
 0x210   :  { %v361_v13 = vperm.slane %v11757_v56, 7  ;;  %v11579_v32 = vld [vmem:[%s17476_s3 + $0xcc4] sm:$0xf]  ;;  %v11360_v56 = vld [vmem:[%s17476_s3 + $0x5e4] sm:$0xf0] }
 0x211   :  { %5868 = vmatpush.bf16.msrb.mxu2 %v10245_v25  ;;  %v10178_v53 = vld [vmem:[%s17476_s3 + $0xce0] sm:$0xf0]  ;;  %v8553_v25 = vor.u32 %v11176_v21, %v8552_v31  ;;  %v11480_v20 = vld [vmem:[%s17476_s3 + $0x9a4] sm:$0xf0] }
 0x212   :  { %5896 = vmatpush.bf16.msra.mxu0 %v8713_v9  ;;  %v2496_v40 = vadd.f32 %v2495_v62, %v361_v13  ;;  %v10181_v43 = vor.u32 %v11579_v32, %v10178_v53  ;;  %v11571_v48 = vld [vmem:[%s17476_s3 + $0xc84] sm:$0xf]  ;;  %v2498_v27 = vadd.f32 %v2497_v61, %v361_v13  ;;  %v11240_v9 = vld [vmem:[%s17476_s3 + $0x224] sm:$0xf0] }
 0x213   :  { %5910 = vmatpush.bf16.msra.mxu1 %v8969_v11  ;;  %v10146_v50 = vld [vmem:[%s17476_s3 + $0xca0] sm:$0xf0]  ;;  %v2525_v11 = vpop.f32.mrf.mxu1  ;;  %v10024_v32 = vld [vmem:[%s17476_s3 + $0xb88] sm:$0xf] }
 0x214   :  { %v2510_v44 = vadd.f32 %v2509_v51, %v2496_v40  ;;  %v10149_v62 = vor.u32 %v11571_v48, %v10146_v50  ;;  %v2512_v41 = vadd.f32 %v2511_v18, %v2498_v27  ;;  %v11563_v33 = vld [vmem:[%s17476_s3 + $0xc44] sm:$0xf]  ;;  %v10057_v51 = vor.u32 %v11552_v29, %v10056_v19  ;;  %v11544_v53 = vld [vmem:[%s17476_s3 + $0xba4] sm:$0xf0] }
 0x215   :  { %5869 = vmatpush.bf16.msrb.mxu2 %v10213_v30  ;;  %v10114_v4 = vld [vmem:[%s17476_s3 + $0xc60] sm:$0xf0]  ;;  %v2553_v30 = vpop.f32.mrf.mxu3  ;;  %v9769_v40 = vor.u32 %v11480_v20, %v9768_v16  ;;  %v9256_v1 = vld [vmem:[%s17476_s3 + $0x588] sm:$0xf] }
 0x216   :  { %5897 = vmatpush.bf16.msra.mxu0 %v8681_v26  ;;  %v2524_v38 = vadd.f32 %v2523_v3, %v2510_v44  ;;  %v10117_v15 = vor.u32 %v11563_v33, %v10114_v4  ;;  %v2526_v24 = vadd.f32 %v2525_v11, %v2512_v41  ;;  %v11555_v26 = vld [vmem:[%s17476_s3 + $0xc04] sm:$0xf]  ;;  %v11352_v46 = vld [vmem:[%s17476_s3 + $0x5a4] sm:$0xf0] }
 0x217   :  { %5911 = vmatpush.bf16.msra.mxu1 %v8937_v28  ;;  %v10082_v2 = vld [vmem:[%s17476_s3 + $0xc20] sm:$0xf0]  ;;  %v8809_v28 = vor.u32 %v11240_v9, %v8808_v17  ;;  %v9736_v48 = vld [vmem:[%s17476_s3 + $0x948] sm:$0xf]  ;;  %v9257_v27 = vor.u32 %v11352_v46, %v9256_v1 }
 0x218   :  { %v2538_v8 = vadd.f32 %v2537_v52, %v2524_v38  ;;  %v2540_v61 = vadd.f32 %v2539_v23, %v2526_v24  ;;  %v11675_v37 = vld [vmem:[%s17476_s3 + $0xfc4] sm:$0xf]  ;;  %v11472_v50 = vld [vmem:[%s17476_s3 + $0x964] sm:$0xf0]  ;;  %v5679_v24 = vpop.f32.mrf.mxu0 }
 0x219   :  { %5870 = vmatpush.bf16.msrb.mxu2 %v10181_v43  ;;  %v10562_v39 = vld [vmem:[%s17476_s3 + $0xfe0] sm:$0xf0]  ;;  %v11536_v63 = vld [vmem:[%s17476_s3 + $0xb64] sm:$0xf0]  ;;  %v9737_v0 = vor.u32 %v11472_v50, %v9736_v48 }
 0x21a   :  { %5898 = vmatpush.bf16.msra.mxu0 %v8649_v42  ;;  %v2552_v13 = vadd.f32 %v2551_v49, %v2538_v8  ;;  %v10085_v42 = vor.u32 %v11555_v26, %v10082_v2  ;;  %v2554_v3 = vadd.f32 %v2553_v30, %v2540_v61  ;;  %v10565_v52 = vor.u32 %v11675_v37, %v10562_v39  ;;  %v11667_v49 = vld [vmem:[%s17476_s3 + $0xf84] sm:$0xf]  ;;  %v11344_v38 = vld [vmem:[%s17476_s3 + $0x564] sm:$0xf0] }
 0x21b   :  { %5912 = vmatpush.bf16.msra.mxu1 %v8905_v36  ;;  %v9289_v36 = vor.u32 %v11360_v56, %v9288_v54  ;;  %v10530_v18 = vld [vmem:[%s17476_s3 + $0xfa0] sm:$0xf0]  ;;  %v11464_v33 = vld [vmem:[%s17476_s3 + $0x924] sm:$0xf0]  ;;  %v5693_v56 = vpop.f32.mrf.mxu1 }
 0x21c   :  { %v2563_v43 = vmax.f32 %v2552_v13, 0.0  ;;  %v2571_v44 = vmax.f32 %v2554_v3, 0.0  ;;  %v14838_v6 = vld [vmem:[%s17477_s4] sm:$0xff]  ;;  %v10533_v4 = vor.u32 %v11667_v49, %v10530_v18  ;;  %v11528_v31 = vld [vmem:[%s17476_s3 + $0xb24] sm:$0xf0] }
 0x21d   :  { %5871 = vmatpush.bf16.msrb.mxu2 %v10149_v62  ;;  %v9224_v62 = vld [vmem:[%s17476_s3 + $0x548] sm:$0xf]  ;;  %v3094_v21 = vperm.slane %v14838_v6, 0  ;;  %v11659_v8 = vld [vmem:[%s17476_s3 + $0xf44] sm:$0xf] }
 0x21e   :  { %5899 = vmatpush.bf16.msra.mxu0 %v8617_v47  ;;  %v10025_v47 = vor.u32 %v11544_v53, %v10024_v32  ;;  %v14826_v57 = vpack.c.bf16 %v2571_v44, %v2563_v43  ;;  %v9225_v17 = vor.u32 %v11344_v38, %v9224_v62  ;;  %v10498_v9 = vld [vmem:[%s17476_s3 + $0xf60] sm:$0xf0]  ;;  %v9192_v10 = vld [vmem:[%s17476_s3 + $0x508] sm:$0xf] }
 0x21f   :  { %5913 = vmatpush.bf16.msra.mxu1 %v8873_v58  ;;  %v9992_v58 = vld [vmem:[%s17476_s3 + $0xb48] sm:$0xf]  ;;  %v5680_v23 = vadd.f32 %v5679_v24, %v3094_v21  ;;  %v10466_v54 = vld [vmem:[%s17476_s3 + $0xf20] sm:$0xf0]  ;;  %v5707_v43 = vpop.f32.mrf.mxu2 }
 0x220   :  { %5776 = vmatmul.bf16.vlgmr.msrb.gmra.mxu3 %v14826_v57  ;;  %v9993_v41 = vor.u32 %v11536_v63, %v9992_v58  ;;  %v11336_v11 = vld [vmem:[%s17476_s3 + $0x524] sm:$0xf0]  ;;  %v11643_v37 = vld [vmem:[%s17476_s3 + $0xec4] sm:$0xf] }
 0x221   :  { %5872 = vmatpush.bf16.msrb.mxu2 %v10117_v15  ;;  %5880 = vmatpush.bf16.msrb.mxu3 %v10565_v52  ;;  %v9672_v19 = vld [vmem:[%s17476_s3 + $0x8c8] sm:$0xf]  ;;  %v5694_v16 = vadd.f32 %v5693_v56, %v5680_v23  ;;  %v10434_v39 = vld [vmem:[%s17476_s3 + $0xee0] sm:$0xf0] }
 0x222   :  { %5900 = vmatpush.bf16.msra.mxu0 %v8585_v60  ;;  %v9704_v60 = vld [vmem:[%s17476_s3 + $0x908] sm:$0xf]  ;;  %v10437_v52 = vor.u32 %v11643_v37, %v10434_v39  ;;  %v11635_v18 = vld [vmem:[%s17476_s3 + $0xe84] sm:$0xf] }
 0x223   :  { %5914 = vmatpush.bf16.msra.mxu1 %v8841_v7  ;;  %v9960_v7 = vld [vmem:[%s17476_s3 + $0xb08] sm:$0xf]  ;;  %v9705_v55 = vor.u32 %v11464_v33, %v9704_v60  ;;  %v5708_v50 = vadd.f32 %v5707_v43, %v5694_v16  ;;  %v8714_v43 = vld [vmem:[%s17476_s3 + $0x168] sm:$0xf0] }
 0x224   :  { %v9961_v15 = vor.u32 %v11528_v31, %v9960_v7  ;;  %v11456_v29 = vld [vmem:[%s17476_s3 + $0x8e4] sm:$0xf0] }
 0x225   :  { %5873 = vmatpush.bf16.msrb.mxu2 %v10085_v42  ;;  %5881 = vmatpush.bf16.msrb.mxu3 %v10533_v4  ;;  %v9928_v26 = vld [vmem:[%s17476_s3 + $0xac8] sm:$0xf]  ;;  %v9673_v13 = vor.u32 %v11456_v29, %v9672_v19  ;;  %v11292_v19 = vld [vmem:[%s17476_s3 + $0x3cc] sm:$0xf] }
 0x226   :  { %5901 = vmatpush.bf16.msra.mxu0 %v8553_v25  ;;  %v10501_v25 = vor.u32 %v11659_v8, %v10498_v9  ;;  %v11520_v2 = vld [vmem:[%s17476_s3 + $0xae4] sm:$0xf0]  ;;  %v11627_v9 = vld [vmem:[%s17476_s3 + $0xe44] sm:$0xf]  ;;  %v9034_v29 = vld [vmem:[%s17476_s3 + $0x3e8] sm:$0xf0] }
 0x227   :  { %5915 = vmatpush.bf16.msra.mxu1 %v8809_v28  ;;  %v9193_v28 = vor.u32 %v11336_v11, %v9192_v10  ;;  %v9160_v61 = vld [vmem:[%s17476_s3 + $0x4c8] sm:$0xf]  ;;  %v9929_v20 = vor.u32 %v11520_v2, %v9928_v26  ;;  %v8778_v10 = vld [vmem:[%s17476_s3 + $0x1e8] sm:$0xf0]  ;;  %v9037_v56 = vor.u32 %v11292_v19, %v9034_v29 }
 0x228   :  { %5874 = vmatmul.bf16.vlgmr.msrb.gmra.mxu2 %v14648_v34  ;;  %v9640_v30 = vld [vmem:[%s17476_s3 + $0x888] sm:$0xf]  ;;  %v11260_v29 = vld [vmem:[%s17476_s3 + $0x2cc] sm:$0xf] }
 0x229   :  { %5902 = vmatmul.bf16.vlgmr.msra.gmra.mxu0 %v14144_v59  ;;  %5922 = vmatpush.bf16.msra.mxu2 %v9289_v36  ;;  %v11448_v42 = vld [vmem:[%s17476_s3 + $0x8a4] sm:$0xf0] }
 0x22a   :  { %5950 = vmatpush.bf16.msrb.mxu0 %v9801_v45  ;;  %5916 = vmatmul.bf16.vlgmr.msra.gmra.mxu1 %v14146_v22  ;;  %v11651_v45 = vld [vmem:[%s17476_s3 + $0xf04] sm:$0xf]  ;;  %v9896_v53 = vld [vmem:[%s17476_s3 + $0xa88] sm:$0xf] }
 0x22b   :  { %5964 = vmatpush.bf16.msrb.mxu1 %v10057_v51  ;;  %v11328_v51 = vld [vmem:[%s17476_s3 + $0x4e4] sm:$0xf0]  ;;  %5882 = vmatpush.bf16.msrb.mxu3 %v10501_v25  ;;  %v10469_v32 = vor.u32 %v11651_v45, %v10466_v54 }
 0x22c   :  { %v11512_v3 = vld [vmem:[%s17476_s3 + $0xaa4] sm:$0xf0]  ;;  %v9161_v36 = vor.u32 %v11328_v51, %v9160_v61  ;;  %v11220_v61 = vld [vmem:[%s17476_s3 + $0x18c] sm:$0xf] }
 0x22d   :  { %5923 = vmatpush.bf16.msra.mxu2 %v9257_v27  ;;  %v9128_v1 = vld [vmem:[%s17476_s3 + $0x488] sm:$0xf]  ;;  %v9897_v44 = vor.u32 %v11512_v3, %v9896_v53  ;;  %v5721_v27 = vpop.f32.mrf.mxu3  ;;  %v8746_v51 = vld [vmem:[%s17476_s3 + $0x1a8] sm:$0xf0] }
 0x22e   :  { %5951 = vmatpush.bf16.msrb.mxu0 %v9769_v40  ;;  %v9641_v40 = vor.u32 %v11448_v42, %v9640_v30  ;;  %v11320_v46 = vld [vmem:[%s17476_s3 + $0x4a4] sm:$0xf0]  ;;  %v14941_v62 = vadd.f32 %v5721_v27, %v5708_v50  ;;  %v11284_v30 = vld [vmem:[%s17476_s3 + $0x38c] sm:$0xf]  ;;  %v15035_v50 = vpop.f32.mrf.mxu0 }
 0x22f   :  { %5965 = vmatpush.bf16.msrb.mxu1 %v10025_v47  ;;  %v9608_v47 = vld [vmem:[%s17476_s3 + $0x848] sm:$0xf]  ;;  %5883 = vmatpush.bf16.msrb.mxu3 %v10469_v32  ;;  %v9129_v49 = vor.u32 %v11320_v46, %v9128_v1  ;;  %v9002_v42 = vld [vmem:[%s17476_s3 + $0x3a8] sm:$0xf0] }
 0x230   :  { %v11440_v48 = vld [vmem:[%s17476_s3 + $0x864] sm:$0xf0]  ;;  %5832 = vmatmul.bf16.vlgmr.msra.gmra.mxu3 %v14151_v14  ;;  %v9005_v1 = vor.u32 %v11284_v30, %v9002_v42  ;;  %v11212_v46 = vld [vmem:[%s17476_s3 + $0x14c] sm:$0xf] }
 0x231   :  { %5924 = vmatpush.bf16.msra.mxu2 %v9225_v17  ;;  %v9864_v58 = vld [vmem:[%s17476_s3 + $0xa48] sm:$0xf]  ;;  %v9609_v38 = vor.u32 %v11440_v48, %v9608_v47  ;;  %v11276_v47 = vld [vmem:[%s17476_s3 + $0x34c] sm:$0xf]  ;;  %v8717_v27 = vor.u32 %v11212_v46, %v8714_v43 }
 0x232   :  { %5952 = vmatpush.bf16.msrb.mxu0 %v9737_v0  ;;  %v11504_v63 = vld [vmem:[%s17476_s3 + $0xa64] sm:$0xf0]  ;;  %v10402_v0 = vld [vmem:[%s17476_s3 + $0xea0] sm:$0xf0]  ;;  %v8970_v48 = vld [vmem:[%s17476_s3 + $0x368] sm:$0xf0] }
 0x233   :  { %5966 = vmatpush.bf16.msrb.mxu1 %v9993_v41  ;;  %v9096_v41 = vld [vmem:[%s17476_s3 + $0x448] sm:$0xf]  ;;  %v9865_v4 = vor.u32 %v11504_v63, %v9864_v58  ;;  %5884 = vmatpush.bf16.msrb.mxu3 %v10437_v52  ;;  %v10405_v8 = vor.u32 %v11635_v18, %v10402_v0  ;;  %v8973_v0 = vor.u32 %v11276_v47, %v8970_v48  ;;  %v11244_v46 = vld [vmem:[%s17476_s3 + $0x24c] sm:$0xf] }
 0x234   :  { %v11312_v60 = vld [vmem:[%s17476_s3 + $0x464] sm:$0xf0]  ;;  %v8842_v43 = vld [vmem:[%s17476_s3 + $0x268] sm:$0xf0] }
 0x235   :  { %5925 = vmatpush.bf16.msra.mxu2 %v9193_v28  ;;  %v9576_v33 = vld [vmem:[%s17476_s3 + $0x808] sm:$0xf]  ;;  %v9097_v11 = vor.u32 %v11312_v60, %v9096_v41  ;;  %v8682_v41 = vld [vmem:[%s17476_s3 + $0x128] sm:$0xf0] }
 0x236   :  { %5953 = vmatpush.bf16.msrb.mxu0 %v9705_v55  ;;  %v11432_v7 = vld [vmem:[%s17476_s3 + $0x824] sm:$0xf0]  ;;  %v11228_v55 = vld [vmem:[%s17476_s3 + $0x1cc] sm:$0xf] }
 0x237   :  { %5967 = vmatpush.bf16.msrb.mxu1 %v9961_v15  ;;  %v9832_v31 = vld [vmem:[%s17476_s3 + $0xa08] sm:$0xf]  ;;  %v10370_v15 = vld [vmem:[%s17476_s3 + $0xe60] sm:$0xf0]  ;;  %v9577_v24 = vor.u32 %v11432_v7, %v9576_v33  ;;  %v8781_v23 = vor.u32 %v11228_v55, %v8778_v10  ;;  %5885 = vmatpush.bf16.msrb.mxu3 %v10405_v8  ;;  %v11268_v33 = vld [vmem:[%s17476_s3 + $0x30c] sm:$0xf] }
 0x238   :  { %v11496_v17 = vld [vmem:[%s17476_s3 + $0xa24] sm:$0xf0]  ;;  %v10373_v54 = vor.u32 %v11627_v9, %v10370_v15  ;;  %v8650_v15 = vld [vmem:[%s17476_s3 + $0xe8] sm:$0xf0] }
 0x239   :  { %5926 = vmatpush.bf16.msra.mxu2 %v9161_v36  ;;  %v9064_v25 = vld [vmem:[%s17476_s3 + $0x408] sm:$0xf]  ;;  %v9833_v2 = vor.u32 %v11496_v17, %v9832_v31  ;;  %v8749_v36 = vor.u32 %v11220_v61, %v8746_v51  ;;  %v11188_v61 = vld [vmem:[%s17476_s3 + $0x8c] sm:$0xf] }
 0x23a   :  { %5954 = vmatpush.bf16.msrb.mxu0 %v9673_v13  ;;  %v11304_v26 = vld [vmem:[%s17476_s3 + $0x424] sm:$0xf0]  ;;  %v11619_v13 = vld [vmem:[%s17476_s3 + $0xe04] sm:$0xf] }
 0x23b   :  { %5968 = vmatpush.bf16.msrb.mxu1 %v9929_v20  ;;  %v10312_v28 = vld [vmem:[%s17476_s3 + $0xdc8] sm:$0xf]  ;;  %v9065_v16 = vor.u32 %v11304_v26, %v9064_v25  ;;  %v10338_v20 = vld [vmem:[%s17476_s3 + $0xe20] sm:$0xf0]  ;;  %5886 = vmatpush.bf16.msrb.mxu3 %v10373_v54 }
 0x23c   :  { %v11616_v45 = vld [vmem:[%s17476_s3 + $0xde4] sm:$0xf0] }
 0x23d   :  { %5927 = vmatpush.bf16.msra.mxu2 %v9129_v49  ;;  %v10313_v32 = vor.u32 %v11616_v45, %v10312_v28  ;;  %v9544_v53 = vld [vmem:[%s17476_s3 + $0x7c8] sm:$0xf] }
 0x23e   :  { %5955 = vmatpush.bf16.msrb.mxu0 %v9641_v40  ;;  %v11424_v3 = vld [vmem:[%s17476_s3 + $0x7e4] sm:$0xf0]  ;;  %v10341_v40 = vor.u32 %v11619_v13, %v10338_v20  ;;  %v8874_v20 = vld [vmem:[%s17476_s3 + $0x2a8] sm:$0xf0] }
 0x23f   :  { %5969 = vmatpush.bf16.msrb.mxu1 %v9897_v44  ;;  %v10280_v37 = vld [vmem:[%s17476_s3 + $0xd88] sm:$0xf]  ;;  %v9545_v44 = vor.u32 %v11424_v3, %v9544_v53 }
 0x240   :  { %v11608_v39 = vld [vmem:[%s17476_s3 + $0xda4] sm:$0xf0]  ;;  %5887 = vmatpush.bf16.msrb.mxu3 %v10341_v40  ;;  %v8586_v40 = vld [vmem:[%s17476_s3 + $0x68] sm:$0xf0] }
 0x241   :  { %5928 = vmatpush.bf16.msra.mxu2 %v9097_v11  ;;  %v10281_v52 = vor.u32 %v11608_v39, %v10280_v37  ;;  %v9512_v58 = vld [vmem:[%s17476_s3 + $0x788] sm:$0xf]  ;;  %v11196_v11 = vld [vmem:[%s17476_s3 + $0xcc] sm:$0xf] }
 0x242   :  { %5956 = vmatpush.bf16.msrb.mxu0 %v9609_v38  ;;  %v11416_v63 = vld [vmem:[%s17476_s3 + $0x7a4] sm:$0xf0]  ;;  %v11204_v38 = vld [vmem:[%s17476_s3 + $0x10c] sm:$0xf]  ;;  %v8653_v45 = vor.u32 %v11196_v11, %v8650_v15 }
 0x243   :  { %5970 = vmatpush.bf16.msrb.mxu1 %v9865_v4  ;;  %v10248_v49 = vld [vmem:[%s17476_s3 + $0xd48] sm:$0xf]  ;;  %v9513_v60 = vor.u32 %v11416_v63, %v9512_v58  ;;  %v8938_v4 = vld [vmem:[%s17476_s3 + $0x328] sm:$0xf0]  ;;  %5888 = vmatmul.bf16.vlgmr.msrb.gmra.mxu3 %v14826_v57  ;;  %v8685_v8 = vor.u32 %v11204_v38, %v8682_v41 }
 0x244   :  { %v11600_v18 = vld [vmem:[%s17476_s3 + $0xd64] sm:$0xf0]  ;;  %5936 = vmatpush.bf16.msra.mxu3 %v9545_v44  ;;  %v8941_v10 = vor.u32 %v11268_v33, %v8938_v4  ;;  %v11180_v39 = vld [vmem:[%s17476_s3 + $0x4c] sm:$0xf] }
 0x245   :  { %5929 = vmatpush.bf16.msra.mxu2 %v9065_v16  ;;  %v10249_v7 = vor.u32 %v11600_v18, %v10248_v49  ;;  %v9480_v31 = vld [vmem:[%s17476_s3 + $0x748] sm:$0xf]  ;;  %v5735_v25 = vpop.f32.mrf.mxu0  ;;  %v11252_v16 = vld [vmem:[%s17476_s3 + $0x28c] sm:$0xf]  ;;  %v8845_v49 = vor.u32 %v11244_v46, %v8842_v43 }
 0x246   :  { %5957 = vmatpush.bf16.msrb.mxu0 %v9577_v24  ;;  %v11408_v17 = vld [vmem:[%s17476_s3 + $0x764] sm:$0xf0]  ;;  %v8906_v24 = vld [vmem:[%s17476_s3 + $0x2e8] sm:$0xf0]  ;;  %v15095_v28 = vadd.f32 %v5735_v25, %v14941_v62  ;;  %v8877_v37 = vor.u32 %v11252_v16, %v8874_v20 }
 0x247   :  { %5971 = vmatpush.bf16.msrb.mxu1 %v9833_v2  ;;  %v10216_v9 = vld [vmem:[%s17476_s3 + $0xd08] sm:$0xf]  ;;  %v9481_v19 = vor.u32 %v11408_v17, %v9480_v31  ;;  %v8909_v13 = vor.u32 %v11260_v29, %v8906_v24  ;;  %v8618_v62 = vld [vmem:[%s17476_s3 + $0xa8] sm:$0xf0] }
 0x248   :  { %5930 = vmatmul.bf16.vlgmr.msra.gmra.mxu2 %v14148_v12  ;;  %v11592_v55 = vld [vmem:[%s17476_s3 + $0xd24] sm:$0xf0]  ;;  %5937 = vmatpush.bf16.msra.mxu3 %v9513_v60  ;;  %v8621_v53 = vor.u32 %v11188_v61, %v8618_v62  ;;  %v8554_v18 = vld [vmem:[%s17476_s3 + $0x28] sm:$0xf0] }
 0x249   :  { %5958 = vmatmul.bf16.vlgmr.msrb.gmra.mxu0 %v14303_v35  ;;  %5978 = vmatpush.bf16.msrb.mxu2 %v10313_v32  ;;  %v10217_v26 = vor.u32 %v11592_v55, %v10216_v9  ;;  %v9448_v2 = vld [vmem:[%s17476_s3 + $0x708] sm:$0xf]  ;;  %v8810_v38 = vld [vmem:[%s17476_s3 + $0x228] sm:$0xf0] }
 0x24a   :  { %6006 = vmatpush.bf16.msra.mxu0 %v8781_v23  ;;  %5972 = vmatmul.bf16.vlgmr.msrb.gmra.mxu1 %v14456_v5  ;;  %v11400_v23 = vld [vmem:[%s17476_s3 + $0x724] sm:$0xf0]  ;;  %v11484_v33 = vld [vmem:[%s17476_s3 + $0x9cc] sm:$0xf] }
 0x24b   :  { %6020 = vmatpush.bf16.msra.mxu1 %v9037_v56  ;;  %v10184_v54 = vld [vmem:[%s17476_s3 + $0xcc8] sm:$0xf]  ;;  %v9449_v51 = vor.u32 %v11400_v23, %v9448_v2  ;;  %v9802_v4 = vld [vmem:[%s17476_s3 + $0x9e8] sm:$0xf0] }
 0x24c   :  { %v11584_v56 = vld [vmem:[%s17476_s3 + $0xce4] sm:$0xf0]  ;;  %5938 = vmatpush.bf16.msra.mxu3 %v9481_v19  ;;  %v11548_v17 = vld [vmem:[%s17476_s3 + $0xbcc] sm:$0xf]  ;;  %v9805_v15 = vor.u32 %v11484_v33, %v9802_v4 }
 0x24d   :  { %5979 = vmatpush.bf16.msrb.mxu2 %v10281_v52  ;;  %v10185_v30 = vor.u32 %v11584_v56, %v10184_v54  ;;  %v9416_v42 = vld [vmem:[%s17476_s3 + $0x6c8] sm:$0xf]  ;;  %v8589_v52 = vor.u32 %v11180_v39, %v8586_v40  ;;  %v11356_v19 = vld [vmem:[%s17476_s3 + $0x5cc] sm:$0xf] }
 0x24e   :  { %6007 = vmatpush.bf16.msra.mxu0 %v8749_v36  ;;  %v11392_v32 = vld [vmem:[%s17476_s3 + $0x6e4] sm:$0xf0]  ;;  %v9290_v29 = vld [vmem:[%s17476_s3 + $0x5e8] sm:$0xf0] }
 0x24f   :  { %6021 = vmatpush.bf16.msra.mxu1 %v9005_v1  ;;  %v10152_v3 = vld [vmem:[%s17476_s3 + $0xc88] sm:$0xf]  ;;  %v9417_v1 = vor.u32 %v11392_v32, %v9416_v42  ;;  %v11476_v2 = vld [vmem:[%s17476_s3 + $0x98c] sm:$0xf]  ;;  %v9293_v62 = vor.u32 %v11356_v19, %v9290_v29 }
 0x250   :  { %v11576_v36 = vld [vmem:[%s17476_s3 + $0xca4] sm:$0xf0]  ;;  %5939 = vmatpush.bf16.msra.mxu3 %v9449_v51  ;;  %v9770_v23 = vld [vmem:[%s17476_s3 + $0x9a8] sm:$0xf0] }
 0x251   :  { %5980 = vmatpush.bf16.msrb.mxu2 %v10249_v7  ;;  %v10153_v44 = vor.u32 %v11576_v36, %v10152_v3  ;;  %v9384_v47 = vld [vmem:[%s17476_s3 + $0x688] sm:$0xf]  ;;  %v10026_v61 = vld [vmem:[%s17476_s3 + $0xba8] sm:$0xf0]  ;;  %v9773_v20 = vor.u32 %v11476_v2, %v9770_v23 }
 0x252   :  { %6008 = vmatpush.bf16.msra.mxu0 %v8717_v27  ;;  %v11384_v48 = vld [vmem:[%s17476_s3 + $0x6a4] sm:$0xf0]  ;;  %v11172_v27 = vld [vmem:[%s17476_s3 + $0xc] sm:$0xf] }
 0x253   :  { %6022 = vmatpush.bf16.msra.mxu1 %v8973_v0  ;;  %v10120_v58 = vld [vmem:[%s17476_s3 + $0xc48] sm:$0xf]  ;;  %v11236_v0 = vld [vmem:[%s17476_s3 + $0x20c] sm:$0xf]  ;;  %v9385_v41 = vor.u32 %v11384_v48, %v9384_v47  ;;  %v8557_v9 = vor.u32 %v11172_v27, %v8554_v18 }
 0x254   :  { %v11568_v63 = vld [vmem:[%s17476_s3 + $0xc64] sm:$0xf0]  ;;  %5940 = vmatpush.bf16.msra.mxu3 %v9417_v1  ;;  %v8813_v11 = vor.u32 %v11236_v0, %v8810_v38  ;;  %v9258_v42 = vld [vmem:[%s17476_s3 + $0x5a8] sm:$0xf0] }
 0x255   :  { %5981 = vmatpush.bf16.msrb.mxu2 %v10217_v26  ;;  %v9352_v60 = vld [vmem:[%s17476_s3 + $0x648] sm:$0xf]  ;;  %v10121_v7 = vor.u32 %v11568_v63, %v10120_v58  ;;  %v11468_v3 = vld [vmem:[%s17476_s3 + $0x94c] sm:$0xf] }
 0x256   :  { %6009 = vmatpush.bf16.msra.mxu0 %v8685_v8  ;;  %v11376_v31 = vld [vmem:[%s17476_s3 + $0x664] sm:$0xf0]  ;;  %v10058_v8 = vld [vmem:[%s17476_s3 + $0xbe8] sm:$0xf0] }
 0x257   :  { %6023 = vmatpush.bf16.msra.mxu1 %v8941_v10  ;;  %v10088_v55 = vld [vmem:[%s17476_s3 + $0xc08] sm:$0xf]  ;;  %v9353_v24 = vor.u32 %v11376_v31, %v9352_v60  ;;  %v10061_v25 = vor.u32 %v11548_v17, %v10058_v8  ;;  %v9738_v36 = vld [vmem:[%s17476_s3 + $0x968] sm:$0xf0] }
 0x258   :  { %v11560_v10 = vld [vmem:[%s17476_s3 + $0xc24] sm:$0xf0]  ;;  %5941 = vmatpush.bf16.msra.mxu3 %v9385_v41  ;;  %v11532_v39 = vld [vmem:[%s17476_s3 + $0xb4c] sm:$0xf] }
 0x259   :  { %5982 = vmatpush.bf16.msrb.mxu2 %v10185_v30  ;;  %v9320_v26 = vld [vmem:[%s17476_s3 + $0x608] sm:$0xf]  ;;  %v10089_v54 = vor.u32 %v11560_v10, %v10088_v55  ;;  %v11348_v30 = vld [vmem:[%s17476_s3 + $0x58c] sm:$0xf] }
 0x25a   :  { %6010 = vmatpush.bf16.msra.mxu0 %v8653_v45  ;;  %v15202_v45 = vpop.f32.mrf.mxu1  ;;  %v11368_v56 = vld [vmem:[%s17476_s3 + $0x624] sm:$0xf0]  ;;  %v9994_v40 = vld [vmem:[%s17476_s3 + $0xb68] sm:$0xf0]  ;;  %v9261_v1 = vor.u32 %v11348_v30, %v9258_v42 }
 0x25b   :  { %6024 = vmatpush.bf16.msra.mxu1 %v8909_v13  ;;  %v11540_v13 = vld [vmem:[%s17476_s3 + $0xb8c] sm:$0xf]  ;;  %v10568_v51 = vld [vmem:[%s17476_s3 + $0xfc8] sm:$0xf]  ;;  %v9321_v32 = vor.u32 %v11368_v56, %v9320_v26 }
 0x25c   :  { %v11680_v16 = vld [vmem:[%s17476_s3 + $0xfe4] sm:$0xf0]  ;;  %5942 = vmatpush.bf16.msra.mxu3 %v9353_v24  ;;  %v11340_v47 = vld [vmem:[%s17476_s3 + $0x54c] sm:$0xf] }
 0x25d   :  { %5983 = vmatpush.bf16.msrb.mxu2 %v10153_v44  ;;  %v10536_v46 = vld [vmem:[%s17476_s3 + $0xf88] sm:$0xf]  ;;  %v9741_v44 = vor.u32 %v11468_v3, %v9738_v36  ;;  %v9226_v48 = vld [vmem:[%s17476_s3 + $0x568] sm:$0xf0] }
 0x25e   :  { %6011 = vmatpush.bf16.msra.mxu0 %v8621_v53  ;;  %v10029_v53 = vor.u32 %v11540_v13, %v10026_v61  ;;  %v11672_v43 = vld [vmem:[%s17476_s3 + $0xfa4] sm:$0xf0]  ;;  %v11460_v58 = vld [vmem:[%s17476_s3 + $0x90c] sm:$0xf]  ;;  %v9229_v41 = vor.u32 %v11340_v47, %v9226_v48 }
 0x25f   :  { %6025 = vmatpush.bf16.msra.mxu1 %v8877_v37  ;;  %v10569_v37 = vor.u32 %v11680_v16, %v10568_v51  ;;  %v9706_v63 = vld [vmem:[%s17476_s3 + $0x928] sm:$0xf0]  ;;  %v10504_v60 = vld [vmem:[%s17476_s3 + $0xf48] sm:$0xf] }
 0x260   :  { %5943 = vmatpush.bf16.msra.mxu3 %v9321_v32  ;;  %v11524_v18 = vld [vmem:[%s17476_s3 + $0xb0c] sm:$0xf]  ;;  %v11664_v33 = vld [vmem:[%s17476_s3 + $0xf64] sm:$0xf0]  ;;  %v9709_v4 = vor.u32 %v11460_v58, %v9706_v63 }
 0x261   :  { %5984 = vmatpush.bf16.msrb.mxu2 %v10121_v7  ;;  %v9962_v0 = vld [vmem:[%s17476_s3 + $0xb28] sm:$0xf0]  ;;  %v10472_v19 = vld [vmem:[%s17476_s3 + $0xf08] sm:$0xf] }
 0x262   :  { %6012 = vmatpush.bf16.msra.mxu0 %v8589_v52  ;;  %v9997_v52 = vor.u32 %v11532_v39, %v9994_v40  ;;  %v5749_v27 = vpop.f32.mrf.mxu1  ;;  %v11332_v7 = vld [vmem:[%s17476_s3 + $0x50c] sm:$0xf]  ;;  %v9965_v31 = vor.u32 %v11524_v18, %v9962_v0  ;;  %v11656_v29 = vld [vmem:[%s17476_s3 + $0xf24] sm:$0xf0] }
 0x263   :  { %6026 = vmatpush.bf16.msra.mxu1 %v8845_v49  ;;  %v10537_v49 = vor.u32 %v11672_v43, %v10536_v46  ;;  %v15265_v38 = vadd.f32 %v5749_v27, %v15095_v28  ;;  %5944 = vmatmul.bf16.vlgmr.msra.gmra.mxu3 %v14151_v14  ;;  %v9194_v28 = vld [vmem:[%s17476_s3 + $0x528] sm:$0xf0]  ;;  %v10473_v13 = vor.u32 %v11656_v29, %v10472_v19  ;;  %v10440_v16 = vld [vmem:[%s17476_s3 + $0xec8] sm:$0xf] }
 0x264   :  { %5992 = vmatpush.bf16.msrb.mxu3 %v10569_v37  ;;  %v11452_v17 = vld [vmem:[%s17476_s3 + $0x8cc] sm:$0xf]  ;;  %v3095_v37 = vperm.slane %v14838_v6, 1  ;;  %v11640_v47 = vld [vmem:[%s17476_s3 + $0xea4] sm:$0xf0] }
 0x265   :  { %5985 = vmatpush.bf16.msrb.mxu2 %v10089_v54  ;;  %v9674_v8 = vld [vmem:[%s17476_s3 + $0x8e8] sm:$0xf0]  ;;  %v11598_v6 = vld [vmem:[%s17476_s3 + $0xd5c] sm:$0xf] }
 0x266   :  { %6013 = vmatpush.bf16.msra.mxu0 %v8557_v9  ;;  %v10505_v9 = vor.u32 %v11664_v33, %v10504_v60  ;;  %v11516_v55 = vld [vmem:[%s17476_s3 + $0xacc] sm:$0xf]  ;;  %v9677_v24 = vor.u32 %v11452_v17, %v9674_v8  ;;  %v10376_v33 = vld [vmem:[%s17476_s3 + $0xe48] sm:$0xf]  ;;  %v9040_v8 = vld [vmem:[%s17476_s3 + $0x3d0] sm:$0xf] }
 0x267   :  { %6027 = vmatpush.bf16.msra.mxu1 %v8813_v11  ;;  %v9930_v10 = vld [vmem:[%s17476_s3 + $0xae8] sm:$0xf0]  ;;  %v15292_v11 = vpop.f32.mrf.mxu0  ;;  %v11632_v17 = vld [vmem:[%s17476_s3 + $0xe64] sm:$0xf0] }
 0x268   :  { %5986 = vmatmul.bf16.vlgmr.msrb.gmra.mxu2 %v14648_v34  ;;  %5993 = vmatpush.bf16.msrb.mxu3 %v10537_v49  ;;  %v9162_v26 = vld [vmem:[%s17476_s3 + $0x4e8] sm:$0xf0]  ;;  %v9933_v2 = vor.u32 %v11516_v55, %v9930_v10 }
 0x269   :  { %6014 = vmatmul.bf16.vlgmr.msra.gmra.mxu0 %v14144_v59  ;;  %6034 = vmatpush.bf16.msra.mxu2 %v9293_v62  ;;  %v11444_v23 = vld [vmem:[%s17476_s3 + $0x88c] sm:$0xf] }
 0x26a   :  { %6062 = vmatpush.bf16.msrb.mxu0 %v9805_v15  ;;  %6028 = vmatmul.bf16.vlgmr.msra.gmra.mxu1 %v14146_v22  ;;  %v9197_v15 = vor.u32 %v11332_v7, %v9194_v28  ;;  %v9642_v54 = vld [vmem:[%s17476_s3 + $0x8a8] sm:$0xf0]  ;;  %v15312_v56 = vpop.f32.mrf.mxu1  ;;  %v11233_v7 = vld [vmem:[%s17476_s3 + $0x1ec] sm:$0xf0] }
 0x26b   :  { %6076 = vmatpush.bf16.msrb.mxu1 %v10061_v25  ;;  %v11324_v25 = vld [vmem:[%s17476_s3 + $0x4cc] sm:$0xf]  ;;  %v9645_v30 = vor.u32 %v11444_v23, %v9642_v54  ;;  %v10344_v54 = vld [vmem:[%s17476_s3 + $0xe08] sm:$0xf] }
 0x26c   :  { %5994 = vmatpush.bf16.msrb.mxu3 %v10505_v9  ;;  %v11508_v61 = vld [vmem:[%s17476_s3 + $0xa8c] sm:$0xf]  ;;  %v9165_v51 = vor.u32 %v11324_v25, %v9162_v26  ;;  %v11297_v9 = vld [vmem:[%s17476_s3 + $0x3ec] sm:$0xf0] }
 0x26d   :  { %6035 = vmatpush.bf16.msra.mxu2 %v9261_v1  ;;  %v9898_v62 = vld [vmem:[%s17476_s3 + $0xaa8] sm:$0xf0]  ;;  %v9041_v23 = vor.u32 %v11297_v9, %v9040_v8 }
 0x26e   :  { %6063 = vmatpush.bf16.msrb.mxu0 %v9773_v20  ;;  %v11648_v20 = vld [vmem:[%s17476_s3 + $0xee4] sm:$0xf0]  ;;  %v11316_v42 = vld [vmem:[%s17476_s3 + $0x48c] sm:$0xf] }
 0x26f   :  { %6077 = vmatpush.bf16.msrb.mxu1 %v10029_v53  ;;  %v9130_v32 = vld [vmem:[%s17476_s3 + $0x4a8] sm:$0xf0]  ;;  %v9901_v53 = vor.u32 %v11508_v61, %v9898_v62  ;;  %v10441_v39 = vor.u32 %v11648_v20, %v10440_v16  ;;  %v5791_v46 = vpop.f32.mrf.mxu0  ;;  %v11225_v61 = vld [vmem:[%s17476_s3 + $0x1ac] sm:$0xf0] }
 0x270   :  { %v11436_v3 = vld [vmem:[%s17476_s3 + $0x84c] sm:$0xf]  ;;  %5995 = vmatpush.bf16.msrb.mxu3 %v10473_v13  ;;  %v9133_v43 = vor.u32 %v11316_v42, %v9130_v32  ;;  %v8752_v13 = vld [vmem:[%s17476_s3 + $0x190] sm:$0xf] }
 0x271   :  { %6036 = vmatpush.bf16.msra.mxu2 %v9229_v41  ;;  %v9610_v36 = vld [vmem:[%s17476_s3 + $0x868] sm:$0xf0]  ;;  %v5792_v41 = vadd.f32 %v5791_v46, %v3095_v37  ;;  %v9008_v16 = vld [vmem:[%s17476_s3 + $0x390] sm:$0xf] }
 0x272   :  { %6064 = vmatpush.bf16.msrb.mxu0 %v9741_v44  ;;  %v11500_v40 = vld [vmem:[%s17476_s3 + $0xa4c] sm:$0xf]  ;;  %v10408_v44 = vld [vmem:[%s17476_s3 + $0xe88] sm:$0xf]  ;;  %v9613_v48 = vor.u32 %v11436_v3, %v9610_v36  ;;  %v5805_v28 = vpop.f32.mrf.mxu1  ;;  %v11289_v20 = vld [vmem:[%s17476_s3 + $0x3ac] sm:$0xf0] }
 0x273   :  { %6078 = vmatpush.bf16.msrb.mxu1 %v9997_v52  ;;  %v9866_v1 = vld [vmem:[%s17476_s3 + $0xa68] sm:$0xf0]  ;;  %v10409_v60 = vor.u32 %v11640_v47, %v10408_v44  ;;  %v15389_v55 = vadd.f32 %v5805_v28, %v5792_v41  ;;  %v11217_v46 = vld [vmem:[%s17476_s3 + $0x16c] sm:$0xf0] }
 0x274   :  { %v11308_v52 = vld [vmem:[%s17476_s3 + $0x44c] sm:$0xf]  ;;  %v9869_v27 = vor.u32 %v11500_v40, %v9866_v1  ;;  %5996 = vmatpush.bf16.msrb.mxu3 %v10441_v39  ;;  %v9009_v40 = vor.u32 %v11289_v20, %v9008_v16  ;;  %v8720_v1 = vld [vmem:[%s17476_s3 + $0x150] sm:$0xf] }
 0x275   :  { %6037 = vmatpush.bf16.msra.mxu2 %v9197_v15  ;;  %v9098_v58 = vld [vmem:[%s17476_s3 + $0x468] sm:$0xf0]  ;;  %v8976_v44 = vld [vmem:[%s17476_s3 + $0x350] sm:$0xf] }
 0x276   :  { %6065 = vmatpush.bf16.msrb.mxu0 %v9709_v4  ;;  %v11428_v63 = vld [vmem:[%s17476_s3 + $0x80c] sm:$0xf]  ;;  %v8784_v4 = vld [vmem:[%s17476_s3 + $0x1d0] sm:$0xf] }
 0x277   :  { %6079 = vmatpush.bf16.msrb.mxu1 %v9965_v31  ;;  %v9578_v49 = vld [vmem:[%s17476_s3 + $0x828] sm:$0xf0]  ;;  %v9101_v31 = vor.u32 %v11308_v52, %v9098_v58  ;;  %v11281_v47 = vld [vmem:[%s17476_s3 + $0x36c] sm:$0xf0] }
 0x278   :  { %v11492_v18 = vld [vmem:[%s17476_s3 + $0xa0c] sm:$0xf]  ;;  %v9581_v10 = vor.u32 %v11428_v63, %v9578_v49  ;;  %5997 = vmatpush.bf16.msrb.mxu3 %v10409_v60  ;;  %v8721_v63 = vor.u32 %v11217_v46, %v8720_v1  ;;  %v11209_v41 = vld [vmem:[%s17476_s3 + $0x12c] sm:$0xf0] }
 0x279   :  { %6038 = vmatpush.bf16.msra.mxu2 %v9165_v51  ;;  %v9834_v0 = vld [vmem:[%s17476_s3 + $0xa28] sm:$0xf0]  ;;  %v11624_v51 = vld [vmem:[%s17476_s3 + $0xe24] sm:$0xf0]  ;;  %v8624_v16 = vld [vmem:[%s17476_s3 + $0x90] sm:$0xf] }
 0x27a   :  { %6066 = vmatpush.bf16.msrb.mxu0 %v9677_v24  ;;  %v11300_v15 = vld [vmem:[%s17476_s3 + $0x40c] sm:$0xf]  ;;  %v9837_v29 = vor.u32 %v11492_v18, %v9834_v0  ;;  %v8785_v24 = vor.u32 %v11233_v7, %v8784_v4  ;;  %v10345_v39 = vor.u32 %v11624_v51, %v10344_v54  ;;  %v8977_v18 = vor.u32 %v11281_v47, %v8976_v44  ;;  %v8688_v0 = vld [vmem:[%s17476_s3 + $0x110] sm:$0xf] }
 0x27b   :  { %6080 = vmatpush.bf16.msrb.mxu1 %v9933_v2  ;;  %v9066_v19 = vld [vmem:[%s17476_s3 + $0x428] sm:$0xf0]  ;;  %v10377_v2 = vor.u32 %v11632_v17, %v10376_v33  ;;  %v8944_v33 = vld [vmem:[%s17476_s3 + $0x310] sm:$0xf]  ;;  %v8689_v17 = vor.u32 %v11209_v41, %v8688_v0 }
 0x27c   :  { %v11612_v25 = vld [vmem:[%s17476_s3 + $0xdcc] sm:$0xf]  ;;  %v9069_v62 = vor.u32 %v11300_v15, %v9066_v19  ;;  %v11273_v4 = vld [vmem:[%s17476_s3 + $0x32c] sm:$0xf0] }
 0x27d   :  { %6039 = vmatpush.bf16.msra.mxu2 %v9133_v43  ;;  %v10314_v26 = vld [vmem:[%s17476_s3 + $0xde8] sm:$0xf0]  ;;  %5998 = vmatpush.bf16.msrb.mxu3 %v10377_v2  ;;  %v8945_v15 = vor.u32 %v11273_v4, %v8944_v33  ;;  %v8656_v19 = vld [vmem:[%s17476_s3 + $0xd0] sm:$0xf] }
 0x27e   :  { %6067 = vmatpush.bf16.msrb.mxu0 %v9645_v30  ;;  %v10317_v30 = vor.u32 %v11612_v25, %v10314_v26  ;;  %v11420_v42 = vld [vmem:[%s17476_s3 + $0x7cc] sm:$0xf]  ;;  %v8912_v25 = vld [vmem:[%s17476_s3 + $0x2d0] sm:$0xf] }
 0x27f   :  { %6081 = vmatpush.bf16.msrb.mxu1 %v9901_v53  ;;  %v9546_v32 = vld [vmem:[%s17476_s3 + $0x7e8] sm:$0xf0]  ;;  %v8753_v53 = vor.u32 %v11225_v61, %v8752_v13  ;;  %v11265_v26 = vld [vmem:[%s17476_s3 + $0x2ec] sm:$0xf0] }
 0x280   :  { %v11604_v3 = vld [vmem:[%s17476_s3 + $0xd8c] sm:$0xf]  ;;  %v9549_v43 = vor.u32 %v11420_v42, %v9546_v32  ;;  %v8913_v51 = vor.u32 %v11265_v26, %v8912_v25  ;;  %v11193_v20 = vld [vmem:[%s17476_s3 + $0xac] sm:$0xf0]  ;;  %v15519_v42 = vpop.f32.mrf.mxu1 }
 0x281   :  { %6040 = vmatpush.bf16.msra.mxu2 %v9101_v31  ;;  %v10282_v36 = vld [vmem:[%s17476_s3 + $0xda8] sm:$0xf0]  ;;  %5999 = vmatpush.bf16.msrb.mxu3 %v10345_v39  ;;  %v8625_v1 = vor.u32 %v11193_v20, %v8624_v16  ;;  %v8560_v4 = vld [vmem:[%s17476_s3 + $0x10] sm:$0xf] }
 0x282   :  { %6068 = vmatpush.bf16.msrb.mxu0 %v9613_v48  ;;  %v10285_v48 = vor.u32 %v11604_v3, %v10282_v36  ;;  %v11412_v52 = vld [vmem:[%s17476_s3 + $0x78c] sm:$0xf]  ;;  %v11257_v3 = vld [vmem:[%s17476_s3 + $0x2ac] sm:$0xf0] }
 0x283   :  { %6082 = vmatpush.bf16.msrb.mxu1 %v9869_v27  ;;  %v9514_v58 = vld [vmem:[%s17476_s3 + $0x7a8] sm:$0xf0]  ;;  %v10064_v26 = vld [vmem:[%s17476_s3 + $0xbd0] sm:$0xf] }
 0x284   :  { %v11596_v27 = vld [vmem:[%s17476_s3 + $0xd4c] sm:$0xf]  ;;  %v9517_v60 = vor.u32 %v11412_v52, %v9514_v58  ;;  %6000 = vmatmul.bf16.vlgmr.msrb.gmra.mxu3 %v14826_v57  ;;  %v11185_v52 = vld [vmem:[%s17476_s3 + $0x6c] sm:$0xf0] }
 0x285   :  { %6041 = vmatpush.bf16.msra.mxu2 %v9069_v62  ;;  %v10250_v49 = vld [vmem:[%s17476_s3 + $0xd68] sm:$0xf0]  ;;  %6048 = vmatpush.bf16.msra.mxu3 %v9549_v43  ;;  %v9296_v20 = vld [vmem:[%s17476_s3 + $0x5d0] sm:$0xf] }
 0x286   :  { %6069 = vmatpush.bf16.msrb.mxu0 %v9581_v10  ;;  %v10253_v7 = vor.u32 %v11596_v27, %v10250_v49  ;;  %v11404_v28 = vld [vmem:[%s17476_s3 + $0x74c] sm:$0xf]  ;;  %v15485_v10 = vpop.f32.mrf.mxu2  ;;  %v8848_v27 = vld [vmem:[%s17476_s3 + $0x250] sm:$0xf] }
 0x287   :  { %6083 = vmatpush.bf16.msrb.mxu1 %v9837_v29  ;;  %v9482_v31 = vld [vmem:[%s17476_s3 + $0x768] sm:$0xf0]  ;;  %v11201_v29 = vld [vmem:[%s17476_s3 + $0xec] sm:$0xf0] }
 0x288   :  { %6042 = vmatmul.bf16.vlgmr.msra.gmra.mxu2 %v14148_v12  ;;  %v11588_v8 = vld [vmem:[%s17476_s3 + $0xd0c] sm:$0xf]  ;;  %v8657_v13 = vor.u32 %v11201_v29, %v8656_v19  ;;  %v11249_v49 = vld [vmem:[%s17476_s3 + $0x26c] sm:$0xf0] }
 0x289   :  { %6070 = vmatmul.bf16.vlgmr.msrb.gmra.mxu0 %v14303_v35  ;;  %6090 = vmatpush.bf16.msrb.mxu2 %v10317_v30  ;;  %v10218_v9 = vld [vmem:[%s17476_s3 + $0xd28] sm:$0xf0]  ;;  %v15517_v30 = vpop.f32.mrf.mxu0  ;;  %v9808_v19 = vld [vmem:[%s17476_s3 + $0x9d0] sm:$0xf] }
 0x28a   :  { %6118 = vmatpush.bf16.msra.mxu0 %v8785_v24  ;;  %6084 = vmatmul.bf16.vlgmr.msrb.gmra.mxu1 %v14456_v5  ;;  %v9485_v24 = vor.u32 %v11404_v28, %v9482_v31  ;;  %v10221_v2 = vor.u32 %v11588_v8, %v10218_v9  ;;  %v9450_v54 = vld [vmem:[%s17476_s3 + $0x728] sm:$0xf0]  ;;  %v11177_v28 = vld [vmem:[%s17476_s3 + $0x2c] sm:$0xf0] }
 0x28b   :  { %6132 = vmatpush.bf16.msra.mxu1 %v9041_v23  ;;  %6049 = vmatpush.bf16.msra.mxu3 %v9517_v60  ;;  %v11396_v23 = vld [vmem:[%s17476_s3 + $0x70c] sm:$0xf]  ;;  %v8816_v31 = vld [vmem:[%s17476_s3 + $0x210] sm:$0xf] }
 0x28c   :  { %v11580_v61 = vld [vmem:[%s17476_s3 + $0xccc] sm:$0xf]  ;;  %v9453_v32 = vor.u32 %v11396_v23, %v9450_v54  ;;  %v11489_v29 = vld [vmem:[%s17476_s3 + $0x9ec] sm:$0xf0]  ;;  %v15598_v23 = vpop.f32.mrf.mxu1  ;;  %v8561_v54 = vor.u32 %v11177_v28, %v8560_v4 }
 0x28d   :  { %6091 = vmatpush.bf16.msrb.mxu2 %v10285_v48  ;;  %v10186_v62 = vld [vmem:[%s17476_s3 + $0xce8] sm:$0xf0]  ;;  %v8592_v48 = vld [vmem:[%s17476_s3 + $0x50] sm:$0xf]  ;;  %v9809_v16 = vor.u32 %v11489_v29, %v9808_v19 }
 0x28e   :  { %6119 = vmatpush.bf16.msra.mxu0 %v8753_v53  ;;  %v8880_v53 = vld [vmem:[%s17476_s3 + $0x290] sm:$0xf]  ;;  %v10189_v36 = vor.u32 %v11580_v61, %v10186_v62  ;;  %v11388_v39 = vld [vmem:[%s17476_s3 + $0x6cc] sm:$0xf]  ;;  %v5763_v44 = vpop.f32.mrf.mxu2  ;;  %v8593_v41 = vor.u32 %v11185_v52, %v8592_v48 }
 0x28f   :  { %6133 = vmatpush.bf16.msra.mxu1 %v9009_v40  ;;  %6050 = vmatpush.bf16.msra.mxu3 %v9485_v24  ;;  %v9418_v40 = vld [vmem:[%s17476_s3 + $0x6e8] sm:$0xf0]  ;;  %v8881_v47 = vor.u32 %v11257_v3, %v8880_v53  ;;  %v15546_v58 = vadd.f32 %v5763_v44, %v15265_v38  ;;  %v11545_v44 = vld [vmem:[%s17476_s3 + $0xbac] sm:$0xf0] }
 0x290   :  { %v11572_v46 = vld [vmem:[%s17476_s3 + $0xc8c] sm:$0xf]  ;;  %v11537_v4 = vld [vmem:[%s17476_s3 + $0xb6c] sm:$0xf0] }
 0x291   :  { %6092 = vmatpush.bf16.msrb.mxu2 %v10253_v7  ;;  %v10154_v43 = vld [vmem:[%s17476_s3 + $0xca8] sm:$0xf0]  ;;  %v8849_v7 = vor.u32 %v11249_v49, %v8848_v27  ;;  %v15578_v8 = vpop.f32.mrf.mxu0  ;;  %v9264_v27 = vld [vmem:[%s17476_s3 + $0x590] sm:$0xf] }
 0x292   :  { %6120 = vmatpush.bf16.msra.mxu0 %v8721_v63  ;;  %v9421_v63 = vor.u32 %v11388_v39, %v9418_v40  ;;  %v11380_v0 = vld [vmem:[%s17476_s3 + $0x68c] sm:$0xf]  ;;  %v9776_v39 = vld [vmem:[%s17476_s3 + $0x990] sm:$0xf] }
 0x293   :  { %6134 = vmatpush.bf16.msra.mxu1 %v8977_v18  ;;  %6051 = vmatpush.bf16.msra.mxu3 %v9453_v32  ;;  %v10157_v18 = vor.u32 %v11572_v46, %v10154_v43  ;;  %v9386_v38 = vld [vmem:[%s17476_s3 + $0x6a8] sm:$0xf0]  ;;  %v11361_v32 = vld [vmem:[%s17476_s3 + $0x5ec] sm:$0xf0] }
 0x294   :  { %v11564_v60 = vld [vmem:[%s17476_s3 + $0xc4c] sm:$0xf]  ;;  %v9389_v9 = vor.u32 %v11380_v0, %v9386_v38  ;;  %v11481_v40 = vld [vmem:[%s17476_s3 + $0x9ac] sm:$0xf0] }
 0x295   :  { %6093 = vmatpush.bf16.msrb.mxu2 %v10221_v2  ;;  %v10122_v33 = vld [vmem:[%s17476_s3 + $0xc68] sm:$0xf0]  ;;  %v11553_v2 = vld [vmem:[%s17476_s3 + $0xbec] sm:$0xf0] }
 0x296   :  { %6121 = vmatpush.bf16.msra.mxu0 %v8689_v17  ;;  %v11241_v17 = vld [vmem:[%s17476_s3 + $0x22c] sm:$0xf0]  ;;  %v10125_v24 = vor.u32 %v11564_v60, %v10122_v33  ;;  %v9354_v25 = vld [vmem:[%s17476_s3 + $0x668] sm:$0xf0]  ;;  %v15606_v62 = vpop.f32.mrf.mxu2  ;;  %v10065_v3 = vor.u32 %v11553_v2, %v10064_v26 }
 0x297   :  { %6135 = vmatpush.bf16.msra.mxu1 %v8945_v15  ;;  %6052 = vmatpush.bf16.msra.mxu3 %v9421_v63  ;;  %v11372_v15 = vld [vmem:[%s17476_s3 + $0x64c] sm:$0xf]  ;;  %v10032_v43 = vld [vmem:[%s17476_s3 + $0xb90] sm:$0xf]  ;;  %v9777_v63 = vor.u32 %v11481_v40, %v9776_v39 }
 0x298   :  { %v10090_v61 = vld [vmem:[%s17476_s3 + $0xc28] sm:$0xf0]  ;;  %v9357_v53 = vor.u32 %v11372_v15, %v9354_v25  ;;  %v11353_v49 = vld [vmem:[%s17476_s3 + $0x5ac] sm:$0xf0]  ;;  %v10033_v0 = vor.u32 %v11545_v44, %v10032_v43 }
 0x299   :  { %6094 = vmatpush.bf16.msrb.mxu2 %v10189_v36  ;;  %v11364_v36 = vld [vmem:[%s17476_s3 + $0x60c] sm:$0xf]  ;;  %v9744_v38 = vld [vmem:[%s17476_s3 + $0x950] sm:$0xf]  ;;  %v9265_v28 = vor.u32 %v11353_v49, %v9264_v27  ;;  %v15727_v49 = vpop.f32.mrf.mxu3 }
 0x29a   :  { %6122 = vmatpush.bf16.msra.mxu0 %v8657_v13  ;;  %v11556_v13 = vld [vmem:[%s17476_s3 + $0xc0c] sm:$0xf]  ;;  %v10000_v33 = vld [vmem:[%s17476_s3 + $0xb50] sm:$0xf] }
 0x29b   :  { %6136 = vmatpush.bf16.msra.mxu1 %v8913_v51  ;;  %v8817_v51 = vor.u32 %v11241_v17, %v8816_v31  ;;  %6053 = vmatpush.bf16.msra.mxu3 %v9389_v9  ;;  %v9322_v46 = vld [vmem:[%s17476_s3 + $0x628] sm:$0xf0]  ;;  %v9232_v19 = vld [vmem:[%s17476_s3 + $0x550] sm:$0xf]  ;;  %v10001_v26 = vor.u32 %v11537_v4, %v10000_v33 }
 0x29c   :  { %v11676_v48 = vld [vmem:[%s17476_s3 + $0xfcc] sm:$0xf]  ;;  %v11345_v29 = vld [vmem:[%s17476_s3 + $0x56c] sm:$0xf0] }
 0x29d   :  { %6095 = vmatpush.bf16.msrb.mxu2 %v10157_v18  ;;  %v10570_v52 = vld [vmem:[%s17476_s3 + $0xfe8] sm:$0xf0]  ;;  %v9325_v18 = vor.u32 %v11364_v36, %v9322_v46  ;;  %v9712_v2 = vld [vmem:[%s17476_s3 + $0x910] sm:$0xf] }
 0x29e   :  { %6123 = vmatpush.bf16.msra.mxu0 %v8625_v1  ;;  %v10093_v1 = vor.u32 %v11556_v13, %v10090_v61  ;;  %v10573_v60 = vor.u32 %v11676_v48, %v10570_v52  ;;  %v11668_v31 = vld [vmem:[%s17476_s3 + $0xf8c] sm:$0xf]  ;;  %v5819_v9 = vpop.f32.mrf.mxu2  ;;  %v9968_v61 = vld [vmem:[%s17476_s3 + $0xb10] sm:$0xf] }
 0x29f   :  { %6137 = vmatpush.bf16.msra.mxu1 %v8881_v47  ;;  %v9297_v47 = vor.u32 %v11361_v32, %v9296_v20  ;;  %6054 = vmatpush.bf16.msra.mxu3 %v9357_v53  ;;  %v10538_v17 = vld [vmem:[%s17476_s3 + $0xfa8] sm:$0xf0]  ;;  %v15675_v25 = vadd.f32 %v5819_v9, %v15389_v55  ;;  %v11529_v55 = vld [vmem:[%s17476_s3 + $0xb2c] sm:$0xf0]  ;;  %v15700_v32 = vld [vmem:[%s17477_s4] sm:$0xff] }
 0x2a0   :  { %v10541_v13 = vor.u32 %v11668_v31, %v10538_v17  ;;  %v10506_v20 = vld [vmem:[%s17476_s3 + $0xf68] sm:$0xf0]  ;;  %v3096_v53 = vperm.slane %v15700_v32, 2  ;;  %v9200_v36 = vld [vmem:[%s17476_s3 + $0x510] sm:$0xf]  ;;  %v9969_v40 = vor.u32 %v11529_v55, %v9968_v61 }
 0x2a1   :  { %6096 = vmatpush.bf16.msrb.mxu2 %v10125_v24  ;;  %v15672_v24 = vpop.f32.mrf.mxu1  ;;  %v11337_v39 = vld [vmem:[%s17476_s3 + $0x52c] sm:$0xf0]  ;;  %v10474_v27 = vld [vmem:[%s17476_s3 + $0xf28] sm:$0xf0] }
 0x2a2   :  { %6124 = vmatpush.bf16.msra.mxu0 %v8593_v41  ;;  %v11473_v41 = vld [vmem:[%s17476_s3 + $0x96c] sm:$0xf0]  ;;  %v9201_v52 = vor.u32 %v11337_v39, %v9200_v36  ;;  %v11636_v39 = vld [vmem:[%s17476_s3 + $0xe8c] sm:$0xf] }
 0x2a3   :  { %6138 = vmatpush.bf16.msra.mxu1 %v8849_v7  ;;  %v15657_v7 = vpop.f32.mrf.mxu0  ;;  %v9745_v15 = vor.u32 %v11473_v41, %v9744_v38  ;;  %6055 = vmatpush.bf16.msra.mxu3 %v9325_v18  ;;  %v11457_v46 = vld [vmem:[%s17476_s3 + $0x8ec] sm:$0xf0] }
 0x2a4   :  { %v9936_v44 = vld [vmem:[%s17476_s3 + $0xad0] sm:$0xf] }
 0x2a5   :  { %6097 = vmatpush.bf16.msrb.mxu2 %v10093_v1  ;;  %v9680_v1 = vld [vmem:[%s17476_s3 + $0x8d0] sm:$0xf] }
 0x2a6   :  { %6125 = vmatpush.bf16.msra.mxu0 %v8561_v54  ;;  %v11465_v54 = vld [vmem:[%s17476_s3 + $0x92c] sm:$0xf0]  ;;  %6056 = vmatmul.bf16.vlgmr.msra.gmra.mxu3 %v14151_v14 }
 0x2a7   :  { %6139 = vmatpush.bf16.msra.mxu1 %v8817_v51  ;;  %6104 = vmatpush.bf16.msrb.mxu3 %v10573_v60  ;;  %v9233_v51 = vor.u32 %v11345_v29, %v9232_v19  ;;  %v9168_v38 = vld [vmem:[%s17476_s3 + $0x4d0] sm:$0xf]  ;;  %v11644_v29 = vld [vmem:[%s17476_s3 + $0xecc] sm:$0xf] }
 0x2a8   :  { %6098 = vmatmul.bf16.vlgmr.msrb.gmra.mxu2 %v14648_v34  ;;  %v11329_v41 = vld [vmem:[%s17476_s3 + $0x4ec] sm:$0xf0] }
 0x2a9   :  { %6126 = vmatmul.bf16.vlgmr.msra.gmra.mxu0 %v14144_v59  ;;  %6146 = vmatpush.bf16.msra.mxu2 %v9297_v47  ;;  %v11521_v47 = vld [vmem:[%s17476_s3 + $0xaec] sm:$0xf0]  ;;  %v5917_v60 = vpop.f32.mrf.mxu1  ;;  %v9169_v19 = vor.u32 %v11329_v41, %v9168_v38  ;;  %v11229_v41 = vld [vmem:[%s17476_s3 + $0x1d4] sm:$0xf] }
 0x2aa   :  { %6174 = vmatpush.bf16.msrb.mxu0 %v9809_v16  ;;  %6140 = vmatmul.bf16.vlgmr.msra.gmra.mxu1 %v14146_v22  ;;  %v11660_v16 = vld [vmem:[%s17476_s3 + $0xf4c] sm:$0xf]  ;;  %v9937_v33 = vor.u32 %v11521_v47, %v9936_v44  ;;  %v9648_v4 = vld [vmem:[%s17476_s3 + $0x890] sm:$0xf] }
 0x2ab   :  { %6188 = vmatpush.bf16.msrb.mxu1 %v10065_v3  ;;  %v9713_v3 = vor.u32 %v11465_v54, %v9712_v2  ;;  %6105 = vmatpush.bf16.msrb.mxu3 %v10541_v13  ;;  %v10509_v43 = vor.u32 %v11660_v16, %v10506_v20  ;;  %v5903_v48 = vpop.f32.mrf.mxu0  ;;  %v9904_v9 = vld [vmem:[%s17476_s3 + $0xa90] sm:$0xf] }
 0x2ac   :  { %v5904_v18 = vadd.f32 %v5903_v48, %v3096_v53  ;;  %v9136_v54 = vld [vmem:[%s17476_s3 + $0x490] sm:$0xf] }
 0x2ad   :  { %6147 = vmatpush.bf16.msra.mxu2 %v9265_v28  ;;  %v11449_v28 = vld [vmem:[%s17476_s3 + $0x8ac] sm:$0xf0] }
 0x2ae   :  { %6175 = vmatpush.bf16.msrb.mxu0 %v9777_v63  ;;  %v11652_v63 = vld [vmem:[%s17476_s3 + $0xf0c] sm:$0xf]  ;;  %v15743_v31 = vadd.f32 %v5917_v60, %v5904_v18  ;;  %v9649_v2 = vor.u32 %v11449_v28, %v9648_v4  ;;  %v11321_v13 = vld [vmem:[%s17476_s3 + $0x4ac] sm:$0xf0]  ;;  %v8786_v60 = vld [vmem:[%s17476_s3 + $0x1f0] sm:$0xf0] }
 0x2af   :  { %6189 = vmatpush.bf16.msrb.mxu1 %v10033_v0  ;;  %v9681_v0 = vor.u32 %v11457_v46, %v9680_v1  ;;  %6106 = vmatpush.bf16.msrb.mxu3 %v10509_v43  ;;  %v10477_v17 = vor.u32 %v11652_v63, %v10474_v27  ;;  %v9616_v55 = vld [vmem:[%s17476_s3 + $0x850] sm:$0xf]  ;;  %v9137_v36 = vor.u32 %v11321_v13, %v9136_v54  ;;  %v5777_v1 = vpop.f32.mrf.mxu3  ;;  %v10378_v4 = vld [vmem:[%s17476_s3 + $0xe68] sm:$0xf0]  ;;  %v11293_v28 = vld [vmem:[%s17476_s3 + $0x3d4] sm:$0xf] }
 0x2b0   :  { %v9872_v20 = vld [vmem:[%s17476_s3 + $0xa50] sm:$0xf]  ;;  %v15791_v48 = vadd.f32 %v5777_v1, %v15546_v58  ;;  %v11628_v58 = vld [vmem:[%s17476_s3 + $0xe4c] sm:$0xf] }
 0x2b1   :  { %6148 = vmatpush.bf16.msra.mxu2 %v9233_v51  ;;  %v11441_v51 = vld [vmem:[%s17476_s3 + $0x86c] sm:$0xf0]  ;;  %v10381_v13 = vor.u32 %v11628_v58, %v10378_v4 }
 0x2b2   :  { %6176 = vmatpush.bf16.msrb.mxu0 %v9745_v15  ;;  %v11513_v15 = vld [vmem:[%s17476_s3 + $0xaac] sm:$0xf0]  ;;  %v9617_v46 = vor.u32 %v11441_v51, %v9616_v55  ;;  %v11620_v55 = vld [vmem:[%s17476_s3 + $0xe0c] sm:$0xf]  ;;  %v11221_v51 = vld [vmem:[%s17476_s3 + $0x194] sm:$0xf] }
 0x2b3   :  { %6190 = vmatpush.bf16.msrb.mxu1 %v10001_v26  ;;  %v10442_v26 = vld [vmem:[%s17476_s3 + $0xee8] sm:$0xf0]  ;;  %v9905_v61 = vor.u32 %v11513_v15, %v9904_v9  ;;  %6107 = vmatpush.bf16.msrb.mxu3 %v10477_v17  ;;  %v9104_v43 = vld [vmem:[%s17476_s3 + $0x450] sm:$0xf]  ;;  %v9042_v17 = vld [vmem:[%s17476_s3 + $0x3f0] sm:$0xf0] }
 0x2b4   :  { %v10445_v16 = vor.u32 %v11644_v29, %v10442_v26  ;;  %v11313_v44 = vld [vmem:[%s17476_s3 + $0x46c] sm:$0xf0]  ;;  %v8789_v26 = vor.u32 %v11229_v41, %v8786_v60  ;;  %v11277_v41 = vld [vmem:[%s17476_s3 + $0x354] sm:$0xf] }
 0x2b5   :  { %6149 = vmatpush.bf16.msra.mxu2 %v9201_v52  ;;  %v9584_v47 = vld [vmem:[%s17476_s3 + $0x810] sm:$0xf]  ;;  %v8978_v60 = vld [vmem:[%s17476_s3 + $0x370] sm:$0xf0] }
 0x2b6   :  { %6177 = vmatpush.bf16.msrb.mxu0 %v9713_v3  ;;  %v11505_v3 = vld [vmem:[%s17476_s3 + $0xa6c] sm:$0xf0] }
 0x2b7   :  { %6191 = vmatpush.bf16.msrb.mxu1 %v9969_v40  ;;  %v10410_v40 = vld [vmem:[%s17476_s3 + $0xea8] sm:$0xf0]  ;;  %v9873_v52 = vor.u32 %v11505_v3, %v9872_v20  ;;  %v11433_v63 = vld [vmem:[%s17476_s3 + $0x82c] sm:$0xf0]  ;;  %6108 = vmatpush.bf16.msrb.mxu3 %v10445_v16  ;;  %v8754_v16 = vld [vmem:[%s17476_s3 + $0x1b0] sm:$0xf0] }
 0x2b8   :  { %v9840_v27 = vld [vmem:[%s17476_s3 + $0xa10] sm:$0xf]  ;;  %v10413_v38 = vor.u32 %v11636_v39, %v10410_v40  ;;  %v9585_v9 = vor.u32 %v11433_v63, %v9584_v47  ;;  %v10346_v3 = vld [vmem:[%s17476_s3 + $0xe28] sm:$0xf0]  ;;  %v9010_v39 = vld [vmem:[%s17476_s3 + $0x3b0] sm:$0xf0]  ;;  %v15852_v40 = vpop.f32.mrf.mxu3 }
 0x2b9   :  { %6150 = vmatpush.bf16.msra.mxu2 %v9169_v19  ;;  %v11497_v18 = vld [vmem:[%s17476_s3 + $0xa2c] sm:$0xf0]  ;;  %v10349_v63 = vor.u32 %v11620_v55, %v10346_v3 }
 0x2ba   :  { %6178 = vmatpush.bf16.msrb.mxu0 %v9681_v0  ;;  %v15802_v0 = vpop.f32.mrf.mxu2  ;;  %v9072_v15 = vld [vmem:[%s17476_s3 + $0x410] sm:$0xf]  ;;  %v9841_v29 = vor.u32 %v11497_v18, %v9840_v27  ;;  %v11213_v18 = vld [vmem:[%s17476_s3 + $0x154] sm:$0xf] }
 0x2bb   :  { %6192 = vmatpush.bf16.msrb.mxu1 %v9937_v33  ;;  %v9105_v33 = vor.u32 %v11313_v44, %v9104_v43  ;;  %v11305_v19 = vld [vmem:[%s17476_s3 + $0x42c] sm:$0xf0]  ;;  %6109 = vmatpush.bf16.msrb.mxu3 %v10413_v38  ;;  %v8757_v44 = vor.u32 %v11221_v51, %v8754_v16  ;;  %v8722_v38 = vld [vmem:[%s17476_s3 + $0x170] sm:$0xf0] }
 0x2bc   :  { %v11617_v54 = vld [vmem:[%s17476_s3 + $0xdec] sm:$0xf0]  ;;  %v9073_v20 = vor.u32 %v11305_v19, %v9072_v15 }
 0x2bd   :  { %6151 = vmatpush.bf16.msra.mxu2 %v9137_v36  ;;  %v11285_v36 = vld [vmem:[%s17476_s3 + $0x394] sm:$0xf]  ;;  %v11425_v43 = vld [vmem:[%s17476_s3 + $0x7ec] sm:$0xf0] }
 0x2be   :  { %6179 = vmatpush.bf16.msrb.mxu0 %v9649_v2  ;;  %v10320_v2 = vld [vmem:[%s17476_s3 + $0xdd0] sm:$0xf]  ;;  %v9013_v27 = vor.u32 %v11285_v36, %v9010_v39 }
 0x2bf   :  { %6193 = vmatpush.bf16.msrb.mxu1 %v9905_v61  ;;  %v9045_v61 = vor.u32 %v11293_v28, %v9042_v17  ;;  %v10321_v1 = vor.u32 %v11617_v54, %v10320_v2  ;;  %v10288_v47 = vld [vmem:[%s17476_s3 + $0xd90] sm:$0xf]  ;;  %6110 = vmatpush.bf16.msrb.mxu3 %v10381_v13  ;;  %v8690_v2 = vld [vmem:[%s17476_s3 + $0x130] sm:$0xf0] }
 0x2c0   :  { %v9520_v28 = vld [vmem:[%s17476_s3 + $0x790] sm:$0xf]  ;;  %v11269_v13 = vld [vmem:[%s17476_s3 + $0x314] sm:$0xf]  ;;  %v5833_v55 = vpop.f32.mrf.mxu3 }
 0x2c1   :  { %6152 = vmatpush.bf16.msra.mxu2 %v9105_v33  ;;  %v11417_v17 = vld [vmem:[%s17476_s3 + $0x7ac] sm:$0xf0]  ;;  %v5834_v3 = vadd.f32 %v5833_v55, %v15675_v25  ;;  %v8658_v25 = vld [vmem:[%s17476_s3 + $0xf0] sm:$0xf0] }
 0x2c2   :  { %6180 = vmatpush.bf16.msrb.mxu0 %v9617_v46  ;;  %v9552_v46 = vld [vmem:[%s17476_s3 + $0x7d0] sm:$0xf]  ;;  %v5875_v33 = vpop.f32.mrf.mxu2  ;;  %v9521_v54 = vor.u32 %v11417_v17, %v9520_v28  ;;  %v8626_v17 = vld [vmem:[%s17476_s3 + $0xb0] sm:$0xf0] }
 0x2c3   :  { %6194 = vmatpush.bf16.msrb.mxu1 %v9873_v52  ;;  %v11609_v52 = vld [vmem:[%s17476_s3 + $0xdac] sm:$0xf0]  ;;  %v9553_v58 = vor.u32 %v11425_v43, %v9552_v46  ;;  %6111 = vmatpush.bf16.msrb.mxu3 %v10349_v63  ;;  %v11197_v43 = vld [vmem:[%s17476_s3 + $0xd4] sm:$0xf] }
 0x2c4   :  { %v10289_v4 = vor.u32 %v11609_v52, %v10288_v47  ;;  %v10256_v15 = vld [vmem:[%s17476_s3 + $0xd50] sm:$0xf]  ;;  %v5848_v47 = vadd.f32 %v15578_v8, %v5834_v3  ;;  %v11261_v63 = vld [vmem:[%s17476_s3 + $0x2d4] sm:$0xf]  ;;  %v8661_v8 = vor.u32 %v11197_v43, %v8658_v25 }
 0x2c5   :  { %6153 = vmatpush.bf16.msra.mxu2 %v9073_v20  ;;  %v11601_v19 = vld [vmem:[%s17476_s3 + $0xd6c] sm:$0xf0]  ;;  %v11181_v3 = vld [vmem:[%s17476_s3 + $0x54] sm:$0xf] }
 0x2c6   :  { %6181 = vmatpush.bf16.msrb.mxu0 %v9585_v9  ;;  %v8725_v9 = vor.u32 %v11213_v18, %v8722_v38  ;;  %v10257_v51 = vor.u32 %v11601_v19, %v10256_v15  ;;  %v9488_v16 = vld [vmem:[%s17476_s3 + $0x750] sm:$0xf]  ;;  %6112 = vmatmul.bf16.vlgmr.msrb.gmra.mxu3 %v14826_v57  ;;  %v15958_v15 = vpop.f32.mrf.mxu0  ;;  %v8850_v43 = vld [vmem:[%s17476_s3 + $0x270] sm:$0xf0] }
 0x2c7   :  { %6195 = vmatpush.bf16.msrb.mxu1 %v9841_v29  ;;  %v8981_v29 = vor.u32 %v11277_v41, %v8978_v60  ;;  %6160 = vmatpush.bf16.msra.mxu3 %v9553_v58  ;;  %v11409_v20 = vld [vmem:[%s17476_s3 + $0x76c] sm:$0xf0]  ;;  %v5862_v60 = vadd.f32 %v15598_v23, %v5848_v47  ;;  %v11253_v23 = vld [vmem:[%s17476_s3 + $0x294] sm:$0xf] }
 0x2c8   :  { %6154 = vmatmul.bf16.vlgmr.msra.gmra.mxu2 %v14148_v12  ;;  %v10224_v39 = vld [vmem:[%s17476_s3 + $0xd10] sm:$0xf]  ;;  %v9489_v52 = vor.u32 %v11409_v20, %v9488_v16 }
 0x2c9   :  { %6182 = vmatmul.bf16.vlgmr.msrb.gmra.mxu0 %v14303_v35  ;;  %6202 = vmatpush.bf16.msrb.mxu2 %v10321_v1  ;;  %v11593_v1 = vld [vmem:[%s17476_s3 + $0xd2c] sm:$0xf0] }
 0x2ca   :  { %6230 = vmatpush.bf16.msra.mxu0 %v8789_v26  ;;  %6196 = vmatmul.bf16.vlgmr.msrb.gmra.mxu1 %v14456_v5  ;;  %v11205_v26 = vld [vmem:[%s17476_s3 + $0x114] sm:$0xf]  ;;  %v10225_v18 = vor.u32 %v11593_v1, %v10224_v39  ;;  %v9456_v38 = vld [vmem:[%s17476_s3 + $0x710] sm:$0xf] }
 0x2cb   :  { %6244 = vmatpush.bf16.msra.mxu1 %v9045_v61  ;;  %v8946_v61 = vld [vmem:[%s17476_s3 + $0x330] sm:$0xf0]  ;;  %v8693_v36 = vor.u32 %v11205_v26, %v8690_v2  ;;  %6161 = vmatpush.bf16.msra.mxu3 %v9521_v54  ;;  %v10192_v58 = vld [vmem:[%s17476_s3 + $0xcd0] sm:$0xf]  ;;  %v5876_v26 = vadd.f32 %v5875_v33, %v5862_v60  ;;  %v15966_v2 = vpop.f32.mrf.mxu1  ;;  %v5835_v54 = vpop.f32.mrf.mxu3 }
 0x2cc   :  { %v8949_v46 = vor.u32 %v11269_v13, %v8946_v61  ;;  %v11585_v41 = vld [vmem:[%s17476_s3 + $0xcec] sm:$0xf0] }
 0x2cd   :  { %6203 = vmatpush.bf16.msrb.mxu2 %v10289_v4  ;;  %v15949_v4 = vpop.f32.mrf.mxu2  ;;  %v10193_v13 = vor.u32 %v11585_v41, %v10192_v58  ;;  %v11393_v61 = vld [vmem:[%s17476_s3 + $0x6ec] sm:$0xf0]  ;;  %v8818_v58 = vld [vmem:[%s17476_s3 + $0x230] sm:$0xf0] }
 0x2ce   :  { %6231 = vmatpush.bf16.msra.mxu0 %v8757_v44  ;;  %v5794_v44 = vadd.f32 %v15517_v30, %v3095_v37  ;;  %v11401_v37 = vld [vmem:[%s17476_s3 + $0x72c] sm:$0xf0]  ;;  %v16018_v41 = vpop.f32.mrf.mxu0 }
 0x2cf   :  { %6245 = vmatpush.bf16.msra.mxu1 %v9013_v27  ;;  %v8914_v27 = vld [vmem:[%s17476_s3 + $0x2f0] sm:$0xf0]  ;;  %6162 = vmatpush.bf16.msra.mxu3 %v9489_v52  ;;  %v9457_v19 = vor.u32 %v11401_v37, %v9456_v38  ;;  %v10160_v33 = vld [vmem:[%s17476_s3 + $0xc90] sm:$0xf] }
 0x2d0   :  { %v5808_v30 = vadd.f32 %v15519_v42, %v5794_v44  ;;  %v8917_v28 = vor.u32 %v11261_v63, %v8914_v27  ;;  %v11189_v42 = vld [vmem:[%s17476_s3 + $0x94] sm:$0xf]  ;;  %v11577_v16 = vld [vmem:[%s17476_s3 + $0xcac] sm:$0xf0] }
 0x2d1   :  { %6204 = vmatpush.bf16.msrb.mxu2 %v10257_v51  ;;  %v8629_v51 = vor.u32 %v11189_v42, %v8626_v17  ;;  %v10161_v25 = vor.u32 %v11577_v16, %v10160_v33  ;;  %v9392_v44 = vld [vmem:[%s17476_s3 + $0x690] sm:$0xf]  ;;  %v11173_v27 = vld [vmem:[%s17476_s3 + $0x14] sm:$0xf] }
 0x2d2   :  { %6232 = vmatpush.bf16.msra.mxu0 %v8725_v9  ;;  %v5822_v9 = vadd.f32 %v15802_v0, %v5808_v30  ;;  %v9424_v0 = vld [vmem:[%s17476_s3 + $0x6d0] sm:$0xf]  ;;  %v8562_v30 = vld [vmem:[%s17476_s3 + $0x30] sm:$0xf0] }
 0x2d3   :  { %6246 = vmatpush.bf16.msra.mxu1 %v8981_v29  ;;  %v8882_v29 = vld [vmem:[%s17476_s3 + $0x2b0] sm:$0xf0]  ;;  %6163 = vmatpush.bf16.msra.mxu3 %v9457_v19  ;;  %v9425_v1 = vor.u32 %v11393_v61, %v9424_v0  ;;  %v10128_v52 = vld [vmem:[%s17476_s3 + $0xc50] sm:$0xf]  ;;  %v5889_v19 = vpop.f32.mrf.mxu3  ;;  %v8565_v0 = vor.u32 %v11173_v27, %v8562_v30 }
 0x2d4   :  { %v5836_v55 = vadd.f32 %v5835_v54, %v5822_v9  ;;  %v8885_v20 = vor.u32 %v11253_v23, %v8882_v29  ;;  %v11569_v63 = vld [vmem:[%s17476_s3 + $0xc6c] sm:$0xf0]  ;;  %v11485_v42 = vld [vmem:[%s17476_s3 + $0x9d4] sm:$0xf]  ;;  %v16032_v9 = vpop.f32.mrf.mxu1 }
 0x2d5   :  { %6205 = vmatpush.bf16.msrb.mxu2 %v10225_v18  ;;  %v5931_v38 = vpop.f32.mrf.mxu2  ;;  %v9810_v17 = vld [vmem:[%s17476_s3 + $0x9f0] sm:$0xf0]  ;;  %v11377_v23 = vld [vmem:[%s17476_s3 + $0x66c] sm:$0xf0] }
 0x2d6   :  { %6233 = vmatpush.bf16.msra.mxu0 %v8693_v36  ;;  %v8594_v36 = vld [vmem:[%s17476_s3 + $0x70] sm:$0xf0]  ;;  %v5850_v39 = vadd.f32 %v15657_v7, %v5836_v55  ;;  %v11385_v7 = vld [vmem:[%s17476_s3 + $0x6ac] sm:$0xf0]  ;;  %v16021_v60 = vadd.f32 %v5931_v38, %v15743_v31  ;;  %v10129_v31 = vor.u32 %v11569_v63, %v10128_v52  ;;  %v9813_v33 = vor.u32 %v11485_v42, %v9810_v17 }
 0x2d7   :  { %6247 = vmatpush.bf16.msra.mxu1 %v8949_v46  ;;  %v11245_v46 = vld [vmem:[%s17476_s3 + $0x254] sm:$0xf]  ;;  %v8597_v47 = vor.u32 %v11181_v3, %v8594_v36  ;;  %6164 = vmatpush.bf16.msra.mxu3 %v9425_v1  ;;  %v10096_v61 = vld [vmem:[%s17476_s3 + $0xc10] sm:$0xf] }
 0x2d8   :  { %v5864_v18 = vadd.f32 %v15672_v24, %v5850_v39  ;;  %v8853_v37 = vor.u32 %v11245_v46, %v8850_v43  ;;  %v9393_v24 = vor.u32 %v11385_v7, %v9392_v44  ;;  %v11549_v29 = vld [vmem:[%s17476_s3 + $0xbd4] sm:$0xf]  ;;  %v11561_v55 = vld [vmem:[%s17476_s3 + $0xc2c] sm:$0xf0] }
 0x2d9   :  { %6206 = vmatpush.bf16.msrb.mxu2 %v10193_v13  ;;  %v10066_v54 = vld [vmem:[%s17476_s3 + $0xbf0] sm:$0xf0]  ;;  %v16043_v13 = vadd.f32 %v5889_v19, %v5876_v26  ;;  %v9328_v36 = vld [vmem:[%s17476_s3 + $0x610] sm:$0xf]  ;;  %v10097_v46 = vor.u32 %v11561_v55, %v10096_v61 }
 0x2da   :  { %6234 = vmatpush.bf16.msra.mxu0 %v8661_v8  ;;  %v11237_v8 = vld [vmem:[%s17476_s3 + $0x214] sm:$0xf]  ;;  %v10069_v3 = vor.u32 %v11549_v29, %v10066_v54  ;;  %v11369_v43 = vld [vmem:[%s17476_s3 + $0x62c] sm:$0xf0] }
 0x2db   :  { %6248 = vmatpush.bf16.msra.mxu1 %v8917_v28  ;;  %v9360_v28 = vld [vmem:[%s17476_s3 + $0x650] sm:$0xf]  ;;  %v11357_v16 = vld [vmem:[%s17476_s3 + $0x5d4] sm:$0xf]  ;;  %6165 = vmatpush.bf16.msra.mxu3 %v9393_v24  ;;  %v9329_v30 = vor.u32 %v11369_v43, %v9328_v36 }
 0x2dc   :  { %v9298_v26 = vld [vmem:[%s17476_s3 + $0x5f0] sm:$0xf0]  ;;  %v11681_v52 = vld [vmem:[%s17476_s3 + $0xfec] sm:$0xf0]  ;;  %v16110_v54 = vpop.f32.mrf.mxu1 }
 0x2dd   :  { %6207 = vmatpush.bf16.msrb.mxu2 %v10161_v25  ;;  %v11477_v39 = vld [vmem:[%s17476_s3 + $0x994] sm:$0xf]  ;;  %v9301_v7 = vor.u32 %v11357_v16, %v9298_v26  ;;  %v11673_v29 = vld [vmem:[%s17476_s3 + $0xfac] sm:$0xf0] }
 0x2de   :  { %6235 = vmatpush.bf16.msra.mxu0 %v8629_v51  ;;  %v8821_v51 = vor.u32 %v11237_v8, %v8818_v58  ;;  %v9778_v1 = vld [vmem:[%s17476_s3 + $0x9b0] sm:$0xf0]  ;;  %v11665_v43 = vld [vmem:[%s17476_s3 + $0xf6c] sm:$0xf0] }
 0x2df   :  { %6249 = vmatpush.bf16.msra.mxu1 %v8885_v20  ;;  %v9361_v20 = vor.u32 %v11377_v23, %v9360_v28  ;;  %v11541_v25 = vld [vmem:[%s17476_s3 + $0xb94] sm:$0xf]  ;;  %v9781_v63 = vor.u32 %v11477_v39, %v9778_v1  ;;  %v5891_v28 = vpop.f32.mrf.mxu3  ;;  %v10544_v23 = vld [vmem:[%s17476_s3 + $0xf90] sm:$0xf] }
 0x2e0   :  { %v10034_v44 = vld [vmem:[%s17476_s3 + $0xbb0] sm:$0xf0] }
 0x2e1   :  { %6208 = vmatpush.bf16.msrb.mxu2 %v10129_v31  ;;  %v11349_v27 = vld [vmem:[%s17476_s3 + $0x594] sm:$0xf]  ;;  %6166 = vmatpush.bf16.msra.mxu3 %v9361_v20  ;;  %v10037_v8 = vor.u32 %v11541_v25, %v10034_v44  ;;  %v3097_v25 = vperm.slane %v15700_v32, 3  ;;  %v11670_v32 = vld [vmem:[%s17476_s3 + $0xf9c] sm:$0xf] }
 0x2e2   :  { %6236 = vmatpush.bf16.msra.mxu0 %v8597_v47  ;;  %v10576_v47 = vld [vmem:[%s17476_s3 + $0xfd0] sm:$0xf]  ;;  %v9266_v38 = vld [vmem:[%s17476_s3 + $0x5b0] sm:$0xf0] }
 0x2e3   :  { %6250 = vmatpush.bf16.msra.mxu1 %v8853_v37  ;;  %v5878_v37 = vadd.f32 %v15949_v4, %v5864_v18  ;;  %v11469_v58 = vld [vmem:[%s17476_s3 + $0x954] sm:$0xf]  ;;  %v10577_v42 = vor.u32 %v11681_v52, %v10576_v47  ;;  %v16101_v18 = vpop.f32.mrf.mxu0  ;;  %v9269_v31 = vor.u32 %v11349_v27, %v9266_v38 }
 0x2e4   :  { %v9746_v24 = vld [vmem:[%s17476_s3 + $0x970] sm:$0xf0] }
 0x2e5   :  { %6209 = vmatpush.bf16.msrb.mxu2 %v10097_v46  ;;  %v11533_v17 = vld [vmem:[%s17476_s3 + $0xb54] sm:$0xf]  ;;  %v5892_v19 = vadd.f32 %v5891_v28, %v5878_v37  ;;  %6167 = vmatpush.bf16.msra.mxu3 %v9329_v30  ;;  %v10512_v46 = vld [vmem:[%s17476_s3 + $0xf50] sm:$0xf] }
 0x2e6   :  { %6237 = vmatpush.bf16.msra.mxu0 %v8565_v0  ;;  %v10002_v4 = vld [vmem:[%s17476_s3 + $0xb70] sm:$0xf0]  ;;  %v9749_v0 = vor.u32 %v11469_v58, %v9746_v24  ;;  %v10513_v38 = vor.u32 %v11665_v43, %v10512_v46  ;;  %v10480_v24 = vld [vmem:[%s17476_s3 + $0xf10] sm:$0xf] }
 0x2e7   :  { %6251 = vmatpush.bf16.msra.mxu1 %v8821_v51  ;;  %v11341_v61 = vld [vmem:[%s17476_s3 + $0x554] sm:$0xf]  ;;  %v6567_v51 = vmax.f32 %v16043_v13, 0.0  ;;  %v10005_v16 = vor.u32 %v11533_v17, %v10002_v4  ;;  %v11657_v28 = vld [vmem:[%s17476_s3 + $0xf2c] sm:$0xf0]  ;;  %v6029_v17 = vpop.f32.mrf.mxu1 }
 0x2e8   :  { %v9234_v55 = vld [vmem:[%s17476_s3 + $0x570] sm:$0xf0]  ;;  %6210 = vmatmul.bf16.vlgmr.msrb.gmra.mxu2 %v14648_v34  ;;  %6168 = vmatmul.bf16.vlgmr.msra.gmra.mxu3 %v14151_v14 }
 0x2e9   :  { %6238 = vmatmul.bf16.vlgmr.msra.gmra.mxu0 %v14144_v59  ;;  %6258 = vmatpush.bf16.msra.mxu2 %v9301_v7  ;;  %v11461_v26 = vld [vmem:[%s17476_s3 + $0x914] sm:$0xf]  ;;  %v9237_v1 = vor.u32 %v11341_v61, %v9234_v55  ;;  %v10481_v55 = vor.u32 %v11657_v28, %v10480_v24  ;;  %v16225_v28 = vpop.f32.mrf.mxu2 }
 0x2ea   :  { %6286 = vmatpush.bf16.msrb.mxu0 %v9813_v33  ;;  %6252 = vmatmul.bf16.vlgmr.msra.gmra.mxu1 %v14146_v22  ;;  %v6575_v33 = vmax.f32 %v5892_v19, 0.0  ;;  %v9714_v20 = vld [vmem:[%s17476_s3 + $0x930] sm:$0xf0] }
 0x2eb   :  { %6300 = vmatpush.bf16.msrb.mxu1 %v10069_v3  ;;  %6216 = vmatpush.bf16.msrb.mxu3 %v10577_v42  ;;  %v10545_v3 = vor.u32 %v11673_v29, %v10544_v23  ;;  %v11525_v13 = vld [vmem:[%s17476_s3 + $0xb14] sm:$0xf]  ;;  %v9717_v44 = vor.u32 %v11461_v26, %v9714_v20  ;;  %v10448_v26 = vld [vmem:[%s17476_s3 + $0xed0] sm:$0xf] }
 0x2ec   :  { %v9970_v36 = vld [vmem:[%s17476_s3 + $0xb30] sm:$0xf0]  ;;  %v16132_v39 = vpack.c.bf16 %v6575_v33, %v6567_v51  ;;  %v11649_v20 = vld [vmem:[%s17476_s3 + $0xeec] sm:$0xf0] }
 0x2ed   :  { %6259 = vmatpush.bf16.msra.mxu2 %v9269_v31  ;;  %v11333_v7 = vld [vmem:[%s17476_s3 + $0x514] sm:$0xf]  ;;  %v9973_v52 = vor.u32 %v11525_v13, %v9970_v36 }
 0x2ee   :  { %6287 = vmatpush.bf16.msrb.mxu0 %v9781_v63  ;;  %v9202_v47 = vld [vmem:[%s17476_s3 + $0x530] sm:$0xf0] }
 0x2ef   :  { %6301 = vmatpush.bf16.msrb.mxu1 %v10037_v8  ;;  %v11453_v63 = vld [vmem:[%s17476_s3 + $0x8d4] sm:$0xf]  ;;  %6217 = vmatpush.bf16.msrb.mxu3 %v10545_v3  ;;  %v6015_v8 = vpop.f32.mrf.mxu0  ;;  %v9205_v58 = vor.u32 %v11333_v7, %v9202_v47 }
 0x2f0   :  { %v9682_v27 = vld [vmem:[%s17476_s3 + $0x8f0] sm:$0xf0]  ;;  %v6016_v42 = vadd.f32 %v6015_v8, %v3097_v25 }
 0x2f1   :  { %v11517_v37 = vld [vmem:[%s17476_s3 + $0xad4] sm:$0xf]  ;;  %6260 = vmatpush.bf16.msra.mxu2 %v9237_v1  ;;  %v9685_v4 = vor.u32 %v11453_v63, %v9682_v27  ;;  %v10416_v27 = vld [vmem:[%s17476_s3 + $0xe90] sm:$0xf] }
 0x2f2   :  { %6288 = vmatpush.bf16.msrb.mxu0 %v9749_v0  ;;  %v9938_v30 = vld [vmem:[%s17476_s3 + $0xaf0] sm:$0xf0]  ;;  %v16178_v61 = vadd.f32 %v6029_v17, %v6016_v42  ;;  %v6031_v42 = vpop.f32.mrf.mxu1 }
 0x2f3   :  { %6302 = vmatpush.bf16.msrb.mxu1 %v10005_v16  ;;  %v11325_v19 = vld [vmem:[%s17476_s3 + $0x4d4] sm:$0xf]  ;;  %v9941_v23 = vor.u32 %v11517_v37, %v9938_v30  ;;  %6218 = vmatpush.bf16.msrb.mxu3 %v10513_v38  ;;  %v11641_v38 = vld [vmem:[%s17476_s3 + $0xeac] sm:$0xf0] }
 0x2f4   :  { %v9170_v31 = vld [vmem:[%s17476_s3 + $0x4f0] sm:$0xf0] }
 0x2f5   :  { %v11445_v29 = vld [vmem:[%s17476_s3 + $0x894] sm:$0xf]  ;;  %6261 = vmatpush.bf16.msra.mxu2 %v9205_v58  ;;  %v9173_v16 = vor.u32 %v11325_v19, %v9170_v31 }
 0x2f6   :  { %6289 = vmatpush.bf16.msrb.mxu0 %v9717_v44  ;;  %v9650_v0 = vld [vmem:[%s17476_s3 + $0x8b0] sm:$0xf0]  ;;  %v10449_v44 = vor.u32 %v11649_v20, %v10448_v26  ;;  %v9048_v26 = vld [vmem:[%s17476_s3 + $0x3d8] sm:$0xf] }
 0x2f7   :  { %6303 = vmatpush.bf16.msrb.mxu1 %v9973_v52  ;;  %v11509_v51 = vld [vmem:[%s17476_s3 + $0xa94] sm:$0xf]  ;;  %v9653_v3 = vor.u32 %v11445_v29, %v9650_v0  ;;  %6219 = vmatpush.bf16.msrb.mxu3 %v10481_v55  ;;  %v6017_v52 = vpop.f32.mrf.mxu0  ;;  %v10384_v29 = vld [vmem:[%s17476_s3 + $0xe50] sm:$0xf]  ;;  %v8792_v0 = vld [vmem:[%s17476_s3 + $0x1d8] sm:$0xf] }
 0x2f8   :  { %v9906_v33 = vld [vmem:[%s17476_s3 + $0xab0] sm:$0xf0]  ;;  %v6018_v37 = vadd.f32 %v6017_v52, %v3097_v25  ;;  %v11234_v55 = vld [vmem:[%s17476_s3 + $0x1f4] sm:$0xf0] }
 0x2f9   :  { %v11317_v13 = vld [vmem:[%s17476_s3 + $0x494] sm:$0xf]  ;;  %v9909_v1 = vor.u32 %v11509_v51, %v9906_v33  ;;  %6262 = vmatpush.bf16.msra.mxu2 %v9173_v16  ;;  %v5945_v51 = vpop.f32.mrf.mxu3  ;;  %v11633_v16 = vld [vmem:[%s17476_s3 + $0xe6c] sm:$0xf0]  ;;  %v11298_v20 = vld [vmem:[%s17476_s3 + $0x3f4] sm:$0xf0] }
 0x2fa   :  { %6290 = vmatpush.bf16.msrb.mxu0 %v9685_v4  ;;  %v9138_v36 = vld [vmem:[%s17476_s3 + $0x4b0] sm:$0xf0]  ;;  %v16236_v31 = vadd.f32 %v6031_v42, %v6018_v37  ;;  %v9049_v52 = vor.u32 %v11298_v20, %v9048_v26  ;;  %v11282_v26 = vld [vmem:[%s17476_s3 + $0x374] sm:$0xf0] }
 0x2fb   :  { %6304 = vmatpush.bf16.msrb.mxu1 %v9941_v23  ;;  %v11437_v46 = vld [vmem:[%s17476_s3 + $0x854] sm:$0xf]  ;;  %v9141_v63 = vor.u32 %v11317_v13, %v9138_v36  ;;  %6220 = vmatpush.bf16.msrb.mxu3 %v10449_v44  ;;  %v10417_v23 = vor.u32 %v11641_v38, %v10416_v27  ;;  %v8760_v27 = vld [vmem:[%s17476_s3 + $0x198] sm:$0xf] }
 0x2fc   :  { %v9618_v43 = vld [vmem:[%s17476_s3 + $0x870] sm:$0xf0]  ;;  %v11226_v38 = vld [vmem:[%s17476_s3 + $0x1b4] sm:$0xf0] }
 0x2fd   :  { %v11501_v7 = vld [vmem:[%s17476_s3 + $0xa54] sm:$0xf]  ;;  %v9621_v30 = vor.u32 %v11437_v46, %v9618_v43  ;;  %6263 = vmatpush.bf16.msra.mxu2 %v9141_v63  ;;  %v8793_v43 = vor.u32 %v11234_v55, %v8792_v0  ;;  %v10352_v63 = vld [vmem:[%s17476_s3 + $0xe10] sm:$0xf]  ;;  %v11218_v55 = vld [vmem:[%s17476_s3 + $0x174] sm:$0xf0] }
 0x2fe   :  { %v9874_v47 = vld [vmem:[%s17476_s3 + $0xa70] sm:$0xf0]  ;;  %6291 = vmatpush.bf16.msrb.mxu0 %v9653_v3  ;;  %v5946_v3 = vadd.f32 %v5945_v51, %v16021_v60 }
 0x2ff   :  { %v11309_v8 = vld [vmem:[%s17476_s3 + $0x454] sm:$0xf]  ;;  %6305 = vmatpush.bf16.msrb.mxu1 %v9909_v1  ;;  %v9877_v17 = vor.u32 %v11501_v7, %v9874_v47  ;;  %6221 = vmatpush.bf16.msrb.mxu3 %v10417_v23  ;;  %v10385_v47 = vor.u32 %v11633_v16, %v10384_v29  ;;  %v8984_v16 = vld [vmem:[%s17476_s3 + $0x358] sm:$0xf] }
 0x300   :  { %v9106_v58 = vld [vmem:[%s17476_s3 + $0x470] sm:$0xf0]  ;;  %v5960_v7 = vadd.f32 %v16018_v41, %v5946_v3  ;;  %v11625_v41 = vld [vmem:[%s17476_s3 + $0xe2c] sm:$0xf0] }
 0x301   :  { %v11429_v24 = vld [vmem:[%s17476_s3 + $0x814] sm:$0xf]  ;;  %v9109_v33 = vor.u32 %v11309_v8, %v9106_v58  ;;  %v11290_v8 = vld [vmem:[%s17476_s3 + $0x3b4] sm:$0xf0]  ;;  %v10353_v29 = vor.u32 %v11625_v41, %v10352_v63 }
 0x302   :  { %v9586_v25 = vld [vmem:[%s17476_s3 + $0x830] sm:$0xf0]  ;;  %6292 = vmatpush.bf16.msrb.mxu0 %v9621_v30  ;;  %v9016_v30 = vld [vmem:[%s17476_s3 + $0x398] sm:$0xf] }
 0x303   :  { %v11493_v4 = vld [vmem:[%s17476_s3 + $0xa14] sm:$0xf]  ;;  %v9589_v13 = vor.u32 %v11429_v24, %v9586_v25  ;;  %6306 = vmatpush.bf16.msrb.mxu1 %v9877_v17  ;;  %6264 = vmatpush.bf16.msra.mxu2 %v9109_v33  ;;  %v5974_v17 = vadd.f32 %v16032_v9, %v5960_v7  ;;  %v5987_v25 = vpop.f32.mrf.mxu2  ;;  %v9017_v0 = vor.u32 %v11290_v8, %v9016_v30  ;;  %v8728_v9 = vld [vmem:[%s17476_s3 + $0x158] sm:$0xf] }
 0x304   :  { %v9842_v19 = vld [vmem:[%s17476_s3 + $0xa30] sm:$0xf0]  ;;  %6222 = vmatpush.bf16.msrb.mxu3 %v10385_v47  ;;  %v8952_v47 = vld [vmem:[%s17476_s3 + $0x318] sm:$0xf] }
 0x305   :  { %v11301_v36 = vld [vmem:[%s17476_s3 + $0x414] sm:$0xf]  ;;  %v9845_v46 = vor.u32 %v11493_v4, %v9842_v19  ;;  %v8761_v4 = vor.u32 %v11226_v38, %v8760_v27  ;;  %v16307_v51 = vadd.f32 %v5987_v25, %v5974_v17  ;;  %v8920_v17 = vld [vmem:[%s17476_s3 + $0x2d8] sm:$0xf] }
 0x306   :  { %v9074_v1 = vld [vmem:[%s17476_s3 + $0x430] sm:$0xf0]  ;;  %6293 = vmatpush.bf16.msrb.mxu0 %v9589_v13  ;;  %v11266_v25 = vld [vmem:[%s17476_s3 + $0x2f4] sm:$0xf0] }
 0x307   :  { %v11613_v44 = vld [vmem:[%s17476_s3 + $0xdd4] sm:$0xf]  ;;  %v9077_v37 = vor.u32 %v11301_v36, %v9074_v1  ;;  %6307 = vmatpush.bf16.msrb.mxu1 %v9845_v46  ;;  %v8729_v36 = vor.u32 %v11218_v55, %v8728_v9 }
 0x308   :  { %v10322_v60 = vld [vmem:[%s17476_s3 + $0xdf0] sm:$0xf0]  ;;  %6223 = vmatpush.bf16.msrb.mxu3 %v10353_v29 }
 0x309   :  { %v10325_v58 = vor.u32 %v11613_v44, %v10322_v60  ;;  %v11421_v24 = vld [vmem:[%s17476_s3 + $0x7d4] sm:$0xf]  ;;  %6265 = vmatpush.bf16.msra.mxu2 %v9077_v37  ;;  %6294 = vmatmul.bf16.vlgmr.msrb.gmra.mxu0 %v14303_v35  ;;  %v8696_v44 = vld [vmem:[%s17476_s3 + $0x118] sm:$0xf] }
 0x30a   :  { %v9554_v42 = vld [vmem:[%s17476_s3 + $0x7f0] sm:$0xf0]  ;;  %6342 = vmatpush.bf16.msra.mxu0 %v8793_v43  ;;  %6308 = vmatmul.bf16.vlgmr.msrb.gmra.mxu1 %v14456_v5  ;;  %v8985_v43 = vor.u32 %v11282_v26, %v8984_v16  ;;  %v11210_v60 = vld [vmem:[%s17476_s3 + $0x134] sm:$0xf0] }
 0x30b   :  { %v11605_v19 = vld [vmem:[%s17476_s3 + $0xd94] sm:$0xf]  ;;  %6356 = vmatpush.bf16.msra.mxu1 %v9049_v52  ;;  %v9557_v33 = vor.u32 %v11421_v24, %v9554_v42  ;;  %v11274_v52 = vld [vmem:[%s17476_s3 + $0x334] sm:$0xf0]  ;;  %6224 = vmatmul.bf16.vlgmr.msrb.gmra.mxu3 %v14826_v57  ;;  %v8697_v37 = vor.u32 %v11210_v60, %v8696_v44  ;;  %v16379_v55 = vpop.f32.mrf.mxu2 }
 0x30c   :  { %v10290_v23 = vld [vmem:[%s17476_s3 + $0xdb0] sm:$0xf0]  ;;  %6266 = vmatmul.bf16.vlgmr.msra.gmra.mxu2 %v14148_v12  ;;  %v8953_v8 = vor.u32 %v11274_v52, %v8952_v47  ;;  %v11202_v24 = vld [vmem:[%s17476_s3 + $0xf4] sm:$0xf0] }
 0x30d   :  { %6314 = vmatpush.bf16.msrb.mxu2 %v10325_v58  ;;  %v10293_v20 = vor.u32 %v11605_v19, %v10290_v23  ;;  %v11413_v3 = vld [vmem:[%s17476_s3 + $0x794] sm:$0xf]  ;;  %6272 = vmatpush.bf16.msra.mxu3 %v9557_v33  ;;  %v8664_v58 = vld [vmem:[%s17476_s3 + $0xd8] sm:$0xf]  ;;  %v8921_v33 = vor.u32 %v11266_v25, %v8920_v17 }
 0x30e   :  { %v9522_v13 = vld [vmem:[%s17476_s3 + $0x7b0] sm:$0xf0]  ;;  %6343 = vmatpush.bf16.msra.mxu0 %v8761_v4  ;;  %v8665_v29 = vor.u32 %v11202_v24, %v8664_v58  ;;  %v8632_v16 = vld [vmem:[%s17476_s3 + $0x98] sm:$0xf] }
 0x30f   :  { %v11597_v1 = vld [vmem:[%s17476_s3 + $0xd54] sm:$0xf]  ;;  %6357 = vmatpush.bf16.msra.mxu1 %v9017_v0  ;;  %v9525_v7 = vor.u32 %v11413_v3, %v9522_v13  ;;  %v11194_v26 = vld [vmem:[%s17476_s3 + $0xb4] sm:$0xf0] }
 0x310   :  { %v10258_v46 = vld [vmem:[%s17476_s3 + $0xd70] sm:$0xf0]  ;;  %v8888_v3 = vld [vmem:[%s17476_s3 + $0x298] sm:$0xf]  ;;  %v8633_v44 = vor.u32 %v11194_v26, %v8632_v16 }
 0x311   :  { %6315 = vmatpush.bf16.msrb.mxu2 %v10293_v20  ;;  %v10261_v63 = vor.u32 %v11597_v1, %v10258_v46  ;;  %v11405_v27 = vld [vmem:[%s17476_s3 + $0x754] sm:$0xf]  ;;  %6273 = vmatpush.bf16.msra.mxu3 %v9525_v7  ;;  %v11258_v13 = vld [vmem:[%s17476_s3 + $0x2b4] sm:$0xf0] }
 0x312   :  { %v9490_v38 = vld [vmem:[%s17476_s3 + $0x770] sm:$0xf0]  ;;  %6344 = vmatpush.bf16.msra.mxu0 %v8729_v36  ;;  %v16393_v36 = vpop.f32.mrf.mxu3  ;;  %v8889_v47 = vor.u32 %v11258_v13, %v8888_v3  ;;  %v8600_v52 = vld [vmem:[%s17476_s3 + $0x58] sm:$0xf] }
 0x313   :  { %v11589_v41 = vld [vmem:[%s17476_s3 + $0xd14] sm:$0xf]  ;;  %6358 = vmatpush.bf16.msra.mxu1 %v8985_v43  ;;  %v9493_v42 = vor.u32 %v11405_v27, %v9490_v38  ;;  %v8856_v38 = vld [vmem:[%s17476_s3 + $0x258] sm:$0xf]  ;;  %v6043_v25 = vpop.f32.mrf.mxu2 }
 0x314   :  { %v10226_v30 = vld [vmem:[%s17476_s3 + $0xd30] sm:$0xf0]  ;;  %v8568_v17 = vld [vmem:[%s17476_s3 + $0x18] sm:$0xf] }
 0x315   :  { %6316 = vmatpush.bf16.msrb.mxu2 %v10261_v63  ;;  %v10229_v4 = vor.u32 %v11589_v41, %v10226_v30  ;;  %v11397_v19 = vld [vmem:[%s17476_s3 + $0x714] sm:$0xf]  ;;  %6274 = vmatpush.bf16.msra.mxu3 %v9493_v42  ;;  %v11186_v63 = vld [vmem:[%s17476_s3 + $0x74] sm:$0xf0] }
 0x316   :  { %v9458_v23 = vld [vmem:[%s17476_s3 + $0x730] sm:$0xf0]  ;;  %6345 = vmatpush.bf16.msra.mxu0 %v8697_v37  ;;  %v11250_v37 = vld [vmem:[%s17476_s3 + $0x274] sm:$0xf0]  ;;  %v8601_v58 = vor.u32 %v11186_v63, %v8600_v52 }
 0x317   :  { %v11581_v0 = vld [vmem:[%s17476_s3 + $0xcd4] sm:$0xf]  ;;  %6359 = vmatpush.bf16.msra.mxu1 %v8953_v8  ;;  %v9461_v20 = vor.u32 %v11397_v19, %v9458_v23  ;;  %v11178_v19 = vld [vmem:[%s17476_s3 + $0x34] sm:$0xf0] }
 0x318   :  { %v10194_v9 = vld [vmem:[%s17476_s3 + $0xcf0] sm:$0xf0]  ;;  %v8824_v23 = vld [vmem:[%s17476_s3 + $0x218] sm:$0xf] }
 0x319   :  { %6317 = vmatpush.bf16.msrb.mxu2 %v10229_v4  ;;  %v10197_v1 = vor.u32 %v11581_v0, %v10194_v9  ;;  %v11389_v46 = vld [vmem:[%s17476_s3 + $0x6d4] sm:$0xf]  ;;  %6275 = vmatpush.bf16.msra.mxu3 %v9461_v20  ;;  %v8857_v4 = vor.u32 %v11250_v37, %v8856_v38  ;;  %v16444_v0 = vadd.f32 %v6043_v25, %v16178_v61  ;;  %v9816_v16 = vld [vmem:[%s17476_s3 + $0x9d8] sm:$0xf] }
 0x31a   :  { %v9426_v43 = vld [vmem:[%s17476_s3 + $0x6f0] sm:$0xf0]  ;;  %6346 = vmatpush.bf16.msra.mxu0 %v8665_v29  ;;  %v11242_v29 = vld [vmem:[%s17476_s3 + $0x234] sm:$0xf0]  ;;  %v6001_v20 = vpop.f32.mrf.mxu3 }
 0x31b   :  { %v11573_v60 = vld [vmem:[%s17476_s3 + $0xc94] sm:$0xf]  ;;  %6360 = vmatpush.bf16.msra.mxu1 %v8921_v33  ;;  %v9429_v27 = vor.u32 %v11389_v46, %v9426_v43  ;;  %v11490_v26 = vld [vmem:[%s17476_s3 + $0x9f4] sm:$0xf0]  ;;  %v16465_v46 = vadd.f32 %v6001_v20, %v16307_v51  ;;  %v8569_v43 = vor.u32 %v11178_v19, %v8568_v17 }
 0x31c   :  { %v10162_v7 = vld [vmem:[%s17476_s3 + $0xcb0] sm:$0xf0]  ;;  %v10072_v13 = vld [vmem:[%s17476_s3 + $0xbd8] sm:$0xf] }
 0x31d   :  { %6318 = vmatpush.bf16.msrb.mxu2 %v10197_v1  ;;  %v10165_v41 = vor.u32 %v11573_v60, %v10162_v7  ;;  %v11381_v30 = vld [vmem:[%s17476_s3 + $0x694] sm:$0xf]  ;;  %6276 = vmatpush.bf16.msra.mxu3 %v9429_v27  ;;  %v11554_v1 = vld [vmem:[%s17476_s3 + $0xbf4] sm:$0xf0]  ;;  %v8825_v7 = vor.u32 %v11242_v29, %v8824_v23 }
 0x31e   :  { %v9394_v8 = vld [vmem:[%s17476_s3 + $0x6b0] sm:$0xf0]  ;;  %6347 = vmatpush.bf16.msra.mxu0 %v8633_v44  ;;  %v9304_v52 = vld [vmem:[%s17476_s3 + $0x5d8] sm:$0xf]  ;;  %v10073_v27 = vor.u32 %v11554_v1, %v10072_v13 }
 0x31f   :  { %v11565_v24 = vld [vmem:[%s17476_s3 + $0xc54] sm:$0xf]  ;;  %6361 = vmatpush.bf16.msra.mxu1 %v8889_v47  ;;  %v9397_v9 = vor.u32 %v11381_v30, %v9394_v8  ;;  %v9817_v47 = vor.u32 %v11490_v26, %v9816_v16  ;;  %v11362_v51 = vld [vmem:[%s17476_s3 + $0x5f4] sm:$0xf0] }
 0x320   :  { %v10130_v42 = vld [vmem:[%s17476_s3 + $0xc70] sm:$0xf0]  ;;  %v9784_v37 = vld [vmem:[%s17476_s3 + $0x998] sm:$0xf] }
 0x321   :  { %v11373_v33 = vld [vmem:[%s17476_s3 + $0x654] sm:$0xf]  ;;  %6319 = vmatpush.bf16.msrb.mxu2 %v10165_v41  ;;  %v10133_v3 = vor.u32 %v11565_v24, %v10130_v42  ;;  %6277 = vmatpush.bf16.msra.mxu3 %v9397_v9  ;;  %v11482_v41 = vld [vmem:[%s17476_s3 + $0x9b4] sm:$0xf0]  ;;  %v9305_v42 = vor.u32 %v11362_v51, %v9304_v52 }
 0x322   :  { %v9362_v61 = vld [vmem:[%s17476_s3 + $0x670] sm:$0xf0]  ;;  %6348 = vmatpush.bf16.msra.mxu0 %v8601_v58  ;;  %v10040_v58 = vld [vmem:[%s17476_s3 + $0xb98] sm:$0xf]  ;;  %v9785_v19 = vor.u32 %v11482_v41, %v9784_v37 }
 0x323   :  { %v11557_v44 = vld [vmem:[%s17476_s3 + $0xc14] sm:$0xf]  ;;  %6362 = vmatpush.bf16.msra.mxu1 %v8857_v4  ;;  %v9365_v63 = vor.u32 %v11373_v33, %v9362_v61  ;;  %v11546_v24 = vld [vmem:[%s17476_s3 + $0xbb4] sm:$0xf0]  ;;  %v6045_v4 = vpop.f32.mrf.mxu2 }
 0x324   :  { %v10098_v60 = vld [vmem:[%s17476_s3 + $0xc30] sm:$0xf0]  ;;  %v9272_v23 = vld [vmem:[%s17476_s3 + $0x598] sm:$0xf]  ;;  %v16510_v9 = vadd.f32 %v6045_v4, %v16236_v31  ;;  %v10041_v16 = vor.u32 %v11546_v24, %v10040_v58 }
 0x325   :  { %v11365_v38 = vld [vmem:[%s17476_s3 + $0x614] sm:$0xf]  ;;  %6320 = vmatpush.bf16.msrb.mxu2 %v10133_v3  ;;  %v10101_v30 = vor.u32 %v11557_v44, %v10098_v60  ;;  %v11354_v29 = vld [vmem:[%s17476_s3 + $0x5b4] sm:$0xf0]  ;;  %6278 = vmatpush.bf16.msra.mxu3 %v9365_v63 }
 0x326   :  { %v9330_v8 = vld [vmem:[%s17476_s3 + $0x630] sm:$0xf0]  ;;  %6349 = vmatpush.bf16.msra.mxu0 %v8569_v43  ;;  %v9752_v26 = vld [vmem:[%s17476_s3 + $0x958] sm:$0xf]  ;;  %v9273_v13 = vor.u32 %v11354_v29, %v9272_v23 }
 0x327   :  { %v11677_v17 = vld [vmem:[%s17476_s3 + $0xfd4] sm:$0xf]  ;;  %6363 = vmatpush.bf16.msra.mxu1 %v8825_v7  ;;  %v9333_v33 = vor.u32 %v11365_v38, %v9330_v8  ;;  %v11474_v20 = vld [vmem:[%s17476_s3 + $0x974] sm:$0xf0] }
 0x328   :  { %v10578_v25 = vld [vmem:[%s17476_s3 + $0xff0] sm:$0xf0]  ;;  %v10008_v31 = vld [vmem:[%s17476_s3 + $0xb58] sm:$0xf]  ;;  %v9753_v44 = vor.u32 %v11474_v20, %v9752_v26 }
 0x329   :  { %6321 = vmatpush.bf16.msrb.mxu2 %v10101_v30  ;;  %6350 = vmatmul.bf16.vlgmr.msra.gmra.mxu0 %v14144_v59  ;;  %v10581_v3 = vor.u32 %v11677_v17, %v10578_v25  ;;  %v11538_v61 = vld [vmem:[%s17476_s3 + $0xb74] sm:$0xf0]  ;;  %v11669_v1 = vld [vmem:[%s17476_s3 + $0xf94] sm:$0xf] }
 0x32a   :  { %6398 = vmatpush.bf16.msrb.mxu0 %v9817_v47  ;;  %6364 = vmatmul.bf16.vlgmr.msra.gmra.mxu1 %v14146_v22  ;;  %v10546_v43 = vld [vmem:[%s17476_s3 + $0xfb0] sm:$0xf0]  ;;  %v9240_v60 = vld [vmem:[%s17476_s3 + $0x558] sm:$0xf]  ;;  %v10009_v47 = vor.u32 %v11538_v61, %v10008_v31 }
 0x32b   :  { %6412 = vmatpush.bf16.msrb.mxu1 %v10073_v27  ;;  %v11346_v7 = vld [vmem:[%s17476_s3 + $0x574] sm:$0xf0]  ;;  %6279 = vmatpush.bf16.msra.mxu3 %v9333_v33  ;;  %v10549_v63 = vor.u32 %v11669_v1, %v10546_v43  ;;  %v11661_v41 = vld [vmem:[%s17476_s3 + $0xf54] sm:$0xf] }
 0x32c   :  { %v9720_v52 = vld [vmem:[%s17476_s3 + $0x918] sm:$0xf]  ;;  %6322 = vmatmul.bf16.vlgmr.msrb.gmra.mxu2 %v14648_v34  ;;  %v9241_v37 = vor.u32 %v11346_v7, %v9240_v60  ;;  %v10514_v30 = vld [vmem:[%s17476_s3 + $0xf70] sm:$0xf0]  ;;  %v16600_v60 = vpop.f32.mrf.mxu3 }
 0x32d   :  { %6370 = vmatpush.bf16.msra.mxu2 %v9305_v42  ;;  %v11466_v51 = vld [vmem:[%s17476_s3 + $0x934] sm:$0xf0]  ;;  %v10517_v4 = vor.u32 %v11661_v41, %v10514_v30  ;;  %v11653_v33 = vld [vmem:[%s17476_s3 + $0xf14] sm:$0xf] }
 0x32e   :  { %6399 = vmatpush.bf16.msrb.mxu0 %v9785_v19  ;;  %v9976_v27 = vld [vmem:[%s17476_s3 + $0xb18] sm:$0xf]  ;;  %6280 = vmatmul.bf16.vlgmr.msra.gmra.mxu3 %v14151_v14  ;;  %v9721_v8 = vor.u32 %v11466_v51, %v9720_v52  ;;  %v10450_v52 = vld [vmem:[%s17476_s3 + $0xef0] sm:$0xf0] }
 0x32f   :  { %6413 = vmatpush.bf16.msrb.mxu1 %v10041_v16  ;;  %6328 = vmatpush.bf16.msrb.mxu3 %v10581_v3  ;;  %v11530_v38 = vld [vmem:[%s17476_s3 + $0xb34] sm:$0xf0]  ;;  %v10482_v16 = vld [vmem:[%s17476_s3 + $0xf30] sm:$0xf0] }
 0x330   :  { %v9208_v58 = vld [vmem:[%s17476_s3 + $0x518] sm:$0xf]  ;;  %v9977_v42 = vor.u32 %v11530_v38, %v9976_v27  ;;  %v10485_v1 = vor.u32 %v11653_v33, %v10482_v16 }
 0x331   :  { %6371 = vmatpush.bf16.msra.mxu2 %v9273_v13  ;;  %v11338_v24 = vld [vmem:[%s17476_s3 + $0x534] sm:$0xf0] }
 0x332   :  { %6400 = vmatpush.bf16.msrb.mxu0 %v9753_v44  ;;  %v9688_v17 = vld [vmem:[%s17476_s3 + $0x8d8] sm:$0xf]  ;;  %v9209_v29 = vor.u32 %v11338_v24, %v9208_v58 }
 0x333   :  { %6414 = vmatpush.bf16.msrb.mxu1 %v10009_v47  ;;  %v11458_v25 = vld [vmem:[%s17476_s3 + $0x8f4] sm:$0xf0]  ;;  %6329 = vmatpush.bf16.msrb.mxu3 %v10549_v63  ;;  %v11645_v47 = vld [vmem:[%s17476_s3 + $0xed4] sm:$0xf] }
 0x334   :  { %v9944_v19 = vld [vmem:[%s17476_s3 + $0xad8] sm:$0xf]  ;;  %v9689_v26 = vor.u32 %v11458_v25, %v9688_v17  ;;  %v10453_v30 = vor.u32 %v11645_v47, %v10450_v52  ;;  %v10418_v17 = vld [vmem:[%s17476_s3 + $0xeb0] sm:$0xf0]  ;;  %v9050_v47 = vld [vmem:[%s17476_s3 + $0x3f8] sm:$0xf0] }
 0x335   :  { %v11522_v23 = vld [vmem:[%s17476_s3 + $0xaf4] sm:$0xf0]  ;;  %6372 = vmatpush.bf16.msra.mxu2 %v9241_v37 }
 0x336   :  { %6401 = vmatpush.bf16.msrb.mxu0 %v9721_v8  ;;  %v9176_v20 = vld [vmem:[%s17476_s3 + $0x4d8] sm:$0xf]  ;;  %v9945_v31 = vor.u32 %v11522_v23, %v9944_v19 }
 0x337   :  { %v11330_v3 = vld [vmem:[%s17476_s3 + $0x4f4] sm:$0xf0]  ;;  %6415 = vmatpush.bf16.msrb.mxu1 %v9977_v42  ;;  %6330 = vmatpush.bf16.msrb.mxu3 %v10517_v4  ;;  %v11637_v42 = vld [vmem:[%s17476_s3 + $0xe94] sm:$0xf] }
 0x338   :  { %v9656_v61 = vld [vmem:[%s17476_s3 + $0x898] sm:$0xf]  ;;  %v9177_v7 = vor.u32 %v11330_v3, %v9176_v20  ;;  %v10421_v20 = vor.u32 %v11637_v42, %v10418_v17  ;;  %v11629_v3 = vld [vmem:[%s17476_s3 + $0xe54] sm:$0xf]  ;;  %v11222_v17 = vld [vmem:[%s17476_s3 + $0x19c] sm:$0xf] }
 0x339   :  { %v11450_v13 = vld [vmem:[%s17476_s3 + $0x8b4] sm:$0xf0]  ;;  %6373 = vmatpush.bf16.msra.mxu2 %v9209_v29  ;;  %v11621_v42 = vld [vmem:[%s17476_s3 + $0xe14] sm:$0xf] }
 0x33a   :  { %v9912_v43 = vld [vmem:[%s17476_s3 + $0xa98] sm:$0xf]  ;;  %6402 = vmatpush.bf16.msrb.mxu0 %v9689_v26  ;;  %v9657_v51 = vor.u32 %v11450_v13, %v9656_v61  ;;  %v8794_v61 = vld [vmem:[%s17476_s3 + $0x1f8] sm:$0xf0]  ;;  %v6071_v13 = vpop.f32.mrf.mxu0 }
 0x33b   :  { %v11514_v44 = vld [vmem:[%s17476_s3 + $0xab4] sm:$0xf0]  ;;  %6416 = vmatpush.bf16.msrb.mxu1 %v9945_v31  ;;  %6331 = vmatpush.bf16.msrb.mxu3 %v10485_v1  ;;  %v11230_v31 = vld [vmem:[%s17476_s3 + $0x1dc] sm:$0xf]  ;;  %v6057_v1 = vpop.f32.mrf.mxu3 }
 0x33c   :  { %v9144_v63 = vld [vmem:[%s17476_s3 + $0x498] sm:$0xf]  ;;  %v9913_v38 = vor.u32 %v11514_v44, %v9912_v43  ;;  %v10386_v44 = vld [vmem:[%s17476_s3 + $0xe70] sm:$0xf0]  ;;  %v6058_v52 = vadd.f32 %v6057_v1, %v16444_v0 }
 0x33d   :  { %v11322_v27 = vld [vmem:[%s17476_s3 + $0x4b4] sm:$0xf0]  ;;  %6374 = vmatpush.bf16.msra.mxu2 %v9177_v7  ;;  %v11294_v7 = vld [vmem:[%s17476_s3 + $0x3dc] sm:$0xf] }
 0x33e   :  { %v9624_v37 = vld [vmem:[%s17476_s3 + $0x858] sm:$0xf]  ;;  %v9145_v24 = vor.u32 %v11322_v27, %v9144_v63  ;;  %6403 = vmatpush.bf16.msrb.mxu0 %v9657_v51 }
 0x33f   :  { %v11442_v41 = vld [vmem:[%s17476_s3 + $0x874] sm:$0xf0]  ;;  %6417 = vmatpush.bf16.msrb.mxu1 %v9913_v38  ;;  %6332 = vmatpush.bf16.msrb.mxu3 %v10453_v30  ;;  %v6085_v38 = vpop.f32.mrf.mxu1 }
 0x340   :  { %v9880_v8 = vld [vmem:[%s17476_s3 + $0xa58] sm:$0xf]  ;;  %v9625_v25 = vor.u32 %v11442_v41, %v9624_v37  ;;  %v8797_v41 = vor.u32 %v11230_v31, %v8794_v61 }
 0x341   :  { %v11506_v58 = vld [vmem:[%s17476_s3 + $0xa74] sm:$0xf0]  ;;  %6375 = vmatpush.bf16.msra.mxu2 %v9145_v24  ;;  %v9053_v24 = vor.u32 %v11294_v7, %v9050_v47  ;;  %v8730_v7 = vld [vmem:[%s17476_s3 + $0x178] sm:$0xf0] }
 0x342   :  { %v9112_v4 = vld [vmem:[%s17476_s3 + $0x458] sm:$0xf]  ;;  %v9881_v29 = vor.u32 %v11506_v58, %v9880_v8  ;;  %6404 = vmatpush.bf16.msrb.mxu0 %v9625_v25  ;;  %v6072_v8 = vadd.f32 %v6071_v13, %v6058_v52  ;;  %v10389_v58 = vor.u32 %v11629_v3, %v10386_v44  ;;  %v8762_v25 = vld [vmem:[%s17476_s3 + $0x1b8] sm:$0xf0] }
 0x343   :  { %v11314_v19 = vld [vmem:[%s17476_s3 + $0x474] sm:$0xf0]  ;;  %6333 = vmatpush.bf16.msrb.mxu3 %v10421_v20  ;;  %v8765_v31 = vor.u32 %v11222_v17, %v8762_v25  ;;  %v11214_v44 = vld [vmem:[%s17476_s3 + $0x15c] sm:$0xf]  ;;  %v6059_v52 = vpop.f32.mrf.mxu3 }
 0x344   :  { %v9592_v23 = vld [vmem:[%s17476_s3 + $0x818] sm:$0xf]  ;;  %v9113_v43 = vor.u32 %v11314_v19, %v9112_v4  ;;  %6418 = vmatpush.bf16.msrb.mxu1 %v9881_v29  ;;  %v6099_v4 = vpop.f32.mrf.mxu2  ;;  %v11286_v29 = vld [vmem:[%s17476_s3 + $0x39c] sm:$0xf]  ;;  %v6086_v3 = vadd.f32 %v6085_v38, %v6072_v8  ;;  %v6060_v38 = vadd.f32 %v6059_v52, %v16510_v9  ;;  %v8733_v8 = vor.u32 %v11214_v44, %v8730_v7 }
 0x345   :  { %v11434_v33 = vld [vmem:[%s17476_s3 + $0x834] sm:$0xf0]  ;;  %v11206_v17 = vld [vmem:[%s17476_s3 + $0x11c] sm:$0xf] }
 0x346   :  { %v9848_v16 = vld [vmem:[%s17476_s3 + $0xa18] sm:$0xf]  ;;  %v9593_v51 = vor.u32 %v11434_v33, %v9592_v23  ;;  %6376 = vmatpush.bf16.msra.mxu2 %v9113_v43  ;;  %v10354_v23 = vld [vmem:[%s17476_s3 + $0xe30] sm:$0xf0]  ;;  %v9018_v33 = vld [vmem:[%s17476_s3 + $0x3b8] sm:$0xf0]  ;;  %v16717_v47 = vadd.f32 %v6099_v4, %v6086_v3 }
 0x347   :  { %v11498_v26 = vld [vmem:[%s17476_s3 + $0xa34] sm:$0xf0]  ;;  %6334 = vmatpush.bf16.msrb.mxu3 %v10389_v58  ;;  %v10357_v1 = vor.u32 %v11621_v42, %v10354_v23  ;;  %v9021_v43 = vor.u32 %v11286_v29, %v9018_v33  ;;  %v8698_v25 = vld [vmem:[%s17476_s3 + $0x138] sm:$0xf0]  ;;  %v6087_v4 = vpop.f32.mrf.mxu1 }
 0x348   :  { %v9080_v63 = vld [vmem:[%s17476_s3 + $0x418] sm:$0xf]  ;;  %v9849_v37 = vor.u32 %v11498_v26, %v9848_v16  ;;  %6405 = vmatpush.bf16.msrb.mxu0 %v9593_v51  ;;  %v11270_v23 = vld [vmem:[%s17476_s3 + $0x31c] sm:$0xf] }
 0x349   :  { %v11306_v27 = vld [vmem:[%s17476_s3 + $0x434] sm:$0xf0]  ;;  %v8954_v29 = vld [vmem:[%s17476_s3 + $0x338] sm:$0xf0] }
 0x34a   :  { %v10328_v30 = vld [vmem:[%s17476_s3 + $0xdd8] sm:$0xf]  ;;  %v9081_v19 = vor.u32 %v11306_v27, %v9080_v63  ;;  %6419 = vmatpush.bf16.msrb.mxu1 %v9849_v37  ;;  %v11278_v63 = vld [vmem:[%s17476_s3 + $0x35c] sm:$0xf] }
 0x34b   :  { %v11618_v0 = vld [vmem:[%s17476_s3 + $0xdf4] sm:$0xf0]  ;;  %6406 = vmatmul.bf16.vlgmr.msrb.gmra.mxu0 %v14303_v35  ;;  %v8986_v27 = vld [vmem:[%s17476_s3 + $0x378] sm:$0xf0]  ;;  %6335 = vmatpush.bf16.msrb.mxu3 %v10357_v1  ;;  %v8957_v1 = vor.u32 %v11270_v23, %v8954_v29 }
 0x34c   :  { %v10329_v16 = vor.u32 %v11618_v0, %v10328_v30  ;;  %v9560_v26 = vld [vmem:[%s17476_s3 + $0x7d8] sm:$0xf]  ;;  %6454 = vmatpush.bf16.msra.mxu0 %v8797_v41  ;;  %6377 = vmatpush.bf16.msra.mxu2 %v9081_v19  ;;  %v6073_v0 = vpop.f32.mrf.mxu0  ;;  %v8989_v42 = vor.u32 %v11278_v63, %v8986_v27  ;;  %v6101_v3 = vpop.f32.mrf.mxu2  ;;  %v8666_v44 = vld [vmem:[%s17476_s3 + $0xf8] sm:$0xf0] }
 0x34d   :  { %v11426_v20 = vld [vmem:[%s17476_s3 + $0x7f4] sm:$0xf0]  ;;  %6420 = vmatmul.bf16.vlgmr.msrb.gmra.mxu1 %v14456_v5  ;;  %v8922_v63 = vld [vmem:[%s17476_s3 + $0x2f8] sm:$0xf0] }
 0x34e   :  { %v10296_v61 = vld [vmem:[%s17476_s3 + $0xd98] sm:$0xf]  ;;  %6468 = vmatpush.bf16.msra.mxu1 %v9053_v24  ;;  %v9561_v51 = vor.u32 %v11426_v20, %v9560_v26  ;;  %v6074_v24 = vadd.f32 %v6073_v0, %v6060_v38  ;;  %6336 = vmatmul.bf16.vlgmr.msrb.gmra.mxu3 %v14826_v57 }
 0x34f   :  { %v11610_v13 = vld [vmem:[%s17476_s3 + $0xdb4] sm:$0xf0]  ;;  %6378 = vmatmul.bf16.vlgmr.msra.gmra.mxu2 %v14148_v12 }
 0x350   :  { %6426 = vmatpush.bf16.msrb.mxu2 %v10329_v16  ;;  %v10297_v37 = vor.u32 %v11610_v13, %v10296_v61  ;;  %v9528_v41 = vld [vmem:[%s17476_s3 + $0x798] sm:$0xf]  ;;  %6455 = vmatpush.bf16.msra.mxu0 %v8765_v31  ;;  %v6088_v20 = vadd.f32 %v6087_v4, %v6074_v24  ;;  %v8701_v31 = vor.u32 %v11206_v17, %v8698_v25  ;;  %v8890_v17 = vld [vmem:[%s17476_s3 + $0x2b8] sm:$0xf0] }
 0x351   :  { %v11418_v30 = vld [vmem:[%s17476_s3 + $0x7b4] sm:$0xf0]  ;;  %6384 = vmatpush.bf16.msra.mxu3 %v9561_v51  ;;  %v11262_v51 = vld [vmem:[%s17476_s3 + $0x2dc] sm:$0xf] }
 0x352   :  { %v10264_v58 = vld [vmem:[%s17476_s3 + $0xd58] sm:$0xf]  ;;  %6469 = vmatpush.bf16.msra.mxu1 %v9021_v43  ;;  %v9529_v19 = vor.u32 %v11418_v30, %v9528_v41  ;;  %v11198_v43 = vld [vmem:[%s17476_s3 + $0xdc] sm:$0xf]  ;;  %v16772_v7 = vadd.f32 %v6101_v3, %v6088_v20 }
 0x353   :  { %v11602_v9 = vld [vmem:[%s17476_s3 + $0xd74] sm:$0xf0]  ;;  %v8669_v41 = vor.u32 %v11198_v43, %v8666_v44  ;;  %v8602_v20 = vld [vmem:[%s17476_s3 + $0x78] sm:$0xf0] }
 0x354   :  { %6427 = vmatpush.bf16.msrb.mxu2 %v10297_v37  ;;  %v10265_v33 = vor.u32 %v11602_v9, %v10264_v58  ;;  %v9496_v16 = vld [vmem:[%s17476_s3 + $0x758] sm:$0xf]  ;;  %6456 = vmatpush.bf16.msra.mxu0 %v8733_v8  ;;  %v8925_v8 = vor.u32 %v11262_v51, %v8922_v63  ;;  %v11190_v58 = vld [vmem:[%s17476_s3 + $0x9c] sm:$0xf] }
 0x355   :  { %v11410_v26 = vld [vmem:[%s17476_s3 + $0x774] sm:$0xf0]  ;;  %6385 = vmatpush.bf16.msra.mxu3 %v9529_v19  ;;  %v8634_v9 = vld [vmem:[%s17476_s3 + $0xb8] sm:$0xf0] }
 0x356   :  { %v10232_v61 = vld [vmem:[%s17476_s3 + $0xd18] sm:$0xf]  ;;  %6470 = vmatpush.bf16.msra.mxu1 %v8989_v42  ;;  %v9497_v52 = vor.u32 %v11410_v26, %v9496_v16  ;;  %v11254_v42 = vld [vmem:[%s17476_s3 + $0x29c] sm:$0xf]  ;;  %v8637_v23 = vor.u32 %v11190_v58, %v8634_v9  ;;  %v6113_v9 = vpop.f32.mrf.mxu3 }
 0x357   :  { %v11594_v13 = vld [vmem:[%s17476_s3 + $0xd34] sm:$0xf0]  ;;  %v8893_v16 = vor.u32 %v11254_v42, %v8890_v17  ;;  %v11182_v26 = vld [vmem:[%s17476_s3 + $0x5c] sm:$0xf] }
 0x358   :  { %6428 = vmatpush.bf16.msrb.mxu2 %v10265_v33  ;;  %v10233_v27 = vor.u32 %v11594_v13, %v10232_v61  ;;  %v9464_v38 = vld [vmem:[%s17476_s3 + $0x718] sm:$0xf]  ;;  %6457 = vmatpush.bf16.msra.mxu0 %v8701_v31  ;;  %v11246_v31 = vld [vmem:[%s17476_s3 + $0x25c] sm:$0xf]  ;;  %v8605_v44 = vor.u32 %v11182_v26, %v8602_v20 }
 0x359   :  { %v11402_v37 = vld [vmem:[%s17476_s3 + $0x734] sm:$0xf0]  ;;  %6386 = vmatpush.bf16.msra.mxu3 %v9497_v52  ;;  %v8858_v61 = vld [vmem:[%s17476_s3 + $0x278] sm:$0xf0] }
 0x35a   :  { %v10200_v30 = vld [vmem:[%s17476_s3 + $0xcd8] sm:$0xf]  ;;  %6471 = vmatpush.bf16.msra.mxu1 %v8957_v1  ;;  %v9465_v24 = vor.u32 %v11402_v37, %v9464_v38  ;;  %v11174_v63 = vld [vmem:[%s17476_s3 + $0x1c] sm:$0xf] }
 0x35b   :  { %v11586_v0 = vld [vmem:[%s17476_s3 + $0xcf4] sm:$0xf0]  ;;  %v8570_v38 = vld [vmem:[%s17476_s3 + $0x38] sm:$0xf0] }
 0x35c   :  { %6429 = vmatpush.bf16.msrb.mxu2 %v10233_v27  ;;  %v10201_v25 = vor.u32 %v11586_v0, %v10200_v30  ;;  %v9432_v4 = vld [vmem:[%s17476_s3 + $0x6d8] sm:$0xf]  ;;  %6458 = vmatpush.bf16.msra.mxu0 %v8669_v41  ;;  %v8861_v27 = vor.u32 %v11246_v31, %v8858_v61  ;;  %v11238_v37 = vld [vmem:[%s17476_s3 + $0x21c] sm:$0xf] }
 0x35d   :  { %v11394_v19 = vld [vmem:[%s17476_s3 + $0x6f4] sm:$0xf0]  ;;  %6387 = vmatpush.bf16.msra.mxu3 %v9465_v24  ;;  %v8826_v41 = vld [vmem:[%s17476_s3 + $0x238] sm:$0xf0] }
 0x35e   :  { %v10168_v29 = vld [vmem:[%s17476_s3 + $0xc98] sm:$0xf]  ;;  %6472 = vmatpush.bf16.msra.mxu1 %v8925_v8  ;;  %v9433_v3 = vor.u32 %v11394_v19, %v9432_v4  ;;  %v11486_v8 = vld [vmem:[%s17476_s3 + $0x9dc] sm:$0xf]  ;;  %v16871_v4 = vadd.f32 %v6113_v9, %v16717_v47  ;;  %v8573_v19 = vor.u32 %v11174_v63, %v8570_v38  ;;  %v6115_v9 = vpop.f32.mrf.mxu3 }
 0x35f   :  { %v11578_v33 = vld [vmem:[%s17476_s3 + $0xcb4] sm:$0xf0]  ;;  %v9818_v58 = vld [vmem:[%s17476_s3 + $0x9f8] sm:$0xf0] }
 0x360   :  { %6430 = vmatpush.bf16.msrb.mxu2 %v10201_v25  ;;  %v10169_v13 = vor.u32 %v11578_v33, %v10168_v29  ;;  %v9400_v1 = vld [vmem:[%s17476_s3 + $0x698] sm:$0xf]  ;;  %6459 = vmatpush.bf16.msra.mxu0 %v8637_v23  ;;  %v11550_v17 = vld [vmem:[%s17476_s3 + $0xbdc] sm:$0xf]  ;;  %v8829_v33 = vor.u32 %v11238_v37, %v8826_v41 }
 0x361   :  { %v11386_v43 = vld [vmem:[%s17476_s3 + $0x6b4] sm:$0xf0]  ;;  %6388 = vmatpush.bf16.msra.mxu3 %v9433_v3  ;;  %v10074_v25 = vld [vmem:[%s17476_s3 + $0xbf8] sm:$0xf0] }
 0x362   :  { %v10136_v52 = vld [vmem:[%s17476_s3 + $0xc58] sm:$0xf]  ;;  %6473 = vmatpush.bf16.msra.mxu1 %v8893_v16  ;;  %v9401_v30 = vor.u32 %v11386_v43, %v9400_v1  ;;  %v9821_v16 = vor.u32 %v11486_v8, %v9818_v58  ;;  %v11358_v26 = vld [vmem:[%s17476_s3 + $0x5dc] sm:$0xf]  ;;  %v10077_v3 = vor.u32 %v11550_v17, %v10074_v25  ;;  %v6116_v25 = vadd.f32 %v6115_v9, %v16772_v7 }
 0x363   :  { %v11570_v51 = vld [vmem:[%s17476_s3 + $0xc74] sm:$0xf0]  ;;  %v9306_v47 = vld [vmem:[%s17476_s3 + $0x5f8] sm:$0xf0]  ;;  %v6569_v7 = vmax.f32 %v16871_v4, 0.0 }
 0x364   :  { %v9368_v0 = vld [vmem:[%s17476_s3 + $0x658] sm:$0xf]  ;;  %6431 = vmatpush.bf16.msrb.mxu2 %v10169_v13  ;;  %v10137_v24 = vor.u32 %v11570_v51, %v10136_v52  ;;  %6460 = vmatpush.bf16.msra.mxu0 %v8605_v44  ;;  %v11478_v61 = vld [vmem:[%s17476_s3 + $0x99c] sm:$0xf]  ;;  %v9309_v51 = vor.u32 %v11358_v26, %v9306_v47 }
 0x365   :  { %v11378_v42 = vld [vmem:[%s17476_s3 + $0x674] sm:$0xf0]  ;;  %6389 = vmatpush.bf16.msra.mxu3 %v9401_v30  ;;  %v9786_v13 = vld [vmem:[%s17476_s3 + $0x9b8] sm:$0xf0] }
 0x366   :  { %v10104_v23 = vld [vmem:[%s17476_s3 + $0xc18] sm:$0xf]  ;;  %6474 = vmatpush.bf16.msra.mxu1 %v8861_v27  ;;  %v9369_v20 = vor.u32 %v11378_v42, %v9368_v0  ;;  %v11542_v44 = vld [vmem:[%s17476_s3 + $0xb9c] sm:$0xf]  ;;  %v9789_v38 = vor.u32 %v11478_v61, %v9786_v13 }
 0x367   :  { %v11562_v29 = vld [vmem:[%s17476_s3 + $0xc34] sm:$0xf0]  ;;  %v10042_v52 = vld [vmem:[%s17476_s3 + $0xbb8] sm:$0xf0] }
 0x368   :  { %v9336_v31 = vld [vmem:[%s17476_s3 + $0x618] sm:$0xf]  ;;  %6432 = vmatpush.bf16.msrb.mxu2 %v10137_v24  ;;  %v10105_v1 = vor.u32 %v11562_v29, %v10104_v23  ;;  %6461 = vmatpush.bf16.msra.mxu0 %v8573_v19  ;;  %v11350_v37 = vld [vmem:[%s17476_s3 + $0x59c] sm:$0xf]  ;;  %v10045_v0 = vor.u32 %v11542_v44, %v10042_v52 }
 0x369   :  { %v11370_v43 = vld [vmem:[%s17476_s3 + $0x634] sm:$0xf0]  ;;  %v9274_v41 = vld [vmem:[%s17476_s3 + $0x5b8] sm:$0xf0]  ;;  %6390 = vmatpush.bf16.msra.mxu3 %v9369_v20 }
 0x36a   :  { %v10584_v63 = vld [vmem:[%s17476_s3 + $0xfd8] sm:$0xf]  ;;  %6475 = vmatpush.bf16.msra.mxu1 %v8829_v33  ;;  %v9337_v30 = vor.u32 %v11370_v43, %v9336_v31  ;;  %v11470_v8 = vld [vmem:[%s17476_s3 + $0x95c] sm:$0xf]  ;;  %v9277_v19 = vor.u32 %v11350_v37, %v9274_v41 }
 0x36b   :  { %v11682_v27 = vld [vmem:[%s17476_s3 + $0xff4] sm:$0xf0]  ;;  %v9754_v58 = vld [vmem:[%s17476_s3 + $0x978] sm:$0xf0]  ;;  %6462 = vmatmul.bf16.vlgmr.msra.gmra.mxu0 %v14144_v59 }
 0x36c   :  { %6510 = vmatpush.bf16.msrb.mxu0 %v9821_v16  ;;  %6433 = vmatpush.bf16.msrb.mxu2 %v10105_v1  ;;  %v10585_v24 = vor.u32 %v11682_v27, %v10584_v63  ;;  %v11534_v42 = vld [vmem:[%s17476_s3 + $0xb5c] sm:$0xf]  ;;  %v10552_v23 = vld [vmem:[%s17476_s3 + $0xf98] sm:$0xf]  ;;  %v9757_v29 = vor.u32 %v11470_v8, %v9754_v58  ;;  %v6577_v16 = vmax.f32 %v6116_v25, 0.0 }
 0x36d   :  { %v10010_v17 = vld [vmem:[%s17476_s3 + $0xb78] sm:$0xf0]  ;;  %6476 = vmatmul.bf16.vlgmr.msra.gmra.mxu1 %v14146_v22  ;;  %v11674_v59 = vld [vmem:[%s17476_s3 + $0xfb4] sm:$0xf0]  ;;  %6391 = vmatpush.bf16.msra.mxu3 %v9337_v30 }
 0x36e   :  { %6524 = vmatpush.bf16.msrb.mxu1 %v10077_v3  ;;  %v11342_v33 = vld [vmem:[%s17476_s3 + $0x55c] sm:$0xf]  ;;  %v10013_v26 = vor.u32 %v11534_v42, %v10010_v17  ;;  %v10553_v3 = vor.u32 %v11674_v59, %v10552_v23  ;;  %v16956_v61 = vpack.c.bf16 %v6577_v16, %v6569_v7  ;;  %v10520_v1 = vld [vmem:[%s17476_s3 + $0xf58] sm:$0xf] }
 0x36f   :  { %v9242_v22 = vld [vmem:[%s17476_s3 + $0x578] sm:$0xf0]  ;;  %6434 = vmatmul.bf16.vlgmr.msrb.gmra.mxu2 %v14648_v34  ;;  %v11666_v43 = vld [vmem:[%s17476_s3 + $0xf74] sm:$0xf0] }
 0x370   :  { %6482 = vmatpush.bf16.msra.mxu2 %v9309_v51  ;;  %6511 = vmatpush.bf16.msrb.mxu0 %v9789_v38  ;;  %v11462_v47 = vld [vmem:[%s17476_s3 + $0x91c] sm:$0xf]  ;;  %v9245_v13 = vor.u32 %v11342_v33, %v9242_v22  ;;  %v10521_v37 = vor.u32 %v11666_v43, %v10520_v1  ;;  %v10488_v8 = vld [vmem:[%s17476_s3 + $0xf18] sm:$0xf] }
 0x371   :  { %v9722_v20 = vld [vmem:[%s17476_s3 + $0x938] sm:$0xf0]  ;;  %6440 = vmatpush.bf16.msrb.mxu3 %v10585_v24  ;;  %v11658_v58 = vld [vmem:[%s17476_s3 + $0xf34] sm:$0xf0] }
 0x372   :  { %6525 = vmatpush.bf16.msrb.mxu1 %v10045_v0  ;;  %v11526_v4 = vld [vmem:[%s17476_s3 + $0xb1c] sm:$0xf]  ;;  %6392 = vmatmul.bf16.vlgmr.msra.gmra.mxu3 %v14151_v14  ;;  %v9725_v44 = vor.u32 %v11462_v47, %v9722_v20  ;;  %v10489_v23 = vor.u32 %v11658_v58, %v10488_v8  ;;  %v10456_v22 = vld [vmem:[%s17476_s3 + $0xed8] sm:$0xf] }
 0x373   :  { %v9978_v31 = vld [vmem:[%s17476_s3 + $0xb38] sm:$0xf0]  ;;  %v11650_v7 = vld [vmem:[%s17476_s3 + $0xef4] sm:$0xf0] }
 0x374   :  { %6483 = vmatpush.bf16.msra.mxu2 %v9277_v19  ;;  %6512 = vmatpush.bf16.msrb.mxu0 %v9757_v29  ;;  %v11334_v52 = vld [vmem:[%s17476_s3 + $0x51c] sm:$0xf]  ;;  %v9981_v63 = vor.u32 %v11526_v4, %v9978_v31  ;;  %v10457_v31 = vor.u32 %v11650_v7, %v10456_v22 }
 0x375   :  { %v9210_v51 = vld [vmem:[%s17476_s3 + $0x538] sm:$0xf0]  ;;  %6441 = vmatpush.bf16.msrb.mxu3 %v10553_v3 }
 0x376   :  { %6526 = vmatpush.bf16.msrb.mxu1 %v10013_v26  ;;  %v11454_v27 = vld [vmem:[%s17476_s3 + $0x8dc] sm:$0xf]  ;;  %v9213_v0 = vor.u32 %v11334_v52, %v9210_v51  ;;  %v11642_v52 = vld [vmem:[%s17476_s3 + $0xeb4] sm:$0xf0] }
 0x377   :  { %v9690_v38 = vld [vmem:[%s17476_s3 + $0x8f8] sm:$0xf0] }
 0x378   :  { %v11518_v41 = vld [vmem:[%s17476_s3 + $0xadc] sm:$0xf]  ;;  %6484 = vmatpush.bf16.msra.mxu2 %v9245_v13  ;;  %6513 = vmatpush.bf16.msrb.mxu0 %v9725_v44  ;;  %v9693_v9 = vor.u32 %v11454_v27, %v9690_v38  ;;  %v10424_v44 = vld [vmem:[%s17476_s3 + $0xe98] sm:$0xf] }
 0x379   :  { %v9946_v30 = vld [vmem:[%s17476_s3 + $0xaf8] sm:$0xf0]  ;;  %6442 = vmatpush.bf16.msrb.mxu3 %v10521_v37 }
 0x37a   :  { %v11326_v24 = vld [vmem:[%s17476_s3 + $0x4dc] sm:$0xf]  ;;  %6527 = vmatpush.bf16.msrb.mxu1 %v9981_v63  ;;  %v9949_v17 = vor.u32 %v11518_v41, %v9946_v30  ;;  %v10425_v30 = vor.u32 %v11642_v52, %v10424_v44  ;;  %v5682_v52 = vadd.f32 %v15035_v50, %v3094_v21  ;;  %v11696_v21 = vld [vmem:[%s17478_s5 + $0x68] sm:$0xff] }
 0x37b   :  { %v9178_v42 = vld [vmem:[%s17476_s3 + $0x4f8] sm:$0xf0] }
 0x37c   :  { %v11446_v25 = vld [vmem:[%s17476_s3 + $0x89c] sm:$0xf]  ;;  %6485 = vmatpush.bf16.msra.mxu2 %v9213_v0  ;;  %v9181_v33 = vor.u32 %v11326_v24, %v9178_v42  ;;  %6514 = vmatpush.bf16.msrb.mxu0 %v9693_v9  ;;  %v10392_v9 = vld [vmem:[%s17476_s3 + $0xe58] sm:$0xf] }
 0x37d   :  { %v9658_v19 = vld [vmem:[%s17476_s3 + $0x8b8] sm:$0xf0]  ;;  %6443 = vmatpush.bf16.msrb.mxu3 %v10489_v23  ;;  %v11634_v24 = vld [vmem:[%s17476_s3 + $0xe74] sm:$0xf0] }
 0x37e   :  { %v11510_v59 = vld [vmem:[%s17476_s3 + $0xa9c] sm:$0xf]  ;;  %v9661_v16 = vor.u32 %v11446_v25, %v9658_v19  ;;  %6528 = vmatpush.bf16.msrb.mxu1 %v9949_v17 }
 0x37f   :  { %v9914_v29 = vld [vmem:[%s17476_s3 + $0xab8] sm:$0xf0] }
 0x380   :  { %v11318_v26 = vld [vmem:[%s17476_s3 + $0x49c] sm:$0xf]  ;;  %v9917_v20 = vor.u32 %v11510_v59, %v9914_v29  ;;  %6486 = vmatpush.bf16.msra.mxu2 %v9181_v33  ;;  %6515 = vmatpush.bf16.msrb.mxu0 %v9661_v16  ;;  %v10393_v33 = vor.u32 %v11634_v24, %v10392_v9  ;;  %v10360_v16 = vld [vmem:[%s17476_s3 + $0xe18] sm:$0xf]  ;;  %v17148_v9 = vpop.f32.mrf.mxu0 }
 0x381   :  { %v9146_v47 = vld [vmem:[%s17476_s3 + $0x4b8] sm:$0xf0]  ;;  %6444 = vmatpush.bf16.msrb.mxu3 %v10457_v31 }
 0x382   :  { %v11438_v3 = vld [vmem:[%s17476_s3 + $0x85c] sm:$0xf]  ;;  %v9149_v43 = vor.u32 %v11318_v26, %v9146_v47  ;;  %6529 = vmatpush.bf16.msrb.mxu1 %v9917_v20  ;;  %v11626_v26 = vld [vmem:[%s17476_s3 + $0xe34] sm:$0xf0] }
 0x383   :  { %v9626_v4 = vld [vmem:[%s17476_s3 + $0x878] sm:$0xf0] }
 0x384   :  { %v11502_v13 = vld [vmem:[%s17476_s3 + $0xa5c] sm:$0xf]  ;;  %v9629_v51 = vor.u32 %v11438_v3, %v9626_v4  ;;  %6487 = vmatpush.bf16.msra.mxu2 %v9149_v43  ;;  %v11689_v4 = vld [vmem:[%s17478_s5 + $0x30] sm:$0xff] }
 0x385   :  { %v9882_v1 = vld [vmem:[%s17476_s3 + $0xa78] sm:$0xf0]  ;;  %6445 = vmatpush.bf16.msrb.mxu3 %v10425_v30  ;;  %v11697_v43 = vld [vmem:[%s17478_s5 + $0x70] sm:$0xff] }
 0x386   :  { %v11310_v63 = vld [vmem:[%s17476_s3 + $0x45c] sm:$0xf]  ;;  %v9885_v38 = vor.u32 %v11502_v13, %v9882_v1  ;;  %6516 = vmatpush.bf16.msrb.mxu0 %v9629_v51  ;;  %v10361_v1 = vor.u32 %v11626_v26, %v10360_v16 }
 0x387   :  { %v9114_v27 = vld [vmem:[%s17476_s3 + $0x478] sm:$0xf0] }
 0x388   :  { %v11430_v37 = vld [vmem:[%s17476_s3 + $0x81c] sm:$0xf]  ;;  %v9117_v58 = vor.u32 %v11310_v63, %v9114_v27  ;;  %6530 = vmatpush.bf16.msrb.mxu1 %v9885_v38  ;;  %v5696_v38 = vadd.f32 %v15202_v45, %v5682_v52 }
 0x389   :  { %v9594_v41 = vld [vmem:[%s17476_s3 + $0x838] sm:$0xf0]  ;;  %6446 = vmatpush.bf16.msrb.mxu3 %v10393_v33 }
 0x38a   :  { %v11494_v0 = vld [vmem:[%s17476_s3 + $0xa1c] sm:$0xf]  ;;  %v9597_v42 = vor.u32 %v11430_v37, %v9594_v41  ;;  %6488 = vmatpush.bf16.msra.mxu2 %v9117_v58  ;;  %v11695_v58 = vld [vmem:[%s17478_s5 + $0x60] sm:$0xff] }
 0x38b   :  { %v9850_v8 = vld [vmem:[%s17476_s3 + $0xa38] sm:$0xf0] }
 0x38c   :  { %v11302_v17 = vld [vmem:[%s17476_s3 + $0x41c] sm:$0xf]  ;;  %v9853_v19 = vor.u32 %v11494_v0, %v9850_v8  ;;  %6517 = vmatpush.bf16.msrb.mxu0 %v9597_v42  ;;  %v5710_v8 = vadd.f32 %v15485_v10, %v5696_v38 }
 0x38d   :  { %v9082_v25 = vld [vmem:[%s17476_s3 + $0x438] sm:$0xf0]  ;;  %6447 = vmatpush.bf16.msrb.mxu3 %v10361_v1  ;;  %v17192_v1 = vpop.f32.mrf.mxu2 }
 0x38e   :  { %v11690_v23 = vld [vmem:[%s17478_s5 + $0x38] sm:$0xff]  ;;  %v9085_v7 = vor.u32 %v11302_v17, %v9082_v25  ;;  %6531 = vmatpush.bf16.msrb.mxu1 %v9853_v19 }
 0x38f   :  { %v11614_v59 = vld [vmem:[%s17476_s3 + $0xddc] sm:$0xf]  ;;  %6518 = vmatmul.bf16.vlgmr.msrb.gmra.mxu0 %v14303_v35  ;;  %v11688_v35 = vld [vmem:[%s17478_s5 + $0x28] sm:$0xff] }
 0x390   :  { %v10330_v29 = vld [vmem:[%s17476_s3 + $0xdf8] sm:$0xf0]  ;;  %7106 = vmatpush.bf16.msra.mxu0 %v11690_v23  ;;  %6489 = vmatpush.bf16.msra.mxu2 %v9085_v7  ;;  %v17170_v7 = vpop.f32.mrf.mxu1 }
 0x391   :  { %v11698_v22 = vld [vmem:[%s17478_s5 + $0x78] sm:$0xff]  ;;  %v10333_v47 = vor.u32 %v11614_v59, %v10330_v29  ;;  %6532 = vmatmul.bf16.vlgmr.msrb.gmra.mxu1 %v14456_v5  ;;  %6448 = vmatmul.bf16.vlgmr.msrb.gmra.mxu3 %v14826_v57  ;;  %v5724_v59 = vadd.f32 %v15727_v49, %v5710_v8  ;;  %v6566_v8 = vmax.f32 %v15791_v48, 0.0 }
 0x392   :  { %v11422_v20 = vld [vmem:[%s17476_s3 + $0x7dc] sm:$0xf]  ;;  %7120 = vmatpush.bf16.msra.mxu1 %v11698_v22 }
 0x393   :  { %v9562_v3 = vld [vmem:[%s17476_s3 + $0x7f8] sm:$0xf0]  ;;  %6490 = vmatmul.bf16.vlgmr.msra.gmra.mxu2 %v14148_v12  ;;  %v11687_v12 = vld [vmem:[%s17478_s5 + $0x20] sm:$0xff]  ;;  %v5738_v22 = vadd.f32 %v15292_v11, %v5724_v59 }
 0x394   :  { %v11606_v31 = vld [vmem:[%s17476_s3 + $0xd9c] sm:$0xf]  ;;  %v9565_v44 = vor.u32 %v11422_v20, %v9562_v3  ;;  %6538 = vmatpush.bf16.msrb.mxu2 %v10333_v47  ;;  %7107 = vmatpush.bf16.msra.mxu0 %v11689_v4  ;;  %v11685_v47 = vld [vmem:[%s17478_s5 + $0x10] sm:$0xff] }
 0x395   :  { %v10298_v13 = vld [vmem:[%s17476_s3 + $0xdb8] sm:$0xf0]  ;;  %v5752_v3 = vadd.f32 %v15312_v56, %v5738_v22  ;;  %v11693_v4 = vld [vmem:[%s17478_s5 + $0x50] sm:$0xff]  ;;  %v6157_v22 = vpop.f32.mrf.mxu2 }
 0x396   :  { %v10301_v51 = vor.u32 %v11606_v31, %v10298_v13  ;;  %v11414_v63 = vld [vmem:[%s17476_s3 + $0x79c] sm:$0xf]  ;;  %7121 = vmatpush.bf16.msra.mxu1 %v11697_v43  ;;  %6496 = vmatpush.bf16.msra.mxu3 %v9565_v44  ;;  %v17194_v43 = vpop.f32.mrf.mxu3 }
 0x397   :  { %v9530_v27 = vld [vmem:[%s17476_s3 + $0x7b8] sm:$0xf0]  ;;  %v5766_v13 = vadd.f32 %v15606_v62, %v5752_v3  ;;  %v11684_v62 = vld [vmem:[%s17478_s5 + $0x8] sm:$0xff] }
 0x398   :  { %v10266_v5 = vld [vmem:[%s17476_s3 + $0xd78] sm:$0xf0]  ;;  %v9533_v50 = vor.u32 %v11414_v63, %v9530_v27  ;;  %6539 = vmatpush.bf16.msrb.mxu2 %v10301_v51  ;;  %7108 = vmatpush.bf16.msra.mxu0 %v11688_v35  ;;  %v6129_v51 = vpop.f32.mrf.mxu0 }
 0x399   :  { %v10269_v37 = vor.u32 %v11598_v6, %v10266_v5  ;;  %v11406_v41 = vld [vmem:[%s17476_s3 + $0x75c] sm:$0xf]  ;;  %v5780_v35 = vadd.f32 %v15852_v40, %v5766_v13  ;;  %v11692_v6 = vld [vmem:[%s17478_s5 + $0x48] sm:$0xff]  ;;  %v11683_v40 = vld [vmem:[%s17478_s5] sm:$0xff] }
 0x39a   :  { %v9498_v30 = vld [vmem:[%s17476_s3 + $0x778] sm:$0xf0]  ;;  %7122 = vmatpush.bf16.msra.mxu1 %v11696_v21  ;;  %6497 = vmatpush.bf16.msra.mxu3 %v9533_v50 }
 0x39b   :  { %v11590_v45 = vld [vmem:[%s17476_s3 + $0xd1c] sm:$0xf]  ;;  %v9501_v24 = vor.u32 %v11406_v41, %v9498_v30  ;;  %v6574_v30 = vmax.f32 %v5780_v35, 0.0 }
 0x39c   :  { %v10234_v0 = vld [vmem:[%s17476_s3 + $0xd38] sm:$0xf0]  ;;  %6540 = vmatpush.bf16.msrb.mxu2 %v10269_v37  ;;  %7109 = vmatpush.bf16.msra.mxu0 %v11687_v12  ;;  %v6143_v12 = vpop.f32.mrf.mxu1 }
 0x39d   :  { %v10237_v42 = vor.u32 %v11590_v45, %v10234_v0  ;;  %v11398_v17 = vld [vmem:[%s17476_s3 + $0x71c] sm:$0xf]  ;;  %v11691_v45 = vld [vmem:[%s17478_s5 + $0x40] sm:$0xff] }
 0x39e   :  { %v9466_v25 = vld [vmem:[%s17476_s3 + $0x738] sm:$0xf0]  ;;  %7123 = vmatpush.bf16.msra.mxu1 %v11695_v58  ;;  %6498 = vmatpush.bf16.msra.mxu3 %v9501_v24  ;;  %v17240_v58 = vld [vmem:[%s17477_s4] sm:$0xff] }
 0x39f   :  { %v11686_v10 = vld [vmem:[%s17478_s5 + $0x18] sm:$0xff]  ;;  %v9469_v33 = vor.u32 %v11398_v17, %v9466_v25  ;;  %v3098_v24 = vperm.slane %v17240_v58, 4 }
 0x3a0   :  { %v11582_v19 = vld [vmem:[%s17476_s3 + $0xcdc] sm:$0xf]  ;;  %6541 = vmatpush.bf16.msrb.mxu2 %v10237_v42  ;;  %7110 = vmatpush.bf16.msra.mxu0 %v11686_v10 }
 0x3a1   :  { %v10202_v23 = vld [vmem:[%s17476_s3 + $0xcf8] sm:$0xf0]  ;;  %v6130_v48 = vadd.f32 %v6129_v51, %v3098_v24 }
 0x3a2   :  { %v11694_v29 = vld [vmem:[%s17478_s5 + $0x58] sm:$0xff]  ;;  %v10205_v16 = vor.u32 %v11582_v19, %v10202_v23  ;;  %6499 = vmatpush.bf16.msra.mxu3 %v9469_v33  ;;  %v17249_v19 = vpop.f32.mrf.mxu0  ;;  %v6582_v33 = vpack.c.bf16 %v6574_v30, %v6566_v8 }
 0x3a3   :  { %v11390_v26 = vld [vmem:[%s17476_s3 + $0x6dc] sm:$0xf]  ;;  %7124 = vmatpush.bf16.msra.mxu1 %v11694_v29 }
 0x3a4   :  { %v9434_v49 = vld [vmem:[%s17476_s3 + $0x6f8] sm:$0xf0]  ;;  %6542 = vmatpush.bf16.msrb.mxu2 %v10205_v16  ;;  %7111 = vmatpush.bf16.msra.mxu0 %v11685_v47  ;;  %v6171_v16 = vpop.f32.mrf.mxu3 }
 0x3a5   :  { %v11574_v11 = vld [vmem:[%s17476_s3 + $0xc9c] sm:$0xf]  ;;  %v9437_v31 = vor.u32 %v11390_v26, %v9434_v49  ;;  %v11721_v26 = vld [vmem:[%s17478_s5 + $0x130] sm:$0xff]  ;;  %v6128_v49 = vadd.f32 %v17148_v9, %v3098_v24 }
 0x3a6   :  { %v10170_v20 = vld [vmem:[%s17476_s3 + $0xcb8] sm:$0xf0]  ;;  %v11705_v9 = vld [vmem:[%s17478_s5 + $0xb0] sm:$0xff] }
 0x3a7   :  { %v10173_v44 = vor.u32 %v11574_v11, %v10170_v20  ;;  %v11382_v52 = vld [vmem:[%s17476_s3 + $0x69c] sm:$0xf]  ;;  %7125 = vmatpush.bf16.msra.mxu1 %v11693_v4  ;;  %6500 = vmatpush.bf16.msra.mxu3 %v9437_v31  ;;  %v5906_v11 = vadd.f32 %v15958_v15, %v3096_v53  ;;  %v6144_v4 = vadd.f32 %v6143_v12, %v6130_v48  ;;  %v6197_v15 = vpop.f32.mrf.mxu1  ;;  %v11720_v31 = vld [vmem:[%s17478_s5 + $0x128] sm:$0xff] }
 0x3a8   :  { %v9402_v56 = vld [vmem:[%s17476_s3 + $0x6b8] sm:$0xf0]  ;;  %7112 = vmatpush.bf16.msra.mxu0 %v11684_v62 }
 0x3a9   :  { %v11566_v63 = vld [vmem:[%s17476_s3 + $0xc5c] sm:$0xf]  ;;  %v9405_v5 = vor.u32 %v11382_v52, %v9402_v56  ;;  %6543 = vmatpush.bf16.msrb.mxu2 %v10173_v44  ;;  %v6158_v13 = vadd.f32 %v6157_v22, %v6144_v4  ;;  %v5920_v44 = vadd.f32 %v15966_v2, %v5906_v11  ;;  %v11729_v56 = vld [vmem:[%s17478_s5 + $0x170] sm:$0xff]  ;;  %v11716_v22 = vld [vmem:[%s17478_s5 + $0x108] sm:$0xff] }
 0x3aa   :  { %v10138_v27 = vld [vmem:[%s17476_s3 + $0xc78] sm:$0xf0]  ;;  %v11700_v4 = vld [vmem:[%s17478_s5 + $0x88] sm:$0xff] }
 0x3ab   :  { %v10141_v21 = vor.u32 %v11566_v63, %v10138_v27  ;;  %v11374_v50 = vld [vmem:[%s17476_s3 + $0x65c] sm:$0xf]  ;;  %7126 = vmatpush.bf16.msra.mxu1 %v11692_v6  ;;  %6501 = vmatpush.bf16.msra.mxu3 %v9405_v5  ;;  %v6172_v62 = vadd.f32 %v6171_v16, %v6158_v13  ;;  %v5934_v63 = vadd.f32 %v16225_v28, %v5920_v44  ;;  %v6211_v27 = vpop.f32.mrf.mxu2  ;;  %v11728_v28 = vld [vmem:[%s17478_s5 + $0x168] sm:$0xff] }
 0x3ac   :  { %v9370_v38 = vld [vmem:[%s17476_s3 + $0x678] sm:$0xf0]  ;;  %7113 = vmatpush.bf16.msra.mxu0 %v11683_v40  ;;  %v6225_v35 = vpop.f32.mrf.mxu3  ;;  %v11724_v13 = vld [vmem:[%s17478_s5 + $0x148] sm:$0xff] }
 0x3ad   :  { %v11558_v37 = vld [vmem:[%s17476_s3 + $0xc1c] sm:$0xf]  ;;  %v9373_v42 = vor.u32 %v11374_v50, %v9370_v38  ;;  %6544 = vmatpush.bf16.msrb.mxu2 %v10141_v21  ;;  %v5948_v5 = vadd.f32 %v16393_v36, %v5934_v63  ;;  %v6185_v21 = vpop.f32.mrf.mxu0  ;;  %v11723_v63 = vld [vmem:[%s17478_s5 + $0x140] sm:$0xff] }
 0x3ae   :  { %v10106_v41 = vld [vmem:[%s17476_s3 + $0xc38] sm:$0xf0]  ;;  %v6186_v38 = vadd.f32 %v6185_v21, %v6172_v62 }
 0x3af   :  { %v11722_v0 = vld [vmem:[%s17478_s5 + $0x138] sm:$0xff]  ;;  %v10109_v17 = vor.u32 %v11558_v37, %v10106_v41  ;;  %7127 = vmatpush.bf16.msra.mxu1 %v11691_v45  ;;  %6502 = vmatpush.bf16.msra.mxu3 %v9373_v42  ;;  %v5962_v41 = vadd.f32 %v16101_v18, %v5948_v5  ;;  %v6199_v30 = vpop.f32.mrf.mxu1  ;;  %v11727_v45 = vld [vmem:[%s17478_s5 + $0x160] sm:$0xff]  ;;  %v11717_v42 = vld [vmem:[%s17478_s5 + $0x110] sm:$0xff] }
 0x3b0   :  { %v11366_v25 = vld [vmem:[%s17476_s3 + $0x61c] sm:$0xf]  ;;  %7162 = vmatpush.bf16.msrb.mxu0 %v11722_v0  ;;  %v6200_v0 = vadd.f32 %v6199_v30, %v6186_v38  ;;  %v11712_v38 = vld [vmem:[%s17478_s5 + $0xe8] sm:$0xff] }
 0x3b1   :  { %v9338_v10 = vld [vmem:[%s17476_s3 + $0x638] sm:$0xf0]  ;;  %6545 = vmatpush.bf16.msrb.mxu2 %v10109_v17  ;;  %7114 = vmatmul.bf16.vlgmr.msra.gmra.mxu0 %v6582_v33 }
 0x3b2   :  { %v11706_v23 = vld [vmem:[%s17478_s5 + $0xb8] sm:$0xff]  ;;  %v9341_v47 = vor.u32 %v11366_v25, %v9338_v10  ;;  %7128 = vmatmul.bf16.vlgmr.msra.gmra.mxu1 %v16132_v39  ;;  %v6142_v39 = vadd.f32 %v17170_v7, %v6128_v49  ;;  %v11704_v7 = vld [vmem:[%s17478_s5 + $0xa8] sm:$0xff]  ;;  %v5976_v25 = vadd.f32 %v16110_v54, %v5962_v41  ;;  %v11711_v41 = vld [vmem:[%s17478_s5 + $0xe0] sm:$0xff] }
 0x3b3   :  { %v11678_v59 = vld [vmem:[%s17476_s3 + $0xfdc] sm:$0xf]  ;;  %v6213_v10 = vpop.f32.mrf.mxu2 }
 0x3b4   :  { %v10586_v29 = vld [vmem:[%s17476_s3 + $0xff8] sm:$0xf0]  ;;  %7163 = vmatpush.bf16.msrb.mxu0 %v11721_v26  ;;  %6503 = vmatpush.bf16.msra.mxu3 %v9341_v47  ;;  %v6156_v51 = vadd.f32 %v17192_v1, %v6142_v39  ;;  %v11719_v1 = vld [vmem:[%s17478_s5 + $0x120] sm:$0xff]  ;;  %v6227_v48 = vpop.f32.mrf.mxu3  ;;  %v5990_v49 = vadd.f32 %v16379_v55, %v5976_v25  ;;  %v11709_v25 = vld [vmem:[%s17478_s5 + $0xd0] sm:$0xff] }
 0x3b5   :  { %v10589_v20 = vor.u32 %v11678_v59, %v10586_v29  ;;  %v11730_v3 = vld [vmem:[%s17478_s5 + $0x178] sm:$0xff]  ;;  %7134 = vmatpush.bf16.msra.mxu2 %v11706_v23  ;;  %v6214_v59 = vadd.f32 %v6213_v10, %v6200_v0  ;;  %v11701_v29 = vld [vmem:[%s17478_s5 + $0x90] sm:$0xff]  ;;  %v6239_v47 = vpop.f32.mrf.mxu0 }
 0x3b6   :  { %v10554_v53 = vld [vmem:[%s17476_s3 + $0xfb8] sm:$0xf0]  ;;  %7176 = vmatpush.bf16.msrb.mxu1 %v11730_v3  ;;  %6546 = vmatmul.bf16.vlgmr.msrb.gmra.mxu2 %v14648_v34  ;;  %v6170_v6 = vadd.f32 %v17194_v43, %v6156_v51 }
 0x3b7   :  { %v10557_v52 = vor.u32 %v11670_v32, %v10554_v53  ;;  %v11662_v34 = vld [vmem:[%s17476_s3 + $0xf5c] sm:$0xf]  ;;  %6504 = vmatmul.bf16.vlgmr.msra.gmra.mxu3 %v14151_v14  ;;  %v11703_v14 = vld [vmem:[%s17478_s5 + $0xa0] sm:$0xff]  ;;  %v6228_v26 = vadd.f32 %v6227_v48, %v6214_v59  ;;  %v6004_v32 = vadd.f32 %v16600_v60, %v5990_v49 }
 0x3b8   :  { %6552 = vmatpush.bf16.msrb.mxu3 %v10589_v20  ;;  %v10522_v2 = vld [vmem:[%s17476_s3 + $0xf78] sm:$0xf0]  ;;  %7164 = vmatpush.bf16.msrb.mxu0 %v11720_v31  ;;  %v6184_v37 = vadd.f32 %v17249_v19, %v6170_v6  ;;  %v11725_v20 = vld [vmem:[%s17478_s5 + $0x150] sm:$0xff]  ;;  %v11715_v53 = vld [vmem:[%s17478_s5 + $0x100] sm:$0xff]  ;;  %v6253_v31 = vpop.f32.mrf.mxu1  ;;  %v3099_v6 = vperm.slane %v17240_v58, 5 }
 0x3b9   :  { %7135 = vmatpush.bf16.msra.mxu2 %v11705_v9  ;;  %v10525_v50 = vor.u32 %v11662_v34, %v10522_v2  ;;  %v11654_v43 = vld [vmem:[%s17476_s3 + $0xf1c] sm:$0xf]  ;;  %v11699_v60 = vld [vmem:[%s17478_s5 + $0x80] sm:$0xff]  ;;  %v6576_v51 = vmax.f32 %v6004_v32, 0.0 }
 0x3ba   :  { %7177 = vmatpush.bf16.msrb.mxu1 %v11729_v56  ;;  %v10490_v36 = vld [vmem:[%s17476_s3 + $0xf38] sm:$0xf0]  ;;  %v6198_v17 = vadd.f32 %v6197_v15, %v6184_v37  ;;  %v6578_v15 = vmax.f32 %v6228_v26, 0.0 }
 0x3bb   :  { %v11718_v40 = vld [vmem:[%s17478_s5 + $0x118] sm:$0xff]  ;;  %v10493_v12 = vor.u32 %v11654_v43, %v10490_v36  ;;  %v6267_v34 = vpop.f32.mrf.mxu2 }
 0x3bc   :  { %6553 = vmatpush.bf16.msrb.mxu3 %v10557_v52  ;;  %7165 = vmatpush.bf16.msrb.mxu0 %v11719_v1  ;;  %v11702_v8 = vld [vmem:[%s17478_s5 + $0x98] sm:$0xff]  ;;  %v6212_v16 = vadd.f32 %v6211_v27, %v6198_v17  ;;  %v6281_v5 = vpop.f32.mrf.mxu3 }
 0x3bd   :  { %7136 = vmatpush.bf16.msra.mxu2 %v11704_v7  ;;  %v11646_v24 = vld [vmem:[%s17476_s3 + $0xedc] sm:$0xf]  ;;  %v6568_v7 = vmax.f32 %v16465_v46, 0.0  ;;  %v6241_v1 = vpop.f32.mrf.mxu0  ;;  %v11713_v46 = vld [vmem:[%s17478_s5 + $0xf0] sm:$0xff] }
 0x3be   :  { %7178 = vmatpush.bf16.msrb.mxu1 %v11728_v28  ;;  %v10458_v18 = vld [vmem:[%s17476_s3 + $0xef8] sm:$0xf0]  ;;  %v6226_v3 = vadd.f32 %v6225_v35, %v6212_v16  ;;  %v6242_v28 = vadd.f32 %v6241_v1, %v3099_v6  ;;  %v11707_v16 = vld [vmem:[%s17478_s5 + $0xc0] sm:$0xff] }
 0x3bf   :  { %v10461_v19 = vor.u32 %v11646_v24, %v10458_v18  ;;  %v11726_v23 = vld [vmem:[%s17478_s5 + $0x158] sm:$0xff]  ;;  %v6584_v35 = vpack.c.bf16 %v6576_v51, %v6568_v7 }
 0x3c0   :  { %6554 = vmatpush.bf16.msrb.mxu3 %v10525_v50  ;;  %7166 = vmatpush.bf16.msrb.mxu0 %v11718_v40  ;;  %v11638_v33 = vld [vmem:[%s17476_s3 + $0xe9c] sm:$0xf]  ;;  %v6570_v44 = vmax.f32 %v6226_v3, 0.0  ;;  %v6255_v21 = vpop.f32.mrf.mxu1  ;;  %v6240_v50 = vadd.f32 %v6239_v47, %v3099_v6 }
 0x3c1   :  { %7137 = vmatpush.bf16.msra.mxu2 %v11703_v14  ;;  %v10426_v54 = vld [vmem:[%s17476_s3 + $0xeb8] sm:$0xf0]  ;;  %v6256_v40 = vadd.f32 %v6255_v21, %v6242_v28 }
 0x3c2   :  { %7179 = vmatpush.bf16.msrb.mxu1 %v11727_v45  ;;  %v10429_v11 = vor.u32 %v11638_v33, %v10426_v54  ;;  %v11630_v9 = vld [vmem:[%s17476_s3 + $0xe5c] sm:$0xf]  ;;  %v6586_v62 = vpack.c.bf16 %v6578_v15, %v6570_v44  ;;  %v6254_v36 = vadd.f32 %v6253_v31, %v6240_v50  ;;  %v11732_v31 = vld [vmem:[%s17478_s5 + $0x188] sm:$0xff] }
 0x3c3   :  { %v10394_v55 = vld [vmem:[%s17476_s3 + $0xe78] sm:$0xf0]  ;;  %v6269_v43 = vpop.f32.mrf.mxu2 }
 0x3c4   :  { %6555 = vmatpush.bf16.msrb.mxu3 %v10493_v12  ;;  %7167 = vmatpush.bf16.msrb.mxu0 %v11717_v42  ;;  %v10397_v39 = vor.u32 %v11630_v9, %v10394_v55  ;;  %v11622_v52 = vld [vmem:[%s17476_s3 + $0xe1c] sm:$0xf]  ;;  %v6268_v37 = vadd.f32 %v6267_v34, %v6254_v36  ;;  %v6283_v12 = vpop.f32.mrf.mxu3  ;;  %v6270_v45 = vadd.f32 %v6269_v43, %v6256_v40  ;;  %v11736_v9 = vld [vmem:[%s17478_s5 + $0x1a8] sm:$0xff]  ;;  %v11735_v55 = vld [vmem:[%s17478_s5 + $0x1a0] sm:$0xff] }
 0x3c5   :  { %7138 = vmatpush.bf16.msra.mxu2 %v11702_v8  ;;  %v10362_v56 = vld [vmem:[%s17476_s3 + $0xe38] sm:$0xf0]  ;;  %v6295_v14 = vpop.f32.mrf.mxu0 }
 0x3c6   :  { %7180 = vmatpush.bf16.msrb.mxu1 %v11726_v23  ;;  %v10365_v2 = vor.u32 %v11622_v52, %v10362_v56  ;;  %v11714_v27 = vld [vmem:[%s17478_s5 + $0xf8] sm:$0xff]  ;;  %v6284_v0 = vadd.f32 %v6283_v12, %v6270_v45  ;;  %v11708_v23 = vld [vmem:[%s17478_s5 + $0xc8] sm:$0xff] }
 0x3c7   :  { %v11710_v8 = vld [vmem:[%s17478_s5 + $0xd8] sm:$0xff] }
 0x3c8   :  { %6556 = vmatpush.bf16.msrb.mxu3 %v10461_v19  ;;  %7168 = vmatpush.bf16.msrb.mxu0 %v11716_v22  ;;  %v6309_v30 = vpop.f32.mrf.mxu1  ;;  %v11738_v49 = vld [vmem:[%s17478_s5 + $0x1b8] sm:$0xff] }
 0x3c9   :  { %7139 = vmatpush.bf16.msra.mxu2 %v11701_v29  ;;  %v11734_v32 = vld [vmem:[%s17478_s5 + $0x198] sm:$0xff] }
 0x3ca   :  { %7181 = vmatpush.bf16.msrb.mxu1 %v11725_v20 }
 0x3cb   :  { %v6323_v24 = vpop.f32.mrf.mxu2 }
 0x3cc   :  { %6557 = vmatpush.bf16.msrb.mxu3 %v10429_v11  ;;  %7169 = vmatpush.bf16.msrb.mxu0 %v11715_v53  ;;  %v11737_v11 = vld [vmem:[%s17478_s5 + $0x1b0] sm:$0xff] }
 0x3cd   :  { %7140 = vmatpush.bf16.msra.mxu2 %v11700_v4  ;;  %v6297_v42 = vpop.f32.mrf.mxu0 }
 0x3ce   :  { %7182 = vmatpush.bf16.msrb.mxu1 %v11724_v13  ;;  %v6298_v17 = vadd.f32 %v6297_v42, %v6284_v0  ;;  %v11731_v13 = vld [vmem:[%s17478_s5 + $0x180] sm:$0xff] }
 0x3cf   :  { %7170 = vmatmul.bf16.vlgmr.msrb.gmra.mxu0 %v6586_v62 }
 0x3d0   :  { %6558 = vmatpush.bf16.msrb.mxu3 %v10397_v39  ;;  %v6311_v19 = vpop.f32.mrf.mxu1 }
 0x3d1   :  { %7141 = vmatpush.bf16.msra.mxu2 %v11699_v60  ;;  %v6337_v10 = vpop.f32.mrf.mxu3  ;;  %v6312_v59 = vadd.f32 %v6311_v19, %v6298_v17  ;;  %v3100_v60 = vperm.slane %v17240_v58, 6  ;;  %v11744_v17 = vld [vmem:[%s17478_s5 + $0x1e8] sm:$0xff]  ;;  %v11741_v19 = vld [vmem:[%s17478_s5 + $0x1d0] sm:$0xff] }
 0x3d2   :  { %7183 = vmatpush.bf16.msrb.mxu1 %v11723_v63 }
 0x3d3   :  { %v6325_v33 = vpop.f32.mrf.mxu2 }
 0x3d4   :  { %6559 = vmatpush.bf16.msrb.mxu3 %v10365_v2  ;;  %7142 = vmatmul.bf16.vlgmr.msra.gmra.mxu2 %v6584_v35  ;;  %v6326_v22 = vadd.f32 %v6325_v33, %v6312_v59  ;;  %v11740_v59 = vld [vmem:[%s17478_s5 + $0x1c8] sm:$0xff]  ;;  %v11739_v33 = vld [vmem:[%s17478_s5 + $0x1c0] sm:$0xff] }
 0x3d5   :  { %7190 = vmatpush.bf16.msrb.mxu2 %v11738_v49  ;;  %v6351_v53 = vpop.f32.mrf.mxu0 }
 0x3d6   :  { %v6352_v51 = vadd.f32 %v6351_v53, %v3100_v60 }
 0x3d7   :  { %6560 = vmatmul.bf16.vlgmr.msrb.gmra.mxu3 %v14826_v57  ;;  %v6282_v57 = vadd.f32 %v6281_v5, %v6268_v37 }
 0x3d8   :  { %7148 = vmatpush.bf16.msra.mxu3 %v11714_v27  ;;  %v6365_v15 = vpop.f32.mrf.mxu1 }
 0x3d9   :  { %v6296_v18 = vadd.f32 %v6295_v14, %v6282_v57  ;;  %v6339_v26 = vpop.f32.mrf.mxu3  ;;  %7191 = vmatpush.bf16.msrb.mxu2 %v11737_v11  ;;  %v6366_v2 = vadd.f32 %v6365_v15, %v6352_v51  ;;  %v11746_v57 = vld [vmem:[%s17478_s5 + $0x1f8] sm:$0xff] }
 0x3da   :  { %v6340_v47 = vadd.f32 %v6339_v26, %v6326_v22  ;;  %v3101_v22 = vperm.slane %v17240_v58, 7 }
 0x3db   :  { %v6310_v48 = vadd.f32 %v6309_v30, %v6296_v18  ;;  %v6379_v39 = vpop.f32.mrf.mxu2 }
 0x3dc   :  { %7149 = vmatpush.bf16.msra.mxu3 %v11713_v46  ;;  %v6579_v3 = vmax.f32 %v6340_v47, 0.0  ;;  %v6380_v27 = vadd.f32 %v6379_v39, %v6366_v2 }
 0x3dd   :  { %v6324_v29 = vadd.f32 %v6323_v24, %v6310_v48  ;;  %7192 = vmatpush.bf16.msrb.mxu2 %v11736_v9  ;;  %v6353_v44 = vpop.f32.mrf.mxu0 }
 0x3de   :  { %v6354_v62 = vadd.f32 %v6353_v44, %v3100_v60 }
 0x3df   :  { %v6338_v54 = vadd.f32 %v6337_v10, %v6324_v29  ;;  %v11742_v10 = vld [vmem:[%s17478_s5 + $0x1d8] sm:$0xff] }
 0x3e0   :  { %7150 = vmatpush.bf16.msra.mxu3 %v11712_v38  ;;  %v6367_v56 = vpop.f32.mrf.mxu1 }
 0x3e1   :  { %v6571_v20 = vmax.f32 %v6338_v54, 0.0  ;;  %7193 = vmatpush.bf16.msrb.mxu2 %v11735_v55  ;;  %v6368_v63 = vadd.f32 %v6367_v56, %v6354_v62 }
 0x3e3   :  { %v6587_v4 = vpack.c.bf16 %v6579_v3, %v6571_v20  ;;  %v6381_v34 = vpop.f32.mrf.mxu2 }
 0x3e4   :  { %7151 = vmatpush.bf16.msra.mxu3 %v11711_v41  ;;  %v6382_v6 = vadd.f32 %v6381_v34, %v6368_v63 }
 0x3e5   :  { %7184 = vmatmul.bf16.vlgmr.msrb.gmra.mxu1 %v6587_v4  ;;  %7194 = vmatpush.bf16.msrb.mxu2 %v11734_v32  ;;  %v6407_v7 = vpop.f32.mrf.mxu0 }
 0x3e8   :  { %7152 = vmatpush.bf16.msra.mxu3 %v11710_v8  ;;  %v6421_v35 = vpop.f32.mrf.mxu1  ;;  %v11745_v8 = vld [vmem:[%s17478_s5 + $0x1f0] sm:$0xff] }
 0x3ec   :  { %7153 = vmatpush.bf16.msra.mxu3 %v11709_v25  ;;  %v11743_v25 = vld [vmem:[%s17478_s5 + $0x1e0] sm:$0xff] }
 0x3ed   :  { %v6409_v28 = vpop.f32.mrf.mxu0 }
 0x3f0   :  { %7154 = vmatpush.bf16.msra.mxu3 %v11708_v23  ;;  %v6423_v36 = vpop.f32.mrf.mxu1 }
 0x3f2   :  { %v6435_v21 = vpop.f32.mrf.mxu2 }
 0x3f4   :  { %7155 = vmatpush.bf16.msra.mxu3 %v11707_v16 }
 0x3f5   :  { %v6393_v52 = vpop.f32.mrf.mxu3  ;;  %v6463_v48 = vpop.f32.mrf.mxu0 }
 0x3f6   :  { %v6394_v5 = vadd.f32 %v6393_v52, %v6380_v27  ;;  %v6464_v49 = vadd.f32 %v6463_v48, %v3101_v22 }
 0x3f7   :  { %7156 = vmatmul.bf16.vlgmr.msra.gmra.mxu3 %v16956_v61  ;;  %v11733_v61 = vld [vmem:[%s17478_s5 + $0x190] sm:$0xff] }
 0x3f8   :  { %7195 = vmatpush.bf16.msrb.mxu2 %v11733_v61  ;;  %v6408_v50 = vadd.f32 %v6407_v7, %v6394_v5  ;;  %7204 = vmatpush.bf16.msrb.mxu3 %v11746_v57  ;;  %v6477_v23 = vpop.f32.mrf.mxu1 }
 0x3f9   :  { %v6478_v3 = vadd.f32 %v6477_v23, %v6464_v49 }
 0x3fa   :  { %v6422_v43 = vadd.f32 %v6421_v35, %v6408_v50  ;;  %v6437_v41 = vpop.f32.mrf.mxu2 }
 0x3fc   :  { %7196 = vmatpush.bf16.msrb.mxu2 %v11732_v31  ;;  %v6436_v37 = vadd.f32 %v6435_v21, %v6422_v43  ;;  %7205 = vmatpush.bf16.msrb.mxu3 %v11745_v8  ;;  %v11747_v21 = vld [vmem:[%s17479_s6] ss:$0 sm:$0xff] }
 0x3fd   :  { %v6395_v1 = vpop.f32.mrf.mxu3  ;;  %v6465_v54 = vpop.f32.mrf.mxu0 }
 0x3fe   :  { %v6396_v46 = vadd.f32 %v6395_v1, %v6382_v6  ;;  %v6466_v47 = vadd.f32 %v6465_v54, %v3101_v22 }
 0x400   :  { %7197 = vmatpush.bf16.msrb.mxu2 %v11731_v13  ;;  %v6410_v38 = vadd.f32 %v6409_v28, %v6396_v46  ;;  %7206 = vmatpush.bf16.msrb.mxu3 %v11744_v17  ;;  %v6479_v26 = vpop.f32.mrf.mxu1 }
 0x401   :  { %v6480_v4 = vadd.f32 %v6479_v26, %v6466_v47 }
 0x402   :  { %v6424_v40 = vadd.f32 %v6423_v36, %v6410_v38 }
 0x404   :  { %v6438_v12 = vadd.f32 %v6437_v41, %v6424_v40  ;;  %7207 = vmatpush.bf16.msrb.mxu3 %v11743_v25 }
 0x408   :  { %7208 = vmatpush.bf16.msrb.mxu3 %v11742_v10 }
 0x40c   :  { %7209 = vmatpush.bf16.msrb.mxu3 %v11741_v19  ;;  %v6519_v11 = vpop.f32.mrf.mxu0 }
 0x40e   :  { %v6533_v55 = vpop.f32.mrf.mxu1 }
 0x410   :  { %7210 = vmatpush.bf16.msrb.mxu3 %v11740_v59 }
 0x414   :  { %v6449_v14 = vpop.f32.mrf.mxu3  ;;  %7211 = vmatpush.bf16.msrb.mxu3 %v11739_v33  ;;  %v6521_v13 = vpop.f32.mrf.mxu0 }
 0x415   :  { %v6450_v30 = vadd.f32 %v6449_v14, %v6436_v37 }
 0x416   :  { %v6491_v29 = vpop.f32.mrf.mxu2  ;;  %v6535_v52 = vpop.f32.mrf.mxu1 }
 0x417   :  { %v6572_v24 = vmax.f32 %v6450_v30, 0.0  ;;  %v6492_v9 = vadd.f32 %v6491_v29, %v6478_v3 }
 0x41c   :  { %v6451_v45 = vpop.f32.mrf.mxu3 }
 0x41d   :  { %v6452_v0 = vadd.f32 %v6451_v45, %v6438_v12 }
 0x41e   :  { %v6493_v20 = vpop.f32.mrf.mxu2 }
 0x41f   :  { %v6580_v18 = vmax.f32 %v6452_v0, 0.0  ;;  %v6494_v53 = vadd.f32 %v6493_v20, %v6480_v4 }
 0x421   :  { %v6588_v42 = vpack.c.bf16 %v6580_v18, %v6572_v24 }
 0x423   :  { %7198 = vmatmul.bf16.vlgmr.msrb.gmra.mxu2 %v6588_v42 }
 0x42e   :  { %v7115_v6 = vpop.f32.mrf.mxu0 }
 0x42f   :  { %v7129_v5 = vpop.f32.mrf.mxu1  ;;  %v7116_v50 = vadd.f32 %v11747_v21, %v7115_v6 }
 0x431   :  { %v7130_v14 = vadd.f32 %v7129_v5, %v7116_v50 }
 0x436   :  { %v7117_v28 = vpop.f32.mrf.mxu0 }
 0x437   :  { %v7131_v43 = vpop.f32.mrf.mxu1  ;;  %v7118_v37 = vadd.f32 %v11747_v21, %v7117_v28 }
 0x439   :  { %v6547_v31 = vpop.f32.mrf.mxu2  ;;  %v7132_v45 = vadd.f32 %v7131_v43, %v7118_v37 }
 0x43a   :  { %v6505_v16 = vpop.f32.mrf.mxu3 }
 0x43b   :  { %v6506_v61 = vadd.f32 %v6505_v16, %v6492_v9 }
 0x43d   :  { %v6520_v39 = vadd.f32 %v6519_v11, %v6506_v61 }
 0x43f   :  { %v6534_v58 = vadd.f32 %v6533_v55, %v6520_v39 }
 0x441   :  { %v6548_v51 = vadd.f32 %v6547_v31, %v6534_v58  ;;  %v6549_v62 = vpop.f32.mrf.mxu2 }
 0x442   :  { %v6507_v32 = vpop.f32.mrf.mxu3 }
 0x443   :  { %v6508_v15 = vadd.f32 %v6507_v32, %v6494_v53 }
 0x445   :  { %v6522_v44 = vadd.f32 %v6521_v13, %v6508_v15 }
 0x447   :  { %v6536_v56 = vadd.f32 %v6535_v52, %v6522_v44 }
 0x449   :  { %v6550_v34 = vadd.f32 %v6549_v62, %v6536_v56 }
 0x44c   :  { %v7171_v30 = vpop.f32.mrf.mxu0 }
 0x454   :  { %v7173_v25 = vpop.f32.mrf.mxu0 }
 0x457   :  { %v7143_v46 = vpop.f32.mrf.mxu2 }
 0x458   :  { %v7144_v40 = vadd.f32 %v7143_v46, %v7130_v14 }
 0x45a   :  { %v6561_v60 = vpop.f32.mrf.mxu3 }
 0x45b   :  { %v6562_v7 = vadd.f32 %v6561_v60, %v6548_v51 }
 0x45d   :  { %v6573_v27 = vmax.f32 %v6562_v7, 0.0 }
 0x45f   :  { %v7145_v36 = vpop.f32.mrf.mxu2 }
 0x460   :  { %v7146_v24 = vadd.f32 %v7145_v36, %v7132_v45 }
 0x462   :  { %v6563_v2 = vpop.f32.mrf.mxu3  ;;  %v7185_v0 = vpop.f32.mrf.mxu1 }
 0x463   :  { %v6564_v63 = vadd.f32 %v6563_v2, %v6550_v34 }
 0x465   :  { %v6581_v35 = vmax.f32 %v6564_v63, 0.0 }
 0x467   :  { %v6589_v1 = vpack.c.bf16 %v6581_v35, %v6573_v27 }
 0x469   :  { %7212 = vmatmul.bf16.vlgmr.msrb.gmra.mxu3 %v6589_v1 }
 0x46a   :  { %v7187_v23 = vpop.f32.mrf.mxu1 }
 0x47a   :  { %v7157_v38 = vpop.f32.mrf.mxu3 }
 0x47b   :  { %v7158_v41 = vadd.f32 %v7157_v38, %v7144_v40 }
 0x47d   :  { %v7172_v57 = vadd.f32 %v7171_v30, %v7158_v41 }
 0x47f   :  { %v7186_v42 = vadd.f32 %v7185_v0, %v7172_v57 }
 0x482   :  { %v7159_v12 = vpop.f32.mrf.mxu3 }
 0x483   :  { %v7160_v18 = vadd.f32 %v7159_v12, %v7146_v24 }
 0x485   :  { %v7174_v48 = vadd.f32 %v7173_v25, %v7160_v18 }
 0x487   :  { %v7188_v29 = vadd.f32 %v7187_v23, %v7174_v48 }
 0x4a6   :  { %v7199_v8 = vpop.f32.mrf.mxu2 }
 0x4a7   :  { %v7200_v17 = vadd.f32 %v7199_v8, %v7186_v42 }
 0x4ae   :  { %v7201_v59 = vpop.f32.mrf.mxu2 }
 0x4af   :  { %v7202_v33 = vadd.f32 %v7201_v59, %v7188_v29 }
 0x4ec   :  { %v7213_v10 = vpop.f32.mrf.mxu3 }
 0x4ed   :  { %v7214_v19 = vadd.f32 %v7213_v10, %v7200_v17 }
 0x4ef   :  { %7218 = vmax.xlane.f32.xlu0 %v7214_v19 }
 0x4f4   :  { %v7215_v54 = vpop.f32.mrf.mxu3 }
 0x4f5   :  { %v7216_v22 = vadd.f32 %v7215_v54, %v7202_v33 }
 0x4f7   :  { %7220 = vmax.xlane.f32.xlu0 %v7216_v22 }
 0x562   :  { %v7219_v16 = vpop.xlane.xlu0 %7218 }
 0x563   :  { %v7222_v26 = vsub.f32 %v7214_v19, %v7219_v16 }
 0x565   :  { %v7224_v49 = vmul.f32 1.442695, %v7222_v26 }
 0x567   :  { %11748 = vpow2.f32 %v7224_v49 }
 0x56a   :  { %v7221_v47 = vpop.xlane.xlu0 %7220 }
 0x56b   :  { %v7223_v11 = vsub.f32 %v7216_v22, %v7221_v47 }
 0x56d   :  { %v11749_v20 = vpop.eup %11748  ;;  %v7226_v3 = vmul.f32 1.442695, %v7223_v11 }
 0x56e   :  { %7228 = vadd.xlane.f32.xlu1 %v11749_v20 }
 0x56f   :  { %11750 = vpow2.f32 %v7226_v3 }
 0x575   :  { %v11751_v4 = vpop.eup %11750 }
 0x576   :  { %7230 = vadd.xlane.f32.xlu1 %v11751_v4 }
 0x5e1   :  { %v7229_v9 = vpop.xlane.xlu1 %7228 }
 0x5e2   :  { %11752 = vrcp.f32 %v7229_v9 }
 0x5e8   :  { %v11753_v55 = vpop.eup %11752 }
 0x5e9   :  { %v7234_v32 = vmul.f32 %v11753_v55, %v11749_v20  ;;  %v7231_v53 = vpop.xlane.xlu1 %7230 }
 0x5ea   :  { %11754 = vrcp.f32 %v7231_v53 }
 0x5eb   :  { %7236 = vst [vmem:[%s17480_s7] sm:$0xff] %v7234_v32 }
 0x5f0   :  { %v11755_v61 = vpop.eup %11754 }
 0x5f1   :  { %v7235_v15 = vmul.f32 %v11755_v61, %v11751_v4 }
 0x5f3   :  { %7237 = vst [vmem:[%s17480_s7 + $0x8] sm:$0xff] %v7235_v15 }

</bundles_post_ra>
